<compile_context>
chip_gen: v5e
topology: v5e:2x2
jax: 0.10.0
libtpu: 0.0.40
codegen_flags: <defaults>
</compile_context>

<pallas_src>
import numpy as np
import jax
import jax.numpy as jnp
from jax import lax
from jax.experimental import pallas as pl
from jax.experimental.pallas import tpu as pltpu

SELU_ALPHA = 1.6732632423543772848170429916717
SELU_SCALE = 1.0507009873554804934193349852946

# Fixed geometry implied by the module: fc1 takes 64 features == 64 channels * 1 * 1,
# which requires a 14x14 input (conv5 -> 10, pool2 -> 5, conv3 -> 3, pool3 -> 1).
H_IN, W_IN, C_IN = 14, 14, 2
X_COLS = H_IN * W_IN * C_IN              # 392   (rows of banded conv1 weight)
OH1, OW1, C1 = 10, 10, 32
C1_COLS = OH1 * OW1 * C1                 # 3200  (conv1 output lanes: (oh, ow, c))
PH1, PW1 = 5, 5
P1_COLS = PH1 * PW1 * C1                 # 800   (pooled conv1 lanes: (ph, pw, c))
OH2, OW2, C2 = 3, 3, 64
C2_COLS = OH2 * OW2 * C2                 # 576   (conv2 output lanes: (oh, ow, c))
FC1_OUT, FC1_PAD = 230, 256
FC2_OUT, FC2_PAD = 100, 128
FC3_OUT, FC3_PAD = 2, 128


def _selu(x):
    return SELU_SCALE * jnp.where(x > 0, x, SELU_ALPHA * (jnp.exp(x) - 1.0))


# ---------------------------------------------------------------------------
# The single fused Pallas kernel (one batch tile per grid step)
# ---------------------------------------------------------------------------
def _simplenet_kernel(x_ref, w1_ref, b1_ref, w2_ref, b2_ref,
                      fw1_ref, fb1_ref, fw2_ref, fb2_ref, fw3_ref, fb3_ref,
                      o_ref):
    """Whole SimpleNet forward for one batch tile; 5 batched MXU matmuls, no scratch.

    x_ref : (TB, 392) bf16      rows = samples, lanes = (h, w, cin) flattened
    w1/w2 : full HxW block-Toeplitz conv weights (392,3200) / (800,576) bf16
    fw*   : lane-padded fc weights (bf16); b*/fb* biases as (1, C) f32
    o_ref : (TB, 128) f32       lane-dense padded output
    """
    # ---- conv1 (5x5 valid, 2->32): one batched matmul, f32 accumulation ----
    c1 = jnp.dot(x_ref[...], w1_ref[...],
                 preferred_element_type=jnp.float32) + b1_ref[...]        # (TB, 3200)

    # ---- maxpool 2x2 stride 2 + SELU, kept entirely in vregs (no stores) ----
    chunks = []
    for ph in range(PH1):
        for pw in range(PW1):
            def win(dh, dw):
                base = ((2 * ph + dh) * OW1 + (2 * pw + dw)) * C1
                return c1[:, base:base + C1]
            chunks.append(jnp.maximum(jnp.maximum(win(0, 0), win(0, 1)),
                                      jnp.maximum(win(1, 0), win(1, 1))))
    p1 = _selu(jnp.concatenate(chunks, axis=1))                           # (TB, 800)

    # ---- conv2 (3x3 valid, 32->64): one batched matmul ----
    c2 = jnp.dot(p1.astype(jnp.bfloat16), w2_ref[...],
                 preferred_element_type=jnp.float32) + b2_ref[...]        # (TB, 576)

    # ---- maxpool 3x3 stride 3 over the 3x3 map + SELU -> (TB, 64) features ----
    f = c2[:, 0:C2]
    for k in range(1, OH2 * OW2):
        f = jnp.maximum(f, c2[:, k * C2:(k + 1) * C2])
    f = _selu(f)

    # ---- fc1 -> selu -> fc2 -> selu -> fc3 (lane-padded 256 / 128 / 128) ----
    # TODO(synk): nn.Dropout(0.15) is identity in eval/inference mode; training-mode
    # stochastic dropout is not implemented here.
    h1 = _selu(jnp.dot(f.astype(jnp.bfloat16), fw1_ref[...],
                       preferred_element_type=jnp.float32) + fb1_ref[...])
    h2 = _selu(jnp.dot(h1.astype(jnp.bfloat16), fw2_ref[...],
                       preferred_element_type=jnp.float32) + fb2_ref[...])
    o_ref[...] = (jnp.dot(h2.astype(jnp.bfloat16), fw3_ref[...],
                          preferred_element_type=jnp.float32)
                  + fb3_ref[...]).astype(o_ref.dtype)


def _round_up(x, m):
    return (x + m - 1) // m * m


@jax.jit
def simplenet_forward(x_nchw, kparams):
    n, c, h, w = x_nchw.shape
    assert (c, h, w) == (C_IN, H_IN, W_IN), (
        "SimpleNet's x.view(-1, 64) requires a (2, 14, 14) input (1x1 map after pool2)")

    # NCHW -> NHWC -> (N, 392) bf16 (MXU operand dtype; accumulation stays f32).
    x2 = jnp.transpose(x_nchw, (0, 2, 3, 1)).reshape(n, X_COLS).astype(jnp.bfloat16)

    # Batch tile: sublane-aligned; big enough (up to 128) to feed the MXU, and a
    # parallel grid axis over tiles so v7x's two TensorCores both get work.
    tb = 128 if n >= 128 else _round_up(n, 8)
    n_pad = _round_up(n, tb)
    if n_pad != n:
        x2 = jnp.pad(x2, ((0, n_pad - n), (0, 0)))

    flops = 2 * n_pad * (X_COLS * C1_COLS + P1_COLS * C2_COLS
                         + C2 * FC1_PAD + FC1_PAD * FC2_PAD + FC2_PAD * FC3_PAD)
    transcendentals = n_pad * (P1_COLS + C2 + FC1_PAD + FC2_PAD)   # exp inside SELU
    weight_bytes = sum(int(np.prod(v.shape)) * v.dtype.itemsize for v in kparams.values())
    bytes_accessed = x2.size * x2.dtype.itemsize + weight_bytes + n_pad * FC3_PAD * 4

    def _whole(shape):
        # Whole-array block with a constant index_map: fetched to VMEM once,
        # never re-DMA'd across grid steps.
        return pl.BlockSpec(shape, lambda b: (0,) * len(shape))

    out_padded = pl.pallas_call(
        _simplenet_kernel,
        grid=(n_pad // tb,),
        in_specs=[
            pl.BlockSpec((tb, X_COLS), lambda b: (b, 0)),            # x tile
            _whole((X_COLS, C1_COLS)), _whole((1, C1_COLS)),         # conv1 W, b
            _whole((P1_COLS, C2_COLS)), _whole((1, C2_COLS)),        # conv2 W, b
            _whole((C2, FC1_PAD)), _whole((1, FC1_PAD)),             # fc1
            _whole((FC1_PAD, FC2_PAD)), _whole((1, FC2_PAD)),        # fc2
            _whole((FC2_PAD, FC3_PAD)), _whole((1, FC3_PAD)),        # fc3
        ],
        out_specs=pl.BlockSpec((tb, FC3_PAD), lambda b: (b, 0)),
        out_shape=jax.ShapeDtypeStruct((n_pad, FC3_PAD), jnp.float32),
        compiler_params=pltpu.CompilerParams(
            dimension_semantics=("parallel",),
            vmem_limit_bytes=32 * 1024 * 1024),
        cost_estimate=pl.CostEstimate(
            flops=flops, transcendentals=transcendentals,
            bytes_accessed=bytes_accessed),
    )(x2, kparams["w1b"], kparams["b1t"], kparams["w2b"], kparams["b2t"],
      kparams["fw1"], kparams["fb1"], kparams["fw2"], kparams["fb2"],
      kparams["fw3"], kparams["fb3"])
    return out_padded[:n, :FC3_OUT]


# ---------------------------------------------------------------------------
# Parameters (deterministic, in-script) + one-time kernel-layout preprocessing
# ---------------------------------------------------------------------------
def init_params(key):
    """PyTorch-like parameters: convs as (kh, kw, cin, cout), fcs as (in, out)."""
    ks = jax.random.split(key, 10)

    def u(k, shape, fan_in):
        bound = 1.0 / np.sqrt(float(fan_in))
        return jax.random.uniform(k, shape, jnp.float32, -bound, bound)

    return {
        "w1": u(ks[0], (5, 5, 2, 32), 5 * 5 * 2),
        "b1": u(ks[1], (32,), 5 * 5 * 2),
        "w2": u(ks[2], (3, 3, 32, 64), 3 * 3 * 32),
        "b2": u(ks[3], (64,), 3 * 3 * 32),
        "fcw1": u(ks[4], (64, 230), 64),
        "fcb1": u(ks[5], (230,), 64),
        "fcw2": u(ks[6], (230, 100), 230),
        "fcb2": u(ks[7], (100,), 230),
        "fcw3": u(ks[8], (100, 2), 100),
        "fcb3": u(ks[9], (2,), 100),
    }


def _toeplitz_conv_weight(w, h_in, w_in, h_out, w_out):
    """(kh, kw, cin, cout) -> (h_in*w_in*cin, h_out*w_out*cout) full block-Toeplitz
    over H and W, so a valid conv over the whole batch is ONE matmul on the
    (N, h_in*w_in*cin) flattened NHWC input -- no im2col patch duplication."""
    kh, kw, cin, cout = w.shape
    wn = np.asarray(w, np.float32)
    wb = np.zeros((h_in * w_in * cin, h_out * w_out * cout), np.float32)
    for i in range(kh):
        for j in range(kw):
            for oh in range(h_out):
                for ow in range(w_out):
                    r0 = ((oh + i) * w_in + (ow + j)) * cin
                    c0 = (oh * w_out + ow) * cout
                    wb[r0:r0 + cin, c0:c0 + cout] = wn[i, j]
    return jnp.asarray(wb, jnp.bfloat16)


def _pad_fc(w, b, in_pad, out_pad):
    """Zero-pad an (in, out) fc layer to lane-dense (in_pad, out_pad); bias -> (1, out_pad)."""
    wn, bn = np.asarray(w, np.float32), np.asarray(b, np.float32)
    wp = np.zeros((in_pad, out_pad), np.float32)
    wp[:wn.shape[0], :wn.shape[1]] = wn
    bp = np.zeros((1, out_pad), np.float32)
    bp[0, :bn.shape[0]] = bn
    return jnp.asarray(wp, jnp.bfloat16), jnp.asarray(bp, jnp.float32)


def prepare_params(p):
    """One-time preprocessing into the kernel-ready layout (block-Toeplitz bf16 conv
    weights, lane-tiled f32 conv biases, lane-padded bf16 fcs). Padding is exact:
    SELU(0)=0 and padded weight/bias entries are exactly zero, so padded lanes stay 0
    and slicing the final (N, 2) output is lossless."""
    fw1, fb1 = _pad_fc(p["fcw1"], p["fcb1"], C2, FC1_PAD)
    fw2, fb2 = _pad_fc(p["fcw2"], p["fcb2"], FC1_PAD, FC2_PAD)
    fw3, fb3 = _pad_fc(p["fcw3"], p["fcb3"], FC2_PAD, FC3_PAD)
    return {
        "w1b": _toeplitz_conv_weight(p["w1"], H_IN, W_IN, OH1, OW1),     # (392, 3200)
        "b1t": jnp.asarray(np.tile(np.asarray(p["b1"], np.float32),
                                   OH1 * OW1)[None, :]),                 # (1, 3200) f32
        "w2b": _toeplitz_conv_weight(p["w2"], PH1, PW1, OH2, OW2),       # (800, 576)
        "b2t": jnp.asarray(np.tile(np.asarray(p["b2"], np.float32),
                                   OH2 * OW2)[None, :]),                 # (1, 576) f32
        "fw1": fw1, "fb1": fb1, "fw2": fw2, "fb2": fb2, "fw3": fw3, "fb3": fb3,
    }


# ---------------------------------------------------------------------------
# Plain-JAX reference (independent formulation) for a correctness cross-check
# ---------------------------------------------------------------------------
def reference_forward(x_nchw, p):
    hp = lax.Precision.HIGHEST
    dn = ("NHWC", "HWIO", "NHWC")
    x = jnp.transpose(x_nchw, (0, 2, 3, 1)).astype(jnp.float32)
    y = lax.conv_general_dilated(x, p["w1"], (1, 1), "VALID",
                                 dimension_numbers=dn, precision=hp) + p["b1"]
    y = lax.reduce_window(y, -jnp.inf, lax.max, (1, 2, 2, 1), (1, 2, 2, 1), "VALID")
    y = jax.nn.selu(y)
    y = lax.conv_general_dilated(y, p["w2"], (1, 1), "VALID",
                                 dimension_numbers=dn, precision=hp) + p["b2"]
    y = lax.reduce_window(y, -jnp.inf, lax.max, (1, 3, 3, 1), (1, 3, 3, 1), "VALID")
    y = jax.nn.selu(y)
    f = y.reshape(y.shape[0], -1)                     # (N, 64): 1x1 spatial after pool2
    h1 = jax.nn.selu(jnp.dot(f, p["fcw1"], precision=hp) + p["fcb1"])
    h2 = jax.nn.selu(jnp.dot(h1, p["fcw2"], precision=hp) + p["fcb2"])
    return jnp.dot(h2, p["fcw3"], precision=hp) + p["fcb3"]


if __name__ == "__main__":
    key = jax.random.PRNGKey(0)
    k_x, k_p = jax.random.split(key)
    x = jax.random.normal(k_x, (2, C_IN, H_IN, W_IN), jnp.float32)   # NCHW, like PyTorch
    params = init_params(k_p)
    kparams = prepare_params(params)

    out = jax.block_until_ready(simplenet_forward(x, kparams))
    assert out.shape == (2, FC3_OUT), out.shape
    assert bool(jnp.all(jnp.isfinite(out)))

    ref = jax.block_until_ready(reference_forward(x, params))
    max_err = float(jnp.max(jnp.abs(out - ref)))
    # bf16 MXU operands (f32 accumulation) vs. an all-f32 HIGHEST-precision reference.
    assert max_err < 5e-2, f"mismatch vs plain-JAX reference: {max_err}"

    print("KERNEL_OK")
</pallas_src>

<mosaic_0001>
module attributes {stable_mosaic.version = 11 : i64} {
  func.func @_simplenet_kernel(%arg0: i32, %arg1: memref<8x392xbf16, #tpu.memory_space<vmem>>, %arg2: memref<392x3200xbf16, #tpu.memory_space<vmem>>, %arg3: memref<1x3200xf32, #tpu.memory_space<vmem>>, %arg4: memref<800x576xbf16, #tpu.memory_space<vmem>>, %arg5: memref<1x576xf32, #tpu.memory_space<vmem>>, %arg6: memref<64x256xbf16, #tpu.memory_space<vmem>>, %arg7: memref<1x256xf32, #tpu.memory_space<vmem>>, %arg8: memref<256x128xbf16, #tpu.memory_space<vmem>>, %arg9: memref<1x128xf32, #tpu.memory_space<vmem>>, %arg10: memref<128x128xbf16, #tpu.memory_space<vmem>>, %arg11: memref<1x128xf32, #tpu.memory_space<vmem>>, %arg12: memref<8x128xf32, #tpu.memory_space<vmem>>) attributes {dimension_semantics = [#tpu.dimension_semantics<parallel>], iteration_bounds = array<i64: 1>, scalar_prefetch = 0 : i64, scratch_operands = 0 : i64, tpu.core_type = #tpu.core_type<tc>, window_params = [{transform_indices = @transform_0, window_bounds = array<i64: 8, 392>}, {pipeline_mode = #tpu.pipeline_mode<synchronous>, transform_indices = @transform_1, window_bounds = array<i64: 392, 3200>}, {pipeline_mode = #tpu.pipeline_mode<synchronous>, transform_indices = @transform_2, window_bounds = array<i64: 1, 3200>}, {pipeline_mode = #tpu.pipeline_mode<synchronous>, transform_indices = @transform_3, window_bounds = array<i64: 800, 576>}, {pipeline_mode = #tpu.pipeline_mode<synchronous>, transform_indices = @transform_4, window_bounds = array<i64: 1, 576>}, {pipeline_mode = #tpu.pipeline_mode<synchronous>, transform_indices = @transform_5, window_bounds = array<i64: 64, 256>}, {pipeline_mode = #tpu.pipeline_mode<synchronous>, transform_indices = @transform_6, window_bounds = array<i64: 1, 256>}, {pipeline_mode = #tpu.pipeline_mode<synchronous>, transform_indices = @transform_7, window_bounds = array<i64: 256, 128>}, {pipeline_mode = #tpu.pipeline_mode<synchronous>, transform_indices = @transform_8, window_bounds = array<i64: 1, 128>}, {pipeline_mode = #tpu.pipeline_mode<synchronous>, transform_indices = @transform_9, window_bounds = array<i64: 128, 128>}, {pipeline_mode = #tpu.pipeline_mode<synchronous>, transform_indices = @transform_10, window_bounds = array<i64: 1, 128>}, {transform_indices = @transform_11, window_bounds = array<i64: 8, 128>}]} {
    %c0 = arith.constant 0 : index
    %c0_0 = arith.constant 0 : index
    %0 = vector.load %arg1[%c0, %c0_0] : memref<8x392xbf16, #tpu.memory_space<vmem>>, vector<8x392xbf16>
    %c0_1 = arith.constant 0 : index
    %c0_2 = arith.constant 0 : index
    %1 = vector.load %arg2[%c0_1, %c0_2] : memref<392x3200xbf16, #tpu.memory_space<vmem>>, vector<392x3200xbf16>
    %cst = arith.constant dense<0.000000e+00> : vector<8x3200xf32>
    %2 = tpu.matmul %0, %1, %cst {dimension_numbers = #tpu.dot_dimension_numbers<[1], [0], [0], [1], [0, 0, 1, 1], [], []>} : vector<8x392xbf16>, vector<392x3200xbf16>, vector<8x3200xf32> -> vector<8x3200xf32>
    %c0_3 = arith.constant 0 : index
    %c0_4 = arith.constant 0 : index
    %3 = vector.load %arg3[%c0_3, %c0_4] : memref<1x3200xf32, #tpu.memory_space<vmem>>, vector<1x3200xf32>
    %4 = vector.broadcast %3 : vector<1x3200xf32> to vector<8x3200xf32>
    %5 = arith.addf %2, %4 : vector<8x3200xf32>
    %6 = vector.extract_strided_slice %5 {offsets = [0, 0], sizes = [8, 32], strides = [1, 1]} : vector<8x3200xf32> to vector<8x32xf32>
    %7 = vector.extract_strided_slice %5 {offsets = [0, 32], sizes = [8, 32], strides = [1, 1]} : vector<8x3200xf32> to vector<8x32xf32>
    %8 = arith.maximumf %6, %7 : vector<8x32xf32>
    %9 = vector.extract_strided_slice %5 {offsets = [0, 320], sizes = [8, 32], strides = [1, 1]} : vector<8x3200xf32> to vector<8x32xf32>
    %10 = vector.extract_strided_slice %5 {offsets = [0, 352], sizes = [8, 32], strides = [1, 1]} : vector<8x3200xf32> to vector<8x32xf32>
    %11 = arith.maximumf %9, %10 : vector<8x32xf32>
    %12 = arith.maximumf %8, %11 : vector<8x32xf32>
    %13 = vector.extract_strided_slice %5 {offsets = [0, 64], sizes = [8, 32], strides = [1, 1]} : vector<8x3200xf32> to vector<8x32xf32>
    %14 = vector.extract_strided_slice %5 {offsets = [0, 96], sizes = [8, 32], strides = [1, 1]} : vector<8x3200xf32> to vector<8x32xf32>
    %15 = arith.maximumf %13, %14 : vector<8x32xf32>
    %16 = vector.extract_strided_slice %5 {offsets = [0, 384], sizes = [8, 32], strides = [1, 1]} : vector<8x3200xf32> to vector<8x32xf32>
    %17 = vector.extract_strided_slice %5 {offsets = [0, 416], sizes = [8, 32], strides = [1, 1]} : vector<8x3200xf32> to vector<8x32xf32>
    %18 = arith.maximumf %16, %17 : vector<8x32xf32>
    %19 = arith.maximumf %15, %18 : vector<8x32xf32>
    %20 = vector.extract_strided_slice %5 {offsets = [0, 128], sizes = [8, 32], strides = [1, 1]} : vector<8x3200xf32> to vector<8x32xf32>
    %21 = vector.extract_strided_slice %5 {offsets = [0, 160], sizes = [8, 32], strides = [1, 1]} : vector<8x3200xf32> to vector<8x32xf32>
    %22 = arith.maximumf %20, %21 : vector<8x32xf32>
    %23 = vector.extract_strided_slice %5 {offsets = [0, 448], sizes = [8, 32], strides = [1, 1]} : vector<8x3200xf32> to vector<8x32xf32>
    %24 = vector.extract_strided_slice %5 {offsets = [0, 480], sizes = [8, 32], strides = [1, 1]} : vector<8x3200xf32> to vector<8x32xf32>
    %25 = arith.maximumf %23, %24 : vector<8x32xf32>
    %26 = arith.maximumf %22, %25 : vector<8x32xf32>
    %27 = vector.extract_strided_slice %5 {offsets = [0, 192], sizes = [8, 32], strides = [1, 1]} : vector<8x3200xf32> to vector<8x32xf32>
    %28 = vector.extract_strided_slice %5 {offsets = [0, 224], sizes = [8, 32], strides = [1, 1]} : vector<8x3200xf32> to vector<8x32xf32>
    %29 = arith.maximumf %27, %28 : vector<8x32xf32>
    %30 = vector.extract_strided_slice %5 {offsets = [0, 512], sizes = [8, 32], strides = [1, 1]} : vector<8x3200xf32> to vector<8x32xf32>
    %31 = vector.extract_strided_slice %5 {offsets = [0, 544], sizes = [8, 32], strides = [1, 1]} : vector<8x3200xf32> to vector<8x32xf32>
    %32 = arith.maximumf %30, %31 : vector<8x32xf32>
    %33 = arith.maximumf %29, %32 : vector<8x32xf32>
    %34 = vector.extract_strided_slice %5 {offsets = [0, 256], sizes = [8, 32], strides = [1, 1]} : vector<8x3200xf32> to vector<8x32xf32>
    %35 = vector.extract_strided_slice %5 {offsets = [0, 288], sizes = [8, 32], strides = [1, 1]} : vector<8x3200xf32> to vector<8x32xf32>
    %36 = arith.maximumf %34, %35 : vector<8x32xf32>
    %37 = vector.extract_strided_slice %5 {offsets = [0, 576], sizes = [8, 32], strides = [1, 1]} : vector<8x3200xf32> to vector<8x32xf32>
    %38 = vector.extract_strided_slice %5 {offsets = [0, 608], sizes = [8, 32], strides = [1, 1]} : vector<8x3200xf32> to vector<8x32xf32>
    %39 = arith.maximumf %37, %38 : vector<8x32xf32>
    %40 = arith.maximumf %36, %39 : vector<8x32xf32>
    %41 = vector.extract_strided_slice %5 {offsets = [0, 640], sizes = [8, 32], strides = [1, 1]} : vector<8x3200xf32> to vector<8x32xf32>
    %42 = vector.extract_strided_slice %5 {offsets = [0, 672], sizes = [8, 32], strides = [1, 1]} : vector<8x3200xf32> to vector<8x32xf32>
    %43 = arith.maximumf %41, %42 : vector<8x32xf32>
    %44 = vector.extract_strided_slice %5 {offsets = [0, 960], sizes = [8, 32], strides = [1, 1]} : vector<8x3200xf32> to vector<8x32xf32>
    %45 = vector.extract_strided_slice %5 {offsets = [0, 992], sizes = [8, 32], strides = [1, 1]} : vector<8x3200xf32> to vector<8x32xf32>
    %46 = arith.maximumf %44, %45 : vector<8x32xf32>
    %47 = arith.maximumf %43, %46 : vector<8x32xf32>
    %48 = vector.extract_strided_slice %5 {offsets = [0, 704], sizes = [8, 32], strides = [1, 1]} : vector<8x3200xf32> to vector<8x32xf32>
    %49 = vector.extract_strided_slice %5 {offsets = [0, 736], sizes = [8, 32], strides = [1, 1]} : vector<8x3200xf32> to vector<8x32xf32>
    %50 = arith.maximumf %48, %49 : vector<8x32xf32>
    %51 = vector.extract_strided_slice %5 {offsets = [0, 1024], sizes = [8, 32], strides = [1, 1]} : vector<8x3200xf32> to vector<8x32xf32>
    %52 = vector.extract_strided_slice %5 {offsets = [0, 1056], sizes = [8, 32], strides = [1, 1]} : vector<8x3200xf32> to vector<8x32xf32>
    %53 = arith.maximumf %51, %52 : vector<8x32xf32>
    %54 = arith.maximumf %50, %53 : vector<8x32xf32>
    %55 = vector.extract_strided_slice %5 {offsets = [0, 768], sizes = [8, 32], strides = [1, 1]} : vector<8x3200xf32> to vector<8x32xf32>
    %56 = vector.extract_strided_slice %5 {offsets = [0, 800], sizes = [8, 32], strides = [1, 1]} : vector<8x3200xf32> to vector<8x32xf32>
    %57 = arith.maximumf %55, %56 : vector<8x32xf32>
    %58 = vector.extract_strided_slice %5 {offsets = [0, 1088], sizes = [8, 32], strides = [1, 1]} : vector<8x3200xf32> to vector<8x32xf32>
    %59 = vector.extract_strided_slice %5 {offsets = [0, 1120], sizes = [8, 32], strides = [1, 1]} : vector<8x3200xf32> to vector<8x32xf32>
    %60 = arith.maximumf %58, %59 : vector<8x32xf32>
    %61 = arith.maximumf %57, %60 : vector<8x32xf32>
    %62 = vector.extract_strided_slice %5 {offsets = [0, 832], sizes = [8, 32], strides = [1, 1]} : vector<8x3200xf32> to vector<8x32xf32>
    %63 = vector.extract_strided_slice %5 {offsets = [0, 864], sizes = [8, 32], strides = [1, 1]} : vector<8x3200xf32> to vector<8x32xf32>
    %64 = arith.maximumf %62, %63 : vector<8x32xf32>
    %65 = vector.extract_strided_slice %5 {offsets = [0, 1152], sizes = [8, 32], strides = [1, 1]} : vector<8x3200xf32> to vector<8x32xf32>
    %66 = vector.extract_strided_slice %5 {offsets = [0, 1184], sizes = [8, 32], strides = [1, 1]} : vector<8x3200xf32> to vector<8x32xf32>
    %67 = arith.maximumf %65, %66 : vector<8x32xf32>
    %68 = arith.maximumf %64, %67 : vector<8x32xf32>
    %69 = vector.extract_strided_slice %5 {offsets = [0, 896], sizes = [8, 32], strides = [1, 1]} : vector<8x3200xf32> to vector<8x32xf32>
    %70 = vector.extract_strided_slice %5 {offsets = [0, 928], sizes = [8, 32], strides = [1, 1]} : vector<8x3200xf32> to vector<8x32xf32>
    %71 = arith.maximumf %69, %70 : vector<8x32xf32>
    %72 = vector.extract_strided_slice %5 {offsets = [0, 1216], sizes = [8, 32], strides = [1, 1]} : vector<8x3200xf32> to vector<8x32xf32>
    %73 = vector.extract_strided_slice %5 {offsets = [0, 1248], sizes = [8, 32], strides = [1, 1]} : vector<8x3200xf32> to vector<8x32xf32>
    %74 = arith.maximumf %72, %73 : vector<8x32xf32>
    %75 = arith.maximumf %71, %74 : vector<8x32xf32>
    %76 = vector.extract_strided_slice %5 {offsets = [0, 1280], sizes = [8, 32], strides = [1, 1]} : vector<8x3200xf32> to vector<8x32xf32>
    %77 = vector.extract_strided_slice %5 {offsets = [0, 1312], sizes = [8, 32], strides = [1, 1]} : vector<8x3200xf32> to vector<8x32xf32>
    %78 = arith.maximumf %76, %77 : vector<8x32xf32>
    %79 = vector.extract_strided_slice %5 {offsets = [0, 1600], sizes = [8, 32], strides = [1, 1]} : vector<8x3200xf32> to vector<8x32xf32>
    %80 = vector.extract_strided_slice %5 {offsets = [0, 1632], sizes = [8, 32], strides = [1, 1]} : vector<8x3200xf32> to vector<8x32xf32>
    %81 = arith.maximumf %79, %80 : vector<8x32xf32>
    %82 = arith.maximumf %78, %81 : vector<8x32xf32>
    %83 = vector.extract_strided_slice %5 {offsets = [0, 1344], sizes = [8, 32], strides = [1, 1]} : vector<8x3200xf32> to vector<8x32xf32>
    %84 = vector.extract_strided_slice %5 {offsets = [0, 1376], sizes = [8, 32], strides = [1, 1]} : vector<8x3200xf32> to vector<8x32xf32>
    %85 = arith.maximumf %83, %84 : vector<8x32xf32>
    %86 = vector.extract_strided_slice %5 {offsets = [0, 1664], sizes = [8, 32], strides = [1, 1]} : vector<8x3200xf32> to vector<8x32xf32>
    %87 = vector.extract_strided_slice %5 {offsets = [0, 1696], sizes = [8, 32], strides = [1, 1]} : vector<8x3200xf32> to vector<8x32xf32>
    %88 = arith.maximumf %86, %87 : vector<8x32xf32>
    %89 = arith.maximumf %85, %88 : vector<8x32xf32>
    %90 = vector.extract_strided_slice %5 {offsets = [0, 1408], sizes = [8, 32], strides = [1, 1]} : vector<8x3200xf32> to vector<8x32xf32>
    %91 = vector.extract_strided_slice %5 {offsets = [0, 1440], sizes = [8, 32], strides = [1, 1]} : vector<8x3200xf32> to vector<8x32xf32>
    %92 = arith.maximumf %90, %91 : vector<8x32xf32>
    %93 = vector.extract_strided_slice %5 {offsets = [0, 1728], sizes = [8, 32], strides = [1, 1]} : vector<8x3200xf32> to vector<8x32xf32>
    %94 = vector.extract_strided_slice %5 {offsets = [0, 1760], sizes = [8, 32], strides = [1, 1]} : vector<8x3200xf32> to vector<8x32xf32>
    %95 = arith.maximumf %93, %94 : vector<8x32xf32>
    %96 = arith.maximumf %92, %95 : vector<8x32xf32>
    %97 = vector.extract_strided_slice %5 {offsets = [0, 1472], sizes = [8, 32], strides = [1, 1]} : vector<8x3200xf32> to vector<8x32xf32>
    %98 = vector.extract_strided_slice %5 {offsets = [0, 1504], sizes = [8, 32], strides = [1, 1]} : vector<8x3200xf32> to vector<8x32xf32>
    %99 = arith.maximumf %97, %98 : vector<8x32xf32>
    %100 = vector.extract_strided_slice %5 {offsets = [0, 1792], sizes = [8, 32], strides = [1, 1]} : vector<8x3200xf32> to vector<8x32xf32>
    %101 = vector.extract_strided_slice %5 {offsets = [0, 1824], sizes = [8, 32], strides = [1, 1]} : vector<8x3200xf32> to vector<8x32xf32>
    %102 = arith.maximumf %100, %101 : vector<8x32xf32>
    %103 = arith.maximumf %99, %102 : vector<8x32xf32>
    %104 = vector.extract_strided_slice %5 {offsets = [0, 1536], sizes = [8, 32], strides = [1, 1]} : vector<8x3200xf32> to vector<8x32xf32>
    %105 = vector.extract_strided_slice %5 {offsets = [0, 1568], sizes = [8, 32], strides = [1, 1]} : vector<8x3200xf32> to vector<8x32xf32>
    %106 = arith.maximumf %104, %105 : vector<8x32xf32>
    %107 = vector.extract_strided_slice %5 {offsets = [0, 1856], sizes = [8, 32], strides = [1, 1]} : vector<8x3200xf32> to vector<8x32xf32>
    %108 = vector.extract_strided_slice %5 {offsets = [0, 1888], sizes = [8, 32], strides = [1, 1]} : vector<8x3200xf32> to vector<8x32xf32>
    %109 = arith.maximumf %107, %108 : vector<8x32xf32>
    %110 = arith.maximumf %106, %109 : vector<8x32xf32>
    %111 = vector.extract_strided_slice %5 {offsets = [0, 1920], sizes = [8, 32], strides = [1, 1]} : vector<8x3200xf32> to vector<8x32xf32>
    %112 = vector.extract_strided_slice %5 {offsets = [0, 1952], sizes = [8, 32], strides = [1, 1]} : vector<8x3200xf32> to vector<8x32xf32>
    %113 = arith.maximumf %111, %112 : vector<8x32xf32>
    %114 = vector.extract_strided_slice %5 {offsets = [0, 2240], sizes = [8, 32], strides = [1, 1]} : vector<8x3200xf32> to vector<8x32xf32>
    %115 = vector.extract_strided_slice %5 {offsets = [0, 2272], sizes = [8, 32], strides = [1, 1]} : vector<8x3200xf32> to vector<8x32xf32>
    %116 = arith.maximumf %114, %115 : vector<8x32xf32>
    %117 = arith.maximumf %113, %116 : vector<8x32xf32>
    %118 = vector.extract_strided_slice %5 {offsets = [0, 1984], sizes = [8, 32], strides = [1, 1]} : vector<8x3200xf32> to vector<8x32xf32>
    %119 = vector.extract_strided_slice %5 {offsets = [0, 2016], sizes = [8, 32], strides = [1, 1]} : vector<8x3200xf32> to vector<8x32xf32>
    %120 = arith.maximumf %118, %119 : vector<8x32xf32>
    %121 = vector.extract_strided_slice %5 {offsets = [0, 2304], sizes = [8, 32], strides = [1, 1]} : vector<8x3200xf32> to vector<8x32xf32>
    %122 = vector.extract_strided_slice %5 {offsets = [0, 2336], sizes = [8, 32], strides = [1, 1]} : vector<8x3200xf32> to vector<8x32xf32>
    %123 = arith.maximumf %121, %122 : vector<8x32xf32>
    %124 = arith.maximumf %120, %123 : vector<8x32xf32>
    %125 = vector.extract_strided_slice %5 {offsets = [0, 2048], sizes = [8, 32], strides = [1, 1]} : vector<8x3200xf32> to vector<8x32xf32>
    %126 = vector.extract_strided_slice %5 {offsets = [0, 2080], sizes = [8, 32], strides = [1, 1]} : vector<8x3200xf32> to vector<8x32xf32>
    %127 = arith.maximumf %125, %126 : vector<8x32xf32>
    %128 = vector.extract_strided_slice %5 {offsets = [0, 2368], sizes = [8, 32], strides = [1, 1]} : vector<8x3200xf32> to vector<8x32xf32>
    %129 = vector.extract_strided_slice %5 {offsets = [0, 2400], sizes = [8, 32], strides = [1, 1]} : vector<8x3200xf32> to vector<8x32xf32>
    %130 = arith.maximumf %128, %129 : vector<8x32xf32>
    %131 = arith.maximumf %127, %130 : vector<8x32xf32>
    %132 = vector.extract_strided_slice %5 {offsets = [0, 2112], sizes = [8, 32], strides = [1, 1]} : vector<8x3200xf32> to vector<8x32xf32>
    %133 = vector.extract_strided_slice %5 {offsets = [0, 2144], sizes = [8, 32], strides = [1, 1]} : vector<8x3200xf32> to vector<8x32xf32>
    %134 = arith.maximumf %132, %133 : vector<8x32xf32>
    %135 = vector.extract_strided_slice %5 {offsets = [0, 2432], sizes = [8, 32], strides = [1, 1]} : vector<8x3200xf32> to vector<8x32xf32>
    %136 = vector.extract_strided_slice %5 {offsets = [0, 2464], sizes = [8, 32], strides = [1, 1]} : vector<8x3200xf32> to vector<8x32xf32>
    %137 = arith.maximumf %135, %136 : vector<8x32xf32>
    %138 = arith.maximumf %134, %137 : vector<8x32xf32>
    %139 = vector.extract_strided_slice %5 {offsets = [0, 2176], sizes = [8, 32], strides = [1, 1]} : vector<8x3200xf32> to vector<8x32xf32>
    %140 = vector.extract_strided_slice %5 {offsets = [0, 2208], sizes = [8, 32], strides = [1, 1]} : vector<8x3200xf32> to vector<8x32xf32>
    %141 = arith.maximumf %139, %140 : vector<8x32xf32>
    %142 = vector.extract_strided_slice %5 {offsets = [0, 2496], sizes = [8, 32], strides = [1, 1]} : vector<8x3200xf32> to vector<8x32xf32>
    %143 = vector.extract_strided_slice %5 {offsets = [0, 2528], sizes = [8, 32], strides = [1, 1]} : vector<8x3200xf32> to vector<8x32xf32>
    %144 = arith.maximumf %142, %143 : vector<8x32xf32>
    %145 = arith.maximumf %141, %144 : vector<8x32xf32>
    %146 = vector.extract_strided_slice %5 {offsets = [0, 2560], sizes = [8, 32], strides = [1, 1]} : vector<8x3200xf32> to vector<8x32xf32>
    %147 = vector.extract_strided_slice %5 {offsets = [0, 2592], sizes = [8, 32], strides = [1, 1]} : vector<8x3200xf32> to vector<8x32xf32>
    %148 = arith.maximumf %146, %147 : vector<8x32xf32>
    %149 = vector.extract_strided_slice %5 {offsets = [0, 2880], sizes = [8, 32], strides = [1, 1]} : vector<8x3200xf32> to vector<8x32xf32>
    %150 = vector.extract_strided_slice %5 {offsets = [0, 2912], sizes = [8, 32], strides = [1, 1]} : vector<8x3200xf32> to vector<8x32xf32>
    %151 = arith.maximumf %149, %150 : vector<8x32xf32>
    %152 = arith.maximumf %148, %151 : vector<8x32xf32>
    %153 = vector.extract_strided_slice %5 {offsets = [0, 2624], sizes = [8, 32], strides = [1, 1]} : vector<8x3200xf32> to vector<8x32xf32>
    %154 = vector.extract_strided_slice %5 {offsets = [0, 2656], sizes = [8, 32], strides = [1, 1]} : vector<8x3200xf32> to vector<8x32xf32>
    %155 = arith.maximumf %153, %154 : vector<8x32xf32>
    %156 = vector.extract_strided_slice %5 {offsets = [0, 2944], sizes = [8, 32], strides = [1, 1]} : vector<8x3200xf32> to vector<8x32xf32>
    %157 = vector.extract_strided_slice %5 {offsets = [0, 2976], sizes = [8, 32], strides = [1, 1]} : vector<8x3200xf32> to vector<8x32xf32>
    %158 = arith.maximumf %156, %157 : vector<8x32xf32>
    %159 = arith.maximumf %155, %158 : vector<8x32xf32>
    %160 = vector.extract_strided_slice %5 {offsets = [0, 2688], sizes = [8, 32], strides = [1, 1]} : vector<8x3200xf32> to vector<8x32xf32>
    %161 = vector.extract_strided_slice %5 {offsets = [0, 2720], sizes = [8, 32], strides = [1, 1]} : vector<8x3200xf32> to vector<8x32xf32>
    %162 = arith.maximumf %160, %161 : vector<8x32xf32>
    %163 = vector.extract_strided_slice %5 {offsets = [0, 3008], sizes = [8, 32], strides = [1, 1]} : vector<8x3200xf32> to vector<8x32xf32>
    %164 = vector.extract_strided_slice %5 {offsets = [0, 3040], sizes = [8, 32], strides = [1, 1]} : vector<8x3200xf32> to vector<8x32xf32>
    %165 = arith.maximumf %163, %164 : vector<8x32xf32>
    %166 = arith.maximumf %162, %165 : vector<8x32xf32>
    %167 = vector.extract_strided_slice %5 {offsets = [0, 2752], sizes = [8, 32], strides = [1, 1]} : vector<8x3200xf32> to vector<8x32xf32>
    %168 = vector.extract_strided_slice %5 {offsets = [0, 2784], sizes = [8, 32], strides = [1, 1]} : vector<8x3200xf32> to vector<8x32xf32>
    %169 = arith.maximumf %167, %168 : vector<8x32xf32>
    %170 = vector.extract_strided_slice %5 {offsets = [0, 3072], sizes = [8, 32], strides = [1, 1]} : vector<8x3200xf32> to vector<8x32xf32>
    %171 = vector.extract_strided_slice %5 {offsets = [0, 3104], sizes = [8, 32], strides = [1, 1]} : vector<8x3200xf32> to vector<8x32xf32>
    %172 = arith.maximumf %170, %171 : vector<8x32xf32>
    %173 = arith.maximumf %169, %172 : vector<8x32xf32>
    %174 = vector.extract_strided_slice %5 {offsets = [0, 2816], sizes = [8, 32], strides = [1, 1]} : vector<8x3200xf32> to vector<8x32xf32>
    %175 = vector.extract_strided_slice %5 {offsets = [0, 2848], sizes = [8, 32], strides = [1, 1]} : vector<8x3200xf32> to vector<8x32xf32>
    %176 = arith.maximumf %174, %175 : vector<8x32xf32>
    %177 = vector.extract_strided_slice %5 {offsets = [0, 3136], sizes = [8, 32], strides = [1, 1]} : vector<8x3200xf32> to vector<8x32xf32>
    %178 = vector.extract_strided_slice %5 {offsets = [0, 3168], sizes = [8, 32], strides = [1, 1]} : vector<8x3200xf32> to vector<8x32xf32>
    %179 = arith.maximumf %177, %178 : vector<8x32xf32>
    %180 = arith.maximumf %176, %179 : vector<8x32xf32>
    %181 = tpu.concatenate %12, %19, %26, %33, %40, %47, %54, %61, %68, %75, %82, %89, %96, %103, %110, %117 in 1 : vector<8x32xf32>, vector<8x32xf32>, vector<8x32xf32>, vector<8x32xf32>, vector<8x32xf32>, vector<8x32xf32>, vector<8x32xf32>, vector<8x32xf32>, vector<8x32xf32>, vector<8x32xf32>, vector<8x32xf32>, vector<8x32xf32>, vector<8x32xf32>, vector<8x32xf32>, vector<8x32xf32>, vector<8x32xf32> -> vector<8x512xf32>
    %182 = tpu.concatenate %124, %131, %138, %145, %152, %159, %166, %173, %180 in 1 : vector<8x32xf32>, vector<8x32xf32>, vector<8x32xf32>, vector<8x32xf32>, vector<8x32xf32>, vector<8x32xf32>, vector<8x32xf32>, vector<8x32xf32>, vector<8x32xf32> -> vector<8x288xf32>
    %183 = tpu.concatenate %181, %182 in 1 : vector<8x512xf32>, vector<8x288xf32> -> vector<8x800xf32>
    %cst_5 = arith.constant 0.000000e+00 : f32
    %184 = vector.broadcast %cst_5 : f32 to vector<8x800xf32>
    %185 = arith.cmpf ogt, %183, %184 : vector<8x800xf32>
    %186 = math.exp %183 : vector<8x800xf32>
    %cst_6 = arith.constant 1.000000e+00 : f32
    %187 = vector.broadcast %cst_6 : f32 to vector<8x800xf32>
    %188 = arith.subf %186, %187 : vector<8x800xf32>
    %cst_7 = arith.constant 1.67326319 : f32
    %189 = vector.broadcast %cst_7 : f32 to vector<8x800xf32>
    %190 = arith.mulf %189, %188 : vector<8x800xf32>
    %191 = arith.select %185, %183, %190 : vector<8x800xi1>, vector<8x800xf32>
    %cst_8 = arith.constant 1.05070102 : f32
    %192 = vector.broadcast %cst_8 : f32 to vector<8x800xf32>
    %193 = arith.mulf %192, %191 : vector<8x800xf32>
    %194 = arith.truncf %193 : vector<8x800xf32> to vector<8x800xbf16>
    %c0_9 = arith.constant 0 : index
    %c0_10 = arith.constant 0 : index
    %195 = vector.load %arg4[%c0_9, %c0_10] : memref<800x576xbf16, #tpu.memory_space<vmem>>, vector<800x576xbf16>
    %cst_11 = arith.constant dense<0.000000e+00> : vector<8x576xf32>
    %196 = tpu.matmul %194, %195, %cst_11 {dimension_numbers = #tpu.dot_dimension_numbers<[1], [0], [0], [1], [0, 0, 1, 1], [], []>} : vector<8x800xbf16>, vector<800x576xbf16>, vector<8x576xf32> -> vector<8x576xf32>
    %c0_12 = arith.constant 0 : index
    %c0_13 = arith.constant 0 : index
    %197 = vector.load %arg5[%c0_12, %c0_13] : memref<1x576xf32, #tpu.memory_space<vmem>>, vector<1x576xf32>
    %198 = vector.broadcast %197 : vector<1x576xf32> to vector<8x576xf32>
    %199 = arith.addf %196, %198 : vector<8x576xf32>
    %200 = vector.extract_strided_slice %199 {offsets = [0, 0], sizes = [8, 64], strides = [1, 1]} : vector<8x576xf32> to vector<8x64xf32>
    %201 = vector.extract_strided_slice %199 {offsets = [0, 64], sizes = [8, 64], strides = [1, 1]} : vector<8x576xf32> to vector<8x64xf32>
    %202 = arith.maximumf %200, %201 : vector<8x64xf32>
    %203 = vector.extract_strided_slice %199 {offsets = [0, 128], sizes = [8, 64], strides = [1, 1]} : vector<8x576xf32> to vector<8x64xf32>
    %204 = arith.maximumf %202, %203 : vector<8x64xf32>
    %205 = vector.extract_strided_slice %199 {offsets = [0, 192], sizes = [8, 64], strides = [1, 1]} : vector<8x576xf32> to vector<8x64xf32>
    %206 = arith.maximumf %204, %205 : vector<8x64xf32>
    %207 = vector.extract_strided_slice %199 {offsets = [0, 256], sizes = [8, 64], strides = [1, 1]} : vector<8x576xf32> to vector<8x64xf32>
    %208 = arith.maximumf %206, %207 : vector<8x64xf32>
    %209 = vector.extract_strided_slice %199 {offsets = [0, 320], sizes = [8, 64], strides = [1, 1]} : vector<8x576xf32> to vector<8x64xf32>
    %210 = arith.maximumf %208, %209 : vector<8x64xf32>
    %211 = vector.extract_strided_slice %199 {offsets = [0, 384], sizes = [8, 64], strides = [1, 1]} : vector<8x576xf32> to vector<8x64xf32>
    %212 = arith.maximumf %210, %211 : vector<8x64xf32>
    %213 = vector.extract_strided_slice %199 {offsets = [0, 448], sizes = [8, 64], strides = [1, 1]} : vector<8x576xf32> to vector<8x64xf32>
    %214 = arith.maximumf %212, %213 : vector<8x64xf32>
    %215 = vector.extract_strided_slice %199 {offsets = [0, 512], sizes = [8, 64], strides = [1, 1]} : vector<8x576xf32> to vector<8x64xf32>
    %216 = arith.maximumf %214, %215 : vector<8x64xf32>
    %cst_14 = arith.constant 0.000000e+00 : f32
    %217 = vector.broadcast %cst_14 : f32 to vector<8x64xf32>
    %218 = arith.cmpf ogt, %216, %217 : vector<8x64xf32>
    %219 = math.exp %216 : vector<8x64xf32>
    %cst_15 = arith.constant 1.000000e+00 : f32
    %220 = vector.broadcast %cst_15 : f32 to vector<8x64xf32>
    %221 = arith.subf %219, %220 : vector<8x64xf32>
    %cst_16 = arith.constant 1.67326319 : f32
    %222 = vector.broadcast %cst_16 : f32 to vector<8x64xf32>
    %223 = arith.mulf %222, %221 : vector<8x64xf32>
    %224 = arith.select %218, %216, %223 : vector<8x64xi1>, vector<8x64xf32>
    %cst_17 = arith.constant 1.05070102 : f32
    %225 = vector.broadcast %cst_17 : f32 to vector<8x64xf32>
    %226 = arith.mulf %225, %224 : vector<8x64xf32>
    %227 = arith.truncf %226 : vector<8x64xf32> to vector<8x64xbf16>
    %c0_18 = arith.constant 0 : index
    %c0_19 = arith.constant 0 : index
    %228 = vector.load %arg6[%c0_18, %c0_19] : memref<64x256xbf16, #tpu.memory_space<vmem>>, vector<64x256xbf16>
    %cst_20 = arith.constant dense<0.000000e+00> : vector<8x256xf32>
    %229 = tpu.matmul %227, %228, %cst_20 {dimension_numbers = #tpu.dot_dimension_numbers<[1], [0], [0], [1], [0, 0, 1, 1], [], []>} : vector<8x64xbf16>, vector<64x256xbf16>, vector<8x256xf32> -> vector<8x256xf32>
    %c0_21 = arith.constant 0 : index
    %c0_22 = arith.constant 0 : index
    %230 = vector.load %arg7[%c0_21, %c0_22] : memref<1x256xf32, #tpu.memory_space<vmem>>, vector<1x256xf32>
    %231 = vector.broadcast %230 : vector<1x256xf32> to vector<8x256xf32>
    %232 = arith.addf %229, %231 : vector<8x256xf32>
    %cst_23 = arith.constant 0.000000e+00 : f32
    %233 = vector.broadcast %cst_23 : f32 to vector<8x256xf32>
    %234 = arith.cmpf ogt, %232, %233 : vector<8x256xf32>
    %235 = math.exp %232 : vector<8x256xf32>
    %cst_24 = arith.constant 1.000000e+00 : f32
    %236 = vector.broadcast %cst_24 : f32 to vector<8x256xf32>
    %237 = arith.subf %235, %236 : vector<8x256xf32>
    %cst_25 = arith.constant 1.67326319 : f32
    %238 = vector.broadcast %cst_25 : f32 to vector<8x256xf32>
    %239 = arith.mulf %238, %237 : vector<8x256xf32>
    %240 = arith.select %234, %232, %239 : vector<8x256xi1>, vector<8x256xf32>
    %cst_26 = arith.constant 1.05070102 : f32
    %241 = vector.broadcast %cst_26 : f32 to vector<8x256xf32>
    %242 = arith.mulf %241, %240 : vector<8x256xf32>
    %243 = arith.truncf %242 : vector<8x256xf32> to vector<8x256xbf16>
    %c0_27 = arith.constant 0 : index
    %c0_28 = arith.constant 0 : index
    %244 = vector.load %arg8[%c0_27, %c0_28] : memref<256x128xbf16, #tpu.memory_space<vmem>>, vector<256x128xbf16>
    %cst_29 = arith.constant dense<0.000000e+00> : vector<8x128xf32>
    %245 = tpu.matmul %243, %244, %cst_29 {dimension_numbers = #tpu.dot_dimension_numbers<[1], [0], [0], [1], [0, 0, 1, 1], [], []>} : vector<8x256xbf16>, vector<256x128xbf16>, vector<8x128xf32> -> vector<8x128xf32>
    %c0_30 = arith.constant 0 : index
    %c0_31 = arith.constant 0 : index
    %246 = vector.load %arg9[%c0_30, %c0_31] : memref<1x128xf32, #tpu.memory_space<vmem>>, vector<1x128xf32>
    %247 = vector.broadcast %246 : vector<1x128xf32> to vector<8x128xf32>
    %248 = arith.addf %245, %247 : vector<8x128xf32>
    %cst_32 = arith.constant 0.000000e+00 : f32
    %249 = vector.broadcast %cst_32 : f32 to vector<8x128xf32>
    %250 = arith.cmpf ogt, %248, %249 : vector<8x128xf32>
    %251 = math.exp %248 : vector<8x128xf32>
    %cst_33 = arith.constant 1.000000e+00 : f32
    %252 = vector.broadcast %cst_33 : f32 to vector<8x128xf32>
    %253 = arith.subf %251, %252 : vector<8x128xf32>
    %cst_34 = arith.constant 1.67326319 : f32
    %254 = vector.broadcast %cst_34 : f32 to vector<8x128xf32>
    %255 = arith.mulf %254, %253 : vector<8x128xf32>
    %256 = arith.select %250, %248, %255 : vector<8x128xi1>, vector<8x128xf32>
    %cst_35 = arith.constant 1.05070102 : f32
    %257 = vector.broadcast %cst_35 : f32 to vector<8x128xf32>
    %258 = arith.mulf %257, %256 : vector<8x128xf32>
    %259 = arith.truncf %258 : vector<8x128xf32> to vector<8x128xbf16>
    %c0_36 = arith.constant 0 : index
    %c0_37 = arith.constant 0 : index
    %260 = vector.load %arg10[%c0_36, %c0_37] : memref<128x128xbf16, #tpu.memory_space<vmem>>, vector<128x128xbf16>
    %cst_38 = arith.constant dense<0.000000e+00> : vector<8x128xf32>
    %261 = tpu.matmul %259, %260, %cst_38 {dimension_numbers = #tpu.dot_dimension_numbers<[1], [0], [0], [1], [0, 0, 1, 1], [], []>} : vector<8x128xbf16>, vector<128x128xbf16>, vector<8x128xf32> -> vector<8x128xf32>
    %c0_39 = arith.constant 0 : index
    %c0_40 = arith.constant 0 : index
    %262 = vector.load %arg11[%c0_39, %c0_40] : memref<1x128xf32, #tpu.memory_space<vmem>>, vector<1x128xf32>
    %263 = vector.broadcast %262 : vector<1x128xf32> to vector<8x128xf32>
    %264 = arith.addf %261, %263 : vector<8x128xf32>
    %c0_41 = arith.constant 0 : index
    %c0_42 = arith.constant 0 : index
    %265 = vector.load %arg12[%c0_41, %c0_42] : memref<8x128xf32, #tpu.memory_space<vmem>>, vector<8x128xf32>
    tpu.vector_store %arg12[%c0_41, %c0_42], %264 {strides = array<i32>} : memref<8x128xf32, #tpu.memory_space<vmem>>, vector<8x128xf32>,
    return
  }
  func.func @transform_0(%arg0: i32) -> (i32, i32) {
    %c0_i32 = arith.constant 0 : i32
    %c0_i32_0 = arith.constant 0 : i32
    return %arg0, %c0_i32 : i32, i32
  }
  func.func @transform_1(%arg0: i32) -> (i32, i32) {
    %c0_i32 = arith.constant 0 : i32
    %c0_i32_0 = arith.constant 0 : i32
    %c0_i32_1 = arith.constant 0 : i32
    return %c0_i32, %c0_i32_0 : i32, i32
  }
  func.func @transform_2(%arg0: i32) -> (i32, i32) {
    %c0_i32 = arith.constant 0 : i32
    %c0_i32_0 = arith.constant 0 : i32
    %c0_i32_1 = arith.constant 0 : i32
    return %c0_i32, %c0_i32_0 : i32, i32
  }
  func.func @transform_3(%arg0: i32) -> (i32, i32) {
    %c0_i32 = arith.constant 0 : i32
    %c0_i32_0 = arith.constant 0 : i32
    %c0_i32_1 = arith.constant 0 : i32
    return %c0_i32, %c0_i32_0 : i32, i32
  }
  func.func @transform_4(%arg0: i32) -> (i32, i32) {
    %c0_i32 = arith.constant 0 : i32
    %c0_i32_0 = arith.constant 0 : i32
    %c0_i32_1 = arith.constant 0 : i32
    return %c0_i32, %c0_i32_0 : i32, i32
  }
  func.func @transform_5(%arg0: i32) -> (i32, i32) {
    %c0_i32 = arith.constant 0 : i32
    %c0_i32_0 = arith.constant 0 : i32
    %c0_i32_1 = arith.constant 0 : i32
    return %c0_i32, %c0_i32_0 : i32, i32
  }
  func.func @transform_6(%arg0: i32) -> (i32, i32) {
    %c0_i32 = arith.constant 0 : i32
    %c0_i32_0 = arith.constant 0 : i32
    %c0_i32_1 = arith.constant 0 : i32
    return %c0_i32, %c0_i32_0 : i32, i32
  }
  func.func @transform_7(%arg0: i32) -> (i32, i32) {
    %c0_i32 = arith.constant 0 : i32
    %c0_i32_0 = arith.constant 0 : i32
    %c0_i32_1 = arith.constant 0 : i32
    return %c0_i32, %c0_i32_0 : i32, i32
  }
  func.func @transform_8(%arg0: i32) -> (i32, i32) {
    %c0_i32 = arith.constant 0 : i32
    %c0_i32_0 = arith.constant 0 : i32
    %c0_i32_1 = arith.constant 0 : i32
    return %c0_i32, %c0_i32_0 : i32, i32
  }
  func.func @transform_9(%arg0: i32) -> (i32, i32) {
    %c0_i32 = arith.constant 0 : i32
    %c0_i32_0 = arith.constant 0 : i32
    %c0_i32_1 = arith.constant 0 : i32
    return %c0_i32, %c0_i32_0 : i32, i32
  }
  func.func @transform_10(%arg0: i32) -> (i32, i32) {
    %c0_i32 = arith.constant 0 : i32
    %c0_i32_0 = arith.constant 0 : i32
    %c0_i32_1 = arith.constant 0 : i32
    return %c0_i32, %c0_i32_0 : i32, i32
  }
  func.func @transform_11(%arg0: i32) -> (i32, i32) {
    %c0_i32 = arith.constant 0 : i32
    %c0_i32_0 = arith.constant 0 : i32
    return %arg0, %c0_i32 : i32, i32
  }
}

</mosaic_0001>

<bundles_post_ra>
// kernel: simplenet_forward.1
= control target key start
LH: loop header
LB: loop body
LE: loop exit
PB: predicated region body
PF: predicated region fallthrough
CT: control target
= control target key end

     0   :  { %16 = vsyncpa [#allocation3], 0  ;;  %s13726_s0 = inlined_call_operand.vmem [shape: bf16[8,392], index: 0, kind: input, shape index: {}]   ;;  %s13727_s1 = inlined_call_operand.hbm [shape: bf16[392,3200], index: 1, kind: input, shape index: {}]   ;;  %s13728_s2 = inlined_call_operand.hbm [shape: f32[1,3200], index: 2, kind: input, shape index: {}]   ;;  %s13729_s3 = inlined_call_operand.hbm [shape: bf16[800,576], index: 3, kind: input, shape index: {}]   ;;  %s13730_s4 = inlined_call_operand.hbm [shape: f32[1,576], index: 4, kind: input, shape index: {}]   ;;  %s13731_s5 = inlined_call_operand.hbm [shape: bf16[64,256], index: 5, kind: input, shape index: {}]   ;;  %s13732_s6 = inlined_call_operand.hbm [shape: f32[1,256], index: 6, kind: input, shape index: {}]   ;;  %s13733_s7 = inlined_call_operand.hbm [shape: bf16[256,128], index: 7, kind: input, shape index: {}]   ;;  %s13734_s8 = inlined_call_operand.hbm [shape: f32[1,128], index: 8, kind: input, shape index: {}]   ;;  %s13735_s9 = inlined_call_operand.hbm [shape: bf16[128,128], index: 9, kind: input, shape index: {}]   ;;  %s13736_s10 = inlined_call_operand.hbm [shape: f32[1,128], index: 10, kind: input, shape index: {}]   ;;  %s13737_s11 = inlined_call_operand.vmem [shape: f32[8,128], index: 11, kind: output, shape index: {}]  }
   0x1   :  { %17 = vsyncpa [#allocation5], 0 }
   0x2   :  { %18 = vsyncpa [#allocation8], 0 }
   0x3   :  { %19 = vsyncpa [#allocation11], 0 }
   0x4   :  { %20 = vsyncpa [#allocation14], 0  ;;  %s42_s19 = sshll.u32 %s13728_s2, 4  ;;  %s43_s19 = int_to_ptr.hbm [resolvable:$true] %s42_s19 }
   0x5   :  { %21 = vsyncpa [#allocation17], 0  ;;  %s12932_s20 = smov [#allocation4]   ;;  %s66_s24 = sshll.u32 %s13730_s4, 4  ;;  %s67_s24 = int_to_ptr.hbm [resolvable:$true] %s66_s24 }
   0x6   :  { %s44_s21 = sshll.u32 %s12932_s20, 4  ;;  %s12933_s25 = smov [#allocation7]   ;;  %s45_s21 = int_to_ptr.vmem [resolvable:$true] %s44_s21 }
   0x7   :  { %47 = dma.hbm_to_vmem [thread:$0]  %s43_s19, 400, %s45_s21, [#allocation5]  }
   0x8   :  { %s68_s26 = sshll.u32 %s12933_s25, 4  ;;  %s90_s29 = sshll.u32 %s13732_s6, 4  ;;  %s69_s26 = int_to_ptr.vmem [resolvable:$true] %s68_s26  ;;  %s91_s29 = int_to_ptr.hbm [resolvable:$true] %s90_s29 }
   0x9   :  { %71 = dma.hbm_to_vmem [thread:$0]  %s67_s24, 80, %s69_s26, [#allocation8]  }
   0xa   :  { %s114_s12 = sshll.u32 %s13734_s8, 4  ;;  %s12934_s13 = smov [#allocation10]   ;;  %s115_s12 = int_to_ptr.hbm [resolvable:$true] %s114_s12 }
   0xb   :  { %s92_s14 = sshll.u32 %s12934_s13, 4  ;;  %s12935_s4 = smov [#allocation13]   ;;  %s93_s14 = int_to_ptr.vmem [resolvable:$true] %s92_s14 }
   0xc   :  { %95 = dma.hbm_to_vmem [thread:$0]  %s91_s29, 32, %s93_s14, [#allocation11]  }
   0xd   :  { %s116_s15 = sshll.u32 %s12935_s4, 4  ;;  %s28_s18 = sshll.u32 %s13727_s1, 4  ;;  %s117_s15 = int_to_ptr.vmem [resolvable:$true] %s116_s15  ;;  %s29_s18 = int_to_ptr.hbm [resolvable:$true] %s28_s18 }
   0xe   :  { %119 = dma.hbm_to_vmem [thread:$0]  %s115_s12, 16, %s117_s15, [#allocation14]  }
   0xf   :  { %s12936_s6 = smov [#allocation2]   ;;  %s52_s8 = sshll.u32 %s13729_s3, 4  ;;  %s53_s8 = int_to_ptr.hbm [resolvable:$true] %s52_s8 }
  0x10   :  { %s30_s19 = sshll.u32 %s12936_s6, 4  ;;  %s12937_s22 = smov 1600   ;;  %s31_s19 = int_to_ptr.vmem [resolvable:$true] %s30_s19 }
  0x11   :  { %s12938_s23 = smov 100   ;;  %s12939_s24 = smov [#allocation6]  }
  0x12   :  { %36 = dma.hbm_to_vmem [thread:$0]  %s29_s18, 78400, %s31_s19, [#allocation3], %s12937_s22, %s12937_s22, %s12938_s23  }
  0x13   :  { %s54_s25 = sshll.u32 %s12939_s24, 4  ;;  %s12940_s26 = smov 320   ;;  %s55_s25 = int_to_ptr.vmem [resolvable:$true] %s54_s25 }
  0x14   :  { %s12941_s27 = smov 20   ;;  %s76_s29 = sshll.u32 %s13731_s5, 4  ;;  %s77_s29 = int_to_ptr.hbm [resolvable:$true] %s76_s29 }
  0x15   :  { %60 = dma.hbm_to_vmem [thread:$0]  %s53_s8, 32000, %s55_s25, [#allocation5], %s12940_s26, %s12940_s26, %s12941_s27  }
  0x16   :  { %s12942_s2 = smov [#allocation9]   ;;  %s100_s13 = sshll.u32 %s13733_s7, 4  ;;  %s101_s13 = int_to_ptr.hbm [resolvable:$true] %s100_s13 }
  0x17   :  { %s78_s30 = sshll.u32 %s12942_s2, 4  ;;  %s12943_s14 = smov 128   ;;  %s79_s30 = int_to_ptr.vmem [resolvable:$true] %s78_s30 }
  0x18   :  { %s12944_s4 = smov 8   ;;  %s12945_s15 = smov [#allocation12]  }
  0x19   :  { %84 = dma.hbm_to_vmem [thread:$0]  %s77_s29, 1024, %s79_s30, [#allocation8], %s12943_s14, %s12943_s14, %s12944_s4  }
  0x1a   :  { %s102_s16 = sshll.u32 %s12945_s15, 4  ;;  %s12946_s17 = smov 64   ;;  %s103_s16 = int_to_ptr.vmem [resolvable:$true] %s102_s16 }
  0x1b   :  { %s12947_s18 = smov 4   ;;  %s124_s19 = sshll.u32 %s13735_s9, 4  ;;  %s125_s19 = int_to_ptr.hbm [resolvable:$true] %s124_s19 }
  0x1c   :  { %108 = dma.hbm_to_vmem [thread:$0]  %s101_s13, 2048, %s103_s16, [#allocation11], %s12946_s17, %s12946_s17, %s12947_s18  }
  0x1d   :  { %s12948_s20 = smov [#allocation15]   ;;  %s138_s22 = sshll.u32 %s13736_s10, 4  ;;  %s139_s22 = int_to_ptr.hbm [resolvable:$true] %s138_s22 }
  0x1e   :  { %s126_s21 = sshll.u32 %s12948_s20, 4  ;;  %s12949_s23 = smov [#allocation16]   ;;  %s127_s21 = int_to_ptr.vmem [resolvable:$true] %s126_s21 }
  0x1f   :  { %132 = dma.hbm_to_vmem [thread:$0]  %s125_s19, 1024, %s127_s21, [#allocation14], %s12946_s17, %s12946_s17, %s12947_s18  }
  0x20   :  { %s140_s24 = sshll.u32 %s12949_s23, 4  ;;  %s141_s24 = int_to_ptr.vmem [resolvable:$true] %s140_s24 }
  0x21   :  { %143 = dma.hbm_to_vmem [thread:$0]  %s139_s22, 16, %s141_s24, [#allocation17]  }
  0x22   :  { %12920 = dma.done.wait [#allocation3], 78400  }
  0x23   :  { %12921 = vsyncadd [#allocation3], 4294888896 }
  0x24   :  { %12922 = dma.done.wait [#allocation5], 32400  }
  0x25   :  { %12923 = vsyncadd [#allocation5], 4294934896 }
  0x26   :  { %12924 = dma.done.wait [#allocation8], 1104  }
  0x27   :  { %12925 = vsyncadd [#allocation8], 4294966192 }
  0x28   :  { %12926 = dma.done.wait [#allocation11], 2080  }
  0x29   :  { %12927 = vsyncadd [#allocation11], 4294965216 }
  0x2a   :  { %12928 = dma.done.wait [#allocation14], 1040  }
  0x2b   :  { %12929 = vsyncadd [#allocation14], 4294966256 }
  0x2c   :  { %12930 = dma.done.wait [#allocation17], 16  }
  0x2d   :  { %12931 = vsyncadd [#allocation17], 4294967280  ;;  %v8882_v0 = vld [vmem:[#allocation2 + $0x578] sm:$0xf]  ;;  %v11938_v1 = vld [vmem:[#allocation2 + $0x5d8] sm:$0xf0] }
  0x2e   :  { %v9682_v2 = vld [vmem:[#allocation2 + $0xbb8] sm:$0xf]  ;;  %v8883_v3 = vor.u32 %v11938_v1, %v8882_v0  ;;  %v12138_v4 = vld [vmem:[#allocation2 + $0xc18] sm:$0xf0]  ;;  %v8884_v6 = vld [vmem:[#allocation2 + $0x5dc] sm:$0xf0] }
  0x2f   :  { %v11926_v5 = vld [vmem:[#allocation2 + $0x57c] sm:$0xf]  ;;  %v9683_v7 = vor.u32 %v12138_v4, %v9682_v2  ;;  %v10482_v9 = vld [vmem:[#allocation2 + $0x11f8] sm:$0xf]  ;;  %v8782_v11 = vld [vmem:[#allocation2 + $0x4b0] sm:$0xf] }
  0x30   :  { %v8887_v8 = vor.u32 %v11926_v5, %v8884_v6  ;;  %v12338_v10 = vld [vmem:[#allocation2 + $0x1258] sm:$0xf0]  ;;  %4062 = vmatpush.bf16.msra.mxu0 %v8883_v3  ;;  %v11913_v13 = vld [vmem:[#allocation2 + $0x510] sm:$0xf0]  ;;  %v9582_v14 = vld [vmem:[#allocation2 + $0xaf0] sm:$0xf] }
  0x31   :  { %v10483_v12 = vor.u32 %v12338_v10, %v10482_v9  ;;  %v12113_v15 = vld [vmem:[#allocation2 + $0xb50] sm:$0xf0]  ;;  %4075 = vmatpush.bf16.msra.mxu1 %v9683_v7  ;;  %v8783_v16 = vor.u32 %v11913_v13, %v8782_v11  ;;  %v8784_v19 = vld [vmem:[#allocation2 + $0x514] sm:$0xf0]  ;;  %v10382_v20 = vld [vmem:[#allocation2 + $0x1130] sm:$0xf] }
  0x32   :  { %4114 = vmatpush.bf16.msra.mxu3 %v8887_v8  ;;  %v9583_v17 = vor.u32 %v12113_v15, %v9582_v14  ;;  %v11901_v18 = vld [vmem:[#allocation2 + $0x4b4] sm:$0xf]  ;;  %v8682_v23 = vld [vmem:[#allocation2 + $0x3e8] sm:$0xf]  ;;  %v11888_v24 = vld [vmem:[#allocation2 + $0x448] sm:$0xf0] }
  0x33   :  { %4088 = vmatpush.bf16.msra.mxu2 %v10483_v12  ;;  %v8787_v21 = vor.u32 %v11901_v18, %v8784_v19  ;;  %v12313_v22 = vld [vmem:[#allocation2 + $0x1190] sm:$0xf0]  ;;  %v9482_v26 = vld [vmem:[#allocation2 + $0xa28] sm:$0xf]  ;;  %v12088_v27 = vld [vmem:[#allocation2 + $0xa88] sm:$0xf0]  ;;  %v8683_v29 = vor.u32 %v11888_v24, %v8682_v23 }
  0x34   :  { %v10383_v25 = vor.u32 %v12313_v22, %v10382_v20  ;;  %v11876_v28 = vld [vmem:[#allocation2 + $0x3ec] sm:$0xf]  ;;  %4063 = vmatpush.bf16.msra.mxu0 %v8783_v16  ;;  %v8684_v30 = vld [vmem:[#allocation2 + $0x44c] sm:$0xf0]  ;;  %v10282_v31 = vld [vmem:[#allocation2 + $0x1068] sm:$0xf]  ;;  %v9483_v33 = vor.u32 %v12088_v27, %v9482_v26 }
  0x35   :  { %v12288_v32 = vld [vmem:[#allocation2 + $0x10c8] sm:$0xf0]  ;;  %4076 = vmatpush.bf16.msra.mxu1 %v9583_v17  ;;  %v8687_v34 = vor.u32 %v11876_v28, %v8684_v30  ;;  %v8582_v35 = vld [vmem:[#allocation2 + $0x320] sm:$0xf]  ;;  %v11863_v36 = vld [vmem:[#allocation2 + $0x380] sm:$0xf0] }
  0x36   :  { %4115 = vmatpush.bf16.msra.mxu3 %v8787_v21  ;;  %v9382_v37 = vld [vmem:[#allocation2 + $0x960] sm:$0xf]  ;;  %v10283_v38 = vor.u32 %v12288_v32, %v10282_v31  ;;  %v12063_v39 = vld [vmem:[#allocation2 + $0x9c0] sm:$0xf0]  ;;  %v8584_v41 = vld [vmem:[#allocation2 + $0x384] sm:$0xf0]  ;;  %v8583_v44 = vor.u32 %v11863_v36, %v8582_v35 }
  0x37   :  { %4089 = vmatpush.bf16.msra.mxu2 %v10383_v25  ;;  %v11851_v40 = vld [vmem:[#allocation2 + $0x324] sm:$0xf]  ;;  %v10182_v42 = vld [vmem:[#allocation2 + $0xfa0] sm:$0xf]  ;;  %v9383_v45 = vor.u32 %v12063_v39, %v9382_v37  ;;  %v8482_v47 = vld [vmem:[#allocation2 + $0x258] sm:$0xf] }
  0x38   :  { %v12263_v43 = vld [vmem:[#allocation2 + $0x1000] sm:$0xf0]  ;;  %4064 = vmatpush.bf16.msra.mxu0 %v8683_v29  ;;  %v8587_v46 = vor.u32 %v11851_v40, %v8584_v41  ;;  %v11838_v48 = vld [vmem:[#allocation2 + $0x2b8] sm:$0xf0]  ;;  %v9282_v49 = vld [vmem:[#allocation2 + $0x898] sm:$0xf] }
  0x39   :  { %4077 = vmatpush.bf16.msra.mxu1 %v9483_v33  ;;  %v10183_v50 = vor.u32 %v12263_v43, %v10182_v42  ;;  %v12038_v51 = vld [vmem:[#allocation2 + $0x8f8] sm:$0xf0]  ;;  %v8484_v53 = vld [vmem:[#allocation2 + $0x2bc] sm:$0xf0]  ;;  %v10082_v54 = vld [vmem:[#allocation2 + $0xed8] sm:$0xf]  ;;  %v8483_v56 = vor.u32 %v11838_v48, %v8482_v47 }
  0x3a   :  { %4116 = vmatpush.bf16.msra.mxu3 %v8687_v34  ;;  %v11826_v52 = vld [vmem:[#allocation2 + $0x25c] sm:$0xf]  ;;  %v9283_v57 = vor.u32 %v12038_v51, %v9282_v49  ;;  %v8382_v59 = vld [vmem:[#allocation2 + $0x190] sm:$0xf]  ;;  %v11813_v60 = vld [vmem:[#allocation2 + $0x1f0] sm:$0xf0] }
  0x3b   :  { %4090 = vmatpush.bf16.msra.mxu2 %v10283_v38  ;;  %v12238_v55 = vld [vmem:[#allocation2 + $0xf38] sm:$0xf0]  ;;  %v8487_v58 = vor.u32 %v11826_v52, %v8484_v53  ;;  %v9182_v61 = vld [vmem:[#allocation2 + $0x7d0] sm:$0xf]  ;;  %v12013_v63 = vld [vmem:[#allocation2 + $0x830] sm:$0xf0]  ;;  %v8383_v4 = vor.u32 %v11813_v60, %v8382_v59 }
  0x3c   :  { %4065 = vmatpush.bf16.msra.mxu0 %v8583_v44  ;;  %v10083_v62 = vor.u32 %v12238_v55, %v10082_v54  ;;  %v11801_v0 = vld [vmem:[#allocation2 + $0x194] sm:$0xf]  ;;  %v8384_v1 = vld [vmem:[#allocation2 + $0x1f4] sm:$0xf0]  ;;  %v9982_v2 = vld [vmem:[#allocation2 + $0xe10] sm:$0xf]  ;;  %v9183_v5 = vor.u32 %v12013_v63, %v9182_v61 }
  0x3d   :  { %4078 = vmatpush.bf16.msra.mxu1 %v9383_v45  ;;  %v12213_v3 = vld [vmem:[#allocation2 + $0xe70] sm:$0xf0]  ;;  %v8387_v6 = vor.u32 %v11801_v0, %v8384_v1  ;;  %v8282_v7 = vld [vmem:[#allocation2 + $0xc8] sm:$0xf]  ;;  %v11788_v8 = vld [vmem:[#allocation2 + $0x128] sm:$0xf0] }
  0x3e   :  { %4117 = vmatpush.bf16.msra.mxu3 %v8587_v46  ;;  %v9082_v9 = vld [vmem:[#allocation2 + $0x708] sm:$0xf]  ;;  %v9983_v10 = vor.u32 %v12213_v3, %v9982_v2  ;;  %v11988_v11 = vld [vmem:[#allocation2 + $0x768] sm:$0xf0]  ;;  %v8284_v13 = vld [vmem:[#allocation2 + $0x12c] sm:$0xf0]  ;;  %v8283_v17 = vor.u32 %v11788_v8, %v8282_v7 }
  0x3f   :  { %4091 = vmatpush.bf16.msra.mxu2 %v10183_v50  ;;  %v11776_v12 = vld [vmem:[#allocation2 + $0xcc] sm:$0xf]  ;;  %v9882_v14 = vld [vmem:[#allocation2 + $0xd48] sm:$0xf]  ;;  %v8182_v16 = vld [vmem:[#allocation2] sm:$0xf]  ;;  %v9083_v21 = vor.u32 %v11988_v11, %v9082_v9 }
  0x40   :  { %4066 = vmatpush.bf16.msra.mxu0 %v8483_v56  ;;  %v12188_v15 = vld [vmem:[#allocation2 + $0xda8] sm:$0xf0]  ;;  %v11763_v18 = vld [vmem:[#allocation2 + $0x60] sm:$0xf0]  ;;  %v8287_v22 = vor.u32 %v11776_v12, %v8284_v13  ;;  %v8982_v23 = vld [vmem:[#allocation2 + $0x640] sm:$0xf] }
  0x41   :  { %4079 = vmatpush.bf16.msra.mxu1 %v9283_v57  ;;  %v185_v19 = vld [vmem:[%s13726_s0] sm:$0xff]  ;;  %v9883_v27 = vor.u32 %v12188_v15, %v9882_v14  ;;  %v8184_v28 = vld [vmem:[#allocation2 + $0x64] sm:$0xf0]  ;;  %v12326_v32 = vld [vmem:[#allocation2 + $0x11fc] sm:$0xf]  ;;  %v8183_v36 = vor.u32 %v11763_v18, %v8182_v16  ;;  %vm3986_vm0 = vcmask 1043456  }
  0x42   :  { %4118 = vmatpush.bf16.msra.mxu3 %v8487_v58  ;;  %v811_v20 = vld [vmem:[#allocation2 + $0x12c0] sm:$0xff]  ;;  %v13052_v30 = vld [vmem:[%s13726_s0 + $0x8] sm:$0xff]  ;;  %v884_v34 = vunpack.c.l.b16 %v185_v19  ;;  %v885_v39 = vunpack.c.h.b16 %v185_v19  ;;  %v12126_v46 = vld [vmem:[#allocation2 + $0xbbc] sm:$0xf]  ;;  %vm3982_vm1 = vcmask 64512   ;;  %s12950_s0 = smov 96  }
  0x43   :  { %4092 = vmatpush.bf16.msra.mxu2 %v10083_v62  ;;  %v11963_v24 = vld [vmem:[#allocation2 + $0x6a0] sm:$0xf0]  ;;  %v2732_v26 = vunpack.c.l.b16 %v811_v20  ;;  %v9782_v29 = vld [vmem:[#allocation2 + $0xc80] sm:$0xf]  ;;  %v2733_v35 = vunpack.c.h.b16 %v811_v20  ;;  %v886_v43 = vunpack.c.l.b16 %v13052_v30  ;;  %v12301_v50 = vld [vmem:[#allocation2 + $0x1134] sm:$0xf] }
  0x44   :  { %4067 = vmatpush.bf16.msra.mxu0 %v8383_v4  ;;  %v11751_v25 = vld [vmem:[#allocation2 + $0x4] sm:$0xf]  ;;  %v10484_v33 = vld [vmem:[#allocation2 + $0x125c] sm:$0xf0]  ;;  %v8983_v40 = vor.u32 %v11963_v24, %v8982_v23  ;;  %v13055_v49 = vpack.c.b16 %v884_v34, %v884_v34  ;;  %v10384_v51 = vld [vmem:[#allocation2 + $0x1194] sm:$0xf0]  ;;  %v13057_v55 = vpack.c.b16 %v885_v39, %v885_v39 }
  0x45   :  { %4080 = vmatpush.bf16.msra.mxu1 %v9183_v5  ;;  %v12163_v31 = vld [vmem:[#allocation2 + $0xce0] sm:$0xf0]  ;;  %v8890_v37 = vld [vmem:[#allocation2 + $0x580] sm:$0xf]  ;;  %v8187_v41 = vor.u32 %v11751_v25, %v8184_v28  ;;  %v3357_v42 = vpack.c.b16 %v2732_v26, %v2732_v26  ;;  %v10487_v45 = vor.u32 %v12326_v32, %v10484_v33  ;;  %v8790_v52 = vld [vmem:[#allocation2 + $0x4b8] sm:$0xf]  ;;  %v3358_v53 = vpack.c.b16 %v2733_v35, %v2733_v35 }
  0x46   :  { %4119 = vmatpush.bf16.msra.mxu3 %v8387_v6  ;;  %v11939_v38 = vld [vmem:[#allocation2 + $0x5e0] sm:$0xf0]  ;;  %v9783_v44 = vor.u32 %v12163_v31, %v9782_v29  ;;  %v9684_v47 = vld [vmem:[#allocation2 + $0xc1c] sm:$0xf0]  ;;  %v11914_v54 = vld [vmem:[#allocation2 + $0x518] sm:$0xf0]  ;;  %v13060_v59 = vpack.c.b16 %v886_v43, %v886_v43  ;;  %v10387_v61 = vor.u32 %v12301_v50, %v10384_v51  ;;  %v887_v28 = vunpack.c.h.b16 %v13052_v30 }
  0x47   :  { %4093 = vmatpush.bf16.msra.mxu2 %v9983_v10  ;;  %v8891_v48 = vor.u32 %v11939_v38, %v8890_v37  ;;  %v9690_v56 = vld [vmem:[#allocation2 + $0xbc0] sm:$0xf]  ;;  %v12139_v57 = vld [vmem:[#allocation2 + $0xc20] sm:$0xf0]  ;;  %v3988_v58 = vsel %vm3986_vm0, %v3357_v42, 0  ;;  %v9687_v60 = vor.u32 %v12126_v46, %v9684_v47  ;;  %v8791_v1 = vor.u32 %v11914_v54, %v8790_v52  ;;  %s12951_s27 = smov 32  }
  0x48   :  { %4068 = vmatpush.bf16.msra.mxu0 %v8283_v17  ;;  %v12101_v62 = vld [vmem:[#allocation2 + $0xaf4] sm:$0xf]  ;;  %v9584_v63 = vld [vmem:[#allocation2 + $0xb54] sm:$0xf0]  ;;  %v12276_v0 = vld [vmem:[#allocation2 + $0x106c] sm:$0xf]  ;;  %v9691_v5 = vor.u32 %v12139_v57, %v9690_v56 }
  0x49   :  { %4081 = vmatpush.bf16.msra.mxu1 %v9083_v21  ;;  %v10284_v2 = vld [vmem:[#allocation2 + $0x10cc] sm:$0xf0]  ;;  %v3991_v4 = vsel %vm3986_vm0, %v3358_v53, 0  ;;  %v11889_v6 = vld [vmem:[#allocation2 + $0x450] sm:$0xf0]  ;;  %v9587_v9 = vor.u32 %v12101_v62, %v9584_v63  ;;  %vm5620_vm2 = vcmask 261120  }
  0x4a   :  { %4120 = vmatpush.bf16.msra.mxu3 %v8287_v22  ;;  %v8690_v3 = vld [vmem:[#allocation2 + $0x3f0] sm:$0xf]  ;;  %v9590_v7 = vld [vmem:[#allocation2 + $0xaf8] sm:$0xf]  ;;  %v12114_v8 = vld [vmem:[#allocation2 + $0xb58] sm:$0xf0]  ;;  %v10287_v10 = vor.u32 %v12276_v0, %v10284_v2 }
  0x4b   :  { %4094 = vmatpush.bf16.msra.mxu2 %v9883_v27  ;;  %v12076_v11 = vld [vmem:[#allocation2 + $0xa2c] sm:$0xf]  ;;  %v9484_v12 = vld [vmem:[#allocation2 + $0xa8c] sm:$0xf0]  ;;  %v8691_v13 = vor.u32 %v11889_v6, %v8690_v3  ;;  %v12251_v14 = vld [vmem:[#allocation2 + $0xfa4] sm:$0xf]  ;;  %v9591_v17 = vor.u32 %v12114_v8, %v9590_v7 }
  0x4c   :  { %4069 = vmatpush.bf16.msra.mxu0 %v8183_v36  ;;  %v10184_v15 = vld [vmem:[#allocation2 + $0x1004] sm:$0xf0]  ;;  %v11864_v18 = vld [vmem:[#allocation2 + $0x388] sm:$0xf0]  ;;  %v9490_v19 = vld [vmem:[#allocation2 + $0xa30] sm:$0xf]  ;;  %v9487_v21 = vor.u32 %v12076_v11, %v9484_v12 }
  0x4d   :  { %4082 = vmatpush.bf16.msra.mxu1 %v8983_v40  ;;  %v8590_v16 = vld [vmem:[#allocation2 + $0x328] sm:$0xf]  ;;  %v12089_v20 = vld [vmem:[#allocation2 + $0xa90] sm:$0xf0]  ;;  %v10187_v22 = vor.u32 %v12251_v14, %v10184_v15  ;;  %v12051_v23 = vld [vmem:[#allocation2 + $0x964] sm:$0xf]  ;;  %v13068_v40 = vpack.c.b16 %v887_v28, %v887_v28 }
  0x4e   :  { %4121 = vmatpush.bf16.msra.mxu3 %v8187_v41  ;;  %v9384_v24 = vld [vmem:[#allocation2 + $0x9c4] sm:$0xf0]  ;;  %v8591_v25 = vor.u32 %v11864_v18, %v8590_v16  ;;  %v12226_v26 = vld [vmem:[#allocation2 + $0xedc] sm:$0xf]  ;;  %v10084_v27 = vld [vmem:[#allocation2 + $0xf3c] sm:$0xf0]  ;;  %v9491_v29 = vor.u32 %v12089_v20, %v9490_v19 }
  0x4f   :  { %4095 = vmatpush.bf16.msra.mxu2 %v9783_v44  ;;  %4070 = vmatmul.bf16.vlgmr.msra.gmra.mxu0 %v13055_v49  ;;  %v8490_v31 = vld [vmem:[#allocation2 + $0x260] sm:$0xf]  ;;  %v11839_v32 = vld [vmem:[#allocation2 + $0x2c0] sm:$0xf0]  ;;  %v9387_v33 = vor.u32 %v12051_v23, %v9384_v24  ;;  %v9390_v34 = vld [vmem:[#allocation2 + $0x968] sm:$0xf]  ;;  %v10087_v36 = vor.u32 %v12226_v26, %v10084_v27 }
  0x50   :  { %4108 = vmatpush.bf16.msrb.mxu0 %v3988_v58  ;;  %4083 = vmatmul.bf16.vlgmr.msra.gmra.mxu1 %v13057_v55  ;;  %v12064_v35 = vld [vmem:[#allocation2 + $0x9c8] sm:$0xf0]  ;;  %v12026_v37 = vld [vmem:[#allocation2 + $0x89c] sm:$0xf]  ;;  %v9284_v38 = vld [vmem:[#allocation2 + $0x8fc] sm:$0xf0]  ;;  %v8491_v39 = vor.u32 %v11839_v32, %v8490_v31 }
  0x51   :  { %4140 = vmatpush.bf16.msrb.mxu1 %v10487_v45  ;;  %4122 = vmatmul.bf16.vlgmr.msra.gmra.mxu3 %v13055_v49  ;;  %v12201_v41 = vld [vmem:[#allocation2 + $0xe14] sm:$0xf]  ;;  %v9984_v42 = vld [vmem:[#allocation2 + $0xe74] sm:$0xf0]  ;;  %v11814_v43 = vld [vmem:[#allocation2 + $0x1f8] sm:$0xf0]  ;;  %v9391_v44 = vor.u32 %v12064_v35, %v9390_v34  ;;  %v9287_v45 = vor.u32 %v12026_v37, %v9284_v38 }
  0x52   :  { %4166 = vmatpush.bf16.msrb.mxu3 %v8891_v48  ;;  %4096 = vmatmul.bf16.vlgmr.msra.gmra.mxu2 %v13060_v59  ;;  %v8390_v30 = vld [vmem:[#allocation2 + $0x198] sm:$0xf]  ;;  %v9290_v46 = vld [vmem:[#allocation2 + $0x8a0] sm:$0xf]  ;;  %v12039_v47 = vld [vmem:[#allocation2 + $0x900] sm:$0xf0]  ;;  %v9987_v50 = vor.u32 %v12201_v41, %v9984_v42 }
  0x53   :  { %4160 = vmatpush.bf16.msrb.mxu2 %v3991_v4  ;;  %v13070_v48 = vld [vmem:[#allocation2 + $0x12c8] sm:$0xff]  ;;  %v12001_v51 = vld [vmem:[#allocation2 + $0x7d4] sm:$0xf]  ;;  %v9184_v52 = vld [vmem:[#allocation2 + $0x834] sm:$0xf0]  ;;  %v8391_v53 = vor.u32 %v11814_v43, %v8390_v30  ;;  %vm5622_vm3 = vcmask 523264  }
  0x54   :  { %4127 = vmatpush.bf16.msra.mxu0 %v9687_v60  ;;  %v12176_v54 = vld [vmem:[#allocation2 + $0xd4c] sm:$0xf]  ;;  %v9884_v56 = vld [vmem:[#allocation2 + $0xdac] sm:$0xf0]  ;;  %v11789_v58 = vld [vmem:[#allocation2 + $0x130] sm:$0xf0]  ;;  %v9291_v60 = vor.u32 %v12039_v47, %v9290_v46  ;;  %v9187_v62 = vor.u32 %v12001_v51, %v9184_v52 }
  0x55   :  { %4141 = vmatpush.bf16.msrb.mxu1 %v10387_v61  ;;  %v8290_v57 = vld [vmem:[#allocation2 + $0xd0] sm:$0xf]  ;;  %v2734_v61 = vunpack.c.l.b16 %v13070_v48  ;;  %v9190_v63 = vld [vmem:[#allocation2 + $0x7d8] sm:$0xf]  ;;  %v12014_v0 = vld [vmem:[#allocation2 + $0x838] sm:$0xf0] }
  0x56   :  { %4167 = vmatpush.bf16.msrb.mxu3 %v8791_v1  ;;  %v9887_v1 = vor.u32 %v12176_v54, %v9884_v56  ;;  %v11976_v2 = vld [vmem:[#allocation2 + $0x70c] sm:$0xf]  ;;  %v9084_v3 = vld [vmem:[#allocation2 + $0x76c] sm:$0xf0]  ;;  %v8291_v4 = vor.u32 %v11789_v58, %v8290_v57  ;;  %v9784_v6 = vld [vmem:[#allocation2 + $0xce4] sm:$0xf0] }
  0x57   :  { %4179 = vmatpush.bf16.msra.mxu2 %v9691_v5  ;;  %v12151_v5 = vld [vmem:[#allocation2 + $0xc84] sm:$0xf]  ;;  %v8190_v7 = vld [vmem:[#allocation2 + $0x8] sm:$0xf]  ;;  %v11764_v8 = vld [vmem:[#allocation2 + $0x68] sm:$0xf0]  ;;  %v3359_v11 = vpack.c.b16 %v2734_v61, %v2734_v61  ;;  %v9087_v12 = vor.u32 %v11976_v2, %v9084_v3 }
  0x58   :  { %4128 = vmatpush.bf16.msra.mxu0 %v9587_v9  ;;  %v11927_v9 = vld [vmem:[#allocation2 + $0x584] sm:$0xf]  ;;  %v9090_v14 = vld [vmem:[#allocation2 + $0x710] sm:$0xf]  ;;  %v11989_v15 = vld [vmem:[#allocation2 + $0x770] sm:$0xf0]  ;;  %v9787_v16 = vor.u32 %v12151_v5, %v9784_v6  ;;  %v8191_v20 = vor.u32 %v11764_v8, %v8190_v7 }
  0x59   :  { %4142 = vmatpush.bf16.msrb.mxu1 %v10287_v10  ;;  %v9191_v10 = vor.u32 %v12014_v0, %v9190_v63  ;;  %v8984_v18 = vld [vmem:[#allocation2 + $0x6a4] sm:$0xf0]  ;;  %v10490_v19 = vld [vmem:[#allocation2 + $0x1200] sm:$0xf]  ;;  %v9091_v26 = vor.u32 %v11989_v15, %v9090_v14  ;;  %v11902_v28 = vld [vmem:[#allocation2 + $0x4bc] sm:$0xf] }
  0x5a   :  { %4168 = vmatpush.bf16.msrb.mxu3 %v8691_v13  ;;  %v8892_v13 = vld [vmem:[#allocation2 + $0x5e4] sm:$0xf0]  ;;  %v11964_v35 = vld [vmem:[#allocation2 + $0x6a8] sm:$0xf0]  ;;  %v12102_v37 = vld [vmem:[#allocation2 + $0xafc] sm:$0xf] }
  0x5b   :  { %4180 = vmatpush.bf16.msra.mxu2 %v9591_v17  ;;  %v11951_v17 = vld [vmem:[#allocation2 + $0x644] sm:$0xf]  ;;  %v9692_v23 = vld [vmem:[#allocation2 + $0xc24] sm:$0xf0]  ;;  %v8895_v24 = vor.u32 %v11927_v9, %v8892_v13  ;;  %v9592_v38 = vld [vmem:[#allocation2 + $0xb5c] sm:$0xf0] }
  0x5c   :  { %4129 = vmatpush.bf16.msra.mxu0 %v9487_v21  ;;  %v12339_v21 = vld [vmem:[#allocation2 + $0x1260] sm:$0xf0]  ;;  %v8987_v27 = vor.u32 %v11951_v17, %v8984_v18  ;;  %v8990_v34 = vld [vmem:[#allocation2 + $0x648] sm:$0xf]  ;;  %v11877_v30 = vld [vmem:[#allocation2 + $0x3f4] sm:$0xf]  ;;  %v9595_v46 = vor.u32 %v12102_v37, %v9592_v38 }
  0x5d   :  { %4143 = vmatpush.bf16.msrb.mxu1 %v10187_v22  ;;  %v12127_v22 = vld [vmem:[#allocation2 + $0xbc4] sm:$0xf]  ;;  %v10491_v31 = vor.u32 %v12339_v21, %v10490_v19  ;;  %v10492_v42 = vld [vmem:[#allocation2 + $0x1264] sm:$0xf0]  ;;  %v8692_v43 = vld [vmem:[#allocation2 + $0x454] sm:$0xf0] }
  0x5e   :  { %4169 = vmatpush.bf16.msrb.mxu3 %v8591_v25  ;;  %v3994_v25 = vsel %vm3986_vm0, %v3359_v11, 0  ;;  %v9695_v32 = vor.u32 %v12127_v22, %v9692_v23  ;;  %v12327_v41 = vld [vmem:[#allocation2 + $0x1204] sm:$0xf]  ;;  %v10290_v47 = vld [vmem:[#allocation2 + $0x1070] sm:$0xf]  ;;  %v8695_v54 = vor.u32 %v11877_v30, %v8692_v43  ;;  %vm5624_vm4 = vcmask 785408  }
  0x5f   :  { %4181 = vmatpush.bf16.msra.mxu2 %v9491_v29  ;;  %10580 = vmatmul.msk.bf16.vlgmr.msrb.gmra.mxu0 %vm3982_vm1, %v13068_v40  ;;  %v8792_v29 = vld [vmem:[#allocation2 + $0x51c] sm:$0xf0]  ;;  %v12077_v51 = vld [vmem:[#allocation2 + $0xa34] sm:$0xf]  ;;  %v9492_v52 = vld [vmem:[#allocation2 + $0xa94] sm:$0xf0] }
  0x60   :  { %4130 = vmatpush.bf16.msra.mxu0 %v9387_v33  ;;  %v10390_v33 = vld [vmem:[#allocation2 + $0x1138] sm:$0xf]  ;;  %v12302_v56 = vld [vmem:[#allocation2 + $0x113c] sm:$0xf]  ;;  %v10392_v57 = vld [vmem:[#allocation2 + $0x119c] sm:$0xf0] }
  0x61   :  { %4144 = vmatpush.bf16.msrb.mxu1 %v10087_v36  ;;  %v12314_v36 = vld [vmem:[#allocation2 + $0x1198] sm:$0xf0]  ;;  %v11852_v58 = vld [vmem:[#allocation2 + $0x32c] sm:$0xf]  ;;  %v10190_v63 = vld [vmem:[#allocation2 + $0xfa8] sm:$0xf]  ;;  %v10395_v3 = vor.u32 %v12302_v56, %v10392_v57 }
  0x62   :  { %4170 = vmatpush.bf16.msrb.mxu3 %v8491_v39  ;;  %10581 = vmatmul.msk.bf16.vlgmr.msrb.gmra.mxu2 %vm3982_vm1, %v13068_v40  ;;  %v8795_v39 = vor.u32 %v11902_v28, %v8792_v29  ;;  %v12264_v0 = vld [vmem:[#allocation2 + $0x1008] sm:$0xf0]  ;;  %v9392_v2 = vld [vmem:[#allocation2 + $0x9cc] sm:$0xf0]  ;;  %v12277_v5 = vld [vmem:[#allocation2 + $0x1074] sm:$0xf] }
  0x63   :  { %4182 = vmatpush.bf16.msra.mxu2 %v9391_v44  ;;  %v8991_v44 = vor.u32 %v11964_v35, %v8990_v34  ;;  %v10292_v6 = vld [vmem:[#allocation2 + $0x10d4] sm:$0xf0]  ;;  %v11827_v7 = vld [vmem:[#allocation2 + $0x264] sm:$0xf]  ;;  %v8492_v8 = vld [vmem:[#allocation2 + $0x2c4] sm:$0xf0]  ;;  %v10191_v9 = vor.u32 %v12264_v0, %v10190_v63 }
  0x64   :  { %4131 = vmatpush.bf16.msra.mxu0 %v9287_v45  ;;  %v10391_v45 = vor.u32 %v12314_v36, %v10390_v33  ;;  %v10090_v11 = vld [vmem:[#allocation2 + $0xee0] sm:$0xf]  ;;  %v12027_v13 = vld [vmem:[#allocation2 + $0x8a4] sm:$0xf]  ;;  %v9292_v14 = vld [vmem:[#allocation2 + $0x904] sm:$0xf0]  ;;  %v10295_v15 = vor.u32 %v12277_v5, %v10292_v6 }
  0x65   :  { %4145 = vmatpush.bf16.msrb.mxu1 %v9987_v50  ;;  %v12289_v50 = vld [vmem:[#allocation2 + $0x10d0] sm:$0xf0]  ;;  %v12252_v17 = vld [vmem:[#allocation2 + $0xfac] sm:$0xf]  ;;  %v10192_v18 = vld [vmem:[#allocation2 + $0x100c] sm:$0xf0]  ;;  %v9295_v22 = vor.u32 %v12027_v13, %v9292_v14 }
  0x66   :  { %4171 = vmatpush.bf16.msrb.mxu3 %v8391_v53  ;;  %v10495_v53 = vor.u32 %v12327_v41, %v10492_v42  ;;  %v10291_v61 = vor.u32 %v12289_v50, %v10290_v47  ;;  %v11802_v19 = vld [vmem:[#allocation2 + $0x19c] sm:$0xf]  ;;  %v9990_v23 = vld [vmem:[#allocation2 + $0xe18] sm:$0xf]  ;;  %v12227_v29 = vld [vmem:[#allocation2 + $0xee4] sm:$0xf] }
  0x67   :  { %4183 = vmatpush.bf16.msra.mxu2 %v9291_v60  ;;  %v8592_v60 = vld [vmem:[#allocation2 + $0x38c] sm:$0xf0]  ;;  %v8292_v33 = vld [vmem:[#allocation2 + $0x134] sm:$0xf0]  ;;  %v12189_v37 = vld [vmem:[#allocation2 + $0xdb0] sm:$0xf0] }
  0x68   :  { %4132 = vmatpush.bf16.msra.mxu0 %v9187_v62  ;;  %v9495_v62 = vor.u32 %v12077_v51, %v9492_v52  ;;  %v9890_v36 = vld [vmem:[#allocation2 + $0xd50] sm:$0xf]  ;;  %v11977_v38 = vld [vmem:[#allocation2 + $0x714] sm:$0xf]  ;;  %v12202_v30 = vld [vmem:[#allocation2 + $0xe1c] sm:$0xf] }
  0x69   :  { %4146 = vmatpush.bf16.msrb.mxu1 %v9887_v1  ;;  %v12052_v1 = vld [vmem:[#allocation2 + $0x96c] sm:$0xf]  ;;  %v9992_v43 = vld [vmem:[#allocation2 + $0xe7c] sm:$0xf0]  ;;  %v8898_v47 = vld [vmem:[#allocation2 + $0x588] sm:$0xf]  ;;  %v9891_v50 = vor.u32 %v12189_v37, %v9890_v36 }
  0x6a   :  { %4172 = vmatpush.bf16.msrb.mxu3 %v8291_v4  ;;  %v8595_v4 = vor.u32 %v11852_v58, %v8592_v60  ;;  %v11940_v52 = vld [vmem:[#allocation2 + $0x5e8] sm:$0xf0]  ;;  %v8992_v57 = vld [vmem:[#allocation2 + $0x6ac] sm:$0xf0]  ;;  %v9995_v58 = vor.u32 %v12202_v30, %v9992_v43  ;;  %v8798_v5 = vld [vmem:[#allocation2 + $0x4c0] sm:$0xf] }
  0x6b   :  { %4184 = vmatpush.bf16.msra.mxu2 %v9191_v10  ;;  %v9395_v10 = vor.u32 %v12052_v1, %v9392_v2  ;;  %v11952_v56 = vld [vmem:[#allocation2 + $0x64c] sm:$0xf]  ;;  %v13085_v60 = vld [vmem:[#allocation2 + $0x12d0] sm:$0xff]  ;;  %v8899_v0 = vor.u32 %v11940_v52, %v8898_v47  ;;  %v9892_v2 = vld [vmem:[#allocation2 + $0xdb4] sm:$0xf0] }
  0x6c   :  { %4133 = vmatpush.bf16.msra.mxu0 %v9087_v12  ;;  %v12239_v12 = vld [vmem:[#allocation2 + $0xf40] sm:$0xf0]  ;;  %v12177_v1 = vld [vmem:[#allocation2 + $0xd54] sm:$0xf]  ;;  %v10398_v13 = vld [vmem:[#allocation2 + $0x1140] sm:$0xf] }
  0x6d   :  { %4147 = vmatpush.bf16.msrb.mxu1 %v9787_v16  ;;  %v8495_v16 = vor.u32 %v11827_v7, %v8492_v8  ;;  %v10091_v21 = vor.u32 %v12239_v12, %v10090_v11  ;;  %v11915_v6 = vld [vmem:[#allocation2 + $0x520] sm:$0xf0]  ;;  %v2736_v7 = vunpack.c.l.b16 %v13085_v60  ;;  %v9895_v12 = vor.u32 %v12177_v1, %v9892_v2  ;;  %v9498_v37 = vld [vmem:[#allocation2 + $0xa38] sm:$0xf]  ;;  %v11840_v47 = vld [vmem:[#allocation2 + $0x2c8] sm:$0xf0] }
  0x6e   :  { %4173 = vmatpush.bf16.msrb.mxu3 %v8191_v20  ;;  %v8392_v20 = vld [vmem:[#allocation2 + $0x1fc] sm:$0xf0]  ;;  %v12315_v14 = vld [vmem:[#allocation2 + $0x11a0] sm:$0xf0]  ;;  %v12065_v52 = vld [vmem:[#allocation2 + $0x9d0] sm:$0xf0] }
  0x6f   :  { %4185 = vmatpush.bf16.msra.mxu2 %v9091_v26  ;;  %v9192_v26 = vld [vmem:[#allocation2 + $0x83c] sm:$0xf0]  ;;  %v8395_v28 = vor.u32 %v11802_v19, %v8392_v20  ;;  %v8698_v19 = vld [vmem:[#allocation2 + $0x3f8] sm:$0xf]  ;;  %v11890_v20 = vld [vmem:[#allocation2 + $0x458] sm:$0xf0] }
  0x70   :  { %4134 = vmatpush.bf16.msra.mxu0 %v8987_v27  ;;  %4148 = vmatmul.bf16.vlgmr.msrb.gmra.mxu1 %v13060_v59  ;;  %v10195_v27 = vor.u32 %v12252_v17, %v10192_v18  ;;  %v9792_v17 = vld [vmem:[#allocation2 + $0xcec] sm:$0xf0]  ;;  %v11903_v43 = vld [vmem:[#allocation2 + $0x4c4] sm:$0xf]  ;;  %v9298_v1 = vld [vmem:[#allocation2 + $0x8a8] sm:$0xf] }
  0x71   :  { %4212 = vmatpush.bf16.msra.mxu1 %v3994_v25  ;;  %4174 = vmatmul.bf16.vlgmr.msrb.gmra.mxu3 %v13055_v49  ;;  %v12002_v25 = vld [vmem:[#allocation2 + $0x7dc] sm:$0xf]  ;;  %v12040_v2 = vld [vmem:[#allocation2 + $0x908] sm:$0xf0] }
  0x72   :  { %4218 = vmatpush.bf16.msra.mxu3 %v8895_v24  ;;  %v12214_v24 = vld [vmem:[#allocation2 + $0xe78] sm:$0xf0]  ;;  %v9195_v35 = vor.u32 %v12002_v25, %v9192_v26  ;;  %v10298_v26 = vld [vmem:[#allocation2 + $0x1078] sm:$0xf] }
  0x73   :  { %4135 = vmatmul.bf16.vlgmr.msra.gmra.mxu0 %v13057_v55  ;;  %4186 = vmatpush.bf16.msra.mxu2 %v8991_v44  ;;  %v9991_v34 = vor.u32 %v12214_v24, %v9990_v23  ;;  %v2735_v44 = vunpack.c.h.b16 %v13070_v48  ;;  %v12340_v48 = vld [vmem:[#allocation2 + $0x1268] sm:$0xf0]  ;;  %v9598_v23 = vld [vmem:[#allocation2 + $0xb00] sm:$0xf]  ;;  %v12115_v24 = vld [vmem:[#allocation2 + $0xb60] sm:$0xf0] }
  0x74   :  { %4192 = vmatpush.bf16.msrb.mxu0 %v10491_v31  ;;  %v10092_v31 = vld [vmem:[#allocation2 + $0xf44] sm:$0xf0] }
  0x75   :  { %4231 = vmatpush.bf16.msrb.mxu1 %v9695_v32  ;;  %v11777_v32 = vld [vmem:[#allocation2 + $0xd4] sm:$0xf]  ;;  %v10095_v41 = vor.u32 %v12227_v29, %v10092_v31  ;;  %v3360_v63 = vpack.c.b16 %v2735_v44, %v2735_v44  ;;  %v11928_v29 = vld [vmem:[#allocation2 + $0x58c] sm:$0xf]  ;;  %v8900_v31 = vld [vmem:[#allocation2 + $0x5ec] sm:$0xf0] }
  0x76   :  { %4219 = vmatpush.bf16.msra.mxu3 %v8795_v39  ;;  %4187 = vmatmul.bf16.vlgmr.msra.gmra.mxu2 %v13057_v55  ;;  %v9092_v39 = vld [vmem:[#allocation2 + $0x774] sm:$0xf0]  ;;  %v8295_v42 = vor.u32 %v11777_v32, %v8292_v33  ;;  %v9599_v32 = vor.u32 %v12115_v24, %v9598_v23  ;;  %v8598_v33 = vld [vmem:[#allocation2 + $0x330] sm:$0xf]  ;;  %v8800_v44 = vld [vmem:[#allocation2 + $0x524] sm:$0xf0] }
  0x77   :  { %4244 = vmatpush.bf16.msrb.mxu2 %v10495_v53  ;;  %v9095_v51 = vor.u32 %v11977_v38, %v9092_v39  ;;  %v9790_v53 = vld [vmem:[#allocation2 + $0xc88] sm:$0xf]  ;;  %v3997_v11 = vsel %vm3986_vm0, %v3360_v63, 0  ;;  %v12090_v38 = vld [vmem:[#allocation2 + $0xa98] sm:$0xf0]  ;;  %v8903_v39 = vor.u32 %v11928_v29, %v8900_v31 }
  0x78   :  { %4193 = vmatpush.bf16.msrb.mxu0 %v10391_v45  ;;  %v11752_v45 = vld [vmem:[#allocation2 + $0xc] sm:$0xf]  ;;  %v11815_v63 = vld [vmem:[#allocation2 + $0x200] sm:$0xf0]  ;;  %v11765_v23 = vld [vmem:[#allocation2 + $0x70] sm:$0xf0] }
  0x79   :  { %4232 = vmatpush.bf16.msrb.mxu1 %v9595_v46  ;;  %v8192_v46 = vld [vmem:[#allocation2 + $0x6c] sm:$0xf0]  ;;  %v12128_v24 = vld [vmem:[#allocation2 + $0xbcc] sm:$0xf]  ;;  %v11990_v29 = vld [vmem:[#allocation2 + $0x778] sm:$0xf0] }
  0x7a   :  { %4220 = vmatpush.bf16.msra.mxu3 %v8695_v54  ;;  %v12164_v54 = vld [vmem:[#allocation2 + $0xce8] sm:$0xf0] }
  0x7b   :  { %4245 = vmatpush.bf16.msrb.mxu2 %v10395_v3  ;;  %v9791_v3 = vor.u32 %v12164_v54, %v9790_v53  ;;  %v8803_v53 = vor.u32 %v11903_v43, %v8800_v44  ;;  %v10098_v54 = vld [vmem:[#allocation2 + $0xee8] sm:$0xf]  ;;  %v11965_v43 = vld [vmem:[#allocation2 + $0x6b0] sm:$0xf0] }
  0x7c   :  { %4194 = vmatpush.bf16.msrb.mxu0 %v10291_v61  ;;  %v8195_v61 = vor.u32 %v11752_v45, %v8192_v46  ;;  %v9499_v45 = vor.u32 %v12090_v38, %v9498_v37  ;;  %v8498_v46 = vld [vmem:[#allocation2 + $0x268] sm:$0xf] }
  0x7d   :  { %4233 = vmatpush.bf16.msrb.mxu1 %v9495_v62  ;;  %v10498_v62 = vld [vmem:[#allocation2 + $0x1208] sm:$0xf] }
  0x7e   :  { %4221 = vmatpush.bf16.msra.mxu3 %v8595_v4  ;;  %v8995_v4 = vor.u32 %v11952_v56, %v8992_v57  ;;  %v10499_v8 = vor.u32 %v12340_v48, %v10498_v62  ;;  %v12240_v56 = vld [vmem:[#allocation2 + $0xf48] sm:$0xf0]  ;;  %v8499_v57 = vor.u32 %v11840_v47, %v8498_v46  ;;  %v8398_v48 = vld [vmem:[#allocation2 + $0x1a0] sm:$0xf]  ;;  %v10500_v46 = vld [vmem:[#allocation2 + $0x126c] sm:$0xf0] }
  0x7f   :  { %4246 = vmatpush.bf16.msrb.mxu2 %v10295_v15  ;;  %v8799_v15 = vor.u32 %v11915_v6, %v8798_v5  ;;  %v12215_v5 = vld [vmem:[#allocation2 + $0xe80] sm:$0xf0]  ;;  %v8399_v6 = vor.u32 %v11815_v63, %v8398_v48  ;;  %v8906_v47 = vld [vmem:[#allocation2 + $0x590] sm:$0xf] }
  0x80   :  { %4195 = vmatpush.bf16.msrb.mxu0 %v10191_v9  ;;  %10582 = vmatmul.msk.bf16.vlgmr.msra.gmra.mxu1 %vm3982_vm1, %v13068_v40  ;;  %v9698_v9 = vld [vmem:[#allocation2 + $0xbc8] sm:$0xf]  ;;  %v12303_v63 = vld [vmem:[#allocation2 + $0x1144] sm:$0xf] }
  0x81   :  { %4234 = vmatpush.bf16.msrb.mxu1 %v9395_v10  ;;  %v12140_v10 = vld [vmem:[#allocation2 + $0xc28] sm:$0xf0] }
  0x82   :  { %4222 = vmatpush.bf16.msra.mxu3 %v8495_v16  ;;  %v12152_v16 = vld [vmem:[#allocation2 + $0xc8c] sm:$0xf]  ;;  %v9699_v18 = vor.u32 %v12140_v10, %v9698_v9  ;;  %v9299_v9 = vor.u32 %v12040_v2, %v9298_v1  ;;  %v8298_v10 = vld [vmem:[#allocation2 + $0xd8] sm:$0xf]  ;;  %v8806_v1 = vld [vmem:[#allocation2 + $0x4c8] sm:$0xf] }
  0x83   :  { %4247 = vmatpush.bf16.msrb.mxu2 %v10195_v27  ;;  %v9795_v25 = vor.u32 %v12152_v16, %v9792_v17  ;;  %v12290_v27 = vld [vmem:[#allocation2 + $0x10d8] sm:$0xf0]  ;;  %v9898_v16 = vld [vmem:[#allocation2 + $0xd58] sm:$0xf]  ;;  %v11916_v2 = vld [vmem:[#allocation2 + $0x528] sm:$0xf0] }
  0x84   :  { %4196 = vmatpush.bf16.msrb.mxu0 %v10091_v21  ;;  %v3361_v21 = vpack.c.b16 %v2736_v7, %v2736_v7  ;;  %v10299_v36 = vor.u32 %v12290_v27, %v10298_v26  ;;  %v11853_v7 = vld [vmem:[#allocation2 + $0x334] sm:$0xf]  ;;  %v12190_v17 = vld [vmem:[#allocation2 + $0xdb8] sm:$0xf0]  ;;  %v9700_v27 = vld [vmem:[#allocation2 + $0xc2c] sm:$0xf0] }
  0x85   :  { %4235 = vmatpush.bf16.msrb.mxu1 %v9295_v22  ;;  %v10399_v22 = vor.u32 %v12315_v14, %v10398_v13  ;;  %v9198_v13 = vld [vmem:[#allocation2 + $0x7e0] sm:$0xf]  ;;  %v12015_v14 = vld [vmem:[#allocation2 + $0x840] sm:$0xf0]  ;;  %v9899_v26 = vor.u32 %v12190_v17, %v9898_v16  ;;  %v9703_v37 = vor.u32 %v12128_v24, %v9700_v27  ;;  %v8606_v27 = vld [vmem:[#allocation2 + $0x338] sm:$0xf] }
  0x86   :  { %4223 = vmatpush.bf16.msra.mxu3 %v8395_v28  ;;  %v8699_v28 = vor.u32 %v11890_v20, %v8698_v19  ;;  %v11828_v19 = vld [vmem:[#allocation2 + $0x26c] sm:$0xf]  ;;  %v8500_v20 = vld [vmem:[#allocation2 + $0x2cc] sm:$0xf0]  ;;  %v11891_v16 = vld [vmem:[#allocation2 + $0x460] sm:$0xf0] }
  0x87   :  { %4248 = vmatpush.bf16.msrb.mxu2 %v10095_v41  ;;  %v10198_v41 = vld [vmem:[#allocation2 + $0xfb0] sm:$0xf]  ;;  %v8503_v31 = vor.u32 %v11828_v19, %v8500_v20  ;;  %v9606_v19 = vld [vmem:[#allocation2 + $0xb08] sm:$0xf]  ;;  %v12116_v20 = vld [vmem:[#allocation2 + $0xb68] sm:$0xf0] }
  0x88   :  { %4197 = vmatpush.bf16.msrb.mxu0 %v9991_v34  ;;  %v11865_v34 = vld [vmem:[#allocation2 + $0x390] sm:$0xf0] }
  0x89   :  { %4236 = vmatpush.bf16.msrb.mxu1 %v9195_v35  ;;  %v4000_v35 = vsel %vm3986_vm0, %v3361_v21, 0  ;;  %v8599_v30 = vor.u32 %v11865_v34, %v8598_v33  ;;  %v9199_v21 = vor.u32 %v12015_v14, %v9198_v13  ;;  %v12165_v33 = vld [vmem:[#allocation2 + $0xcf0] sm:$0xf0]  ;;  %v12278_v13 = vld [vmem:[#allocation2 + $0x107c] sm:$0xf] }
  0x8a   :  { %4224 = vmatpush.bf16.msra.mxu3 %v8295_v42  ;;  %v12265_v42 = vld [vmem:[#allocation2 + $0x1010] sm:$0xf0]  ;;  %v10300_v14 = vld [vmem:[#allocation2 + $0x10dc] sm:$0xf0] }
  0x8b   :  { %4249 = vmatpush.bf16.msrb.mxu2 %v9995_v58  ;;  %v11878_v58 = vld [vmem:[#allocation2 + $0x3fc] sm:$0xf] }
  0x8c   :  { %4198 = vmatpush.bf16.msrb.mxu0 %v9891_v50  ;;  %v10199_v50 = vor.u32 %v12265_v42, %v10198_v41  ;;  %v9600_v42 = vld [vmem:[#allocation2 + $0xb64] sm:$0xf0] }
  0x8d   :  { %4237 = vmatpush.bf16.msrb.mxu1 %v9095_v51  ;;  %v9398_v51 = vld [vmem:[#allocation2 + $0x970] sm:$0xf] }
  0x8e   :  { %4225 = vmatpush.bf16.msra.mxu3 %v8195_v61  ;;  %v8700_v61 = vld [vmem:[#allocation2 + $0x45c] sm:$0xf0]  ;;  %v9399_v62 = vor.u32 %v12065_v52, %v9398_v51  ;;  %v11778_v51 = vld [vmem:[#allocation2 + $0xdc] sm:$0xf] }
  0x8f   :  { %4250 = vmatpush.bf16.msrb.mxu2 %v9895_v12  ;;  %v8300_v52 = vld [vmem:[#allocation2 + $0x13c] sm:$0xf0] }
  0x90   :  { %4199 = vmatpush.bf16.msrb.mxu0 %v9791_v3  ;;  %v8703_v3 = vor.u32 %v11878_v58, %v8700_v61  ;;  %v12078_v58 = vld [vmem:[#allocation2 + $0xa3c] sm:$0xf]  ;;  %v9500_v61 = vld [vmem:[#allocation2 + $0xa9c] sm:$0xf0]  ;;  %v8303_v48 = vor.u32 %v11778_v51, %v8300_v52  ;;  %v12203_v51 = vld [vmem:[#allocation2 + $0xe24] sm:$0xf] }
  0x91   :  { %4238 = vmatpush.bf16.msrb.mxu1 %v8995_v4  ;;  %4226 = vmatmul.bf16.vlgmr.msra.gmra.mxu3 %v13055_v49  ;;  %v9998_v4 = vld [vmem:[#allocation2 + $0xe20] sm:$0xf]  ;;  %v10000_v52 = vld [vmem:[#allocation2 + $0xe84] sm:$0xf0] }
  0x92   :  { %4270 = vmatpush.bf16.msrb.mxu3 %v8899_v0  ;;  %v10099_v0 = vor.u32 %v12240_v56, %v10098_v54  ;;  %v9999_v12 = vor.u32 %v12215_v5, %v9998_v4  ;;  %v8200_v4 = vld [vmem:[#allocation2 + $0x74] sm:$0xf0]  ;;  %v9503_v5 = vor.u32 %v12078_v58, %v9500_v61  ;;  %v9306_v58 = vld [vmem:[#allocation2 + $0x8b0] sm:$0xf]  ;;  %v12041_v61 = vld [vmem:[#allocation2 + $0x910] sm:$0xf0] }
  0x93   :  { %4200 = vmatmul.bf16.vlgmr.msrb.gmra.mxu0 %v13060_v59  ;;  %4251 = vmatpush.bf16.msrb.mxu2 %v9795_v25  ;;  %v2737_v25 = vunpack.c.h.b16 %v13085_v60 }
  0x94   :  { %4264 = vmatpush.bf16.msra.mxu0 %v3997_v11  ;;  %4239 = vmatmul.bf16.vlgmr.msrb.gmra.mxu1 %v13057_v55  ;;  %v11790_v11 = vld [vmem:[#allocation2 + $0x138] sm:$0xf0] }
  0x95   :  { %4296 = vmatpush.bf16.msra.mxu1 %v10499_v8  ;;  %v8600_v8 = vld [vmem:[#allocation2 + $0x394] sm:$0xf0]  ;;  %v3362_v41 = vpack.c.b16 %v2737_v25, %v2737_v25  ;;  %v12253_v25 = vld [vmem:[#allocation2 + $0xfb4] sm:$0xf] }
  0x96   :  { %4271 = vmatpush.bf16.msrb.mxu3 %v8799_v15  ;;  %4252 = vmatmul.bf16.vlgmr.msrb.gmra.mxu2 %v13060_v59  ;;  %v8603_v15 = vor.u32 %v11853_v7, %v8600_v8  ;;  %v12141_v7 = vld [vmem:[#allocation2 + $0xc30] sm:$0xf0] }
  0x97   :  { %4316 = vmatpush.bf16.msra.mxu2 %v4000_v35  ;;  %v11803_v35 = vld [vmem:[#allocation2 + $0x1a4] sm:$0xf]  ;;  %v4003_v56 = vsel %vm3986_vm0, %v3362_v41, 0  ;;  %v8506_v41 = vld [vmem:[#allocation2 + $0x270] sm:$0xf] }
  0x98   :  { %4283 = vmatpush.bf16.msrb.mxu0 %v9699_v18  ;;  %v8299_v18 = vor.u32 %v11790_v11, %v8298_v10  ;;  %v9400_v10 = vld [vmem:[#allocation2 + $0x9d4] sm:$0xf0]  ;;  %v8807_v11 = vor.u32 %v11916_v2, %v8806_v1  ;;  %v10506_v1 = vld [vmem:[#allocation2 + $0x1210] sm:$0xf] }
  0x99   :  { %4297 = vmatpush.bf16.msra.mxu1 %v10399_v22  ;;  %v8198_v22 = vld [vmem:[#allocation2 + $0x10] sm:$0xf] }
  0x9a   :  { %4272 = vmatpush.bf16.msrb.mxu3 %v8699_v28  ;;  %v9098_v28 = vld [vmem:[#allocation2 + $0x718] sm:$0xf]  ;;  %v8199_v34 = vor.u32 %v11765_v23, %v8198_v22  ;;  %v12028_v22 = vld [vmem:[#allocation2 + $0x8ac] sm:$0xf]  ;;  %v9300_v23 = vld [vmem:[#allocation2 + $0x90c] sm:$0xf0] }
  0x9b   :  { %4322 = vmatpush.bf16.msrb.mxu2 %v8903_v39  ;;  %v9099_v38 = vor.u32 %v11990_v29, %v9098_v28  ;;  %v12103_v39 = vld [vmem:[#allocation2 + $0xb04] sm:$0xf]  ;;  %v11866_v28 = vld [vmem:[#allocation2 + $0x398] sm:$0xf0]  ;;  %v9607_v29 = vor.u32 %v12116_v20, %v9606_v19  ;;  %v9800_v19 = vld [vmem:[#allocation2 + $0xcf4] sm:$0xf0] }
  0x9c   :  { %4284 = vmatpush.bf16.msrb.mxu0 %v9599_v32  ;;  %v9798_v32 = vld [vmem:[#allocation2 + $0xc90] sm:$0xf]  ;;  %v8206_v20 = vld [vmem:[#allocation2 + $0x18] sm:$0xf] }
  0x9d   :  { %4298 = vmatpush.bf16.msra.mxu1 %v10299_v36  ;;  %v8400_v36 = vld [vmem:[#allocation2 + $0x204] sm:$0xf0]  ;;  %v9799_v60 = vor.u32 %v12165_v33, %v9798_v32  ;;  %v9506_v32 = vld [vmem:[#allocation2 + $0xa40] sm:$0xf]  ;;  %v12091_v33 = vld [vmem:[#allocation2 + $0xaa0] sm:$0xf0] }
  0x9e   :  { %4273 = vmatpush.bf16.msrb.mxu3 %v8599_v30  ;;  %v8998_v30 = vld [vmem:[#allocation2 + $0x650] sm:$0xf]  ;;  %v8403_v44 = vor.u32 %v11803_v35, %v8400_v36  ;;  %v12003_v35 = vld [vmem:[#allocation2 + $0x7e4] sm:$0xf]  ;;  %v9200_v36 = vld [vmem:[#allocation2 + $0x844] sm:$0xf0] }
  0x9f   :  { %4323 = vmatpush.bf16.msrb.mxu2 %v8803_v53  ;;  %v9603_v53 = vor.u32 %v12103_v39, %v9600_v42  ;;  %v8999_v54 = vor.u32 %v11965_v43, %v8998_v30  ;;  %v10100_v39 = vld [vmem:[#allocation2 + $0xf4c] sm:$0xf0]  ;;  %v9507_v42 = vor.u32 %v12091_v33, %v9506_v32  ;;  %v9203_v30 = vor.u32 %v12003_v35, %v9200_v36  ;;  %v9406_v43 = vld [vmem:[#allocation2 + $0x978] sm:$0xf]  ;;  %v12291_v33 = vld [vmem:[#allocation2 + $0x10e0] sm:$0xf0] }
  0xa0   :  { %4285 = vmatpush.bf16.msrb.mxu0 %v9499_v45  ;;  %v12328_v45 = vld [vmem:[#allocation2 + $0x120c] sm:$0xf]  ;;  %v8908_v35 = vld [vmem:[#allocation2 + $0x5f4] sm:$0xf0] }
  0xa1   :  { %4299 = vmatpush.bf16.msra.mxu1 %v10199_v50  ;;  %v11941_v50 = vld [vmem:[#allocation2 + $0x5f0] sm:$0xf0] }
  0xa2   :  { %4274 = vmatpush.bf16.msrb.mxu3 %v8499_v57  ;;  %v10503_v57 = vor.u32 %v12328_v45, %v10500_v46  ;;  %v11978_v46 = vld [vmem:[#allocation2 + $0x71c] sm:$0xf] }
  0xa3   :  { %4324 = vmatpush.bf16.msrb.mxu2 %v8703_v3  ;;  %10583 = vmatmul.msk.bf16.vlgmr.msra.gmra.mxu0 %vm3982_vm1, %v13068_v40  ;;  %v11753_v3 = vld [vmem:[#allocation2 + $0x14] sm:$0xf] }
  0xa4   :  { %4286 = vmatpush.bf16.msrb.mxu0 %v9399_v62  ;;  %v8907_v62 = vor.u32 %v11941_v50, %v8906_v47  ;;  %v9100_v47 = vld [vmem:[#allocation2 + $0x77c] sm:$0xf0] }
  0xa5   :  { %4300 = vmatpush.bf16.msra.mxu1 %v10099_v0  ;;  %v10400_v0 = vld [vmem:[#allocation2 + $0x11a4] sm:$0xf0] }
  0xa6   :  { %4275 = vmatpush.bf16.msrb.mxu3 %v8399_v6  ;;  %10584 = vmatmul.msk.bf16.vlgmr.msra.gmra.mxu2 %vm3982_vm1, %v13068_v40  ;;  %v9706_v6 = vld [vmem:[#allocation2 + $0xbd0] sm:$0xf]  ;;  %v10403_v8 = vor.u32 %v12303_v63, %v10400_v0  ;;  %v11953_v63 = vld [vmem:[#allocation2 + $0x654] sm:$0xf]  ;;  %v9000_v0 = vld [vmem:[#allocation2 + $0x6b4] sm:$0xf0] }
  0xa7   :  { %4325 = vmatpush.bf16.msrb.mxu2 %v8603_v15  ;;  %v8706_v15 = vld [vmem:[#allocation2 + $0x400] sm:$0xf]  ;;  %v9707_v17 = vor.u32 %v12141_v7, %v9706_v6  ;;  %v11791_v7 = vld [vmem:[#allocation2 + $0x140] sm:$0xf0] }
  0xa8   :  { %4287 = vmatpush.bf16.msrb.mxu0 %v9299_v9  ;;  %v12053_v9 = vld [vmem:[#allocation2 + $0x974] sm:$0xf]  ;;  %v8707_v24 = vor.u32 %v11891_v16, %v8706_v15  ;;  %v8306_v6 = vld [vmem:[#allocation2 + $0xe0] sm:$0xf]  ;;  %v10406_v15 = vld [vmem:[#allocation2 + $0x1148] sm:$0xf] }
  0xa9   :  { %4301 = vmatpush.bf16.msra.mxu1 %v9999_v12  ;;  %v8203_v12 = vor.u32 %v11753_v3, %v8200_v4  ;;  %v12341_v3 = vld [vmem:[#allocation2 + $0x1270] sm:$0xf0]  ;;  %v12178_v4 = vld [vmem:[#allocation2 + $0xd5c] sm:$0xf]  ;;  %v8307_v16 = vor.u32 %v11791_v7, %v8306_v6 }
  0xaa   :  { %4276 = vmatpush.bf16.msrb.mxu3 %v8299_v18  ;;  %v9403_v18 = vor.u32 %v12053_v9, %v9400_v10  ;;  %v9003_v10 = vor.u32 %v11953_v63, %v9000_v0  ;;  %v10106_v63 = vld [vmem:[#allocation2 + $0xef0] sm:$0xf]  ;;  %v12304_v0 = vld [vmem:[#allocation2 + $0x114c] sm:$0xf] }
  0xab   :  { %4326 = vmatpush.bf16.msrb.mxu2 %v8503_v31  ;;  %v9303_v31 = vor.u32 %v12028_v22, %v9300_v23  ;;  %v12129_v23 = vld [vmem:[#allocation2 + $0xbd4] sm:$0xf] }
  0xac   :  { %4288 = vmatpush.bf16.msrb.mxu0 %v9199_v21  ;;  %v10303_v21 = vor.u32 %v12278_v13, %v10300_v14  ;;  %v10507_v13 = vor.u32 %v12341_v3, %v10506_v1  ;;  %v10408_v1 = vld [vmem:[#allocation2 + $0x11ac] sm:$0xf0]  ;;  %v12241_v3 = vld [vmem:[#allocation2 + $0xf50] sm:$0xf0] }
  0xad   :  { %4302 = vmatpush.bf16.msra.mxu1 %v9899_v26  ;;  %v10200_v26 = vld [vmem:[#allocation2 + $0x1014] sm:$0xf0] }
  0xae   :  { %4277 = vmatpush.bf16.msrb.mxu3 %v8199_v34  ;;  %v10203_v34 = vor.u32 %v12253_v25, %v10200_v26  ;;  %v9708_v25 = vld [vmem:[#allocation2 + $0xc34] sm:$0xf0]  ;;  %v9106_v26 = vld [vmem:[#allocation2 + $0x720] sm:$0xf] }
  0xaf   :  { %4327 = vmatpush.bf16.msrb.mxu2 %v8403_v44  ;;  %v12066_v44 = vld [vmem:[#allocation2 + $0x9d8] sm:$0xf0]  ;;  %v9711_v36 = vor.u32 %v12129_v23, %v9708_v25 }
  0xb0   :  { %4289 = vmatpush.bf16.msrb.mxu0 %v9099_v38  ;;  %v12228_v38 = vld [vmem:[#allocation2 + $0xeec] sm:$0xf] }
  0xb1   :  { %4303 = vmatpush.bf16.msra.mxu1 %v9799_v60  ;;  %4278 = vmatmul.bf16.vlgmr.msrb.gmra.mxu3 %v13055_v49  ;;  %v11841_v60 = vld [vmem:[#allocation2 + $0x2d0] sm:$0xf0]  ;;  %v10103_v45 = vor.u32 %v12228_v38, %v10100_v39  ;;  %v12104_v39 = vld [vmem:[#allocation2 + $0xb0c] sm:$0xf] }
  0xb2   :  { %4335 = vmatpush.bf16.msra.mxu3 %v9703_v37  ;;  %v8607_v37 = vor.u32 %v11866_v28, %v8606_v27  ;;  %v8507_v50 = vor.u32 %v11841_v60, %v8506_v41  ;;  %v11991_v27 = vld [vmem:[#allocation2 + $0x780] sm:$0xf0]  ;;  %v9608_v41 = vld [vmem:[#allocation2 + $0xb6c] sm:$0xf0]  ;;  %v9006_v60 = vld [vmem:[#allocation2 + $0x658] sm:$0xf] }
  0xb3   :  { %4328 = vmatpush.bf16.msrb.mxu2 %v8303_v48  ;;  %v10003_v48 = vor.u32 %v12203_v51, %v10000_v52  ;;  %v9107_v38 = vor.u32 %v11991_v27, %v9106_v26  ;;  %v8808_v51 = vld [vmem:[#allocation2 + $0x52c] sm:$0xf0]  ;;  %v9611_v52 = vor.u32 %v12104_v39, %v9608_v41  ;;  %v9906_v27 = vld [vmem:[#allocation2 + $0xd60] sm:$0xf]  ;;  %v12004_v39 = vld [vmem:[#allocation2 + $0x7ec] sm:$0xf] }
  0xb4   :  { %4290 = vmatpush.bf16.msrb.mxu0 %v8999_v54  ;;  %4304 = vmatmul.bf16.vlgmr.msra.gmra.mxu1 %v13060_v59  ;;  %v11816_v54 = vld [vmem:[#allocation2 + $0x208] sm:$0xf0]  ;;  %v9208_v41 = vld [vmem:[#allocation2 + $0x84c] sm:$0xf0] }
  0xb5   :  { %4368 = vmatpush.bf16.msrb.mxu1 %v4003_v56  ;;  %v9407_v56 = vor.u32 %v12066_v44, %v9406_v43  ;;  %v10206_v44 = vld [vmem:[#allocation2 + $0xfb8] sm:$0xf] }
  0xb6   :  { %4336 = vmatpush.bf16.msra.mxu3 %v9603_v53  ;;  %v8406_v53 = vld [vmem:[#allocation2 + $0x1a8] sm:$0xf] }
  0xb7   :  { %4291 = vmatmul.bf16.vlgmr.msrb.gmra.mxu0 %v13057_v55  ;;  %4329 = vmatpush.bf16.msrb.mxu2 %v8203_v12  ;;  %v8407_v2 = vor.u32 %v11816_v54, %v8406_v53  ;;  %v12016_v12 = vld [vmem:[#allocation2 + $0x848] sm:$0xf0]  ;;  %v13112_v54 = vld [vmem:[#allocation4] sm:$0xff] }
  0xb8   :  { %4348 = vmatpush.bf16.msra.mxu0 %v10503_v57  ;;  %v9103_v57 = vor.u32 %v11978_v46, %v9100_v47  ;;  %v10508_v46 = vld [vmem:[#allocation2 + $0x1274] sm:$0xf0]  ;;  %v12266_v47 = vld [vmem:[#allocation2 + $0x1018] sm:$0xf0] }
  0xb9   :  { %4374 = vmatpush.bf16.msra.mxu1 %v8907_v62  ;;  %v13104_v62 = vld [vmem:[#allocation2 + $0x12d8] sm:$0xff] }
  0xba   :  { %4337 = vmatpush.bf16.msra.mxu3 %v9503_v5  ;;  %4330 = vmatmul.bf16.vlgmr.msrb.gmra.mxu2 %v13055_v49  ;;  %v9900_v5 = vld [vmem:[#allocation2 + $0xdbc] sm:$0xf0]  ;;  %v2738_v9 = vunpack.c.l.b16 %v13104_v62 }
  0xbb   :  { %4387 = vmatpush.bf16.msra.mxu2 %v9707_v17  ;;  %v9903_v14 = vor.u32 %v12178_v4, %v9900_v5  ;;  %v12316_v17 = vld [vmem:[#allocation2 + $0x11a8] sm:$0xf0]  ;;  %v11879_v4 = vld [vmem:[#allocation2 + $0x404] sm:$0xf]  ;;  %v8708_v5 = vld [vmem:[#allocation2 + $0x464] sm:$0xf0] }
  0xbc   :  { %4349 = vmatpush.bf16.msra.mxu0 %v10403_v8  ;;  %v9307_v8 = vor.u32 %v12041_v61, %v9306_v58  ;;  %v10407_v28 = vor.u32 %v12316_v17, %v10406_v15  ;;  %v10207_v61 = vor.u32 %v12266_v47, %v10206_v44  ;;  %v12279_v15 = vld [vmem:[#allocation2 + $0x1084] sm:$0xf]  ;;  %v12216_v17 = vld [vmem:[#allocation2 + $0xe88] sm:$0xf0]  ;;  %v9806_v44 = vld [vmem:[#allocation2 + $0xc98] sm:$0xf] }
  0xbd   :  { %4375 = vmatpush.bf16.msra.mxu1 %v8807_v11  ;;  %v9206_v11 = vld [vmem:[#allocation2 + $0x7e8] sm:$0xf] }
  0xbe   :  { %4338 = vmatpush.bf16.msra.mxu3 %v9403_v18  ;;  %v12153_v18 = vld [vmem:[#allocation2 + $0xc94] sm:$0xf]  ;;  %v9207_v22 = vor.u32 %v12016_v12, %v9206_v11  ;;  %v10411_v11 = vor.u32 %v12304_v0, %v10408_v1  ;;  %v10107_v12 = vor.u32 %v12241_v3, %v10106_v63  ;;  %v8914_v0 = vld [vmem:[#allocation2 + $0x598] sm:$0xf]  ;;  %v12204_v1 = vld [vmem:[#allocation2 + $0xe2c] sm:$0xf] }
  0xbf   :  { %4388 = vmatpush.bf16.msra.mxu2 %v9607_v29  ;;  %v9803_v29 = vor.u32 %v12153_v18, %v9800_v19  ;;  %v11854_v18 = vld [vmem:[#allocation2 + $0x33c] sm:$0xf]  ;;  %v8608_v19 = vld [vmem:[#allocation2 + $0x39c] sm:$0xf0] }
  0xc0   :  { %4350 = vmatpush.bf16.msra.mxu0 %v10303_v21  ;;  %v11766_v21 = vld [vmem:[#allocation2 + $0x78] sm:$0xf0]  ;;  %v8611_v26 = vor.u32 %v11854_v18, %v8608_v19  ;;  %v8814_v19 = vld [vmem:[#allocation2 + $0x4d0] sm:$0xf] }
  0xc1   :  { %4376 = vmatpush.bf16.msra.mxu1 %v8707_v24  ;;  %v3363_v24 = vpack.c.b16 %v2738_v9, %v2738_v9  ;;  %v8207_v32 = vor.u32 %v11766_v21, %v8206_v20  ;;  %v12054_v9 = vld [vmem:[#allocation2 + $0x97c] sm:$0xf]  ;;  %v12029_v21 = vld [vmem:[#allocation2 + $0x8b4] sm:$0xf] }
  0xc2   :  { %4339 = vmatpush.bf16.msra.mxu3 %v9303_v31  ;;  %v10306_v31 = vld [vmem:[#allocation2 + $0x1080] sm:$0xf] }
  0xc3   :  { %4389 = vmatpush.bf16.msra.mxu2 %v9507_v42  ;;  %v11966_v42 = vld [vmem:[#allocation2 + $0x6b8] sm:$0xf0] }
  0xc4   :  { %4351 = vmatpush.bf16.msra.mxu0 %v10203_v34  ;;  %10585 = vmatmul.msk.bf16.vlgmr.msrb.gmra.mxu1 %vm3982_vm1, %v13068_v40  ;;  %v11929_v34 = vld [vmem:[#allocation2 + $0x594] sm:$0xf]  ;;  %v9007_v53 = vor.u32 %v11966_v42, %v9006_v60 }
  0xc5   :  { %4377 = vmatpush.bf16.msra.mxu1 %v8607_v37  ;;  %v4006_v37 = vsel %vm3986_vm0, %v3363_v24, 0  ;;  %v8911_v43 = vor.u32 %v11929_v34, %v8908_v35  ;;  %v11829_v34 = vld [vmem:[#allocation2 + $0x274] sm:$0xf]  ;;  %v8508_v35 = vld [vmem:[#allocation2 + $0x2d4] sm:$0xf0] }
  0xc6   :  { %4340 = vmatpush.bf16.msra.mxu3 %v9203_v30  ;;  %v10307_v30 = vor.u32 %v12291_v33, %v10306_v31  ;;  %v12191_v33 = vld [vmem:[#allocation2 + $0xdc0] sm:$0xf0] }
  0xc7   :  { %4390 = vmatpush.bf16.msra.mxu2 %v9407_v56  ;;  %v12079_v56 = vld [vmem:[#allocation2 + $0xa44] sm:$0xf] }
  0xc8   :  { %4352 = vmatpush.bf16.msra.mxu0 %v10103_v45  ;;  %v12329_v45 = vld [vmem:[#allocation2 + $0x1214] sm:$0xf] }
  0xc9   :  { %4378 = vmatpush.bf16.msra.mxu1 %v8507_v50  ;;  %v11904_v50 = vld [vmem:[#allocation2 + $0x4cc] sm:$0xf]  ;;  %v10511_v58 = vor.u32 %v12329_v45, %v10508_v46  ;;  %v12229_v45 = vld [vmem:[#allocation2 + $0xef4] sm:$0xf]  ;;  %v10108_v46 = vld [vmem:[#allocation2 + $0xf54] sm:$0xf0] }
  0xca   :  { %4341 = vmatpush.bf16.msra.mxu3 %v9103_v57  ;;  %v9508_v57 = vld [vmem:[#allocation2 + $0xaa4] sm:$0xf0] }
  0xcb   :  { %4391 = vmatpush.bf16.msra.mxu2 %v9307_v8  ;;  %v9511_v6 = vor.u32 %v12079_v56, %v9508_v57  ;;  %v832_v8 = vperm.slane %v13112_v54, 0  ;;  %v11979_v56 = vld [vmem:[#allocation2 + $0x724] sm:$0xf]  ;;  %v9108_v57 = vld [vmem:[#allocation2 + $0x784] sm:$0xf0] }
  0xcc   :  { %4353 = vmatpush.bf16.msra.mxu0 %v10003_v48  ;;  %v8811_v48 = vor.u32 %v11904_v50, %v8808_v51  ;;  %v12166_v50 = vld [vmem:[#allocation2 + $0xcf8] sm:$0xf0]  ;;  %v11804_v51 = vld [vmem:[#allocation2 + $0x1ac] sm:$0xf] }
  0xcd   :  { %4379 = vmatpush.bf16.msra.mxu1 %v8407_v2  ;;  %v4071_v2 = vpop.f32.mrf.mxu0  ;;  %v4084_v7 = vpop.f32.mrf.mxu1 }
  0xce   :  { %4342 = vmatpush.bf16.msra.mxu3 %v9003_v10  ;;  %v9408_v10 = vld [vmem:[#allocation2 + $0x9dc] sm:$0xf0]  ;;  %v4072_v24 = vadd.f32 %v4071_v2, %v832_v8  ;;  %v10008_v2 = vld [vmem:[#allocation2 + $0xe8c] sm:$0xf0] }
  0xcf   :  { %4392 = vmatpush.bf16.msra.mxu2 %v9207_v22  ;;  %v9411_v20 = vor.u32 %v12054_v9, %v9408_v10  ;;  %v9308_v22 = vld [vmem:[#allocation2 + $0x914] sm:$0xf0]  ;;  %v9111_v9 = vor.u32 %v11979_v56, %v9108_v57  ;;  %v11930_v56 = vld [vmem:[#allocation2 + $0x59c] sm:$0xf]  ;;  %v8916_v57 = vld [vmem:[#allocation2 + $0x5fc] sm:$0xf0] }
  0xd0   :  { %4354 = vmatpush.bf16.msra.mxu0 %v9903_v14  ;;  %v10006_v14 = vld [vmem:[#allocation2 + $0xe28] sm:$0xf]  ;;  %v4085_v42 = vadd.f32 %v4084_v7, %v4072_v24  ;;  %v11754_v24 = vld [vmem:[#allocation2 + $0x1c] sm:$0xf] }
  0xd1   :  { %4380 = vmatpush.bf16.msra.mxu1 %v8307_v16  ;;  %4343 = vmatmul.bf16.vlgmr.msra.gmra.mxu3 %v13057_v55  ;;  %v10308_v16 = vld [vmem:[#allocation2 + $0x10e4] sm:$0xf0]  ;;  %v10007_v25 = vor.u32 %v12216_v17, %v10006_v14  ;;  %v10011_v14 = vor.u32 %v12204_v1, %v10008_v2  ;;  %v12092_v1 = vld [vmem:[#allocation2 + $0xaa8] sm:$0xf0] }
  0xd2   :  { %4400 = vmatpush.bf16.msrb.mxu3 %v10507_v13  ;;  %v8711_v13 = vor.u32 %v11879_v4, %v8708_v5  ;;  %v10311_v23 = vor.u32 %v12279_v15, %v10308_v16  ;;  %v11942_v4 = vld [vmem:[#allocation2 + $0x5f8] sm:$0xf0]  ;;  %v11779_v5 = vld [vmem:[#allocation2 + $0xe4] sm:$0xf]  ;;  %v10514_v15 = vld [vmem:[#allocation2 + $0x1218] sm:$0xf] }
  0xd3   :  { %4393 = vmatpush.bf16.msra.mxu2 %v9107_v38  ;;  %v12342_v16 = vld [vmem:[#allocation2 + $0x1278] sm:$0xf0]  ;;  %v8915_v17 = vor.u32 %v11942_v4, %v8914_v0  ;;  %v9514_v0 = vld [vmem:[#allocation2 + $0xa48] sm:$0xf] }
  0xd4   :  { %4355 = vmatpush.bf16.msra.mxu0 %v9803_v29  ;;  %v10208_v29 = vld [vmem:[#allocation2 + $0x101c] sm:$0xf0]  ;;  %v13118_v47 = vpop.f32.mrf.mxu3 }
  0xd5   :  { %4381 = vmatpush.bf16.msra.mxu1 %v8207_v32  ;;  %v4097_v31 = vpop.f32.mrf.mxu2  ;;  %v4073_v32 = vpop.f32.mrf.mxu0 }
  0xd6   :  { %4401 = vmatpush.bf16.msrb.mxu3 %v10407_v28  ;;  %v12254_v28 = vld [vmem:[#allocation2 + $0xfbc] sm:$0xf]  ;;  %v4086_v38 = vpop.f32.mrf.mxu1 }
  0xd7   :  { %4356 = vmatmul.bf16.vlgmr.msra.gmra.mxu0 %v13060_v59  ;;  %4394 = vmatpush.bf16.msra.mxu2 %v9007_v53  ;;  %v10211_v60 = vor.u32 %v12254_v28, %v10208_v29  ;;  %v9714_v28 = vld [vmem:[#allocation2 + $0xbd8] sm:$0xf]  ;;  %v12142_v29 = vld [vmem:[#allocation2 + $0xc38] sm:$0xf0]  ;;  %v9808_v38 = vld [vmem:[#allocation2 + $0xcfc] sm:$0xf0] }
  0xd8   :  { %4420 = vmatpush.bf16.msrb.mxu0 %v4006_v37  ;;  %4382 = vmatmul.bf16.vlgmr.msra.gmra.mxu1 %v13055_v49  ;;  %v2739_v37 = vunpack.c.h.b16 %v13104_v62  ;;  %v9211_v62 = vor.u32 %v12004_v39, %v9208_v41  ;;  %v9715_v41 = vor.u32 %v12142_v29, %v9714_v28  ;;  %v11817_v28 = vld [vmem:[#allocation2 + $0x210] sm:$0xf0]  ;;  %v11880_v29 = vld [vmem:[#allocation2 + $0x40c] sm:$0xf] }
  0xd9   :  { %4439 = vmatpush.bf16.msrb.mxu1 %v9711_v36  ;;  %v9311_v36 = vor.u32 %v12029_v21, %v9308_v22  ;;  %v9908_v21 = vld [vmem:[#allocation2 + $0xdc4] sm:$0xf0] }
  0xda   :  { %4402 = vmatpush.bf16.msrb.mxu3 %v10307_v30  ;;  %4395 = vmatmul.bf16.vlgmr.msra.gmra.mxu2 %v13057_v55  ;;  %v9907_v30 = vor.u32 %v12191_v33, %v9906_v27  ;;  %v3364_v53 = vpack.c.b16 %v2739_v37, %v2739_v37  ;;  %v10414_v33 = vld [vmem:[#allocation2 + $0x1150] sm:$0xf]  ;;  %v12154_v37 = vld [vmem:[#allocation2 + $0xc9c] sm:$0xf] }
  0xdb   :  { %4452 = vmatpush.bf16.msrb.mxu2 %v10511_v58  ;;  %v10111_v58 = vor.u32 %v12229_v45, %v10108_v46  ;;  %v12117_v45 = vld [vmem:[#allocation2 + $0xb70] sm:$0xf0]  ;;  %v833_v46 = vperm.slane %v13112_v54, 1 }
  0xdc   :  { %4426 = vmatpush.bf16.msra.mxu0 %v8911_v43  ;;  %v8511_v43 = vor.u32 %v11829_v34, %v8508_v35  ;;  %v4009_v10 = vsel %vm3986_vm0, %v3364_v53, 0  ;;  %v4125_v22 = vpop.f32.mrf.mxu3  ;;  %v12292_v53 = vld [vmem:[#allocation2 + $0x10e8] sm:$0xf0] }
  0xdd   :  { %4440 = vmatpush.bf16.msrb.mxu1 %v9611_v52  ;;  %v8408_v52 = vld [vmem:[#allocation2 + $0x20c] sm:$0xf0]  ;;  %v4110_v3 = vpop.f32.mrf.mxu0  ;;  %v4099_v7 = vpop.f32.mrf.mxu2  ;;  %v4124_v2 = vadd.f32 %v13118_v47, %v833_v46  ;;  %v9414_v47 = vld [vmem:[#allocation2 + $0x980] sm:$0xf] }
  0xde   :  { %4403 = vmatpush.bf16.msrb.mxu3 %v10207_v61  ;;  %v4098_v61 = vadd.f32 %v4097_v31, %v4085_v42  ;;  %v8411_v63 = vor.u32 %v11804_v51, %v8408_v52  ;;  %v10515_v31 = vor.u32 %v12342_v16, %v10514_v15  ;;  %v11892_v42 = vld [vmem:[#allocation2 + $0x468] sm:$0xf0]  ;;  %v9811_v51 = vor.u32 %v12154_v37, %v9808_v38  ;;  %v10314_v52 = vld [vmem:[#allocation2 + $0x1088] sm:$0xf]  ;;  %v10214_v7 = vld [vmem:[#allocation2 + $0xfc0] sm:$0xf] }
  0xdf   :  { %4453 = vmatpush.bf16.msrb.mxu2 %v10411_v11  ;;  %v11954_v11 = vld [vmem:[#allocation2 + $0x65c] sm:$0xf]  ;;  %v10315_v4 = vor.u32 %v12292_v53, %v10314_v52  ;;  %v8816_v15 = vld [vmem:[#allocation2 + $0x534] sm:$0xf0]  ;;  %v9214_v46 = vld [vmem:[#allocation2 + $0x7f0] sm:$0xf] }
  0xe0   :  { %4427 = vmatpush.bf16.msra.mxu0 %v8811_v48  ;;  %v9807_v48 = vor.u32 %v12166_v50, %v9806_v44  ;;  %v13122_v8 = vadd.f32 %v4110_v3, %v4098_v61  ;;  %v9614_v44 = vld [vmem:[#allocation2 + $0xb10] sm:$0xf]  ;;  %v8614_v61 = vld [vmem:[#allocation2 + $0x340] sm:$0xf] }
  0xe1   :  { %4441 = vmatpush.bf16.msrb.mxu1 %v9511_v6  ;;  %v8308_v6 = vld [vmem:[#allocation2 + $0x144] sm:$0xf0] }
  0xe2   :  { %4404 = vmatpush.bf16.msrb.mxu3 %v10107_v12  ;;  %v13125_v12 = vld [vmem:[#allocation2 + $0x12e0] sm:$0xff]  ;;  %v8311_v18 = vor.u32 %v11779_v5, %v8308_v6  ;;  %5363 = vrot.lane.b32.xlu1 %v13122_v8, %s12950_s0  ;;  %v8919_v5 = vor.u32 %v11930_v56, %v8916_v57  ;;  %v12192_v57 = vld [vmem:[#allocation2 + $0xdc8] sm:$0xf0] }
  0xe3   :  { %4454 = vmatpush.bf16.msrb.mxu2 %v10311_v23  ;;  %v11917_v23 = vld [vmem:[#allocation2 + $0x530] sm:$0xf0] }
  0xe4   :  { %4428 = vmatpush.bf16.msra.mxu0 %v8711_v13  ;;  %v9008_v13 = vld [vmem:[#allocation2 + $0x6bc] sm:$0xf0]  ;;  %v8815_v34 = vor.u32 %v11917_v23, %v8814_v19  ;;  %v10114_v23 = vld [vmem:[#allocation2 + $0xef8] sm:$0xf] }
  0xe5   :  { %4442 = vmatpush.bf16.msrb.mxu1 %v9411_v20  ;;  %v12179_v20 = vld [vmem:[#allocation2 + $0xd64] sm:$0xf]  ;;  %v9011_v27 = vor.u32 %v11954_v11, %v9008_v13  ;;  %v4112_v39 = vpop.f32.mrf.mxu0  ;;  %v9515_v11 = vor.u32 %v12092_v1, %v9514_v0  ;;  %v11842_v13 = vld [vmem:[#allocation2 + $0x2d8] sm:$0xf0] }
  0xe6   :  { %4405 = vmatpush.bf16.msrb.mxu3 %v10007_v25  ;;  %v8208_v25 = vld [vmem:[#allocation2 + $0x7c] sm:$0xf0]  ;;  %v9911_v32 = vor.u32 %v12179_v20, %v9908_v21  ;;  %v12130_v0 = vld [vmem:[#allocation2 + $0xbdc] sm:$0xf] }
  0xe7   :  { %4455 = vmatpush.bf16.msrb.mxu2 %v10211_v60  ;;  %10586 = vmatmul.msk.bf16.vlgmr.msrb.gmra.mxu0 %vm3982_vm1, %v13068_v40  ;;  %v8211_v35 = vor.u32 %v11754_v24, %v8208_v25  ;;  %v8714_v60 = vld [vmem:[#allocation2 + $0x408] sm:$0xf]  ;;  %v12242_v24 = vld [vmem:[#allocation2 + $0xf58] sm:$0xf0]  ;;  %v8414_v25 = vld [vmem:[#allocation2 + $0x1b0] sm:$0xf] }
  0xe8   :  { %4429 = vmatpush.bf16.msra.mxu0 %v8611_v26  ;;  %v2740_v26 = vunpack.c.l.b16 %v13125_v12  ;;  %v8415_v38 = vor.u32 %v11817_v28, %v8414_v25  ;;  %v11830_v1 = vld [vmem:[#allocation2 + $0x27c] sm:$0xf]  ;;  %v10516_v25 = vld [vmem:[#allocation2 + $0x127c] sm:$0xf0] }
  0xe9   :  { %4443 = vmatpush.bf16.msrb.mxu1 %v9311_v36  ;;  %v12317_v36 = vld [vmem:[#allocation2 + $0x11b0] sm:$0xf0]  ;;  %v8922_v28 = vld [vmem:[#allocation2 + $0x5a0] sm:$0xf] }
  0xea   :  { %4406 = vmatpush.bf16.msrb.mxu3 %v9907_v30  ;;  %v3365_v30 = vpack.c.b16 %v2740_v26, %v2740_v26  ;;  %v10415_v50 = vor.u32 %v12317_v36, %v10414_v33  ;;  %v12042_v33 = vld [vmem:[#allocation2 + $0x918] sm:$0xf0]  ;;  %v10115_v36 = vor.u32 %v12242_v24, %v10114_v23 }
  0xeb   :  { %4456 = vmatpush.bf16.msrb.mxu2 %v10111_v58  ;;  %v9615_v58 = vor.u32 %v12117_v45, %v9614_v44  ;;  %v11855_v44 = vld [vmem:[#allocation2 + $0x344] sm:$0xf]  ;;  %v8616_v45 = vld [vmem:[#allocation2 + $0x3a4] sm:$0xf0]  ;;  %v12330_v24 = vld [vmem:[#allocation2 + $0x121c] sm:$0xf] }
  0xec   :  { %4430 = vmatpush.bf16.msra.mxu0 %v8511_v43  ;;  %v13131_v43 = vpop.f32.mrf.mxu2  ;;  %v8619_v56 = vor.u32 %v11855_v44, %v8616_v45 }
  0xed   :  { %4444 = vmatpush.bf16.msrb.mxu1 %v9211_v62  ;;  %v8715_v62 = vor.u32 %v11892_v42, %v8714_v60  ;;  %v4149_v3 = vpop.f32.mrf.mxu1  ;;  %v12217_v60 = vld [vmem:[#allocation2 + $0xe90] sm:$0xf0]  ;;  %v8314_v42 = vld [vmem:[#allocation2 + $0xe8] sm:$0xf] }
  0xee   :  { %4407 = vmatpush.bf16.msrb.mxu3 %v9807_v48  ;;  %v11867_v48 = vld [vmem:[#allocation2 + $0x3a0] sm:$0xf0] }
  0xef   :  { %4457 = vmatpush.bf16.msrb.mxu2 %v10011_v14  ;;  %v8615_v6 = vor.u32 %v11867_v48, %v8614_v61  ;;  %v11905_v14 = vld [vmem:[#allocation2 + $0x4d4] sm:$0xf]  ;;  %v11767_v61 = vld [vmem:[#allocation2 + $0x80] sm:$0xf0] }
  0xf0   :  { %4431 = vmatpush.bf16.msra.mxu0 %v8411_v63  ;;  %v4012_v63 = vsel %vm3986_vm0, %v3365_v30, 0  ;;  %v8819_v22 = vor.u32 %v11905_v14, %v8816_v15  ;;  %v9814_v14 = vld [vmem:[#allocation2 + $0xca0] sm:$0xf]  ;;  %v12167_v15 = vld [vmem:[#allocation2 + $0xd00] sm:$0xf0] }
  0xf1   :  { %4445 = vmatpush.bf16.msrb.mxu1 %v9111_v9  ;;  %4408 = vmatmul.bf16.vlgmr.msrb.gmra.mxu3 %v13060_v59  ;;  %v12267_v9 = vld [vmem:[#allocation2 + $0x1020] sm:$0xf0]  ;;  %v9815_v23 = vor.u32 %v12167_v15, %v9814_v14  ;;  %v9622_v14 = vld [vmem:[#allocation2 + $0xb18] sm:$0xf]  ;;  %v12118_v15 = vld [vmem:[#allocation2 + $0xb78] sm:$0xf0] }
  0xf2   :  { %4472 = vmatpush.bf16.msra.mxu3 %v4009_v10  ;;  %v8514_v10 = vld [vmem:[#allocation2 + $0x278] sm:$0xf]  ;;  %v10215_v20 = vor.u32 %v12267_v9, %v10214_v7 }
  0xf3   :  { %4458 = vmatpush.bf16.msrb.mxu2 %v9911_v32  ;;  %v8515_v21 = vor.u32 %v11842_v13, %v8514_v10  ;;  %v9314_v32 = vld [vmem:[#allocation2 + $0x8b8] sm:$0xf] }
  0xf4   :  { %4432 = vmatpush.bf16.msra.mxu0 %v8311_v18  ;;  %v4164_v16 = vpop.f32.mrf.mxu2  ;;  %v12067_v18 = vld [vmem:[#allocation2 + $0x9e0] sm:$0xf0]  ;;  %v13144_v37 = vpop.f32.mrf.mxu3  ;;  %v9315_v30 = vor.u32 %v12042_v33, %v9314_v32 }
  0xf5   :  { %4446 = vmatpush.bf16.msrb.mxu1 %v9011_v27  ;;  %v9415_v27 = vor.u32 %v12067_v18, %v9414_v47  ;;  %v12105_v47 = vld [vmem:[#allocation2 + $0xb14] sm:$0xf] }
  0xf6   :  { %4478 = vmatpush.bf16.msrb.mxu3 %v8915_v17  ;;  %v4136_v17 = vpop.f32.mrf.mxu0  ;;  %v11805_v18 = vld [vmem:[#allocation2 + $0x1b4] sm:$0xf] }
  0xf7   :  { %4459 = vmatpush.bf16.msrb.mxu2 %v9811_v51  ;;  %v4137_v19 = vadd.f32 %v4136_v17, %v4124_v2  ;;  %v8516_v2 = vld [vmem:[#allocation2 + $0x2dc] sm:$0xf0] }
  0xf8   :  { %4433 = vmatpush.bf16.msra.mxu0 %v8211_v35  ;;  %4447 = vmatmul.bf16.vlgmr.msrb.gmra.mxu1 %v13057_v55  ;;  %v4151_v35 = vpop.f32.mrf.mxu1  ;;  %v8519_v13 = vor.u32 %v11830_v1, %v8516_v2  ;;  %v10316_v1 = vld [vmem:[#allocation2 + $0x10ec] sm:$0xf0] }
  0xf9   :  { %4504 = vmatpush.bf16.msra.mxu1 %v10515_v31  ;;  %v4150_v26 = vadd.f32 %v4149_v3, %v4137_v19  ;;  %v8716_v31 = vld [vmem:[#allocation2 + $0x46c] sm:$0xf0]  ;;  %v2741_v3 = vunpack.c.h.b16 %v13125_v12  ;;  %v8416_v12 = vld [vmem:[#allocation2 + $0x214] sm:$0xf0] }
  0xfa   :  { %4479 = vmatpush.bf16.msrb.mxu3 %v8815_v34  ;;  %4460 = vmatmul.bf16.vlgmr.msrb.gmra.mxu2 %v13060_v59  ;;  %v8719_v39 = vor.u32 %v11880_v29, %v8716_v31  ;;  %v11943_v29 = vld [vmem:[#allocation2 + $0x600] sm:$0xf0] }
  0xfb   :  { %4524 = vmatpush.bf16.msra.mxu2 %v4012_v63  ;;  %4434 = vmatmul.bf16.vlgmr.msra.gmra.mxu0 %v13055_v49  ;;  %v13140_v34 = vadd.f32 %v13131_v43, %v4150_v26  ;;  %v11792_v43 = vld [vmem:[#allocation2 + $0x148] sm:$0xf0]  ;;  %v3366_v19 = vpack.c.b16 %v2741_v3, %v2741_v3  ;;  %v834_v26 = vperm.slane %v13112_v54, 2 }
  0xfc   :  { %4491 = vmatpush.bf16.msrb.mxu0 %v9715_v41  ;;  %v10014_v41 = vld [vmem:[#allocation2 + $0xe30] sm:$0xf]  ;;  %v8315_v53 = vor.u32 %v11792_v43, %v8314_v42  ;;  %v13148_v48 = vpop.f32.mrf.mxu2  ;;  %v4177_v10 = vpop.f32.mrf.mxu3  ;;  %v8923_v42 = vor.u32 %v11943_v29, %v8922_v28  ;;  %v10416_v43 = vld [vmem:[#allocation2 + $0x11b4] sm:$0xf0]  ;;  %v12093_v29 = vld [vmem:[#allocation2 + $0xab0] sm:$0xf0] }
  0xfd   :  { %4505 = vmatpush.bf16.msra.mxu1 %v10415_v50  ;;  %5388 = vrot.lane.b32.xlu0 %v13140_v34, %s12950_s0  ;;  %v12017_v50 = vld [vmem:[#allocation2 + $0x850] sm:$0xf0]  ;;  %v10015_v52 = vor.u32 %v12217_v60, %v10014_v41  ;;  %v4015_v35 = vsel %vm3986_vm0, %v3366_v19, 0  ;;  %v12080_v41 = vld [vmem:[#allocation2 + $0xa4c] sm:$0xf]  ;;  %v4176_v45 = vadd.f32 %v13144_v37, %v834_v26 }
  0xfe   :  { %4480 = vmatpush.bf16.msrb.mxu3 %v8715_v62  ;;  %v4138_v51 = vpop.f32.mrf.mxu0  ;;  %v9914_v62 = vld [vmem:[#allocation2 + $0xd68] sm:$0xf]  ;;  %v9215_v63 = vor.u32 %v12017_v50, %v9214_v46  ;;  %v9516_v60 = vld [vmem:[#allocation2 + $0xaac] sm:$0xf0]  ;;  %v8822_v50 = vld [vmem:[#allocation2 + $0x4d8] sm:$0xf] }
  0xff   :  { %4530 = vmatpush.bf16.msrb.mxu2 %v8919_v5  ;;  %v9114_v5 = vld [vmem:[#allocation2 + $0x728] sm:$0xf]  ;;  %v9915_v7 = vor.u32 %v12192_v57, %v9914_v62  ;;  %v11918_v51 = vld [vmem:[#allocation2 + $0x538] sm:$0xf0]  ;;  %v12055_v62 = vld [vmem:[#allocation2 + $0x984] sm:$0xf]  ;;  %v4189_v2 = vadd.f32 %v13148_v48, %v4176_v45 }
 0x100   :  { %4492 = vmatpush.bf16.msrb.mxu0 %v9615_v58  ;;  %v8214_v58 = vld [vmem:[#allocation2 + $0x20] sm:$0xf]  ;;  %v13151_v9 = vpop.f32.mrf.mxu1  ;;  %v8823_v37 = vor.u32 %v11918_v51, %v8822_v50  ;;  %v12030_v10 = vld [vmem:[#allocation2 + $0x8bc] sm:$0xf]  ;;  %v10216_v48 = vld [vmem:[#allocation2 + $0x1024] sm:$0xf0] }
 0x101   :  { %4506 = vmatpush.bf16.msra.mxu1 %v10315_v4  ;;  %10587 = vmatmul.msk.bf16.vlgmr.msra.gmra.mxu3 %vm3982_vm1, %v13068_v40  ;;  %v9716_v4 = vld [vmem:[#allocation2 + $0xc3c] sm:$0xf0]  ;;  %v11868_v19 = vld [vmem:[#allocation2 + $0x3a8] sm:$0xf0]  ;;  %v9522_v28 = vld [vmem:[#allocation2 + $0xa50] sm:$0xf] }
 0x102   :  { %4481 = vmatpush.bf16.msrb.mxu3 %v8615_v6  ;;  %v11992_v6 = vld [vmem:[#allocation2 + $0x788] sm:$0xf0]  ;;  %v9719_v16 = vor.u32 %v12130_v0, %v9716_v4  ;;  %v8722_v4 = vld [vmem:[#allocation2 + $0x410] sm:$0xf]  ;;  %v12205_v50 = vld [vmem:[#allocation2 + $0xe34] sm:$0xf] }
 0x103   :  { %4531 = vmatpush.bf16.msrb.mxu2 %v8819_v22  ;;  %v9115_v17 = vor.u32 %v11992_v6, %v9114_v5  ;;  %v11967_v22 = vld [vmem:[#allocation2 + $0x6c0] sm:$0xf0]  ;;  %v12280_v0 = vld [vmem:[#allocation2 + $0x108c] sm:$0xf]  ;;  %v11893_v5 = vld [vmem:[#allocation2 + $0x470] sm:$0xf0] }
 0x104   :  { %4493 = vmatpush.bf16.msrb.mxu0 %v9515_v11  ;;  %v8215_v11 = vor.u32 %v11767_v61, %v8214_v58  ;;  %v4190_v31 = vpop.f32.mrf.mxu2  ;;  %v9416_v58 = vld [vmem:[#allocation2 + $0x9e4] sm:$0xf0]  ;;  %v9722_v61 = vld [vmem:[#allocation2 + $0xbe0] sm:$0xf]  ;;  %v10016_v51 = vld [vmem:[#allocation2 + $0xe94] sm:$0xf0] }
 0x105   :  { %4507 = vmatpush.bf16.msra.mxu1 %v10215_v20  ;;  %v9616_v20 = vld [vmem:[#allocation2 + $0xb74] sm:$0xf0]  ;;  %v9419_v6 = vor.u32 %v12055_v62, %v9416_v58 }
 0x106   :  { %4482 = vmatpush.bf16.msrb.mxu3 %v8515_v21  ;;  %v9014_v21 = vld [vmem:[#allocation2 + $0x660] sm:$0xf]  ;;  %v9619_v32 = vor.u32 %v12105_v47, %v9616_v20  ;;  %v12255_v47 = vld [vmem:[#allocation2 + $0xfc4] sm:$0xf]  ;;  %v8422_v62 = vld [vmem:[#allocation2 + $0x1b8] sm:$0xf] }
 0x107   :  { %4532 = vmatpush.bf16.msrb.mxu2 %v8719_v39  ;;  %v9015_v33 = vor.u32 %v11967_v22, %v9014_v21  ;;  %v10519_v39 = vor.u32 %v12330_v24, %v10516_v25  ;;  %v9623_v22 = vor.u32 %v12118_v15, %v9622_v14  ;;  %v835_v24 = vperm.slane %v13112_v54, 3  ;;  %v11793_v14 = vld [vmem:[#allocation2 + $0x150] sm:$0xf0] }
 0x108   :  { %4494 = vmatpush.bf16.msrb.mxu0 %v9415_v27  ;;  %v8419_v27 = vor.u32 %v11805_v18, %v8416_v12  ;;  %v4216_v44 = vpop.f32.mrf.mxu1  ;;  %v8622_v12 = vld [vmem:[#allocation2 + $0x348] sm:$0xf]  ;;  %v10219_v26 = vor.u32 %v12255_v47, %v10216_v48 }
 0x109   :  { %4508 = vmatpush.bf16.msra.mxu1 %v10115_v36  ;;  %v11780_v36 = vld [vmem:[#allocation2 + $0xec] sm:$0xf]  ;;  %v8623_v31 = vor.u32 %v11868_v19, %v8622_v12  ;;  %v10422_v12 = vld [vmem:[#allocation2 + $0x1158] sm:$0xf] }
 0x10a   :  { %4483 = vmatpush.bf16.msrb.mxu3 %v8415_v38  ;;  %10588 = vmatmul.msk.bf16.vlgmr.msra.gmra.mxu2 %vm3982_vm1, %v13068_v40  ;;  %v8316_v38 = vld [vmem:[#allocation2 + $0x14c] sm:$0xf0]  ;;  %v12068_v44 = vld [vmem:[#allocation2 + $0x9e8] sm:$0xf0]  ;;  %v9222_v19 = vld [vmem:[#allocation2 + $0x7f8] sm:$0xf] }
 0x10b   :  { %4533 = vmatpush.bf16.msrb.mxu2 %v8619_v56  ;;  %v8319_v46 = vor.u32 %v11780_v36, %v8316_v38  ;;  %v8216_v56 = vld [vmem:[#allocation2 + $0x84] sm:$0xf0]  ;;  %v8522_v36 = vld [vmem:[#allocation2 + $0x280] sm:$0xf]  ;;  %v11843_v38 = vld [vmem:[#allocation2 + $0x2e0] sm:$0xf0] }
 0x10c   :  { %4495 = vmatpush.bf16.msrb.mxu0 %v9315_v30  ;;  %v12305_v30 = vld [vmem:[#allocation2 + $0x1154] sm:$0xf] }
 0x10d   :  { %4509 = vmatpush.bf16.msra.mxu1 %v10015_v52  ;;  %v9519_v52 = vor.u32 %v12080_v41, %v9516_v60  ;;  %v10419_v57 = vor.u32 %v12305_v30, %v10416_v43  ;;  %v9523_v41 = vor.u32 %v12093_v29, %v9522_v28  ;;  %v11980_v60 = vld [vmem:[#allocation2 + $0x72c] sm:$0xf]  ;;  %v9116_v30 = vld [vmem:[#allocation2 + $0x78c] sm:$0xf0]  ;;  %v9422_v43 = vld [vmem:[#allocation2 + $0x988] sm:$0xf] }
 0x10e   :  { %4484 = vmatpush.bf16.msrb.mxu3 %v8315_v53  ;;  %v11755_v53 = vld [vmem:[#allocation2 + $0x24] sm:$0xf]  ;;  %v9423_v58 = vor.u32 %v12068_v44, %v9422_v43  ;;  %v8222_v28 = vld [vmem:[#allocation2 + $0x28] sm:$0xf]  ;;  %v11768_v29 = vld [vmem:[#allocation2 + $0x88] sm:$0xf0] }
 0x10f   :  { %4534 = vmatpush.bf16.msrb.mxu2 %v8519_v13  ;;  %v8219_v3 = vor.u32 %v11755_v53, %v8216_v56  ;;  %v9316_v13 = vld [vmem:[#allocation2 + $0x91c] sm:$0xf0]  ;;  %v11818_v53 = vld [vmem:[#allocation2 + $0x218] sm:$0xf0]  ;;  %v11931_v43 = vld [vmem:[#allocation2 + $0x5a4] sm:$0xf] }
 0x110   :  { %4496 = vmatpush.bf16.msrb.mxu0 %v9215_v63  ;;  %v12143_v63 = vld [vmem:[#allocation2 + $0xc40] sm:$0xf0]  ;;  %v9319_v21 = vor.u32 %v12030_v10, %v9316_v13  ;;  %v9916_v10 = vld [vmem:[#allocation2 + $0xdcc] sm:$0xf0]  ;;  %v8924_v44 = vld [vmem:[#allocation2 + $0x604] sm:$0xf0] }
 0x111   :  { %4510 = vmatpush.bf16.msra.mxu1 %v9915_v7  ;;  %v9723_v7 = vor.u32 %v12143_v63, %v9722_v61  ;;  %v4240_v20 = vpop.f32.mrf.mxu1  ;;  %v11955_v61 = vld [vmem:[#allocation2 + $0x664] sm:$0xf]  ;;  %v9016_v63 = vld [vmem:[#allocation2 + $0x6c4] sm:$0xf0]  ;;  %v8322_v13 = vld [vmem:[#allocation2 + $0xf0] sm:$0xf] }
 0x112   :  { %4485 = vmatpush.bf16.msrb.mxu3 %v8215_v11  ;;  %v10319_v11 = vor.u32 %v12280_v0, %v10316_v1  ;;  %v10019_v0 = vor.u32 %v12205_v50, %v10016_v51  ;;  %v10522_v1 = vld [vmem:[#allocation2 + $0x1220] sm:$0xf]  ;;  %v12106_v51 = vld [vmem:[#allocation2 + $0xb1c] sm:$0xf] }
 0x113   :  { %4535 = vmatpush.bf16.msrb.mxu2 %v8419_v27  ;;  %v9216_v27 = vld [vmem:[#allocation2 + $0x854] sm:$0xf0] }
 0x114   :  { %4497 = vmatpush.bf16.msrb.mxu0 %v9115_v17  ;;  %v8723_v17 = vor.u32 %v11893_v5, %v8722_v4  ;;  %v8423_v5 = vor.u32 %v11818_v53, %v8422_v62  ;;  %v8927_v53 = vor.u32 %v11931_v43, %v8924_v44 }
 0x115   :  { %4486 = vmatmul.bf16.vlgmr.msrb.gmra.mxu3 %v13055_v49  ;;  %4511 = vmatpush.bf16.msra.mxu1 %v9815_v23  ;;  %v12005_v23 = vld [vmem:[#allocation2 + $0x7f4] sm:$0xf] }
 0x116   :  { %4543 = vmatpush.bf16.msra.mxu3 %v9719_v16  ;;  %v4201_v16 = vpop.f32.mrf.mxu0 }
 0x117   :  { %4536 = vmatpush.bf16.msrb.mxu2 %v8319_v46  ;;  %v4202_v18 = vadd.f32 %v4201_v16, %v4189_v2  ;;  %v8523_v46 = vor.u32 %v11843_v38, %v8522_v36  ;;  %v9322_v2 = vld [vmem:[#allocation2 + $0x8c0] sm:$0xf] }
 0x118   :  { %4498 = vmatpush.bf16.msrb.mxu0 %v9015_v33  ;;  %4512 = vmatmul.bf16.vlgmr.msra.gmra.mxu1 %v13060_v59  ;;  %v10116_v33 = vld [vmem:[#allocation2 + $0xf5c] sm:$0xf0] }
 0x119   :  { %4576 = vmatpush.bf16.msrb.mxu1 %v4015_v35  ;;  %v13164_v25 = vadd.f32 %v13151_v9, %v4202_v18  ;;  %v4227_v35 = vpop.f32.mrf.mxu3  ;;  %v9219_v9 = vor.u32 %v12005_v23, %v9216_v27  ;;  %v4242_v56 = vpop.f32.mrf.mxu1  ;;  %v12318_v23 = vld [vmem:[#allocation2 + $0x11b8] sm:$0xf0] }
 0x11a   :  { %4544 = vmatpush.bf16.msra.mxu3 %v9619_v32  ;;  %v12230_v32 = vld [vmem:[#allocation2 + $0xefc] sm:$0xf]  ;;  %v4253_v4 = vpop.f32.mrf.mxu2  ;;  %v10423_v36 = vor.u32 %v12318_v23, %v10422_v12  ;;  %v10222_v56 = vld [vmem:[#allocation2 + $0xfc8] sm:$0xf]  ;;  %v10424_v12 = vld [vmem:[#allocation2 + $0x11bc] sm:$0xf0] }
 0x11b   :  { %4499 = vmatmul.bf16.vlgmr.msrb.gmra.mxu0 %v13057_v55  ;;  %4537 = vmatpush.bf16.msrb.mxu2 %v8219_v3  ;;  %v12043_v3 = vld [vmem:[#allocation2 + $0x920] sm:$0xf0] }
 0x11c   :  { %4556 = vmatpush.bf16.msra.mxu0 %v10519_v39  ;;  %5368 = vrot.lane.b32.xlu2 %v13164_v25, %s12950_s0  ;;  %v4228_v39 = vadd.f32 %v4227_v35, %v835_v24  ;;  %v9323_v47 = vor.u32 %v12043_v3, %v9322_v2  ;;  %v12155_v24 = vld [vmem:[#allocation2 + $0xca4] sm:$0xf]  ;;  %v9724_v35 = vld [vmem:[#allocation2 + $0xc44] sm:$0xf0] }
 0x11d   :  { %4582 = vmatpush.bf16.msra.mxu1 %v8923_v42  ;;  %v10119_v42 = vor.u32 %v12230_v32, %v10116_v33  ;;  %v12131_v33 = vld [vmem:[#allocation2 + $0xbe4] sm:$0xf] }
 0x11e   :  { %4545 = vmatpush.bf16.msra.mxu3 %v9519_v52  ;;  %4538 = vmatmul.bf16.vlgmr.msrb.gmra.mxu2 %v13055_v49  ;;  %v4203_v45 = vpop.f32.mrf.mxu0  ;;  %v4241_v52 = vadd.f32 %v4240_v20, %v4228_v39  ;;  %v12018_v20 = vld [vmem:[#allocation2 + $0x858] sm:$0xf0]  ;;  %v9122_v39 = vld [vmem:[#allocation2 + $0x730] sm:$0xf]  ;;  %v12331_v3 = vld [vmem:[#allocation2 + $0x1224] sm:$0xf] }
 0x11f   :  { %4595 = vmatpush.bf16.msra.mxu2 %v9723_v7  ;;  %v12180_v7 = vld [vmem:[#allocation2 + $0xd6c] sm:$0xf]  ;;  %v9223_v32 = vor.u32 %v12018_v20, %v9222_v19  ;;  %v9727_v45 = vor.u32 %v12131_v33, %v9724_v35  ;;  %v836_v20 = vperm.slane %v13112_v54, 4  ;;  %v8624_v33 = vld [vmem:[#allocation2 + $0x3ac] sm:$0xf0] }
 0x120   :  { %4557 = vmatpush.bf16.msra.mxu0 %v10419_v57  ;;  %v9119_v57 = vor.u32 %v11980_v60, %v9116_v30  ;;  %v9919_v18 = vor.u32 %v12180_v7, %v9916_v10  ;;  %v12293_v30 = vld [vmem:[#allocation2 + $0x10f0] sm:$0xf0]  ;;  %v9524_v7 = vld [vmem:[#allocation2 + $0xab4] sm:$0xf0] }
 0x121   :  { %4583 = vmatpush.bf16.msra.mxu1 %v8823_v37  ;;  %v13169_v37 = vld [vmem:[#allocation2 + $0x12e8] sm:$0xff]  ;;  %v4229_v15 = vpop.f32.mrf.mxu3 }
 0x122   :  { %4546 = vmatpush.bf16.msra.mxu3 %v9419_v6  ;;  %v12343_v6 = vld [vmem:[#allocation2 + $0x1280] sm:$0xf0]  ;;  %v2742_v16 = vunpack.c.l.b16 %v13169_v37  ;;  %v4255_v60 = vpop.f32.mrf.mxu2 }
 0x123   :  { %4596 = vmatpush.bf16.msra.mxu2 %v9623_v22  ;;  %v10523_v48 = vor.u32 %v12343_v6, %v10522_v1  ;;  %v8323_v22 = vor.u32 %v11793_v14, %v8322_v13  ;;  %v8824_v1 = vld [vmem:[#allocation2 + $0x53c] sm:$0xf0]  ;;  %v12081_v6 = vld [vmem:[#allocation2 + $0xa54] sm:$0xf]  ;;  %v12243_v15 = vld [vmem:[#allocation2 + $0xf60] sm:$0xf0] }
 0x124   :  { %4558 = vmatpush.bf16.msra.mxu0 %v10319_v11  ;;  %v4254_v11 = vadd.f32 %v4253_v4, %v4241_v52  ;;  %v9624_v52 = vld [vmem:[#allocation2 + $0xb7c] sm:$0xf0]  ;;  %v10524_v4 = vld [vmem:[#allocation2 + $0x1284] sm:$0xf0] }
 0x125   :  { %4584 = vmatpush.bf16.msra.mxu1 %v8723_v17  ;;  %v9019_v17 = vor.u32 %v11955_v61, %v9016_v63  ;;  %v12268_v63 = vld [vmem:[#allocation2 + $0x1028] sm:$0xf0]  ;;  %v9627_v2 = vor.u32 %v12106_v51, %v9624_v52  ;;  %v10122_v13 = vld [vmem:[#allocation2 + $0xf00] sm:$0xf]  ;;  %v10527_v14 = vor.u32 %v12331_v3, %v10524_v4  ;;  %v2743_v51 = vunpack.c.h.b16 %v13169_v37  ;;  %v11806_v37 = vld [vmem:[#allocation2 + $0x1bc] sm:$0xf] }
 0x126   :  { %4547 = vmatpush.bf16.msra.mxu3 %v9319_v21  ;;  %v4266_v21 = vpop.f32.mrf.mxu0  ;;  %v10223_v10 = vor.u32 %v12268_v63, %v10222_v56  ;;  %v10123_v23 = vor.u32 %v12243_v15, %v10122_v13  ;;  %v10224_v56 = vld [vmem:[#allocation2 + $0x102c] sm:$0xf0]  ;;  %v9224_v63 = vld [vmem:[#allocation2 + $0x85c] sm:$0xf0]  ;;  %v12231_v13 = vld [vmem:[#allocation2 + $0xf04] sm:$0xf] }
 0x127   :  { %4597 = vmatpush.bf16.msra.mxu2 %v9523_v41  ;;  %v13174_v27 = vadd.f32 %v4266_v21, %v4254_v11  ;;  %v11993_v41 = vld [vmem:[#allocation2 + $0x790] sm:$0xf0]  ;;  %v12056_v21 = vld [vmem:[#allocation2 + $0x98c] sm:$0xf] }
 0x128   :  { %4559 = vmatpush.bf16.msra.mxu0 %v10219_v26  ;;  %10589 = vmatmul.msk.bf16.vlgmr.msrb.gmra.mxu1 %vm3982_vm1, %v13068_v40  ;;  %v9816_v26 = vld [vmem:[#allocation2 + $0xd04] sm:$0xf0]  ;;  %v9123_v50 = vor.u32 %v11993_v41, %v9122_v39  ;;  %v12031_v39 = vld [vmem:[#allocation2 + $0x8c4] sm:$0xf] }
 0x129   :  { %4585 = vmatpush.bf16.msra.mxu1 %v8623_v31  ;;  %v3367_v31 = vpack.c.b16 %v2742_v16, %v2742_v16  ;;  %v9819_v38 = vor.u32 %v12155_v24, %v9816_v26  ;;  %5378 = vrot.lane.b32.xlu0 %v13174_v27, %s12950_s0  ;;  %v11881_v16 = vld [vmem:[#allocation2 + $0x414] sm:$0xf]  ;;  %v10022_v26 = vld [vmem:[#allocation2 + $0xe38] sm:$0xf]  ;;  %v9324_v41 = vld [vmem:[#allocation2 + $0x924] sm:$0xf0] }
 0x12a   :  { %4548 = vmatpush.bf16.msra.mxu3 %v9219_v9  ;;  %v10322_v9 = vld [vmem:[#allocation2 + $0x1090] sm:$0xf] }
 0x12b   :  { %4598 = vmatpush.bf16.msra.mxu2 %v9423_v58  ;;  %v10323_v62 = vor.u32 %v12293_v30, %v10322_v9  ;;  %v11968_v58 = vld [vmem:[#allocation2 + $0x6c8] sm:$0xf0]  ;;  %v10324_v9 = vld [vmem:[#allocation2 + $0x10f4] sm:$0xf0]  ;;  %v9922_v30 = vld [vmem:[#allocation2 + $0xd70] sm:$0xf] }
 0x12c   :  { %4560 = vmatpush.bf16.msra.mxu0 %v10119_v42  ;;  %v8223_v42 = vor.u32 %v11768_v29, %v8222_v28 }
 0x12d   :  { %4586 = vmatpush.bf16.msra.mxu1 %v8523_v46  ;;  %v4018_v46 = vsel %vm3986_vm0, %v3367_v31, 0  ;;  %v12218_v31 = vld [vmem:[#allocation2 + $0xe98] sm:$0xf0] }
 0x12e   :  { %4549 = vmatpush.bf16.msra.mxu3 %v9119_v57  ;;  %v9022_v57 = vld [vmem:[#allocation2 + $0x668] sm:$0xf]  ;;  %v4268_v61 = vpop.f32.mrf.mxu0  ;;  %v10023_v60 = vor.u32 %v12218_v31, %v10022_v26  ;;  %v11956_v26 = vld [vmem:[#allocation2 + $0x66c] sm:$0xf]  ;;  %v9024_v31 = vld [vmem:[#allocation2 + $0x6cc] sm:$0xf0] }
 0x12f   :  { %4599 = vmatpush.bf16.msra.mxu2 %v9323_v47  ;;  %v4318_v47 = vpop.f32.mrf.mxu2  ;;  %v12006_v61 = vld [vmem:[#allocation2 + $0x7fc] sm:$0xf] }
 0x130   :  { %4561 = vmatpush.bf16.msra.mxu0 %v10019_v0  ;;  %v11906_v0 = vld [vmem:[#allocation2 + $0x4dc] sm:$0xf] }
 0x131   :  { %4587 = vmatpush.bf16.msra.mxu1 %v8423_v5  ;;  %v9023_v5 = vor.u32 %v11968_v58, %v9022_v57  ;;  %v8827_v11 = vor.u32 %v11906_v0, %v8824_v1  ;;  %v4305_v19 = vpop.f32.mrf.mxu1 }
 0x132   :  { %4550 = vmatpush.bf16.msra.mxu3 %v9019_v17  ;;  %v8724_v17 = vld [vmem:[#allocation2 + $0x474] sm:$0xf0] }
 0x133   :  { %4600 = vmatpush.bf16.msra.mxu2 %v9223_v32  ;;  %v8727_v24 = vor.u32 %v11881_v16, %v8724_v17  ;;  %v11856_v32 = vld [vmem:[#allocation2 + $0x34c] sm:$0xf]  ;;  %v11981_v16 = vld [vmem:[#allocation2 + $0x734] sm:$0xf]  ;;  %v9124_v17 = vld [vmem:[#allocation2 + $0x794] sm:$0xf0] }
 0x134   :  { %4562 = vmatpush.bf16.msra.mxu0 %v9919_v18  ;;  %v12306_v18 = vld [vmem:[#allocation2 + $0x115c] sm:$0xf]  ;;  %v4279_v35 = vpop.f32.mrf.mxu3 }
 0x135   :  { %4588 = vmatpush.bf16.msra.mxu1 %v8323_v22  ;;  %4551 = vmatmul.bf16.vlgmr.msra.gmra.mxu3 %v13057_v55  ;;  %v9424_v22 = vld [vmem:[#allocation2 + $0x9ec] sm:$0xf0]  ;;  %v10427_v29 = vor.u32 %v12306_v18, %v10424_v12  ;;  %v4280_v54 = vadd.f32 %v4279_v35, %v836_v20  ;;  %v8930_v18 = vld [vmem:[#allocation2 + $0x5a8] sm:$0xf]  ;;  %v11944_v12 = vld [vmem:[#allocation2 + $0x608] sm:$0xf0] }
 0x136   :  { %4608 = vmatpush.bf16.msrb.mxu3 %v10523_v48  ;;  %v9527_v48 = vor.u32 %v12081_v6, %v9524_v7  ;;  %v4292_v28 = vpop.f32.mrf.mxu0  ;;  %v8424_v6 = vld [vmem:[#allocation2 + $0x21c] sm:$0xf0] }
 0x137   :  { %4601 = vmatpush.bf16.msra.mxu2 %v9123_v50  ;;  %v4293_v43 = vadd.f32 %v4292_v28, %v4280_v54  ;;  %v8524_v50 = vld [vmem:[#allocation2 + $0x2e4] sm:$0xf0]  ;;  %v4320_v52 = vpop.f32.mrf.mxu2  ;;  %v12206_v28 = vld [vmem:[#allocation2 + $0xe3c] sm:$0xf]  ;;  %v11919_v54 = vld [vmem:[#allocation2 + $0x540] sm:$0xf0] }
 0x138   :  { %4563 = vmatpush.bf16.msra.mxu0 %v9819_v38  ;;  %v12281_v38 = vld [vmem:[#allocation2 + $0x1094] sm:$0xf] }
 0x139   :  { %4589 = vmatpush.bf16.msra.mxu1 %v8223_v42  ;;  %v8627_v42 = vor.u32 %v11856_v32, %v8624_v33  ;;  %v10327_v44 = vor.u32 %v12281_v38, %v10324_v9  ;;  %v4307_v57 = vpop.f32.mrf.mxu1  ;;  %v4306_v58 = vadd.f32 %v4305_v19, %v4293_v43  ;;  %v10530_v32 = vld [vmem:[#allocation2 + $0x1228] sm:$0xf]  ;;  %v12344_v33 = vld [vmem:[#allocation2 + $0x1288] sm:$0xf0]  ;;  %v8830_v9 = vld [vmem:[#allocation2 + $0x4e0] sm:$0xf]  ;;  %v9027_v43 = vor.u32 %v11956_v26, %v9024_v31 }
 0x13a   :  { %4609 = vmatpush.bf16.msrb.mxu3 %v10423_v36  ;;  %v9427_v36 = vor.u32 %v12056_v21, %v9424_v22  ;;  %v11781_v21 = vld [vmem:[#allocation2 + $0xf4] sm:$0xf]  ;;  %v8324_v22 = vld [vmem:[#allocation2 + $0x154] sm:$0xf0]  ;;  %v8831_v52 = vor.u32 %v11919_v54, %v8830_v9 }
 0x13b   :  { %4564 = vmatmul.bf16.vlgmr.msra.gmra.mxu0 %v13060_v59  ;;  %4602 = vmatpush.bf16.msra.mxu2 %v9023_v5  ;;  %v13185_v3 = vadd.f32 %v4318_v47, %v4306_v58  ;;  %v12168_v5 = vld [vmem:[#allocation2 + $0xd08] sm:$0xf0]  ;;  %v8327_v38 = vor.u32 %v11781_v21, %v8324_v22  ;;  %v12069_v54 = vld [vmem:[#allocation2 + $0x9f0] sm:$0xf0] }
 0x13c   :  { %4628 = vmatpush.bf16.msrb.mxu0 %v4018_v46  ;;  %4590 = vmatmul.bf16.vlgmr.msra.gmra.mxu1 %v13055_v49  ;;  %v11831_v46 = vld [vmem:[#allocation2 + $0x284] sm:$0xf]  ;;  %v4281_v15 = vpop.f32.mrf.mxu3 }
 0x13d   :  { %4647 = vmatpush.bf16.msrb.mxu1 %v9727_v45  ;;  %v12193_v45 = vld [vmem:[#allocation2 + $0xdd0] sm:$0xf0]  ;;  %v8527_v1 = vor.u32 %v11831_v46, %v8524_v50  ;;  %5394 = vrot.lane.b32.xlu0 %v13185_v3, %s12950_s0  ;;  %v12144_v46 = vld [vmem:[#allocation2 + $0xc48] sm:$0xf0]  ;;  %v10531_v50 = vor.u32 %v12344_v33, %v10530_v32  ;;  %v12294_v15 = vld [vmem:[#allocation2 + $0x10f8] sm:$0xf0] }
 0x13e   :  { %4610 = vmatpush.bf16.msrb.mxu3 %v10323_v62  ;;  %4603 = vmatmul.bf16.vlgmr.msra.gmra.mxu2 %v13057_v55  ;;  %v9327_v62 = vor.u32 %v12031_v39, %v9324_v41  ;;  %v9923_v0 = vor.u32 %v12193_v45, %v9922_v30  ;;  %v4294_v7 = vpop.f32.mrf.mxu0  ;;  %v13196_v39 = vld [vmem:[#allocation2 + $0x12f0] sm:$0xff]  ;;  %v9730_v45 = vld [vmem:[#allocation2 + $0xbe8] sm:$0xf] }
 0x13f   :  { %4660 = vmatpush.bf16.msrb.mxu2 %v10527_v14  ;;  %v10124_v14 = vld [vmem:[#allocation2 + $0xf64] sm:$0xf0]  ;;  %v12181_v30 = vld [vmem:[#allocation2 + $0xd74] sm:$0xf]  ;;  %v9731_v58 = vor.u32 %v12144_v46, %v9730_v45  ;;  %v12244_v45 = vld [vmem:[#allocation2 + $0xf68] sm:$0xf0] }
 0x140   :  { %4634 = vmatpush.bf16.msra.mxu0 %v8927_v53  ;;  %v12256_v53 = vld [vmem:[#allocation2 + $0xfcc] sm:$0xf]  ;;  %v10127_v19 = vor.u32 %v12231_v13, %v10124_v14  ;;  %v10330_v14 = vld [vmem:[#allocation2 + $0x1098] sm:$0xf]  ;;  %v8530_v33 = vld [vmem:[#allocation2 + $0x288] sm:$0xf] }
 0x141   :  { %4648 = vmatpush.bf16.msrb.mxu1 %v9627_v2  ;;  %v9822_v2 = vld [vmem:[#allocation2 + $0xca8] sm:$0xf]  ;;  %v10227_v4 = vor.u32 %v12256_v53, %v10224_v56  ;;  %v13194_v35 = vpop.f32.mrf.mxu1  ;;  %v10430_v53 = vld [vmem:[#allocation2 + $0x1160] sm:$0xf]  ;;  %v12319_v56 = vld [vmem:[#allocation2 + $0x11c0] sm:$0xf0]  ;;  %v10331_v21 = vor.u32 %v12294_v15, %v10330_v14 }
 0x142   :  { %4611 = vmatpush.bf16.msrb.mxu3 %v10223_v10  ;;  %v3368_v10 = vpack.c.b16 %v2743_v51, %v2743_v51  ;;  %v9823_v47 = vor.u32 %v12168_v5, %v9822_v2  ;;  %v2744_v51 = vunpack.c.l.b16 %v13196_v39  ;;  %v9824_v2 = vld [vmem:[#allocation2 + $0xd0c] sm:$0xf0]  ;;  %v12119_v5 = vld [vmem:[#allocation2 + $0xb80] sm:$0xf0] }
 0x143   :  { %4661 = vmatpush.bf16.msrb.mxu2 %v10427_v29  ;;  %v10024_v29 = vld [vmem:[#allocation2 + $0xe9c] sm:$0xf0]  ;;  %v12019_v15 = vld [vmem:[#allocation2 + $0x860] sm:$0xf0] }
 0x144   :  { %4635 = vmatpush.bf16.msra.mxu0 %v8827_v11  ;;  %v9227_v11 = vor.u32 %v12006_v61, %v9224_v63  ;;  %v4021_v20 = vsel %vm3986_vm0, %v3368_v10, 0  ;;  %v10027_v41 = vor.u32 %v12206_v28, %v10024_v29  ;;  %v8730_v61 = vld [vmem:[#allocation2 + $0x418] sm:$0xf]  ;;  %v11894_v63 = vld [vmem:[#allocation2 + $0x478] sm:$0xf0] }
 0x145   :  { %4649 = vmatpush.bf16.msrb.mxu1 %v9527_v48  ;;  %v8427_v48 = vor.u32 %v11806_v37, %v8424_v6  ;;  %v10431_v37 = vor.u32 %v12319_v56, %v10430_v53  ;;  %v3369_v6 = vpack.c.b16 %v2744_v51, %v2744_v51  ;;  %v8731_v10 = vor.u32 %v11894_v63, %v8730_v61  ;;  %v10230_v28 = vld [vmem:[#allocation2 + $0xfd0] sm:$0xf]  ;;  %v12269_v29 = vld [vmem:[#allocation2 + $0x1030] sm:$0xf0]  ;;  %v9330_v53 = vld [vmem:[#allocation2 + $0x8c8] sm:$0xf] }
 0x146   :  { %4612 = vmatpush.bf16.msrb.mxu3 %v10123_v23  ;;  %v13192_v23 = vpop.f32.mrf.mxu2  ;;  %v8732_v61 = vld [vmem:[#allocation2 + $0x47c] sm:$0xf0] }
 0x147   :  { %4662 = vmatpush.bf16.msrb.mxu2 %v10327_v44  ;;  %v9924_v44 = vld [vmem:[#allocation2 + $0xdd4] sm:$0xf0]  ;;  %v4024_v22 = vsel %vm3986_vm0, %v3369_v6, 0 }
 0x148   :  { %4636 = vmatpush.bf16.msra.mxu0 %v8727_v24  ;;  %v9127_v24 = vor.u32 %v11981_v16, %v9124_v17  ;;  %v9927_v57 = vor.u32 %v12181_v30, %v9924_v44  ;;  %v10231_v30 = vor.u32 %v12269_v29, %v10230_v28  ;;  %v10130_v44 = vld [vmem:[#allocation2 + $0xf08] sm:$0xf]  ;;  %v12132_v28 = vld [vmem:[#allocation2 + $0xbec] sm:$0xf]  ;;  %v2745_v29 = vunpack.c.h.b16 %v13196_v39 }
 0x149   :  { %4650 = vmatpush.bf16.msrb.mxu1 %v9427_v36  ;;  %v8931_v36 = vor.u32 %v11944_v12, %v8930_v18  ;;  %v4372_v7 = vpop.f32.mrf.mxu1  ;;  %v9530_v18 = vld [vmem:[#allocation2 + $0xa58] sm:$0xf]  ;;  %v12094_v12 = vld [vmem:[#allocation2 + $0xab8] sm:$0xf0]  ;;  %v10131_v63 = vor.u32 %v12244_v45, %v10130_v44  ;;  %v12107_v44 = vld [vmem:[#allocation2 + $0xb24] sm:$0xf] }
 0x14a   :  { %4613 = vmatpush.bf16.msrb.mxu3 %v10023_v60  ;;  %v11756_v60 = vld [vmem:[#allocation2 + $0x2c] sm:$0xf]  ;;  %v9531_v31 = vor.u32 %v12094_v12, %v9530_v18  ;;  %v8330_v7 = vld [vmem:[#allocation2 + $0xf8] sm:$0xf]  ;;  %v3370_v39 = vpack.c.b16 %v2745_v29, %v2745_v29  ;;  %v10332_v29 = vld [vmem:[#allocation2 + $0x10fc] sm:$0xf0] }
 0x14b   :  { %10590 = vmatmul.msk.bf16.vlgmr.msrb.gmra.mxu0 %vm3982_vm1, %v13068_v40  ;;  %4663 = vmatpush.bf16.msrb.mxu2 %v10227_v4  ;;  %v9630_v4 = vld [vmem:[#allocation2 + $0xb20] sm:$0xf] }
 0x14c   :  { %4637 = vmatpush.bf16.msra.mxu0 %v8627_v42  ;;  %v8224_v42 = vld [vmem:[#allocation2 + $0x8c] sm:$0xf0]  ;;  %v9631_v17 = vor.u32 %v12119_v5, %v9630_v4  ;;  %v12219_v4 = vld [vmem:[#allocation2 + $0xea0] sm:$0xf0] }
 0x14d   :  { %4651 = vmatpush.bf16.msrb.mxu1 %v9327_v62  ;;  %v8227_v62 = vor.u32 %v11756_v60, %v8224_v42  ;;  %v8832_v60 = vld [vmem:[#allocation2 + $0x544] sm:$0xf0] }
 0x14e   :  { %4614 = vmatpush.bf16.msrb.mxu3 %v9923_v0  ;;  %v12156_v0 = vld [vmem:[#allocation2 + $0xcac] sm:$0xf] }
 0x14f   :  { %4664 = vmatpush.bf16.msrb.mxu2 %v10127_v19  ;;  %v9827_v16 = vor.u32 %v12156_v0, %v9824_v2  ;;  %v11932_v19 = vld [vmem:[#allocation2 + $0x5ac] sm:$0xf]  ;;  %v10030_v2 = vld [vmem:[#allocation2 + $0xe40] sm:$0xf] }
 0x150   :  { %4638 = vmatpush.bf16.msra.mxu0 %v8527_v1  ;;  %v4333_v1 = vpop.f32.mrf.mxu2 }
 0x151   :  { %4652 = vmatpush.bf16.msrb.mxu1 %v9227_v11  ;;  %v13200_v11 = vld [vmem:[#allocation4] sm:$0xff] }
 0x152   :  { %4615 = vmatpush.bf16.msrb.mxu3 %v9823_v47  ;;  %v837_v13 = vperm.slane %v13200_v11, 5  ;;  %v8630_v47 = vld [vmem:[#allocation2 + $0x350] sm:$0xf]  ;;  %v838_v0 = vperm.slane %v13200_v11, 6 }
 0x153   :  { %4665 = vmatpush.bf16.msrb.mxu2 %v10027_v41  ;;  %v11907_v41 = vld [vmem:[#allocation2 + $0x4e4] sm:$0xf] }
 0x154   :  { %4639 = vmatpush.bf16.msra.mxu0 %v8427_v48  ;;  %v11869_v48 = vld [vmem:[#allocation2 + $0x3b0] sm:$0xf0]  ;;  %v4357_v9 = vpop.f32.mrf.mxu0  ;;  %v4344_v42 = vpop.f32.mrf.mxu3  ;;  %v8835_v51 = vor.u32 %v11907_v41, %v8832_v60 }
 0x155   :  { %4653 = vmatpush.bf16.msrb.mxu1 %v9127_v24  ;;  %4616 = vmatmul.bf16.vlgmr.msrb.gmra.mxu3 %v13060_v59  ;;  %v4332_v24 = vadd.f32 %v13192_v23, %v837_v13  ;;  %v8631_v26 = vor.u32 %v11869_v48, %v8630_v47  ;;  %v4383_v46 = vpop.f32.mrf.mxu1  ;;  %v9230_v13 = vld [vmem:[#allocation2 + $0x800] sm:$0xf]  ;;  %v10031_v47 = vor.u32 %v12219_v4, %v10030_v2  ;;  %v4027_v2 = vsel %vm3986_vm0, %v3370_v39, 0  ;;  %v10232_v39 = vld [vmem:[#allocation2 + $0x1034] sm:$0xf0] }
 0x156   :  { %4680 = vmatpush.bf16.msra.mxu3 %v4021_v20  ;;  %v8932_v20 = vld [vmem:[#allocation2 + $0x60c] sm:$0xf0]  ;;  %v4384_v18 = vadd.f32 %v4383_v46, %v838_v0  ;;  %v9632_v46 = vld [vmem:[#allocation2 + $0xb84] sm:$0xf0] }
 0x157   :  { %4666 = vmatpush.bf16.msrb.mxu2 %v9927_v57  ;;  %v8935_v32 = vor.u32 %v11932_v19, %v8932_v20  ;;  %v12044_v57 = vld [vmem:[#allocation2 + $0x928] sm:$0xf0]  ;;  %v9930_v19 = vld [vmem:[#allocation2 + $0xd78] sm:$0xf]  ;;  %v9635_v0 = vor.u32 %v12107_v44, %v9632_v46  ;;  %v11870_v46 = vld [vmem:[#allocation2 + $0x3b8] sm:$0xf0] }
 0x158   :  { %4640 = vmatpush.bf16.msra.mxu0 %v8327_v38  ;;  %v9430_v38 = vld [vmem:[#allocation2 + $0x990] sm:$0xf] }
 0x159   :  { %4654 = vmatpush.bf16.msrb.mxu1 %v9027_v43  ;;  %v4345_v43 = vadd.f32 %v4344_v42, %v4332_v24  ;;  %v8230_v24 = vld [vmem:[#allocation2 + $0x30] sm:$0xf] }
 0x15a   :  { %4686 = vmatpush.bf16.msrb.mxu3 %v8931_v36  ;;  %v11844_v36 = vld [vmem:[#allocation2 + $0x2e8] sm:$0xf0]  ;;  %v9830_v42 = vld [vmem:[#allocation2 + $0xcb0] sm:$0xf] }
 0x15b   :  { %4667 = vmatpush.bf16.msrb.mxu2 %v9827_v16  ;;  %v8531_v23 = vor.u32 %v11844_v36, %v8530_v33  ;;  %v4358_v56 = vadd.f32 %v4357_v9, %v4345_v43  ;;  %v11857_v16 = vld [vmem:[#allocation2 + $0x354] sm:$0xf]  ;;  %v11994_v33 = vld [vmem:[#allocation2 + $0x798] sm:$0xf0]  ;;  %v11832_v9 = vld [vmem:[#allocation2 + $0x28c] sm:$0xf] }
 0x15c   :  { %4641 = vmatpush.bf16.msra.mxu0 %v8227_v62  ;;  %4655 = vmatmul.bf16.vlgmr.msrb.gmra.mxu1 %v13057_v55  ;;  %v11819_v62 = vld [vmem:[#allocation2 + $0x220] sm:$0xf0]  ;;  %v4359_v14 = vpop.f32.mrf.mxu0  ;;  %v4346_v48 = vpop.f32.mrf.mxu3 }
 0x15d   :  { %4712 = vmatpush.bf16.msra.mxu1 %v10531_v50  ;;  %v9431_v50 = vor.u32 %v12069_v54, %v9430_v38  ;;  %v13212_v5 = vadd.f32 %v13194_v35, %v4358_v56  ;;  %v12194_v35 = vld [vmem:[#allocation2 + $0xdd8] sm:$0xf0]  ;;  %v4385_v20 = vpop.f32.mrf.mxu1  ;;  %v4396_v36 = vpop.f32.mrf.mxu2  ;;  %v8532_v54 = vld [vmem:[#allocation2 + $0x2ec] sm:$0xf0]  ;;  %v8432_v56 = vld [vmem:[#allocation2 + $0x224] sm:$0xf0] }
 0x15e   :  { %4687 = vmatpush.bf16.msrb.mxu3 %v8831_v52  ;;  %4668 = vmatmul.bf16.vlgmr.msrb.gmra.mxu2 %v13060_v59  ;;  %v8430_v52 = vld [vmem:[#allocation2 + $0x1c0] sm:$0xf]  ;;  %v9931_v38 = vor.u32 %v12194_v35, %v9930_v19  ;;  %v13215_v41 = vadd.f32 %v4396_v36, %v4384_v18  ;;  %v8535_v45 = vor.u32 %v11832_v9, %v8532_v54  ;;  %v11782_v14 = vld [vmem:[#allocation2 + $0xfc] sm:$0xf]  ;;  %v11920_v48 = vld [vmem:[#allocation2 + $0x548] sm:$0xf0] }
 0x15f   :  { %4642 = vmatmul.bf16.vlgmr.msra.gmra.mxu0 %v13055_v49  ;;  %4732 = vmatpush.bf16.msra.mxu2 %v4024_v22  ;;  %v8431_v1 = vor.u32 %v11819_v62, %v8430_v52  ;;  %v11969_v52 = vld [vmem:[#allocation2 + $0x6d0] sm:$0xf0]  ;;  %v9432_v35 = vld [vmem:[#allocation2 + $0x9f4] sm:$0xf0]  ;;  %v9738_v36 = vld [vmem:[#allocation2 + $0xbf0] sm:$0xf] }
 0x160   :  { %4699 = vmatpush.bf16.msrb.mxu0 %v9731_v58  ;;  %v11882_v58 = vld [vmem:[#allocation2 + $0x41c] sm:$0xf]  ;;  %v12057_v19 = vld [vmem:[#allocation2 + $0x994] sm:$0xf]  ;;  %v12032_v54 = vld [vmem:[#allocation2 + $0x8cc] sm:$0xf] }
 0x161   :  { %4713 = vmatpush.bf16.msra.mxu1 %v10431_v37  ;;  %v9331_v37 = vor.u32 %v12044_v57, %v9330_v53  ;;  %v8735_v6 = vor.u32 %v11882_v58, %v8732_v61  ;;  %v11807_v53 = vld [vmem:[#allocation2 + $0x1c4] sm:$0xf]  ;;  %v12332_v57 = vld [vmem:[#allocation2 + $0x122c] sm:$0xf]  ;;  %v10532_v58 = vld [vmem:[#allocation2 + $0x128c] sm:$0xf0] }
 0x162   :  { %4688 = vmatpush.bf16.msrb.mxu3 %v8731_v10  ;;  %v11794_v10 = vld [vmem:[#allocation2 + $0x158] sm:$0xf0]  ;;  %v8938_v61 = vld [vmem:[#allocation2 + $0x5b0] sm:$0xf]  ;;  %v8435_v4 = vor.u32 %v11807_v53, %v8432_v56  ;;  %v9638_v53 = vld [vmem:[#allocation2 + $0xb28] sm:$0xf] }
 0x163   :  { %4738 = vmatpush.bf16.msrb.mxu2 %v8935_v32  ;;  %v8331_v12 = vor.u32 %v11794_v10, %v8330_v7  ;;  %v9130_v32 = vld [vmem:[#allocation2 + $0x738] sm:$0xf]  ;;  %v10535_v10 = vor.u32 %v12332_v57, %v10532_v58  ;;  %v12120_v56 = vld [vmem:[#allocation2 + $0xb88] sm:$0xf0]  ;;  %v12007_v57 = vld [vmem:[#allocation2 + $0x804] sm:$0xf] }
 0x164   :  { %4700 = vmatpush.bf16.msrb.mxu0 %v9631_v17  ;;  %v8632_v17 = vld [vmem:[#allocation2 + $0x3b4] sm:$0xf0]  ;;  %v9232_v58 = vld [vmem:[#allocation2 + $0x864] sm:$0xf0] }
 0x165   :  { %4714 = vmatpush.bf16.msra.mxu1 %v10331_v21  ;;  %10591 = vmatmul.msk.bf16.vlgmr.msra.gmra.mxu3 %vm3982_vm1, %v13068_v40  ;;  %v9231_v21 = vor.u32 %v12019_v15, %v9230_v13  ;;  %v8635_v22 = vor.u32 %v11857_v16, %v8632_v17  ;;  %v4398_v7 = vpop.f32.mrf.mxu2  ;;  %v8332_v15 = vld [vmem:[#allocation2 + $0x15c] sm:$0xf0]  ;;  %v12307_v16 = vld [vmem:[#allocation2 + $0x1164] sm:$0xf]  ;;  %v10432_v17 = vld [vmem:[#allocation2 + $0x11c4] sm:$0xf0] }
 0x166   :  { %4689 = vmatpush.bf16.msrb.mxu3 %v8631_v26  ;;  %v11769_v26 = vld [vmem:[#allocation2 + $0x90] sm:$0xf0]  ;;  %v9235_v7 = vor.u32 %v12007_v57, %v9232_v58  ;;  %v12320_v57 = vld [vmem:[#allocation2 + $0x11c8] sm:$0xf0] }
 0x167   :  { %4739 = vmatpush.bf16.msrb.mxu2 %v8835_v51  ;;  %v8231_v60 = vor.u32 %v11769_v26, %v8230_v24  ;;  %v9030_v51 = vld [vmem:[#allocation2 + $0x670] sm:$0xf]  ;;  %v11757_v24 = vld [vmem:[#allocation2 + $0x34] sm:$0xf]  ;;  %v8232_v26 = vld [vmem:[#allocation2 + $0x94] sm:$0xf0] }
 0x168   :  { %4701 = vmatpush.bf16.msrb.mxu0 %v9531_v31  ;;  %v9732_v31 = vld [vmem:[#allocation2 + $0xc4c] sm:$0xf0]  ;;  %v8235_v9 = vor.u32 %v11757_v24, %v8232_v26  ;;  %v9438_v24 = vld [vmem:[#allocation2 + $0x998] sm:$0xf]  ;;  %v12070_v26 = vld [vmem:[#allocation2 + $0x9f8] sm:$0xf0] }
 0x169   :  { %4715 = vmatpush.bf16.msra.mxu1 %v10231_v30  ;;  %v12169_v30 = vld [vmem:[#allocation2 + $0xd10] sm:$0xf0]  ;;  %v9735_v43 = vor.u32 %v12132_v28, %v9732_v31  ;;  %v12282_v28 = vld [vmem:[#allocation2 + $0x109c] sm:$0xf]  ;;  %v8738_v31 = vld [vmem:[#allocation2 + $0x420] sm:$0xf] }
 0x16a   :  { %4690 = vmatpush.bf16.msrb.mxu3 %v8531_v23  ;;  %v9131_v23 = vor.u32 %v11994_v33, %v9130_v32  ;;  %v9831_v62 = vor.u32 %v12169_v30, %v9830_v42  ;;  %v11895_v32 = vld [vmem:[#allocation2 + $0x480] sm:$0xf0]  ;;  %v9435_v33 = vor.u32 %v12057_v19, %v9432_v35  ;;  %v10335_v42 = vor.u32 %v12282_v28, %v10332_v29  ;;  %v8438_v19 = vld [vmem:[#allocation2 + $0x1c8] sm:$0xf]  ;;  %v11820_v35 = vld [vmem:[#allocation2 + $0x228] sm:$0xf0] }
 0x16b   :  { %4740 = vmatpush.bf16.msrb.mxu2 %v8735_v6  ;;  %v9532_v6 = vld [vmem:[#allocation2 + $0xabc] sm:$0xf0]  ;;  %v8739_v30 = vor.u32 %v11895_v32, %v8738_v31  ;;  %v11957_v28 = vld [vmem:[#allocation2 + $0x674] sm:$0xf]  ;;  %v9032_v29 = vld [vmem:[#allocation2 + $0x6d4] sm:$0xf0] }
 0x16c   :  { %4702 = vmatpush.bf16.msrb.mxu0 %v9431_v50  ;;  %v13217_v50 = vpop.f32.mrf.mxu0  ;;  %v10538_v31 = vld [vmem:[#allocation2 + $0x1230] sm:$0xf]  ;;  %v12157_v58 = vld [vmem:[#allocation2 + $0xcb4] sm:$0xf] }
 0x16d   :  { %4716 = vmatpush.bf16.msra.mxu1 %v10131_v63  ;;  %v11945_v63 = vld [vmem:[#allocation2 + $0x610] sm:$0xf0] }
 0x16e   :  { %4691 = vmatpush.bf16.msrb.mxu3 %v8431_v1  ;;  %10592 = vmatmul.msk.bf16.vlgmr.msra.gmra.mxu2 %vm3982_vm1, %v13068_v40  ;;  %v9031_v1 = vor.u32 %v11969_v52, %v9030_v51  ;;  %v8939_v13 = vor.u32 %v11945_v63, %v8938_v61  ;;  %v839_v61 = vperm.slane %v13200_v11, 7 }
 0x16f   :  { %4741 = vmatpush.bf16.msrb.mxu2 %v8635_v22 }
 0x170   :  { %4703 = vmatpush.bf16.msrb.mxu0 %v9331_v37  ;;  %v12082_v37 = vld [vmem:[#allocation2 + $0xa5c] sm:$0xf] }
 0x171   :  { %4717 = vmatpush.bf16.msra.mxu1 %v10031_v47  ;;  %v8838_v47 = vld [vmem:[#allocation2 + $0x4e8] sm:$0xf]  ;;  %v9535_v18 = vor.u32 %v12082_v37, %v9532_v6  ;;  %v8538_v37 = vld [vmem:[#allocation2 + $0x290] sm:$0xf]  ;;  %v11845_v6 = vld [vmem:[#allocation2 + $0x2f0] sm:$0xf0] }
 0x172   :  { %4692 = vmatpush.bf16.msrb.mxu3 %v8331_v12  ;;  %v8335_v12 = vor.u32 %v11782_v14, %v8332_v15  ;;  %v8839_v22 = vor.u32 %v11920_v48, %v8838_v47  ;;  %v12095_v14 = vld [vmem:[#allocation2 + $0xac0] sm:$0xf0]  ;;  %v9132_v15 = vld [vmem:[#allocation2 + $0x79c] sm:$0xf0] }
 0x173   :  { %4742 = vmatpush.bf16.msrb.mxu2 %v8535_v45  ;;  %v8638_v45 = vld [vmem:[#allocation2 + $0x358] sm:$0xf]  ;;  %v12207_v47 = vld [vmem:[#allocation2 + $0xe44] sm:$0xf] }
 0x174   :  { %4704 = vmatpush.bf16.msrb.mxu0 %v9231_v21  ;;  %v4424_v20 = vpop.f32.mrf.mxu0  ;;  %v10435_v21 = vor.u32 %v12307_v16, %v10432_v17  ;;  %v8539_v17 = vor.u32 %v11845_v6, %v8538_v37  ;;  %v12020_v6 = vld [vmem:[#allocation2 + $0x868] sm:$0xf0] }
 0x175   :  { %4718 = vmatpush.bf16.msra.mxu1 %v9931_v38  ;;  %v12145_v38 = vld [vmem:[#allocation2 + $0xc50] sm:$0xf0]  ;;  %v4448_v51 = vpop.f32.mrf.mxu1 }
 0x176   :  { %4693 = vmatpush.bf16.msrb.mxu3 %v8231_v60  ;;  %v9332_v60 = vld [vmem:[#allocation2 + $0x92c] sm:$0xf0]  ;;  %v9739_v44 = vor.u32 %v12145_v38, %v9738_v36  ;;  %v8439_v36 = vor.u32 %v11820_v35, %v8438_v19  ;;  %v12345_v38 = vld [vmem:[#allocation2 + $0x1290] sm:$0xf0]  ;;  %v8940_v19 = vld [vmem:[#allocation2 + $0x614] sm:$0xf0] }
 0x177   :  { %4743 = vmatpush.bf16.msrb.mxu2 %v8435_v4  ;;  %v9639_v4 = vor.u32 %v12120_v56, %v9638_v53  ;;  %v11995_v35 = vld [vmem:[#allocation2 + $0x7a0] sm:$0xf0] }
 0x178   :  { %4705 = vmatpush.bf16.msrb.mxu0 %v9131_v23  ;;  %v4409_v23 = vpop.f32.mrf.mxu3 }
 0x179   :  { %4694 = vmatmul.bf16.vlgmr.msrb.gmra.mxu3 %v13055_v49  ;;  %4719 = vmatpush.bf16.msra.mxu1 %v9831_v62  ;;  %v4410_v52 = vadd.f32 %v4409_v23, %v13215_v41  ;;  %v9335_v62 = vor.u32 %v12032_v54, %v9332_v60  ;;  %v10132_v41 = vld [vmem:[#allocation2 + $0xf6c] sm:$0xf0]  ;;  %v13233_v54 = vld [vmem:[#allocation2 + $0x12f8] sm:$0xff]  ;;  %v9439_v60 = vor.u32 %v12070_v26, %v9438_v24 }
 0x17a   :  { %4751 = vmatpush.bf16.msra.mxu3 %v9735_v43  ;;  %v12257_v43 = vld [vmem:[#allocation2 + $0xfd4] sm:$0xf] }
 0x17b   :  { %4744 = vmatpush.bf16.msrb.mxu2 %v8335_v12  ;;  %v13228_v63 = vadd.f32 %v13217_v50, %v4410_v52  ;;  %v11982_v50 = vld [vmem:[#allocation2 + $0x73c] sm:$0xf]  ;;  %v10032_v12 = vld [vmem:[#allocation2 + $0xea4] sm:$0xf0] }
 0x17c   :  { %4706 = vmatpush.bf16.msrb.mxu0 %v9031_v1  ;;  %4720 = vmatmul.bf16.vlgmr.msra.gmra.mxu1 %v13060_v59  ;;  %v8639_v1 = vor.u32 %v11870_v46, %v8638_v45  ;;  %v12045_v45 = vld [vmem:[#allocation2 + $0x930] sm:$0xf0]  ;;  %v10438_v52 = vld [vmem:[#allocation2 + $0x1168] sm:$0xf] }
 0x17d   :  { %4784 = vmatpush.bf16.msrb.mxu1 %v4027_v2  ;;  %v12232_v2 = vld [vmem:[#allocation2 + $0xf0c] sm:$0xf]  ;;  %v4450_v20 = vpop.f32.mrf.mxu1  ;;  %v4461_v32 = vpop.f32.mrf.mxu2 }
 0x17e   :  { %4752 = vmatpush.bf16.msra.mxu3 %v9635_v0  ;;  %v10235_v0 = vor.u32 %v12257_v43, %v10232_v39  ;;  %v10135_v16 = vor.u32 %v12232_v2, %v10132_v41  ;;  %v11795_v43 = vld [vmem:[#allocation2 + $0x160] sm:$0xf0]  ;;  %v9338_v39 = vld [vmem:[#allocation2 + $0x8d0] sm:$0xf]  ;;  %v8238_v2 = vld [vmem:[#allocation2 + $0x38] sm:$0xf] }
 0x17f   :  { %4707 = vmatmul.bf16.vlgmr.msrb.gmra.mxu0 %v13057_v55  ;;  %4745 = vmatpush.bf16.msrb.mxu2 %v8235_v9  ;;  %v12182_v9 = vld [vmem:[#allocation2 + $0xd7c] sm:$0xf]  ;;  %v9238_v41 = vld [vmem:[#allocation2 + $0x808] sm:$0xf]  ;;  %v12108_v20 = vld [vmem:[#allocation2 + $0xb2c] sm:$0xf] }
 0x180   :  { %4764 = vmatpush.bf16.msra.mxu0 %v10535_v10  ;;  %v4435_v10 = vpop.f32.mrf.mxu0  ;;  %v4411_v48 = vpop.f32.mrf.mxu3 }
 0x181   :  { %4790 = vmatpush.bf16.msra.mxu1 %v8939_v13  ;;  %v9538_v13 = vld [vmem:[#allocation2 + $0xa60] sm:$0xf]  ;;  %v4436_v11 = vadd.f32 %v4435_v10, %v839_v61  ;;  %v9832_v61 = vld [vmem:[#allocation2 + $0xd14] sm:$0xf0] }
 0x182   :  { %4753 = vmatpush.bf16.msra.mxu3 %v9535_v18  ;;  %4746 = vmatmul.bf16.vlgmr.msrb.gmra.mxu2 %v13055_v49  ;;  %v9539_v18 = vor.u32 %v12095_v14, %v9538_v13  ;;  %v9740_v10 = vld [vmem:[#allocation2 + $0xc54] sm:$0xf0]  ;;  %v10439_v13 = vor.u32 %v12320_v57, %v10438_v52  ;;  %v8740_v57 = vld [vmem:[#allocation2 + $0x484] sm:$0xf0] }
 0x183   :  { %4803 = vmatpush.bf16.msra.mxu2 %v9739_v44  ;;  %v9035_v44 = vor.u32 %v11957_v28, %v9032_v29  ;;  %v10238_v28 = vld [vmem:[#allocation2 + $0xfd8] sm:$0xf]  ;;  %v12270_v29 = vld [vmem:[#allocation2 + $0x1038] sm:$0xf0] }
 0x184   :  { %4765 = vmatpush.bf16.msra.mxu0 %v10435_v21  ;;  %v4449_v21 = vadd.f32 %v4448_v51, %v4436_v11  ;;  %v10539_v51 = vor.u32 %v12345_v38, %v10538_v31  ;;  %v11908_v38 = vld [vmem:[#allocation2 + $0x4ec] sm:$0xf] }
 0x185   :  { %4791 = vmatpush.bf16.msra.mxu1 %v8839_v22  ;;  %v9135_v22 = vor.u32 %v11982_v50, %v9132_v15  ;;  %v4463_v11 = vpop.f32.mrf.mxu2  ;;  %v9835_v50 = vor.u32 %v12157_v58, %v9832_v61 }
 0x186   :  { %4754 = vmatpush.bf16.msra.mxu3 %v9435_v33  ;;  %v10035_v33 = vor.u32 %v12207_v47, %v10032_v12  ;;  %v4462_v23 = vadd.f32 %v4461_v32, %v4449_v21  ;;  %v9239_v47 = vor.u32 %v12020_v6, %v9238_v41  ;;  %v11933_v12 = vld [vmem:[#allocation2 + $0x5b4] sm:$0xf]  ;;  %v9640_v21 = vld [vmem:[#allocation2 + $0xb8c] sm:$0xf0]  ;;  %v12308_v41 = vld [vmem:[#allocation2 + $0x116c] sm:$0xf] }
 0x187   :  { %4804 = vmatpush.bf16.msra.mxu2 %v9639_v4  ;;  %v11770_v4 = vld [vmem:[#allocation2 + $0x98] sm:$0xf0]  ;;  %v8943_v26 = vor.u32 %v11933_v12, %v8940_v19  ;;  %v10440_v6 = vld [vmem:[#allocation2 + $0x11cc] sm:$0xf0]  ;;  %v12283_v19 = vld [vmem:[#allocation2 + $0x10a4] sm:$0xf] }
 0x188   :  { %4766 = vmatpush.bf16.msra.mxu0 %v10335_v42  ;;  %v9932_v42 = vld [vmem:[#allocation2 + $0xddc] sm:$0xf0]  ;;  %v4437_v46 = vpop.f32.mrf.mxu0  ;;  %v8239_v15 = vor.u32 %v11770_v4, %v8238_v2 }
 0x189   :  { %4792 = vmatpush.bf16.msra.mxu1 %v8739_v30  ;;  %v8338_v30 = vld [vmem:[#allocation2 + $0x100] sm:$0xf]  ;;  %v9935_v53 = vor.u32 %v12182_v9, %v9932_v42  ;;  %v8840_v9 = vld [vmem:[#allocation2 + $0x54c] sm:$0xf0]  ;;  %v12083_v42 = vld [vmem:[#allocation2 + $0xa64] sm:$0xf] }
 0x18a   :  { %4755 = vmatpush.bf16.msra.mxu3 %v9335_v62  ;;  %v2746_v62 = vunpack.c.l.b16 %v13233_v54  ;;  %v8339_v56 = vor.u32 %v11795_v43, %v8338_v30  ;;  %v9540_v30 = vld [vmem:[#allocation2 + $0xac4] sm:$0xf0]  ;;  %v10239_v43 = vor.u32 %v12270_v29, %v10238_v28  ;;  %v10138_v46 = vld [vmem:[#allocation2 + $0xf10] sm:$0xf]  ;;  %v9440_v2 = vld [vmem:[#allocation2 + $0x9fc] sm:$0xf0] }
 0x18b   :  { %4805 = vmatpush.bf16.msra.mxu2 %v9539_v18  ;;  %v9138_v18 = vld [vmem:[#allocation2 + $0x740] sm:$0xf] }
 0x18c   :  { %4767 = vmatpush.bf16.msra.mxu0 %v10235_v0  ;;  %10593 = vmatmul.msk.bf16.vlgmr.msrb.gmra.mxu1 %vm3982_vm1, %v13068_v40  ;;  %v4474_v0 = vpop.f32.mrf.mxu3  ;;  %v3371_v14 = vpack.c.b16 %v2746_v62, %v2746_v62  ;;  %v9139_v32 = vor.u32 %v11995_v35, %v9138_v18  ;;  %v9340_v18 = vld [vmem:[#allocation2 + $0x934] sm:$0xf0]  ;;  %v10340_v35 = vld [vmem:[#allocation2 + $0x1104] sm:$0xf0] }
 0x18d   :  { %4793 = vmatpush.bf16.msra.mxu1 %v8639_v1  ;;  %v9339_v1 = vor.u32 %v12045_v45, %v9338_v39  ;;  %v13236_v37 = vadd.f32 %v4474_v0, %v4462_v23  ;;  %v13243_v23 = vld [vmem:[#allocation4 + $0x8] sm:$0xff]  ;;  %v10540_v39 = vld [vmem:[#allocation2 + $0x1294] sm:$0xf0]  ;;  %v8843_v45 = vor.u32 %v11908_v38, %v8840_v9  ;;  %v4526_v52 = vpop.f32.mrf.mxu2  ;;  %v10343_v9 = vor.u32 %v12283_v19, %v10340_v35 }
 0x18e   :  { %4756 = vmatpush.bf16.msra.mxu3 %v9235_v7  ;;  %v12133_v7 = vld [vmem:[#allocation2 + $0xbf4] sm:$0xf]  ;;  %v4030_v24 = vsel %vm3986_vm0, %v3371_v14, 0  ;;  %v840_v61 = vperm.slane %v13243_v23, 0  ;;  %v12220_v14 = vld [vmem:[#allocation2 + $0xea8] sm:$0xf0] }
 0x18f   :  { %4806 = vmatpush.bf16.msra.mxu2 %v9439_v60  ;;  %5410 = vrot.lane.b32.xlu1 %v13236_v37, %s12950_s0  ;;  %v9743_v48 = vor.u32 %v12133_v7, %v9740_v10  ;;  %v11970_v60 = vld [vmem:[#allocation2 + $0x6d8] sm:$0xf0]  ;;  %v10546_v35 = vld [vmem:[#allocation2 + $0x1238] sm:$0xf] }
 0x190   :  { %4768 = vmatpush.bf16.msra.mxu0 %v10135_v16  ;;  %v10338_v16 = vld [vmem:[#allocation2 + $0x10a0] sm:$0xf] }
 0x191   :  { %4794 = vmatpush.bf16.msra.mxu1 %v8539_v17  ;;  %v12295_v17 = vld [vmem:[#allocation2 + $0x1100] sm:$0xf0] }
 0x192   :  { %4757 = vmatpush.bf16.msra.mxu3 %v9135_v22  ;;  %v10339_v22 = vor.u32 %v12295_v17, %v10338_v16  ;;  %v8640_v16 = vld [vmem:[#allocation2 + $0x3bc] sm:$0xf0] }
 0x193   :  { %4807 = vmatpush.bf16.msra.mxu2 %v9339_v1  ;;  %v12058_v1 = vld [vmem:[#allocation2 + $0x99c] sm:$0xf] }
 0x194   :  { %4769 = vmatpush.bf16.msra.mxu0 %v10035_v33  ;;  %v4476_v31 = vpop.f32.mrf.mxu3  ;;  %v9643_v33 = vor.u32 %v12108_v20, %v9640_v21  ;;  %v13247_v20 = vpop.permute.xlu0 %5388 }
 0x195   :  { %4795 = vmatpush.bf16.msra.mxu1 %v8439_v36  ;;  %v9038_v36 = vld [vmem:[#allocation2 + $0x678] sm:$0xf]  ;;  %v4513_v58 = vpop.f32.mrf.mxu1  ;;  %v4528_v28 = vpop.f32.mrf.mxu2  ;;  %v11833_v31 = vld [vmem:[#allocation2 + $0x294] sm:$0xf] }
 0x196   :  { %4758 = vmatpush.bf16.msra.mxu3 %v9035_v44  ;;  %v12333_v44 = vld [vmem:[#allocation2 + $0x1234] sm:$0xf]  ;;  %v9039_v62 = vor.u32 %v11970_v60, %v9038_v36  ;;  %v12008_v60 = vld [vmem:[#allocation2 + $0x80c] sm:$0xf]  ;;  %v13264_v28 = vld [vmem:[#allocation2 + $0x1300] sm:$0xff] }
 0x197   :  { %4808 = vmatpush.bf16.msra.mxu2 %v9239_v47  ;;  %v10543_v0 = vor.u32 %v12333_v44, %v10540_v39  ;;  %v10443_v47 = vor.u32 %v12308_v41, %v10440_v6  ;;  %v10240_v44 = vld [vmem:[#allocation2 + $0x103c] sm:$0xf0] }
 0x198   :  { %4770 = vmatpush.bf16.msra.mxu0 %v9935_v53  ;;  %v9543_v53 = vor.u32 %v12083_v42, %v9540_v30  ;;  %v4500_v7 = vpop.f32.mrf.mxu0  ;;  %v9240_v42 = vld [vmem:[#allocation2 + $0x86c] sm:$0xf0] }
 0x199   :  { %4796 = vmatpush.bf16.msra.mxu1 %v8339_v56  ;;  %4759 = vmatmul.bf16.vlgmr.msra.gmra.mxu3 %v13057_v55  ;;  %v11883_v56 = vld [vmem:[#allocation2 + $0x424] sm:$0xf] }
 0x19a   :  { %4816 = vmatpush.bf16.msrb.mxu3 %v10539_v51  ;;  %v12245_v51 = vld [vmem:[#allocation2 + $0xf70] sm:$0xf0]  ;;  %v8743_v10 = vor.u32 %v11883_v56, %v8740_v57  ;;  %v8440_v56 = vld [vmem:[#allocation2 + $0x22c] sm:$0xf0] }
 0x19b   :  { %4809 = vmatpush.bf16.msra.mxu2 %v9139_v32  ;;  %v10139_v4 = vor.u32 %v12245_v51, %v10138_v46  ;;  %v8540_v32 = vld [vmem:[#allocation2 + $0x2f4] sm:$0xf0]  ;;  %v12170_v51 = vld [vmem:[#allocation2 + $0xd18] sm:$0xf0] }
 0x19c   :  { %4771 = vmatpush.bf16.msra.mxu0 %v9835_v50  ;;  %v4487_v11 = vpop.f32.mrf.mxu3  ;;  %v9443_v50 = vor.u32 %v12058_v1, %v9440_v2  ;;  %v9838_v46 = vld [vmem:[#allocation2 + $0xcb8] sm:$0xf]  ;;  %v9140_v1 = vld [vmem:[#allocation2 + $0x7a4] sm:$0xf0]  ;;  %v12233_v2 = vld [vmem:[#allocation2 + $0xf14] sm:$0xf]  ;;  %v5379_v41 = vpop.permute.xlu0 %5378 }
 0x19d   :  { %4797 = vmatpush.bf16.msra.mxu1 %v8239_v15  ;;  %v11858_v15 = vld [vmem:[#allocation2 + $0x35c] sm:$0xf]  ;;  %v4488_v17 = vadd.f32 %v4487_v11, %v840_v61  ;;  %v4515_v36 = vpop.f32.mrf.mxu1 }
 0x19e   :  { %4817 = vmatpush.bf16.msrb.mxu3 %v10439_v13  ;;  %v10038_v13 = vld [vmem:[#allocation2 + $0xe48] sm:$0xf] }
 0x19f   :  { %4772 = vmatmul.bf16.vlgmr.msra.gmra.mxu0 %v13060_v59  ;;  %4810 = vmatpush.bf16.msra.mxu2 %v9039_v62  ;;  %v10039_v12 = vor.u32 %v12220_v14, %v10038_v13  ;;  %v4501_v21 = vadd.f32 %v4500_v7, %v4488_v17  ;;  %v8946_v7 = vld [vmem:[#allocation2 + $0x5b8] sm:$0xf]  ;;  %v5381_v13 = vmax.f32 %v13174_v27, %v5379_v41  ;;  %v10040_v27 = vld [vmem:[#allocation2 + $0xeac] sm:$0xf0]  ;;  %v10346_v41 = vld [vmem:[#allocation2 + $0x10a8] sm:$0xf] }
 0x1a0   :  { %4836 = vmatpush.bf16.msrb.mxu0 %v4030_v24  ;;  %4798 = vmatmul.bf16.vlgmr.msra.gmra.mxu1 %v13055_v49  ;;  %v9938_v24 = vld [vmem:[#allocation2 + $0xd80] sm:$0xf]  ;;  %v4502_v62 = vpop.f32.mrf.mxu0 }
 0x1a1   :  { %4855 = vmatpush.bf16.msrb.mxu1 %v9743_v48  ;;  %v12033_v48 = vld [vmem:[#allocation2 + $0x8d4] sm:$0xf]  ;;  %v4514_v38 = vadd.f32 %v4513_v58, %v4501_v21  ;;  %5383 = vrot.lane.b32.xlu1 %v5381_v13, %s12946_s17  ;;  %v12346_v21 = vld [vmem:[#allocation2 + $0x1298] sm:$0xf0]  ;;  %v11896_v62 = vld [vmem:[#allocation2 + $0x488] sm:$0xf0] }
 0x1a2   :  { %4818 = vmatpush.bf16.msrb.mxu3 %v10339_v22  ;;  %v8643_v22 = vor.u32 %v11858_v15, %v8640_v16  ;;  %4811 = vmatmul.bf16.vlgmr.msra.gmra.mxu2 %v13057_v55  ;;  %v9343_v29 = vor.u32 %v12033_v48, %v9340_v18  ;;  %v8340_v15 = vld [vmem:[#allocation2 + $0x164] sm:$0xf0]  ;;  %v13259_v16 = vpop.f32.mrf.mxu2  ;;  %v9040_v48 = vld [vmem:[#allocation2 + $0x6dc] sm:$0xf0]  ;;  %v12208_v18 = vld [vmem:[#allocation2 + $0xe4c] sm:$0xf]  ;;  %v10547_v36 = vor.u32 %v12346_v21, %v10546_v35 }
 0x1a3   :  { %4868 = vmatpush.bf16.msrb.mxu2 %v10543_v0  ;;  %v13251_v39 = vadd.f32 %v4526_v52, %v4514_v38  ;;  %v11983_v0 = vld [vmem:[#allocation2 + $0x744] sm:$0xf]  ;;  %v9839_v52 = vor.u32 %v12170_v51, %v9838_v46  ;;  %v8746_v51 = vld [vmem:[#allocation2 + $0x428] sm:$0xf]  ;;  %v10246_v35 = vld [vmem:[#allocation2 + $0xfe0] sm:$0xf] }
 0x1a4   :  { %4842 = vmatpush.bf16.msra.mxu0 %v8943_v26  ;;  %v12195_v26 = vld [vmem:[#allocation2 + $0xde0] sm:$0xf0]  ;;  %v4489_v58 = vpop.f32.mrf.mxu3  ;;  %v9143_v14 = vor.u32 %v11983_v0, %v9140_v1  ;;  %v9646_v0 = vld [vmem:[#allocation2 + $0xb30] sm:$0xf]  ;;  %v12121_v1 = vld [vmem:[#allocation2 + $0xb90] sm:$0xf0] }
 0x1a5   :  { %4856 = vmatpush.bf16.msrb.mxu1 %v9643_v33  ;;  %v2747_v33 = vunpack.c.h.b16 %v13233_v54  ;;  %v9939_v30 = vor.u32 %v12195_v26, %v9938_v24  ;;  %v11808_v54 = vld [vmem:[#allocation2 + $0x1cc] sm:$0xf]  ;;  %5420 = vrot.lane.b32.xlu2 %v13251_v39, %s12950_s0  ;;  %v8846_v24 = vld [vmem:[#allocation2 + $0x4f0] sm:$0xf]  ;;  %v11921_v26 = vld [vmem:[#allocation2 + $0x550] sm:$0xf0] }
 0x1a6   :  { %4819 = vmatpush.bf16.msrb.mxu3 %v10239_v43  ;;  %v12258_v43 = vld [vmem:[#allocation2 + $0xfdc] sm:$0xf]  ;;  %v8443_v6 = vor.u32 %v11808_v54, %v8440_v56  ;;  %v12183_v38 = vld [vmem:[#allocation2 + $0xd84] sm:$0xf]  ;;  %v841_v54 = vperm.slane %v13243_v23, 1 }
 0x1a7   :  { %4869 = vmatpush.bf16.msrb.mxu2 %v10443_v47  ;;  %v3372_v57 = vpack.c.b16 %v2747_v33, %v2747_v33  ;;  %v10243_v61 = vor.u32 %v12258_v43, %v10240_v44  ;;  %v11958_v47 = vld [vmem:[#allocation2 + $0x67c] sm:$0xf]  ;;  %v10043_v33 = vor.u32 %v12208_v18, %v10040_v27  ;;  %v10446_v43 = vld [vmem:[#allocation2 + $0x1170] sm:$0xf]  ;;  %v12321_v44 = vld [vmem:[#allocation2 + $0x11d0] sm:$0xf0] }
 0x1a8   :  { %4843 = vmatpush.bf16.msra.mxu0 %v8843_v45  ;;  %v8543_v45 = vor.u32 %v11833_v31, %v8540_v32  ;;  %v11758_v31 = vld [vmem:[#allocation2 + $0x3c] sm:$0xf]  ;;  %v8240_v32 = vld [vmem:[#allocation2 + $0x9c] sm:$0xf0]  ;;  %v10447_v58 = vor.u32 %v12321_v44, %v10446_v43  ;;  %v11871_v13 = vld [vmem:[#allocation2 + $0x3c0] sm:$0xf0] }
 0x1a9   :  { %4857 = vmatpush.bf16.msrb.mxu1 %v9543_v53  ;;  %v9243_v53 = vor.u32 %v12008_v60, %v9240_v42  ;;  %v4033_v11 = vsel %vm3986_vm0, %v3372_v57, 0  ;;  %v12146_v60 = vld [vmem:[#allocation2 + $0xc58] sm:$0xf0]  ;;  %v8847_v42 = vor.u32 %v11921_v26, %v8846_v24  ;;  %v8243_v46 = vor.u32 %v11758_v31, %v8240_v32  ;;  %v8948_v27 = vld [vmem:[#allocation2 + $0x61c] sm:$0xf0] }
 0x1aa   :  { %4820 = vmatpush.bf16.msrb.mxu3 %v10139_v4  ;;  %v10140_v4 = vld [vmem:[#allocation2 + $0xf74] sm:$0xf0]  ;;  %v4541_v56 = vpop.f32.mrf.mxu2  ;;  %v12271_v21 = vld [vmem:[#allocation2 + $0x1040] sm:$0xf0]  ;;  %v11846_v24 = vld [vmem:[#allocation2 + $0x2f8] sm:$0xf0] }
 0x1ab   :  { %4870 = vmatpush.bf16.msrb.mxu2 %v10343_v9  ;;  %v10143_v17 = vor.u32 %v12233_v2, %v10140_v4  ;;  %v9746_v9 = vld [vmem:[#allocation2 + $0xbf8] sm:$0xf]  ;;  %v8747_v2 = vor.u32 %v11896_v62, %v8746_v51  ;;  %v9840_v4 = vld [vmem:[#allocation2 + $0xd1c] sm:$0xf0]  ;;  %v12246_v43 = vld [vmem:[#allocation2 + $0xf78] sm:$0xf0] }
 0x1ac   :  { %4844 = vmatpush.bf16.msra.mxu0 %v8743_v10  ;;  %v11946_v10 = vld [vmem:[#allocation2 + $0x618] sm:$0xf0] }
 0x1ad   :  { %4858 = vmatpush.bf16.msrb.mxu1 %v9443_v50  ;;  %v11783_v50 = vld [vmem:[#allocation2 + $0x104] sm:$0xf]  ;;  %v8947_v19 = vor.u32 %v11946_v10, %v8946_v7  ;;  %v8646_v10 = vld [vmem:[#allocation2 + $0x360] sm:$0xf] }
 0x1ae   :  { %4821 = vmatpush.bf16.msrb.mxu3 %v10039_v12  ;;  %v13261_v12 = vpop.f32.mrf.mxu1  ;;  %v8647_v18 = vor.u32 %v11871_v13, %v8646_v10  ;;  %v11796_v10 = vld [vmem:[#allocation2 + $0x168] sm:$0xf0] }
 0x1af   :  { %10594 = vmatmul.msk.bf16.vlgmr.msrb.gmra.mxu0 %vm3982_vm1, %v13068_v40  ;;  %4871 = vmatpush.bf16.msrb.mxu2 %v10243_v61  ;;  %v12158_v61 = vld [vmem:[#allocation2 + $0xcbc] sm:$0xf] }
 0x1b0   :  { %4845 = vmatpush.bf16.msra.mxu0 %v8643_v22  ;;  %v8343_v22 = vor.u32 %v11783_v50, %v8340_v15  ;;  %v9546_v15 = vld [vmem:[#allocation2 + $0xa68] sm:$0xf] }
 0x1b1   :  { %4859 = vmatpush.bf16.msrb.mxu1 %v9343_v29  ;;  %v9043_v29 = vor.u32 %v11958_v47, %v9040_v48  ;;  %v11934_v47 = vld [vmem:[#allocation2 + $0x5bc] sm:$0xf]  ;;  %v4540_v48 = vadd.f32 %v13259_v16, %v841_v54  ;;  %v11909_v16 = vld [vmem:[#allocation2 + $0x4f4] sm:$0xf] }
 0x1b2   :  { %4822 = vmatpush.bf16.msrb.mxu3 %v9939_v30  ;;  %v9940_v30 = vld [vmem:[#allocation2 + $0xde4] sm:$0xf0]  ;;  %v8951_v32 = vor.u32 %v11934_v47, %v8948_v27  ;;  %v11859_v47 = vld [vmem:[#allocation2 + $0x364] sm:$0xf] }
 0x1b3   :  { %4872 = vmatpush.bf16.msrb.mxu2 %v10143_v17  ;;  %v9943_v57 = vor.u32 %v12183_v38, %v9940_v30  ;;  %v12096_v17 = vld [vmem:[#allocation2 + $0xac8] sm:$0xf0]  ;;  %v10146_v30 = vld [vmem:[#allocation2 + $0xf18] sm:$0xf] }
 0x1b4   :  { %4846 = vmatpush.bf16.msra.mxu0 %v8543_v45  ;;  %v2748_v45 = vunpack.c.l.b16 %v13264_v28  ;;  %v10147_v56 = vor.u32 %v12246_v43, %v10146_v30 }
 0x1b5   :  { %4860 = vmatpush.bf16.msrb.mxu1 %v9243_v53  ;;  %v9747_v53 = vor.u32 %v12146_v60, %v9746_v9  ;;  %v10247_v9 = vor.u32 %v12271_v21, %v10246_v35  ;;  %v12196_v35 = vld [vmem:[#allocation2 + $0xde8] sm:$0xf0]  ;;  %v8246_v21 = vld [vmem:[#allocation2 + $0x40] sm:$0xf] }
 0x1b6   :  { %4823 = vmatpush.bf16.msrb.mxu3 %v9839_v52  ;;  %v4580_v52 = vpop.f32.mrf.mxu1  ;;  %v3373_v7 = vpack.c.b16 %v2748_v45, %v2748_v45  ;;  %v8446_v45 = vld [vmem:[#allocation2 + $0x1d0] sm:$0xf] }
 0x1b7   :  { %4873 = vmatpush.bf16.msrb.mxu2 %v10043_v33  ;;  %v9446_v33 = vld [vmem:[#allocation2 + $0x9a0] sm:$0xf] }
 0x1b8   :  { %4847 = vmatpush.bf16.msra.mxu0 %v8443_v6  ;;  %v12296_v6 = vld [vmem:[#allocation2 + $0x1108] sm:$0xf0]  ;;  %v4565_v26 = vpop.f32.mrf.mxu0  ;;  %v4552_v31 = vpop.f32.mrf.mxu3 }
 0x1b9   :  { %4861 = vmatpush.bf16.msrb.mxu1 %v9143_v14  ;;  %4824 = vmatmul.bf16.vlgmr.msrb.gmra.mxu3 %v13060_v59  ;;  %v9647_v14 = vor.u32 %v12121_v1, %v9646_v0  ;;  %v10347_v50 = vor.u32 %v12296_v6, %v10346_v41  ;;  %v4553_v38 = vadd.f32 %v4552_v31, %v4540_v48  ;;  %v842_v41 = vperm.slane %v13243_v23, 2  ;;  %v12221_v6 = vld [vmem:[#allocation2 + $0xeb0] sm:$0xf0]  ;;  %v8648_v48 = vld [vmem:[#allocation2 + $0x3c4] sm:$0xf0] }
 0x1ba   :  { %4888 = vmatpush.bf16.msra.mxu3 %v4033_v11  ;;  %v9843_v11 = vor.u32 %v12158_v61, %v9840_v4  ;;  %v11884_v61 = vld [vmem:[#allocation2 + $0x42c] sm:$0xf]  ;;  %v10046_v4 = vld [vmem:[#allocation2 + $0xe50] sm:$0xf]  ;;  %v2749_v31 = vunpack.c.h.b16 %v13264_v28  ;;  %v9648_v28 = vld [vmem:[#allocation2 + $0xb94] sm:$0xf0] }
 0x1bb   :  { %4874 = vmatpush.bf16.msrb.mxu2 %v9943_v57  ;;  %v4566_v51 = vadd.f32 %v4565_v26, %v4553_v38  ;;  %v9346_v57 = vld [vmem:[#allocation2 + $0x8d8] sm:$0xf]  ;;  %v12134_v26 = vld [vmem:[#allocation2 + $0xbfc] sm:$0xf] }
 0x1bc   :  { %4848 = vmatpush.bf16.msra.mxu0 %v8343_v22  ;;  %v8546_v22 = vld [vmem:[#allocation2 + $0x298] sm:$0xf] }
 0x1bd   :  { %4862 = vmatpush.bf16.msrb.mxu1 %v9043_v29  ;;  %v9547_v29 = vor.u32 %v12096_v17, %v9546_v15  ;;  %v8547_v60 = vor.u32 %v11846_v24, %v8546_v22  ;;  %v13277_v0 = vadd.f32 %v13261_v12, %v4566_v51  ;;  %v10047_v15 = vor.u32 %v12221_v6, %v10046_v4  ;;  %v11771_v22 = vld [vmem:[#allocation2 + $0xa0] sm:$0xf0]  ;;  %v12109_v51 = vld [vmem:[#allocation2 + $0xb34] sm:$0xf]  ;;  %v10548_v4 = vld [vmem:[#allocation2 + $0x129c] sm:$0xf0] }
 0x1be   :  { %4894 = vmatpush.bf16.msrb.mxu3 %v8947_v19  ;;  %v4036_v19 = vsel %vm3986_vm0, %v3373_v7, 0  ;;  %v4591_v44 = vpop.f32.mrf.mxu1  ;;  %v8346_v7 = vld [vmem:[#allocation2 + $0x108] sm:$0xf]  ;;  %v11947_v6 = vld [vmem:[#allocation2 + $0x620] sm:$0xf0] }
 0x1bf   :  { %4875 = vmatpush.bf16.msrb.mxu2 %v9843_v11  ;;  %5436 = vrot.lane.b32.xlu0 %v13277_v0, %s12950_s0  ;;  %v9246_v11 = vld [vmem:[#allocation2 + $0x810] sm:$0xf]  ;;  %v8347_v17 = vor.u32 %v11796_v10, %v8346_v7 }
 0x1c0   :  { %4849 = vmatpush.bf16.msra.mxu0 %v8243_v46  ;;  %4863 = vmatmul.bf16.vlgmr.msrb.gmra.mxu1 %v13057_v55  ;;  %v11821_v46 = vld [vmem:[#allocation2 + $0x230] sm:$0xf0]  ;;  %v4567_v13 = vpop.f32.mrf.mxu0 }
 0x1c1   :  { %4920 = vmatpush.bf16.msra.mxu1 %v10547_v36  ;;  %v12071_v36 = vld [vmem:[#allocation2 + $0xa00] sm:$0xf0]  ;;  %v8447_v52 = vor.u32 %v11821_v46, %v8446_v45  ;;  %v12084_v13 = vld [vmem:[#allocation2 + $0xa6c] sm:$0xf] }
 0x1c2   :  { %4895 = vmatpush.bf16.msrb.mxu3 %v8847_v42  ;;  %v8848_v42 = vld [vmem:[#allocation2 + $0x554] sm:$0xf0]  ;;  %4876 = vmatmul.bf16.vlgmr.msrb.gmra.mxu2 %v13060_v59  ;;  %v9447_v62 = vor.u32 %v12071_v36, %v9446_v33  ;;  %v9146_v33 = vld [vmem:[#allocation2 + $0x748] sm:$0xf]  ;;  %v11996_v36 = vld [vmem:[#allocation2 + $0x7a8] sm:$0xf0] }
 0x1c3   :  { %4850 = vmatmul.bf16.vlgmr.msra.gmra.mxu0 %v13055_v49  ;;  %4940 = vmatpush.bf16.msra.mxu2 %v4036_v19  ;;  %v8851_v54 = vor.u32 %v11909_v16, %v8848_v42  ;;  %v4592_v19 = vadd.f32 %v4591_v44, %v842_v41  ;;  %v4604_v16 = vpop.f32.mrf.mxu2  ;;  %v8548_v42 = vld [vmem:[#allocation2 + $0x2fc] sm:$0xf0]  ;;  %v12171_v45 = vld [vmem:[#allocation2 + $0xd20] sm:$0xf0]  ;;  %v9147_v46 = vor.u32 %v11996_v36, %v9146_v33  ;;  %v12284_v33 = vld [vmem:[#allocation2 + $0x10ac] sm:$0xf] }
 0x1c4   :  { %4907 = vmatpush.bf16.msrb.mxu0 %v9747_v53  ;;  %v5395_v53 = vpop.permute.xlu0 %5394  ;;  %v9846_v44 = vld [vmem:[#allocation2 + $0xcc0] sm:$0xf]  ;;  %v10348_v36 = vld [vmem:[#allocation2 + $0x110c] sm:$0xf0] }
 0x1c5   :  { %4921 = vmatpush.bf16.msra.mxu1 %v10447_v58  ;;  %v12046_v58 = vld [vmem:[#allocation2 + $0x938] sm:$0xf0]  ;;  %v5397_v1 = vmax.f32 %v13185_v3, %v5395_v53  ;;  %v4554_v3 = vpop.f32.mrf.mxu3  ;;  %v13285_v30 = vadd.f32 %v4604_v16, %v4592_v19  ;;  %v8954_v41 = vld [vmem:[#allocation2 + $0x5c0] sm:$0xf]  ;;  %v8854_v19 = vld [vmem:[#allocation2 + $0x4f8] sm:$0xf] }
 0x1c6   :  { %4896 = vmatpush.bf16.msrb.mxu3 %v8747_v2  ;;  %v8748_v2 = vld [vmem:[#allocation2 + $0x48c] sm:$0xf0]  ;;  %v4593_v27 = vpop.f32.mrf.mxu1 }
 0x1c7   :  { %4946 = vmatpush.bf16.msrb.mxu2 %v8951_v32  ;;  %5399 = vrot.lane.b32.xlu2 %v5397_v1, %s12946_s17  ;;  %v8751_v12 = vor.u32 %v11884_v61, %v8748_v2  ;;  %v8651_v32 = vor.u32 %v11859_v47, %v8648_v48  ;;  %v11809_v61 = vld [vmem:[#allocation2 + $0x1d4] sm:$0xf]  ;;  %v8448_v1 = vld [vmem:[#allocation2 + $0x234] sm:$0xf0]  ;;  %v9651_v2 = vor.u32 %v12109_v51, %v9648_v28  ;;  %v11922_v27 = vld [vmem:[#allocation2 + $0x558] sm:$0xf0] }
 0x1c8   :  { %4908 = vmatpush.bf16.msrb.mxu0 %v9647_v14  ;;  %v9347_v14 = vor.u32 %v12046_v58, %v9346_v57  ;;  %v13287_v53 = vpop.f32.mrf.mxu0  ;;  %v11971_v57 = vld [vmem:[#allocation2 + $0x6e0] sm:$0xf0]  ;;  %v9847_v58 = vor.u32 %v12171_v45, %v9846_v44  ;;  %v12309_v47 = vld [vmem:[#allocation2 + $0x1174] sm:$0xf]  ;;  %v9348_v44 = vld [vmem:[#allocation2 + $0x93c] sm:$0xf0]  ;;  %v10351_v28 = vor.u32 %v12284_v33, %v10348_v36 }
 0x1c9   :  { %4922 = vmatpush.bf16.msra.mxu1 %v10347_v50  ;;  %10595 = vmatmul.msk.bf16.vlgmr.msra.gmra.mxu3 %vm3982_vm1, %v13068_v40  ;;  %v12021_v50 = vld [vmem:[#allocation2 + $0x870] sm:$0xf0]  ;;  %v11822_v33 = vld [vmem:[#allocation2 + $0x238] sm:$0xf0]  ;;  %v9454_v36 = vld [vmem:[#allocation2 + $0x9a8] sm:$0xf] }
 0x1ca   :  { %4897 = vmatpush.bf16.msrb.mxu3 %v8647_v18  ;;  %v9946_v18 = vld [vmem:[#allocation2 + $0xd88] sm:$0xf]  ;;  %v9247_v24 = vor.u32 %v12021_v50, %v9246_v11  ;;  %v8955_v50 = vor.u32 %v11947_v6, %v8954_v41  ;;  %v12122_v41 = vld [vmem:[#allocation2 + $0xb98] sm:$0xf0]  ;;  %v12009_v6 = vld [vmem:[#allocation2 + $0x814] sm:$0xf] }
 0x1cb   :  { %4947 = vmatpush.bf16.msrb.mxu2 %v8851_v54  ;;  %v9947_v38 = vor.u32 %v12196_v35, %v9946_v18  ;;  %v4606_v3 = vpop.f32.mrf.mxu2  ;;  %v10448_v18 = vld [vmem:[#allocation2 + $0x11d4] sm:$0xf0]  ;;  %v12059_v35 = vld [vmem:[#allocation2 + $0x9a4] sm:$0xf] }
 0x1cc   :  { %4909 = vmatpush.bf16.msrb.mxu0 %v9547_v29  ;;  %v9748_v29 = vld [vmem:[#allocation2 + $0xc5c] sm:$0xf0]  ;;  %v12234_v3 = vld [vmem:[#allocation2 + $0xf1c] sm:$0xf] }
 0x1cd   :  { %4923 = vmatpush.bf16.msra.mxu1 %v10247_v9  ;;  %v8247_v9 = vor.u32 %v11771_v22, %v8246_v21  ;;  %v9751_v43 = vor.u32 %v12134_v26, %v9748_v29  ;;  %v9448_v21 = vld [vmem:[#allocation2 + $0xa04] sm:$0xf0]  ;;  %v11759_v26 = vld [vmem:[#allocation2 + $0x44] sm:$0xf]  ;;  %v10451_v29 = vor.u32 %v12309_v47, %v10448_v18 }
 0x1ce   :  { %4898 = vmatpush.bf16.msrb.mxu3 %v8547_v60  ;;  %v11834_v60 = vld [vmem:[#allocation2 + $0x29c] sm:$0xf]  ;;  %v9451_v16 = vor.u32 %v12059_v35, %v9448_v21  ;;  %v11847_v47 = vld [vmem:[#allocation2 + $0x300] sm:$0xf0] }
 0x1cf   :  { %4948 = vmatpush.bf16.msrb.mxu2 %v8751_v12  ;;  %v8551_v54 = vor.u32 %v11834_v60, %v8548_v42  ;;  %v8451_v12 = vor.u32 %v11809_v61, %v8448_v1  ;;  %v9754_v60 = vld [vmem:[#allocation2 + $0xc00] sm:$0xf]  ;;  %v12147_v42 = vld [vmem:[#allocation2 + $0xc60] sm:$0xf0]  ;;  %v8654_v1 = vld [vmem:[#allocation2 + $0x368] sm:$0xf] }
 0x1d0   :  { %4910 = vmatpush.bf16.msrb.mxu0 %v9447_v62  ;;  %v3374_v62 = vpack.c.b16 %v2749_v31, %v2749_v31  ;;  %v4632_v22 = vpop.f32.mrf.mxu0  ;;  %v8855_v31 = vor.u32 %v11922_v27, %v8854_v19  ;;  %v12097_v19 = vld [vmem:[#allocation2 + $0xad0] sm:$0xf0]  ;;  %v11984_v27 = vld [vmem:[#allocation2 + $0x74c] sm:$0xf] }
 0x1d1   :  { %4924 = vmatpush.bf16.msra.mxu1 %v10147_v56  ;;  %v9046_v56 = vld [vmem:[#allocation2 + $0x680] sm:$0xf] }
 0x1d2   :  { %4899 = vmatpush.bf16.msrb.mxu3 %v8447_v52  ;;  %v12334_v52 = vld [vmem:[#allocation2 + $0x123c] sm:$0xf]  ;;  %v9047_v7 = vor.u32 %v11971_v57, %v9046_v56  ;;  %v4039_v10 = vsel %vm3986_vm0, %v3374_v62, 0  ;;  %10596 = vmatmul.msk.bf16.vlgmr.msra.gmra.mxu2 %vm3982_vm1, %v13068_v40  ;;  %v10248_v56 = vld [vmem:[#allocation2 + $0x1044] sm:$0xf0] }
 0x1d3   :  { %4949 = vmatpush.bf16.msrb.mxu2 %v8651_v32  ;;  %v10551_v11 = vor.u32 %v12334_v52, %v10548_v4  ;;  %v8248_v32 = vld [vmem:[#allocation2 + $0xa4] sm:$0xf0]  ;;  %v11872_v52 = vld [vmem:[#allocation2 + $0x3c8] sm:$0xf0] }
 0x1d4   :  { %4911 = vmatpush.bf16.msrb.mxu0 %v9347_v14  ;;  %v9548_v14 = vld [vmem:[#allocation2 + $0xacc] sm:$0xf0]  ;;  %v8251_v45 = vor.u32 %v11759_v26, %v8248_v32  ;;  %v10048_v26 = vld [vmem:[#allocation2 + $0xeb4] sm:$0xf0] }
 0x1d5   :  { %4925 = vmatpush.bf16.msra.mxu1 %v10047_v15  ;;  %v11784_v15 = vld [vmem:[#allocation2 + $0x10c] sm:$0xf]  ;;  %v9551_v48 = vor.u32 %v12084_v13, %v9548_v14  ;;  %v8454_v32 = vld [vmem:[#allocation2 + $0x1d8] sm:$0xf] }
 0x1d6   :  { %4900 = vmatpush.bf16.msrb.mxu3 %v8347_v17  ;;  %v8348_v17 = vld [vmem:[#allocation2 + $0x16c] sm:$0xf0] }
 0x1d7   :  { %4950 = vmatpush.bf16.msrb.mxu2 %v8551_v54  ;;  %v12259_v54 = vld [vmem:[#allocation2 + $0xfe4] sm:$0xf] }
 0x1d8   :  { %4912 = vmatpush.bf16.msrb.mxu0 %v9247_v24  ;;  %v8351_v24 = vor.u32 %v11784_v15, %v8348_v17  ;;  %v4617_v51 = vpop.f32.mrf.mxu3  ;;  %v8554_v17 = vld [vmem:[#allocation2 + $0x2a0] sm:$0xf] }
 0x1d9   :  { %4926 = vmatpush.bf16.msra.mxu1 %v9947_v38  ;;  %v8754_v38 = vld [vmem:[#allocation2 + $0x430] sm:$0xf]  ;;  %v4618_v57 = vadd.f32 %v4617_v51, %v13285_v30  ;;  %v4656_v4 = vpop.f32.mrf.mxu1  ;;  %v8655_v30 = vor.u32 %v11872_v52, %v8654_v1  ;;  %v8555_v22 = vor.u32 %v11847_v47, %v8554_v17  ;;  %v12184_v51 = vld [vmem:[#allocation2 + $0xd8c] sm:$0xf]  ;;  %v9254_v17 = vld [vmem:[#allocation2 + $0x818] sm:$0xf] }
 0x1da   :  { %4901 = vmatpush.bf16.msrb.mxu3 %v8247_v9  ;;  %v11897_v9 = vld [vmem:[#allocation2 + $0x490] sm:$0xf0] }
 0x1db   :  { %4951 = vmatpush.bf16.msrb.mxu2 %v8451_v12  ;;  %v8755_v62 = vor.u32 %v11897_v9, %v8754_v38  ;;  %v13298_v13 = vadd.f32 %v13287_v53, %v4618_v57  ;;  %v10251_v12 = vor.u32 %v12259_v54, %v10248_v56  ;;  %v9148_v53 = vld [vmem:[#allocation2 + $0x7ac] sm:$0xf0]  ;;  %v12072_v38 = vld [vmem:[#allocation2 + $0xa08] sm:$0xf0]  ;;  %v11959_v9 = vld [vmem:[#allocation2 + $0x684] sm:$0xf] }
 0x1dc   :  { %4913 = vmatpush.bf16.msrb.mxu0 %v9147_v46  ;;  %v843_v46 = vperm.slane %v13243_v23, 3  ;;  %v9455_v54 = vor.u32 %v12072_v38, %v9454_v36  ;;  %v9948_v57 = vld [vmem:[#allocation2 + $0xdec] sm:$0xf0]  ;;  %v8956_v36 = vld [vmem:[#allocation2 + $0x624] sm:$0xf0] }
 0x1dd   :  { %4902 = vmatmul.bf16.vlgmr.msrb.gmra.mxu3 %v13055_v49  ;;  %4927 = vmatpush.bf16.msra.mxu1 %v9847_v58  ;;  %v9755_v58 = vor.u32 %v12147_v42, %v9754_v60  ;;  %v9048_v60 = vld [vmem:[#allocation2 + $0x6e4] sm:$0xf0]  ;;  %v11997_v38 = vld [vmem:[#allocation2 + $0x7b0] sm:$0xf0] }
 0x1de   :  { %4959 = vmatpush.bf16.msra.mxu3 %v9751_v43  ;;  %v12034_v43 = vld [vmem:[#allocation2 + $0x8dc] sm:$0xf]  ;;  %v9051_v56 = vor.u32 %v11959_v9, %v9048_v60  ;;  %v9656_v60 = vld [vmem:[#allocation2 + $0xb9c] sm:$0xf0] }
 0x1df   :  { %4952 = vmatpush.bf16.msrb.mxu2 %v8351_v24  ;;  %v9351_v61 = vor.u32 %v12034_v43, %v9348_v44  ;;  %v12209_v24 = vld [vmem:[#allocation2 + $0xe54] sm:$0xf]  ;;  %v10554_v43 = vld [vmem:[#allocation2 + $0x1240] sm:$0xf]  ;;  %v12347_v44 = vld [vmem:[#allocation2 + $0x12a0] sm:$0xf0] }
 0x1e0   :  { %4914 = vmatpush.bf16.msrb.mxu0 %v9047_v7  ;;  %4928 = vmatmul.bf16.vlgmr.msra.gmra.mxu1 %v13060_v59  ;;  %v9248_v7 = vld [vmem:[#allocation2 + $0x874] sm:$0xf0]  ;;  %v4619_v35 = vpop.f32.mrf.mxu3  ;;  %v10555_v52 = vor.u32 %v12347_v44, %v10554_v43  ;;  %v12110_v9 = vld [vmem:[#allocation2 + $0xb3c] sm:$0xf]  ;;  %v10254_v43 = vld [vmem:[#allocation2 + $0xfe8] sm:$0xf] }
 0x1e1   :  { %4992 = vmatpush.bf16.msrb.mxu1 %v4039_v10  ;;  %v4643_v10 = vpop.f32.mrf.mxu0  ;;  %v9251_v15 = vor.u32 %v12009_v6, %v9248_v7  ;;  %v12322_v6 = vld [vmem:[#allocation2 + $0x11d8] sm:$0xf0]  ;;  %v12297_v35 = vld [vmem:[#allocation2 + $0x1110] sm:$0xf0]  ;;  %v12272_v44 = vld [vmem:[#allocation2 + $0x1048] sm:$0xf0] }
 0x1e2   :  { %4960 = vmatpush.bf16.msra.mxu3 %v9651_v2  ;;  %v9654_v2 = vld [vmem:[#allocation2 + $0xb38] sm:$0xf]  ;;  %v4644_v14 = vadd.f32 %v4643_v10, %v843_v46  ;;  %v8455_v46 = vor.u32 %v11822_v33, %v8454_v32  ;;  %v9154_v32 = vld [vmem:[#allocation2 + $0x750] sm:$0xf]  ;;  %v11935_v33 = vld [vmem:[#allocation2 + $0x5c4] sm:$0xf] }
 0x1e3   :  { %4915 = vmatmul.bf16.vlgmr.msrb.gmra.mxu0 %v13057_v55  ;;  %4953 = vmatpush.bf16.msrb.mxu2 %v8251_v45  ;;  %v10051_v45 = vor.u32 %v12209_v24, %v10048_v26 }
 0x1e4   :  { %4972 = vmatpush.bf16.msra.mxu0 %v10551_v11  ;;  %v10148_v11 = vld [vmem:[#allocation2 + $0xf7c] sm:$0xf0]  ;;  %v4657_v18 = vadd.f32 %v4656_v4, %v4644_v14  ;;  %v12047_v4 = vld [vmem:[#allocation2 + $0x940] sm:$0xf0]  ;;  %v9951_v14 = vor.u32 %v12184_v51, %v9948_v57  ;;  %v9054_v51 = vld [vmem:[#allocation2 + $0x688] sm:$0xf] }
 0x1e5   :  { %4998 = vmatpush.bf16.msra.mxu1 %v8955_v50  ;;  %v9655_v50 = vor.u32 %v12122_v41, %v9654_v2  ;;  %v10151_v21 = vor.u32 %v12234_v3, %v10148_v11  ;;  %v9354_v2 = vld [vmem:[#allocation2 + $0x8e0] sm:$0xf]  ;;  %v10454_v41 = vld [vmem:[#allocation2 + $0x1178] sm:$0xf]  ;;  %v9848_v3 = vld [vmem:[#allocation2 + $0xd24] sm:$0xf0] }
 0x1e6   :  { %4961 = vmatpush.bf16.msra.mxu3 %v9551_v48  ;;  %v9554_v48 = vld [vmem:[#allocation2 + $0xa70] sm:$0xf]  ;;  %4954 = vmatmul.bf16.vlgmr.msrb.gmra.mxu2 %v13055_v49  ;;  %v9355_v11 = vor.u32 %v12047_v4, %v9354_v2  ;;  %v11910_v57 = vld [vmem:[#allocation2 + $0x4fc] sm:$0xf]  ;;  %v12335_v2 = vld [vmem:[#allocation2 + $0x1244] sm:$0xf] }
 0x1e7   :  { %5011 = vmatpush.bf16.msra.mxu2 %v9755_v58  ;;  %v8354_v58 = vld [vmem:[#allocation2 + $0x110] sm:$0xf]  ;;  %v10556_v4 = vld [vmem:[#allocation2 + $0x12a4] sm:$0xf0] }
 0x1e8   :  { %4973 = vmatpush.bf16.msra.mxu0 %v10451_v29  ;;  %v9555_v29 = vor.u32 %v12097_v19, %v9554_v48  ;;  %v4682_v10 = vpop.f32.mrf.mxu3  ;;  %v10455_v48 = vor.u32 %v12322_v6, %v10454_v41  ;;  %v12135_v19 = vld [vmem:[#allocation2 + $0xc04] sm:$0xf]  ;;  %v10154_v41 = vld [vmem:[#allocation2 + $0xf20] sm:$0xf] }
 0x1e9   :  { %4999 = vmatpush.bf16.msra.mxu1 %v8855_v31  ;;  %v9151_v31 = vor.u32 %v11984_v27, %v9148_v53  ;;  %v4645_v42 = vpop.f32.mrf.mxu0  ;;  %v9756_v27 = vld [vmem:[#allocation2 + $0xc64] sm:$0xf0]  ;;  %v10354_v53 = vld [vmem:[#allocation2 + $0x10b0] sm:$0xf]  ;;  %v12247_v6 = vld [vmem:[#allocation2 + $0xf80] sm:$0xf0] }
 0x1ea   :  { %4962 = vmatpush.bf16.msra.mxu3 %v9451_v16  ;;  %v4658_v16 = vpop.f32.mrf.mxu1 }
 0x1eb   :  { %5012 = vmatpush.bf16.msra.mxu2 %v9655_v50  ;;  %v8254_v50 = vld [vmem:[#allocation2 + $0x48] sm:$0xf]  ;;  %v10355_v16 = vor.u32 %v12297_v35, %v10354_v53  ;;  %v10456_v53 = vld [vmem:[#allocation2 + $0x11dc] sm:$0xf0]  ;;  %v10054_v35 = vld [vmem:[#allocation2 + $0xe58] sm:$0xf] }
 0x1ec   :  { %4974 = vmatpush.bf16.msra.mxu0 %v10351_v28  ;;  %v13303_v28 = vld [vmem:[#allocation2 + $0x1308] sm:$0xff] }
 0x1ed   :  { %5000 = vmatpush.bf16.msra.mxu1 %v8755_v62  ;;  %v4669_v62 = vpop.f32.mrf.mxu2  ;;  %v2750_v7 = vunpack.c.l.b16 %v13303_v28 }
 0x1ee   :  { %4963 = vmatpush.bf16.msra.mxu3 %v9351_v61  ;;  %v11797_v61 = vld [vmem:[#allocation2 + $0x170] sm:$0xf0]  ;;  %v4670_v1 = vadd.f32 %v4669_v62, %v4657_v18  ;;  %v12022_v18 = vld [vmem:[#allocation2 + $0x878] sm:$0xf0]  ;;  %v9155_v62 = vor.u32 %v11997_v38, %v9154_v32 }
 0x1ef   :  { %5013 = vmatpush.bf16.msra.mxu2 %v9555_v29  ;;  %v9255_v29 = vor.u32 %v12022_v18, %v9254_v17  ;;  %v10155_v17 = vor.u32 %v12247_v6, %v10154_v41  ;;  %v9456_v18 = vld [vmem:[#allocation2 + $0xa0c] sm:$0xf0]  ;;  %v12285_v38 = vld [vmem:[#allocation2 + $0x10b4] sm:$0xf]  ;;  %v9854_v6 = vld [vmem:[#allocation2 + $0xcc8] sm:$0xf] }
 0x1f0   :  { %4975 = vmatpush.bf16.msra.mxu0 %v10251_v12  ;;  %10597 = vmatmul.msk.bf16.vlgmr.msrb.gmra.mxu1 %vm3982_vm1, %v13068_v40  ;;  %v8355_v12 = vor.u32 %v11797_v61, %v8354_v58  ;;  %v13306_v47 = vadd.f32 %v4682_v10, %v4670_v1  ;;  %v8856_v58 = vld [vmem:[#allocation2 + $0x55c] sm:$0xf0]  ;;  %v10255_v61 = vor.u32 %v12272_v44, %v10254_v43  ;;  %v12085_v1 = vld [vmem:[#allocation2 + $0xa74] sm:$0xf]  ;;  %v10256_v41 = vld [vmem:[#allocation2 + $0x104c] sm:$0xf0] }
 0x1f1   :  { %5001 = vmatpush.bf16.msra.mxu1 %v8655_v30  ;;  %v12159_v30 = vld [vmem:[#allocation2 + $0xcc4] sm:$0xf]  ;;  %v12197_v43 = vld [vmem:[#allocation2 + $0xdf0] sm:$0xf0] }
 0x1f2   :  { %4964 = vmatpush.bf16.msra.mxu3 %v9251_v15  ;;  %v11772_v15 = vld [vmem:[#allocation2 + $0xa8] sm:$0xf0] }
 0x1f3   :  { %5014 = vmatpush.bf16.msra.mxu2 %v9455_v54  ;;  %v8255_v24 = vor.u32 %v11772_v15, %v8254_v50  ;;  %v9659_v54 = vor.u32 %v12110_v9, %v9656_v60  ;;  %v10559_v15 = vor.u32 %v12335_v2, %v10556_v4  ;;  %v10356_v60 = vld [vmem:[#allocation2 + $0x1114] sm:$0xf0]  ;;  %v12260_v2 = vld [vmem:[#allocation2 + $0xfec] sm:$0xf] }
 0x1f4   :  { %4976 = vmatpush.bf16.msra.mxu0 %v10151_v21  ;;  %v3375_v21 = vpack.c.b16 %v2750_v7, %v2750_v7  ;;  %v8859_v7 = vor.u32 %v11910_v57, %v8856_v58  ;;  %v10359_v58 = vor.u32 %v12285_v38, %v10356_v60  ;;  %v10056_v38 = vld [vmem:[#allocation2 + $0xebc] sm:$0xf0]  ;;  %v12348_v60 = vld [vmem:[#allocation2 + $0x12a8] sm:$0xf0] }
 0x1f5   :  { %5002 = vmatpush.bf16.msra.mxu1 %v8555_v22  ;;  %v9851_v22 = vor.u32 %v12159_v30, %v9848_v3  ;;  %v4671_v26 = vpop.f32.mrf.mxu2  ;;  %v11885_v3 = vld [vmem:[#allocation2 + $0x434] sm:$0xf] }
 0x1f6   :  { %4965 = vmatpush.bf16.msra.mxu3 %v9151_v31  ;;  %v9759_v31 = vor.u32 %v12135_v19, %v9756_v27  ;;  %v4042_v42 = vsel %vm3986_vm0, %v3375_v21, 0  ;;  %v12310_v19 = vld [vmem:[#allocation2 + $0x117c] sm:$0xf] }
 0x1f7   :  { %5015 = vmatpush.bf16.msra.mxu2 %v9355_v11  ;;  %v8756_v11 = vld [vmem:[#allocation2 + $0x494] sm:$0xf0]  ;;  %v12222_v21 = vld [vmem:[#allocation2 + $0xeb8] sm:$0xf0]  ;;  %v10459_v32 = vor.u32 %v12310_v19, %v10456_v53  ;;  %v10156_v19 = vld [vmem:[#allocation2 + $0xf84] sm:$0xf0] }
 0x1f8   :  { %4977 = vmatpush.bf16.msra.mxu0 %v10051_v45  ;;  %v4684_v45 = vpop.f32.mrf.mxu3  ;;  %v11948_v53 = vld [vmem:[#allocation2 + $0x628] sm:$0xf0] }
 0x1f9   :  { %5003 = vmatpush.bf16.msra.mxu1 %v8455_v46  ;;  %v8959_v46 = vor.u32 %v11935_v33, %v8956_v36  ;;  %v4721_v10 = vpop.f32.mrf.mxu1  ;;  %v10055_v33 = vor.u32 %v12222_v21, %v10054_v35  ;;  %v12035_v36 = vld [vmem:[#allocation2 + $0x8e4] sm:$0xf]  ;;  %v2751_v45 = vunpack.c.h.b16 %v13303_v28 }
 0x1fa   :  { %4966 = vmatpush.bf16.msra.mxu3 %v9051_v56  ;;  %v11972_v56 = vld [vmem:[#allocation2 + $0x6e8] sm:$0xf0] }
 0x1fb   :  { %5016 = vmatpush.bf16.msra.mxu2 %v9255_v29  ;;  %v11860_v29 = vld [vmem:[#allocation2 + $0x36c] sm:$0xf] }
 0x1fc   :  { %4978 = vmatpush.bf16.msra.mxu0 %v9951_v14  ;;  %v9055_v14 = vor.u32 %v11972_v56, %v9054_v51  ;;  %v4708_v27 = vpop.f32.mrf.mxu0  ;;  %v8556_v56 = vld [vmem:[#allocation2 + $0x304] sm:$0xf0] }
 0x1fd   :  { %5004 = vmatpush.bf16.msra.mxu1 %v8355_v12  ;;  %4967 = vmatmul.bf16.vlgmr.msra.gmra.mxu3 %v13057_v55  ;;  %v844_v12 = vperm.slane %v13243_v23, 4  ;;  %v4734_v50 = vpop.f32.mrf.mxu2 }
 0x1fe   :  { %5024 = vmatpush.bf16.msrb.mxu3 %v10555_v52  ;;  %v9556_v52 = vld [vmem:[#allocation2 + $0xad4] sm:$0xf0] }
 0x1ff   :  { %5017 = vmatpush.bf16.msra.mxu2 %v9155_v62  ;;  %v9559_v30 = vor.u32 %v12085_v1, %v9556_v52  ;;  %v12010_v1 = vld [vmem:[#allocation2 + $0x81c] sm:$0xf]  ;;  %v9256_v52 = vld [vmem:[#allocation2 + $0x87c] sm:$0xf0] }
 0x200   :  { %4979 = vmatpush.bf16.msra.mxu0 %v9851_v22  ;;  %v4695_v22 = vpop.f32.mrf.mxu3 }
 0x201   :  { %5005 = vmatpush.bf16.msra.mxu1 %v8255_v24  ;;  %v8759_v24 = vor.u32 %v11885_v3, %v8756_v11  ;;  %v4696_v26 = vadd.f32 %v4695_v22, %v844_v12  ;;  %v11810_v3 = vld [vmem:[#allocation2 + $0x1dc] sm:$0xf]  ;;  %v8456_v11 = vld [vmem:[#allocation2 + $0x23c] sm:$0xf0] }
 0x202   :  { %5025 = vmatpush.bf16.msrb.mxu3 %v10455_v48  ;;  %v12060_v48 = vld [vmem:[#allocation2 + $0x9ac] sm:$0xf]  ;;  %v8459_v35 = vor.u32 %v11810_v3, %v8456_v11 }
 0x203   :  { %4980 = vmatmul.bf16.vlgmr.msra.gmra.mxu0 %v13060_v59  ;;  %5018 = vmatpush.bf16.msra.mxu2 %v9055_v14  ;;  %v9459_v23 = vor.u32 %v12060_v48, %v9456_v18  ;;  %v4709_v9 = vadd.f32 %v4708_v27, %v4696_v26  ;;  %v9156_v48 = vld [vmem:[#allocation2 + $0x7b4] sm:$0xf0]  ;;  %v12235_v18 = vld [vmem:[#allocation2 + $0xf24] sm:$0xf]  ;;  %v8962_v27 = vld [vmem:[#allocation2 + $0x5c8] sm:$0xf] }
 0x204   :  { %5044 = vmatpush.bf16.msrb.mxu0 %v4042_v42  ;;  %5006 = vmatmul.bf16.vlgmr.msra.gmra.mxu1 %v13055_v49  ;;  %v9954_v42 = vld [vmem:[#allocation2 + $0xd90] sm:$0xf]  ;;  %v4710_v28 = vpop.f32.mrf.mxu0  ;;  %v8356_v26 = vld [vmem:[#allocation2 + $0x174] sm:$0xf0] }
 0x205   :  { %5063 = vmatpush.bf16.msrb.mxu1 %v9759_v31  ;;  %v8656_v31 = vld [vmem:[#allocation2 + $0x3cc] sm:$0xf0]  ;;  %v4722_v51 = vadd.f32 %v4721_v10, %v4709_v9  ;;  %v4736_v57 = vpop.f32.mrf.mxu2  ;;  %v3376_v10 = vpack.c.b16 %v2751_v45, %v2751_v45  ;;  %v10562_v9 = vld [vmem:[#allocation2 + $0x1248] sm:$0xf]  ;;  %v8762_v28 = vld [vmem:[#allocation2 + $0x438] sm:$0xf] }
 0x206   :  { %5026 = vmatpush.bf16.msrb.mxu3 %v10355_v16  ;;  %v9356_v16 = vld [vmem:[#allocation2 + $0x944] sm:$0xf0]  ;;  %v8659_v44 = vor.u32 %v11860_v29, %v8656_v31  ;;  %5019 = vmatmul.bf16.vlgmr.msra.gmra.mxu2 %v13057_v55  ;;  %v10159_v29 = vor.u32 %v12235_v18, %v10156_v19  ;;  %v8963_v31 = vor.u32 %v11948_v53, %v8962_v27  ;;  %v13326_v45 = vld [vmem:[#allocation2 + $0x1310] sm:$0xff]  ;;  %v10362_v53 = vld [vmem:[#allocation2 + $0x10b8] sm:$0xf] }
 0x207   :  { %5076 = vmatpush.bf16.msrb.mxu2 %v10559_v15  ;;  %v9359_v62 = vor.u32 %v12035_v36, %v9356_v16  ;;  %v13315_v4 = vadd.f32 %v4734_v50, %v4722_v51  ;;  %v10259_v15 = vor.u32 %v12260_v2, %v10256_v41  ;;  %v4045_v21 = vsel %vm3986_vm0, %v3376_v10, 0  ;;  %v12210_v36 = vld [vmem:[#allocation2 + $0xe5c] sm:$0xf]  ;;  %v11760_v51 = vld [vmem:[#allocation2 + $0x4c] sm:$0xf] }
 0x208   :  { %5050 = vmatpush.bf16.msra.mxu0 %v8959_v46  ;;  %v4723_v46 = vpop.f32.mrf.mxu1  ;;  %v4697_v12 = vpop.f32.mrf.mxu3  ;;  %v12185_v57 = vld [vmem:[#allocation2 + $0xd94] sm:$0xf]  ;;  %v10462_v2 = vld [vmem:[#allocation2 + $0x1180] sm:$0xf]  ;;  %v12323_v41 = vld [vmem:[#allocation2 + $0x11e0] sm:$0xf0] }
 0x209   :  { %5064 = vmatpush.bf16.msrb.mxu1 %v9659_v54  ;;  %v11835_v54 = vld [vmem:[#allocation2 + $0x2a4] sm:$0xf]  ;;  %5452 = vrot.lane.b32.xlu1 %v13315_v4, %s12950_s0  ;;  %v13330_v12 = vld [vmem:[#allocation4 + $0x8] sm:$0xff] }
 0x20a   :  { %5027 = vmatpush.bf16.msrb.mxu3 %v10255_v61  ;;  %v9955_v61 = vor.u32 %v12197_v43, %v9954_v42  ;;  %v8559_v14 = vor.u32 %v11835_v54, %v8556_v56  ;;  %v8862_v43 = vld [vmem:[#allocation2 + $0x500] sm:$0xf]  ;;  %v10059_v54 = vor.u32 %v12210_v36, %v10056_v38  ;;  %v10563_v56 = vor.u32 %v12348_v60, %v10562_v9  ;;  %v9856_v27 = vld [vmem:[#allocation2 + $0xd2c] sm:$0xf0]  ;;  %v11936_v36 = vld [vmem:[#allocation2 + $0x5cc] sm:$0xf] }
 0x20b   :  { %5077 = vmatpush.bf16.msrb.mxu2 %v10459_v32  ;;  %v11960_v32 = vld [vmem:[#allocation2 + $0x68c] sm:$0xf] }
 0x20c   :  { %5051 = vmatpush.bf16.msra.mxu0 %v8859_v7  ;;  %v12172_v7 = vld [vmem:[#allocation2 + $0xd28] sm:$0xf0] }
 0x20d   :  { %5065 = vmatpush.bf16.msrb.mxu1 %v9559_v30  ;;  %v9259_v30 = vor.u32 %v12010_v1, %v9256_v52  ;;  %v9855_v50 = vor.u32 %v12172_v7, %v9854_v6  ;;  %v13324_v16 = vpop.f32.mrf.mxu2  ;;  %v9956_v52 = vld [vmem:[#allocation2 + $0xdf4] sm:$0xf0]  ;;  %v2752_v6 = vunpack.c.l.b16 %v13326_v45 }
 0x20e   :  { %5028 = vmatpush.bf16.msrb.mxu3 %v10155_v17  ;;  %v11985_v17 = vld [vmem:[#allocation2 + $0x754] sm:$0xf]  ;;  %v9959_v11 = vor.u32 %v12185_v57, %v9956_v52 }
 0x20f   :  { %5078 = vmatpush.bf16.msrb.mxu2 %v10359_v58  ;;  %v9159_v22 = vor.u32 %v11985_v17, %v9156_v48  ;;  %v9762_v58 = vld [vmem:[#allocation2 + $0xc08] sm:$0xf]  ;;  %v9662_v17 = vld [vmem:[#allocation2 + $0xb40] sm:$0xf]  ;;  %v12123_v48 = vld [vmem:[#allocation2 + $0xba0] sm:$0xf0] }
 0x210   :  { %5052 = vmatpush.bf16.msra.mxu0 %v8759_v24  ;;  %v11785_v24 = vld [vmem:[#allocation2 + $0x114] sm:$0xf] }
 0x211   :  { %5066 = vmatpush.bf16.msrb.mxu1 %v9459_v23  ;;  %v13322_v23 = vpop.f32.mrf.mxu1  ;;  %v8359_v42 = vor.u32 %v11785_v24, %v8356_v26  ;;  %v11873_v24 = vld [vmem:[#allocation2 + $0x3d0] sm:$0xf0]  ;;  %v9663_v26 = vor.u32 %v12123_v48, %v9662_v17 }
 0x212   :  { %5029 = vmatpush.bf16.msrb.mxu3 %v10055_v33  ;;  %v9056_v33 = vld [vmem:[#allocation2 + $0x6ec] sm:$0xf0] }
 0x213   :  { %10598 = vmatmul.msk.bf16.vlgmr.msrb.gmra.mxu0 %vm3982_vm1, %v13068_v40  ;;  %5079 = vmatpush.bf16.msrb.mxu2 %v10259_v15  ;;  %v9059_v46 = vor.u32 %v11960_v32, %v9056_v33  ;;  %v10463_v15 = vor.u32 %v12323_v41, %v10462_v2  ;;  %v9562_v32 = vld [vmem:[#allocation2 + $0xa78] sm:$0xf]  ;;  %v12098_v33 = vld [vmem:[#allocation2 + $0xad8] sm:$0xf0]  ;;  %v11911_v41 = vld [vmem:[#allocation2 + $0x504] sm:$0xf] }
 0x214   :  { %5053 = vmatpush.bf16.msra.mxu0 %v8659_v44  ;;  %v11923_v44 = vld [vmem:[#allocation2 + $0x560] sm:$0xf0] }
 0x215   :  { %5067 = vmatpush.bf16.msrb.mxu1 %v9359_v62  ;;  %v8256_v62 = vld [vmem:[#allocation2 + $0xac] sm:$0xf0]  ;;  %v8863_v1 = vor.u32 %v11923_v44, %v8862_v43  ;;  %v4749_v18 = vpop.f32.mrf.mxu2  ;;  %v12273_v44 = vld [vmem:[#allocation2 + $0x1050] sm:$0xf0] }
 0x216   :  { %5030 = vmatpush.bf16.msrb.mxu3 %v9955_v61  ;;  %v12148_v61 = vld [vmem:[#allocation2 + $0xc68] sm:$0xf0]  ;;  %v8259_v7 = vor.u32 %v11760_v51, %v8256_v62  ;;  %v10262_v43 = vld [vmem:[#allocation2 + $0xff0] sm:$0xf] }
 0x217   :  { %5080 = vmatpush.bf16.msrb.mxu2 %v10159_v29  ;;  %v9763_v10 = vor.u32 %v12148_v61, %v9762_v58  ;;  %v11848_v51 = vld [vmem:[#allocation2 + $0x308] sm:$0xf0]  ;;  %v9462_v58 = vld [vmem:[#allocation2 + $0x9b0] sm:$0xf]  ;;  %v12073_v61 = vld [vmem:[#allocation2 + $0xa10] sm:$0xf0]  ;;  %v10263_v52 = vor.u32 %v12273_v44, %v10262_v43 }
 0x218   :  { %5054 = vmatpush.bf16.msra.mxu0 %v8559_v14  ;;  %v11898_v14 = vld [vmem:[#allocation2 + $0x498] sm:$0xf0]  ;;  %v8262_v44 = vld [vmem:[#allocation2 + $0x50] sm:$0xf] }
 0x219   :  { %5068 = vmatpush.bf16.msrb.mxu1 %v9259_v30  ;;  %v845_v30 = vperm.slane %v13330_v12, 5  ;;  %v4788_v3 = vpop.f32.mrf.mxu1  ;;  %v8763_v19 = vor.u32 %v11898_v14, %v8762_v28  ;;  %v12248_v28 = vld [vmem:[#allocation2 + $0xf88] sm:$0xf0]  ;;  %v8462_v14 = vld [vmem:[#allocation2 + $0x1e0] sm:$0xf] }
 0x21a   :  { %5031 = vmatpush.bf16.msrb.mxu3 %v9855_v50  ;;  %v12160_v50 = vld [vmem:[#allocation2 + $0xccc] sm:$0xf]  ;;  %v9463_v3 = vor.u32 %v12073_v61, %v9462_v58  ;;  %v12198_v43 = vld [vmem:[#allocation2 + $0xdf8] sm:$0xf0]  ;;  %v9162_v58 = vld [vmem:[#allocation2 + $0x758] sm:$0xf] }
 0x21b   :  { %5081 = vmatpush.bf16.msrb.mxu2 %v10059_v54  ;;  %v9859_v29 = vor.u32 %v12160_v50, %v9856_v27  ;;  %v4748_v38 = vadd.f32 %v13324_v16, %v845_v30  ;;  %v9563_v54 = vor.u32 %v12098_v33, %v9562_v32  ;;  %v12048_v50 = vld [vmem:[#allocation2 + $0x948] sm:$0xf0]  ;;  %v8764_v27 = vld [vmem:[#allocation2 + $0x49c] sm:$0xf0]  ;;  %v12023_v32 = vld [vmem:[#allocation2 + $0x880] sm:$0xf0] }
 0x21c   :  { %5055 = vmatpush.bf16.msra.mxu0 %v8459_v35  ;;  %v12298_v35 = vld [vmem:[#allocation2 + $0x1118] sm:$0xf0]  ;;  %v4773_v62 = vpop.f32.mrf.mxu0 }
 0x21d   :  { %5069 = vmatpush.bf16.msrb.mxu1 %v9159_v22  ;;  %5032 = vmatmul.bf16.vlgmr.msrb.gmra.mxu3 %v13060_v59  ;;  %v8662_v22 = vld [vmem:[#allocation2 + $0x370] sm:$0xf]  ;;  %v11998_v61 = vld [vmem:[#allocation2 + $0x7b8] sm:$0xf0] }
 0x21e   :  { %5096 = vmatpush.bf16.msra.mxu3 %v4045_v21  ;;  %v3377_v21 = vpack.c.b16 %v2752_v6, %v2752_v6  ;;  %v8663_v9 = vor.u32 %v11873_v24, %v8662_v22  ;;  %v8864_v6 = vld [vmem:[#allocation2 + $0x564] sm:$0xf0]  ;;  %v11798_v22 = vld [vmem:[#allocation2 + $0x178] sm:$0xf0] }
 0x21f   :  { %5082 = vmatpush.bf16.msrb.mxu2 %v9959_v11  ;;  %v8867_v11 = vor.u32 %v11911_v41, %v8864_v6  ;;  %v8564_v41 = vld [vmem:[#allocation2 + $0x30c] sm:$0xf0] }
 0x220   :  { %5056 = vmatpush.bf16.msra.mxu0 %v8359_v42  ;;  %v4048_v60 = vsel %vm3986_vm0, %v3377_v21, 0  ;;  %v8964_v42 = vld [vmem:[#allocation2 + $0x62c] sm:$0xf0]  ;;  %v8362_v21 = vld [vmem:[#allocation2 + $0x118] sm:$0xf] }
 0x221   :  { %5070 = vmatpush.bf16.msrb.mxu1 %v9059_v46  ;;  %v8562_v46 = vld [vmem:[#allocation2 + $0x2a8] sm:$0xf]  ;;  %v8967_v57 = vor.u32 %v11936_v36, %v8964_v42  ;;  %v13337_v16 = vpop.f32.mrf.mxu1  ;;  %v8363_v36 = vor.u32 %v11798_v22, %v8362_v21  ;;  %v10564_v22 = vld [vmem:[#allocation2 + $0x12ac] sm:$0xf0] }
 0x222   :  { %5102 = vmatpush.bf16.msrb.mxu3 %v8963_v31  ;;  %v10363_v31 = vor.u32 %v12298_v35, %v10362_v53  ;;  %v8563_v2 = vor.u32 %v11848_v51, %v8562_v46  ;;  %v10062_v53 = vld [vmem:[#allocation2 + $0xe60] sm:$0xf]  ;;  %v12223_v35 = vld [vmem:[#allocation2 + $0xec0] sm:$0xf0]  ;;  %v11773_v46 = vld [vmem:[#allocation2 + $0xb0] sm:$0xf0] }
 0x223   :  { %5083 = vmatpush.bf16.msrb.mxu2 %v9859_v29  ;;  %v10063_v33 = vor.u32 %v12223_v35, %v10062_v53  ;;  %v12336_v53 = vld [vmem:[#allocation2 + $0x124c] sm:$0xf]  ;;  %v846_v35 = vperm.slane %v13330_v12, 6 }
 0x224   :  { %5057 = vmatpush.bf16.msra.mxu0 %v8259_v7  ;;  %5071 = vmatmul.bf16.vlgmr.msrb.gmra.mxu1 %v13057_v55  ;;  %v10162_v7 = vld [vmem:[#allocation2 + $0xf28] sm:$0xf]  ;;  %v4775_v24 = vpop.f32.mrf.mxu0 }
 0x225   :  { %5128 = vmatpush.bf16.msra.mxu1 %v10563_v56  ;;  %v4760_v56 = vpop.f32.mrf.mxu3  ;;  %v10163_v48 = vor.u32 %v12248_v28, %v10162_v7  ;;  %v9862_v7 = vld [vmem:[#allocation2 + $0xcd0] sm:$0xf]  ;;  %v12173_v28 = vld [vmem:[#allocation2 + $0xd30] sm:$0xf0] }
 0x226   :  { %5103 = vmatpush.bf16.msrb.mxu3 %v8863_v1  ;;  %v4761_v1 = vadd.f32 %v4760_v56, %v4748_v38  ;;  %5084 = vmatmul.bf16.vlgmr.msrb.gmra.mxu2 %v13060_v59  ;;  %v11861_v38 = vld [vmem:[#allocation2 + $0x374] sm:$0xf]  ;;  %v2753_v56 = vunpack.c.h.b16 %v13326_v45  ;;  %v8970_v24 = vld [vmem:[#allocation2 + $0x5d0] sm:$0xf] }
 0x227   :  { %5058 = vmatmul.bf16.vlgmr.msra.gmra.mxu0 %v13055_v49  ;;  %5148 = vmatpush.bf16.msra.mxu2 %v4048_v60  ;;  %v9962_v60 = vld [vmem:[#allocation2 + $0xd98] sm:$0xf] }
 0x228   :  { %5115 = vmatpush.bf16.msrb.mxu0 %v9763_v10  ;;  %v11823_v10 = vld [vmem:[#allocation2 + $0x240] sm:$0xf0]  ;;  %v4774_v30 = vadd.f32 %v4773_v62, %v4761_v1  ;;  %v12136_v62 = vld [vmem:[#allocation2 + $0xc0c] sm:$0xf]  ;;  %v9963_v1 = vor.u32 %v12198_v43, %v9962_v60  ;;  %v3378_v45 = vpack.c.b16 %v2753_v56, %v2753_v56  ;;  %v11786_v60 = vld [vmem:[#allocation2 + $0x11c] sm:$0xf] }
 0x229   :  { %5129 = vmatpush.bf16.msra.mxu1 %v10463_v15  ;;  %v9362_v15 = vld [vmem:[#allocation2 + $0x8e8] sm:$0xf]  ;;  %v8463_v18 = vor.u32 %v11823_v10, %v8462_v14  ;;  %v4801_v42 = vpop.f32.mrf.mxu1  ;;  %v4812_v14 = vpop.f32.mrf.mxu2  ;;  %v9163_v10 = vor.u32 %v11998_v61, %v9162_v58  ;;  %v12311_v43 = vld [vmem:[#allocation2 + $0x1184] sm:$0xf]  ;;  %v12061_v56 = vld [vmem:[#allocation2 + $0x9b4] sm:$0xf] }
 0x22a   :  { %5104 = vmatpush.bf16.msrb.mxu3 %v8763_v19  ;;  %v13343_v17 = vadd.f32 %v13322_v23, %v4774_v30  ;;  %v11886_v19 = vld [vmem:[#allocation2 + $0x43c] sm:$0xf]  ;;  %v12111_v30 = vld [vmem:[#allocation2 + $0xb44] sm:$0xf]  ;;  %v8364_v42 = vld [vmem:[#allocation2 + $0x17c] sm:$0xf0] }
 0x22b   :  { %5154 = vmatpush.bf16.msrb.mxu2 %v8967_v57  ;;  %v8767_v29 = vor.u32 %v11886_v19, %v8764_v27  ;;  %v9863_v19 = vor.u32 %v12173_v28, %v9862_v7  ;;  %v8464_v27 = vld [vmem:[#allocation2 + $0x244] sm:$0xf0]  ;;  %v8367_v61 = vor.u32 %v11786_v60, %v8364_v42  ;;  %v10364_v7 = vld [vmem:[#allocation2 + $0x111c] sm:$0xf0] }
 0x22c   :  { %5116 = vmatpush.bf16.msrb.mxu0 %v9663_v26  ;;  %5462 = vrot.lane.b32.xlu2 %v13343_v17, %s12950_s0  ;;  %v9363_v26 = vor.u32 %v12048_v50, %v9362_v15  ;;  %v9062_v50 = vld [vmem:[#allocation2 + $0x690] sm:$0xf] }
 0x22d   :  { %5130 = vmatpush.bf16.msra.mxu1 %v10363_v31  ;;  %10599 = vmatmul.msk.bf16.vlgmr.msra.gmra.mxu3 %vm3982_vm1, %v13068_v40  ;;  %v4762_v23 = vpop.f32.mrf.mxu3  ;;  %v9262_v31 = vld [vmem:[#allocation2 + $0x820] sm:$0xf] }
 0x22e   :  { %5105 = vmatpush.bf16.msrb.mxu3 %v8663_v9  ;;  %v8664_v9 = vld [vmem:[#allocation2 + $0x3d4] sm:$0xf0]  ;;  %v9263_v51 = vor.u32 %v12023_v32, %v9262_v31  ;;  %v4051_v23 = vsel %vm3986_vm0, %v3378_v45, 0  ;;  %v12086_v31 = vld [vmem:[#allocation2 + $0xa7c] sm:$0xf] }
 0x22f   :  { %5155 = vmatpush.bf16.msrb.mxu2 %v8867_v11  ;;  %v8667_v57 = vor.u32 %v11861_v38, %v8664_v9  ;;  %v13348_v11 = vpop.f32.mrf.mxu0  ;;  %v9564_v32 = vld [vmem:[#allocation2 + $0xadc] sm:$0xf0]  ;;  %v4800_v9 = vadd.f32 %v13337_v16, %v846_v35  ;;  %v12149_v45 = vld [vmem:[#allocation2 + $0xc70] sm:$0xf0] }
 0x230   :  { %5117 = vmatpush.bf16.msrb.mxu0 %v9563_v54  ;;  %v9764_v54 = vld [vmem:[#allocation2 + $0xc6c] sm:$0xf0]  ;;  %v12261_v35 = vld [vmem:[#allocation2 + $0xff4] sm:$0xf] }
 0x231   :  { %5131 = vmatpush.bf16.msra.mxu1 %v10263_v52  ;;  %v8263_v52 = vor.u32 %v11773_v46, %v8262_v44  ;;  %v9767_v6 = vor.u32 %v12136_v62, %v9764_v54  ;;  %v9567_v44 = vor.u32 %v12086_v31, %v9564_v32  ;;  %v10464_v46 = vld [vmem:[#allocation2 + $0x11e4] sm:$0xf0]  ;;  %v11924_v62 = vld [vmem:[#allocation2 + $0x568] sm:$0xf0]  ;;  %v4814_v54 = vpop.f32.mrf.mxu2  ;;  %v4813_v16 = vadd.f32 %v4812_v14, %v4800_v9 }
 0x232   :  { %5106 = vmatpush.bf16.msrb.mxu3 %v8563_v2  ;;  %v11836_v2 = vld [vmem:[#allocation2 + $0x2ac] sm:$0xf]  ;;  %v847_v9 = vperm.slane %v13330_v12, 7  ;;  %v9570_v54 = vld [vmem:[#allocation2 + $0xa80] sm:$0xf] }
 0x233   :  { %5156 = vmatpush.bf16.msrb.mxu2 %v8767_v29  ;;  %v8567_v15 = vor.u32 %v11836_v2, %v8564_v41  ;;  %v8264_v41 = vld [vmem:[#allocation2 + $0xb4] sm:$0xf0]  ;;  %v12124_v32 = vld [vmem:[#allocation2 + $0xba8] sm:$0xf0] }
 0x234   :  { %5118 = vmatpush.bf16.msrb.mxu0 %v9463_v3  ;;  %v9664_v3 = vld [vmem:[#allocation2 + $0xba4] sm:$0xf0] }
 0x235   :  { %5132 = vmatpush.bf16.msra.mxu1 %v10163_v48  ;;  %v11973_v48 = vld [vmem:[#allocation2 + $0x6f0] sm:$0xf0]  ;;  %v9667_v21 = vor.u32 %v12111_v30, %v9664_v3  ;;  %v11899_v30 = vld [vmem:[#allocation2 + $0x4a0] sm:$0xf0]  ;;  %v9770_v3 = vld [vmem:[#allocation2 + $0xc10] sm:$0xf] }
 0x236   :  { %5107 = vmatpush.bf16.msrb.mxu3 %v8463_v18  ;;  %v11811_v18 = vld [vmem:[#allocation2 + $0x1e4] sm:$0xf]  ;;  %v9063_v29 = vor.u32 %v11973_v48, %v9062_v50  ;;  %10600 = vmatmul.msk.bf16.vlgmr.msra.gmra.mxu2 %vm3982_vm1, %v13068_v40  ;;  %v9364_v50 = vld [vmem:[#allocation2 + $0x94c] sm:$0xf0] }
 0x237   :  { %5157 = vmatpush.bf16.msrb.mxu2 %v8667_v57  ;;  %v9464_v57 = vld [vmem:[#allocation2 + $0xa14] sm:$0xf0]  ;;  %v4840_v58 = vpop.f32.mrf.mxu0 }
 0x238   :  { %5119 = vmatpush.bf16.msrb.mxu0 %v9363_v26  ;;  %v11949_v26 = vld [vmem:[#allocation2 + $0x630] sm:$0xf0]  ;;  %v9467_v28 = vor.u32 %v12061_v56, %v9464_v57  ;;  %v12099_v56 = vld [vmem:[#allocation2 + $0xae0] sm:$0xf0]  ;;  %v11986_v57 = vld [vmem:[#allocation2 + $0x75c] sm:$0xf] }
 0x239   :  { %5133 = vmatpush.bf16.msra.mxu1 %v10063_v33  ;;  %v8467_v33 = vor.u32 %v11811_v18, %v8464_v27  ;;  %v8971_v38 = vor.u32 %v11949_v26, %v8970_v24  ;;  %v8670_v26 = vld [vmem:[#allocation2 + $0x378] sm:$0xf]  ;;  %v9164_v58 = vld [vmem:[#allocation2 + $0x7bc] sm:$0xf0] }
 0x23a   :  { %5108 = vmatpush.bf16.msrb.mxu3 %v8363_v36  ;;  %v10567_v36 = vor.u32 %v12336_v53, %v10564_v22  ;;  %v9771_v22 = vor.u32 %v12149_v45, %v9770_v3  ;;  %v12074_v3 = vld [vmem:[#allocation2 + $0xa18] sm:$0xf0]  ;;  %v11961_v45 = vld [vmem:[#allocation2 + $0x694] sm:$0xf] }
 0x23b   :  { %5158 = vmatpush.bf16.msrb.mxu2 %v8567_v15  ;;  %v12036_v15 = vld [vmem:[#allocation2 + $0x8ec] sm:$0xf] }
 0x23c   :  { %5120 = vmatpush.bf16.msrb.mxu0 %v9263_v51  ;;  %v8870_v51 = vld [vmem:[#allocation2 + $0x508] sm:$0xf]  ;;  %v4825_v48 = vpop.f32.mrf.mxu3  ;;  %v9367_v24 = vor.u32 %v12036_v15, %v9364_v50  ;;  %v9064_v15 = vld [vmem:[#allocation2 + $0x6f4] sm:$0xf0] }
 0x23d   :  { %5134 = vmatpush.bf16.msra.mxu1 %v9963_v1  ;;  %v11761_v1 = vld [vmem:[#allocation2 + $0x54] sm:$0xf]  ;;  %v8871_v2 = vor.u32 %v11924_v62, %v8870_v51  ;;  %v4826_v14 = vadd.f32 %v4825_v48, %v4813_v16  ;;  %v8570_v62 = vld [vmem:[#allocation2 + $0x2b0] sm:$0xf] }
 0x23e   :  { %5109 = vmatpush.bf16.msrb.mxu3 %v8263_v52  ;;  %v10467_v52 = vor.u32 %v12311_v43, %v10464_v46  ;;  %v8267_v18 = vor.u32 %v11761_v1, %v8264_v41  ;;  %v12236_v43 = vld [vmem:[#allocation2 + $0xf2c] sm:$0xf]  ;;  %v10064_v41 = vld [vmem:[#allocation2 + $0xec4] sm:$0xf0] }
 0x23f   :  { %5159 = vmatpush.bf16.msrb.mxu2 %v8467_v33  ;;  %v13359_v31 = vadd.f32 %v13348_v11, %v4826_v14  ;;  %v12011_v33 = vld [vmem:[#allocation2 + $0x824] sm:$0xf]  ;;  %v11849_v11 = vld [vmem:[#allocation2 + $0x310] sm:$0xf0] }
 0x240   :  { %5121 = vmatpush.bf16.msrb.mxu0 %v9163_v10  ;;  %v8770_v10 = vld [vmem:[#allocation2 + $0x440] sm:$0xf]  ;;  %v12349_v14 = vld [vmem:[#allocation2 + $0x12b0] sm:$0xf0] }
 0x241   :  { %5110 = vmatmul.bf16.vlgmr.msrb.gmra.mxu3 %v13055_v49  ;;  %5135 = vmatpush.bf16.msra.mxu1 %v9863_v19  ;;  %v4864_v19 = vpop.f32.mrf.mxu1  ;;  %v8771_v53 = vor.u32 %v11899_v30, %v8770_v10  ;;  %v11824_v10 = vld [vmem:[#allocation2 + $0x248] sm:$0xf0]  ;;  %v9470_v30 = vld [vmem:[#allocation2 + $0x9b8] sm:$0xf] }
 0x242   :  { %5167 = vmatpush.bf16.msra.mxu3 %v9767_v6  ;;  %v12286_v6 = vld [vmem:[#allocation2 + $0x10bc] sm:$0xf]  ;;  %5478 = vrot.lane.b32.xlu0 %v13359_v31, %s12950_s0 }
 0x243   :  { %5160 = vmatpush.bf16.msrb.mxu2 %v8367_v61  ;;  %v10367_v27 = vor.u32 %v12286_v6, %v10364_v7  ;;  %v9571_v6 = vor.u32 %v12099_v56, %v9570_v54  ;;  %v9167_v7 = vor.u32 %v11986_v57, %v9164_v58  ;;  %v8270_v56 = vld [vmem:[#allocation2 + $0x58] sm:$0xf]  ;;  %v11774_v57 = vld [vmem:[#allocation2 + $0xb8] sm:$0xf0]  ;;  %v9270_v58 = vld [vmem:[#allocation2 + $0x828] sm:$0xf] }
 0x244   :  { %5122 = vmatpush.bf16.msrb.mxu0 %v9063_v29  ;;  %5136 = vmatmul.bf16.vlgmr.msra.gmra.mxu1 %v13060_v59  ;;  %v11874_v29 = vld [vmem:[#allocation2 + $0x3d8] sm:$0xf0]  ;;  %v4827_v12 = vpop.f32.mrf.mxu3 }
 0x245   :  { %5200 = vmatpush.bf16.msrb.mxu1 %v4051_v23  ;;  %v9670_v23 = vld [vmem:[#allocation2 + $0xb48] sm:$0xf]  ;;  %v8671_v42 = vor.u32 %v11874_v29, %v8670_v26  ;;  %v9964_v26 = vld [vmem:[#allocation2 + $0xdfc] sm:$0xf0] }
 0x246   :  { %5168 = vmatpush.bf16.msra.mxu3 %v9667_v21  ;;  %v10264_v21 = vld [vmem:[#allocation2 + $0x1054] sm:$0xf0]  ;;  %v9671_v46 = vor.u32 %v12124_v32, %v9670_v23  ;;  %v8370_v29 = vld [vmem:[#allocation2 + $0x120] sm:$0xf]  ;;  %v11799_v23 = vld [vmem:[#allocation2 + $0x180] sm:$0xf0] }
 0x247   :  { %5123 = vmatmul.bf16.vlgmr.msrb.gmra.mxu0 %v13057_v55  ;;  %5161 = vmatpush.bf16.msrb.mxu2 %v8267_v18  ;;  %v10267_v60 = vor.u32 %v12261_v35, %v10264_v21  ;;  %v10570_v18 = vld [vmem:[#allocation2 + $0x1250] sm:$0xf]  ;;  %v12186_v35 = vld [vmem:[#allocation2 + $0xd9c] sm:$0xf] }
 0x248   :  { %5180 = vmatpush.bf16.msra.mxu0 %v10567_v36  ;;  %v9264_v36 = vld [vmem:[#allocation2 + $0x884] sm:$0xf0]  ;;  %v13367_v21 = vld [vmem:[#allocation2 + $0x1318] sm:$0xff]  ;;  %v10571_v32 = vor.u32 %v12349_v14, %v10570_v18  ;;  %v11999_v18 = vld [vmem:[#allocation2 + $0x7c0] sm:$0xf0] }
 0x249   :  { %5206 = vmatpush.bf16.msra.mxu1 %v8971_v38  ;;  %v4851_v38 = vpop.f32.mrf.mxu0  ;;  %v9267_v51 = vor.u32 %v12011_v33, %v9264_v36  ;;  %v4866_v1 = vpop.f32.mrf.mxu1  ;;  %v9370_v33 = vld [vmem:[#allocation2 + $0x8f0] sm:$0xf]  ;;  %v12049_v36 = vld [vmem:[#allocation2 + $0x950] sm:$0xf0]  ;;  %v12112_v14 = vld [vmem:[#allocation2 + $0xb4c] sm:$0xf] }
 0x24a   :  { %5169 = vmatpush.bf16.msra.mxu3 %v9567_v44  ;;  %v10164_v44 = vld [vmem:[#allocation2 + $0xf8c] sm:$0xf0]  ;;  %5162 = vmatmul.bf16.vlgmr.msrb.gmra.mxu2 %v13055_v49  ;;  %v4852_v61 = vadd.f32 %v4851_v38, %v847_v9  ;;  %v9371_v54 = vor.u32 %v12049_v36, %v9370_v33  ;;  %v12137_v1 = vld [vmem:[#allocation2 + $0xc14] sm:$0xf]  ;;  %v11912_v36 = vld [vmem:[#allocation2 + $0x50c] sm:$0xf] }
 0x24b   :  { %5219 = vmatpush.bf16.msra.mxu2 %v9771_v22  ;;  %v10167_v16 = vor.u32 %v12236_v43, %v10164_v44  ;;  %v9471_v22 = vor.u32 %v12074_v3, %v9470_v30  ;;  %v2754_v43 = vunpack.c.l.b16 %v13367_v21  ;;  %v9967_v44 = vor.u32 %v12186_v35, %v9964_v26  ;;  %v9170_v30 = vld [vmem:[#allocation2 + $0x760] sm:$0xf]  ;;  %v11937_v3 = vld [vmem:[#allocation2 + $0x5d4] sm:$0xf] }
 0x24c   :  { %5181 = vmatpush.bf16.msra.mxu0 %v10467_v52  ;;  %v8571_v52 = vor.u32 %v11849_v11, %v8570_v62  ;;  %v4865_v48 = vadd.f32 %v4864_v19, %v4852_v61  ;;  %v4877_v19 = vpop.f32.mrf.mxu2  ;;  %v4890_v9 = vpop.f32.mrf.mxu3  ;;  %v9864_v62 = vld [vmem:[#allocation2 + $0xd34] sm:$0xf0]  ;;  %v12024_v61 = vld [vmem:[#allocation2 + $0x888] sm:$0xf0] }
 0x24d   :  { %5207 = vmatpush.bf16.msra.mxu1 %v8871_v2  ;;  %v12211_v2 = vld [vmem:[#allocation2 + $0xe64] sm:$0xf] }
 0x24e   :  { %5170 = vmatpush.bf16.msra.mxu3 %v9467_v28  ;;  %v8470_v28 = vld [vmem:[#allocation2 + $0x1e8] sm:$0xf]  ;;  %v4878_v38 = vadd.f32 %v4877_v19, %v4865_v48 }
 0x24f   :  { %5220 = vmatpush.bf16.msra.mxu2 %v9671_v46  ;;  %v8371_v46 = vor.u32 %v11799_v23, %v8370_v29  ;;  %v9070_v29 = vld [vmem:[#allocation2 + $0x698] sm:$0xf]  ;;  %v11974_v23 = vld [vmem:[#allocation2 + $0x6f8] sm:$0xf0] }
 0x250   :  { %5182 = vmatpush.bf16.msra.mxu0 %v10367_v27  ;;  %v10067_v27 = vor.u32 %v12211_v2, %v10064_v41  ;;  %v13370_v11 = vadd.f32 %v4890_v9, %v4878_v38  ;;  %v12299_v2 = vld [vmem:[#allocation2 + $0x1120] sm:$0xf0]  ;;  %v3379_v41 = vpack.c.b16 %v2754_v43, %v2754_v43  ;;  %v8872_v38 = vld [vmem:[#allocation2 + $0x56c] sm:$0xf0]  ;;  %v13377_v9 = vld [vmem:[#allocation4 + $0x10] sm:$0xff] }
 0x251   :  { %5208 = vmatpush.bf16.msra.mxu1 %v8771_v53  ;;  %v4853_v50 = vpop.f32.mrf.mxu0  ;;  %v8471_v53 = vor.u32 %v11824_v10, %v8470_v28  ;;  %v9271_v28 = vor.u32 %v12024_v61, %v9270_v58  ;;  %v9572_v43 = vld [vmem:[#allocation2 + $0xae4] sm:$0xf0] }
 0x252   :  { %5171 = vmatpush.bf16.msra.mxu3 %v9367_v24  ;;  %v9067_v24 = vor.u32 %v11961_v45, %v9064_v15  ;;  %5489 = vrot.lane.b32.xlu0 %v13370_v11, %s12950_s0  ;;  %v8972_v45 = vld [vmem:[#allocation2 + $0x634] sm:$0xf0]  ;;  %v5437_v15 = vpop.permute.xlu0 %5436  ;;  %v4054_v35 = vsel %vm3986_vm0, %v3379_v41, 0  ;;  %v8772_v61 = vld [vmem:[#allocation2 + $0x4a4] sm:$0xf0] }
 0x253   :  { %5221 = vmatpush.bf16.msra.mxu2 %v9571_v6  ;;  %v8975_v26 = vor.u32 %v11937_v3, %v8972_v45  ;;  %v5439_v19 = vmax.f32 %v13277_v0, %v5437_v15  ;;  %v10170_v0 = vld [vmem:[#allocation2 + $0xf30] sm:$0xf]  ;;  %v12312_v41 = vld [vmem:[#allocation2 + $0x118c] sm:$0xf] }
 0x254   :  { %5183 = vmatpush.bf16.msra.mxu0 %v10267_v60  ;;  %10601 = vmatmul.msk.bf16.vlgmr.msrb.gmra.mxu1 %vm3982_vm1, %v13068_v40  ;;  %v10470_v60 = vld [vmem:[#allocation2 + $0x1188] sm:$0xf]  ;;  %v4879_v50 = vpop.f32.mrf.mxu2  ;;  %v12224_v3 = vld [vmem:[#allocation2 + $0xec8] sm:$0xf0] }
 0x255   :  { %5209 = vmatpush.bf16.msra.mxu1 %v8671_v42  ;;  %v12324_v42 = vld [vmem:[#allocation2 + $0x11e8] sm:$0xf0] }
 0x256   :  { %5172 = vmatpush.bf16.msra.mxu3 %v9267_v51  ;;  %v12161_v51 = vld [vmem:[#allocation2 + $0xcd4] sm:$0xf]  ;;  %v10471_v12 = vor.u32 %v12324_v42, %v10470_v60  ;;  %v12087_v42 = vld [vmem:[#allocation2 + $0xa84] sm:$0xf] }
 0x257   :  { %5222 = vmatpush.bf16.msra.mxu2 %v9471_v22  ;;  %v9867_v6 = vor.u32 %v12161_v51, %v9864_v62  ;;  %v10270_v22 = vld [vmem:[#allocation2 + $0xff8] sm:$0xf]  ;;  %v12249_v51 = vld [vmem:[#allocation2 + $0xf90] sm:$0xf0]  ;;  %v8875_v62 = vor.u32 %v11912_v36, %v8872_v38  ;;  %v9575_v58 = vor.u32 %v12087_v42, %v9572_v43 }
 0x258   :  { %5184 = vmatpush.bf16.msra.mxu0 %v10167_v16  ;;  %v9772_v16 = vld [vmem:[#allocation2 + $0xc74] sm:$0xf0] }
 0x259   :  { %5210 = vmatpush.bf16.msra.mxu1 %v8571_v52  ;;  %v10370_v52 = vld [vmem:[#allocation2 + $0x10c0] sm:$0xf]  ;;  %v9775_v10 = vor.u32 %v12137_v1, %v9772_v16  ;;  %v10171_v16 = vor.u32 %v12249_v51, %v10170_v0  ;;  %v8572_v42 = vld [vmem:[#allocation2 + $0x314] sm:$0xf0]  ;;  %v12012_v0 = vld [vmem:[#allocation2 + $0x82c] sm:$0xf] }
 0x25a   :  { %5173 = vmatpush.bf16.msra.mxu3 %v9167_v7  ;;  %v8271_v7 = vor.u32 %v11774_v57, %v8270_v56  ;;  %v10371_v48 = vor.u32 %v12299_v2, %v10370_v52  ;;  %5441 = vrot.lane.b32.xlu0 %v5439_v19, %s12946_s17  ;;  %v9071_v57 = vor.u32 %v11974_v23, %v9070_v29  ;;  %v12062_v52 = vld [vmem:[#allocation2 + $0x9bc] sm:$0xf]  ;;  %v9472_v2 = vld [vmem:[#allocation2 + $0xa1c] sm:$0xf0]  ;;  %v12199_v23 = vld [vmem:[#allocation2 + $0xe00] sm:$0xf0] }
 0x25b   :  { %5223 = vmatpush.bf16.msra.mxu2 %v9371_v54  ;;  %v848_v54 = vperm.slane %v13377_v9, 0  ;;  %v9475_v50 = vor.u32 %v12062_v52, %v9472_v2  ;;  %v9970_v29 = vld [vmem:[#allocation2 + $0xda0] sm:$0xf]  ;;  %v9272_v51 = vld [vmem:[#allocation2 + $0x88c] sm:$0xf0] }
 0x25c   :  { %5185 = vmatpush.bf16.msra.mxu0 %v10067_v27  ;;  %v9672_v27 = vld [vmem:[#allocation2 + $0xbac] sm:$0xf0]  ;;  %v11812_v52 = vld [vmem:[#allocation2 + $0x1ec] sm:$0xf] }
 0x25d   :  { %5211 = vmatpush.bf16.msra.mxu1 %v8471_v53  ;;  %v4892_v53 = vpop.f32.mrf.mxu3  ;;  %v9675_v33 = vor.u32 %v12112_v14, %v9672_v27  ;;  %v4929_v56 = vpop.f32.mrf.mxu1  ;;  %v8472_v2 = vld [vmem:[#allocation2 + $0x24c] sm:$0xf0] }
 0x25e   :  { %5174 = vmatpush.bf16.msra.mxu3 %v9067_v24  ;;  %v12274_v24 = vld [vmem:[#allocation2 + $0x1058] sm:$0xf0] }
 0x25f   :  { %5224 = vmatpush.bf16.msra.mxu2 %v9271_v28  ;;  %v10271_v60 = vor.u32 %v12274_v24, %v10270_v22  ;;  %v9372_v22 = vld [vmem:[#allocation2 + $0x954] sm:$0xf0]  ;;  %v12287_v24 = vld [vmem:[#allocation2 + $0x10c4] sm:$0xf] }
 0x260   :  { %5186 = vmatpush.bf16.msra.mxu0 %v9967_v44  ;;  %v12337_v44 = vld [vmem:[#allocation2 + $0x1254] sm:$0xf]  ;;  %v4916_v28 = vpop.f32.mrf.mxu0 }
 0x261   :  { %5212 = vmatpush.bf16.msra.mxu1 %v8371_v46  ;;  %5175 = vmatmul.bf16.vlgmr.msra.gmra.mxu3 %v13057_v55  ;;  %v10572_v46 = vld [vmem:[#allocation2 + $0x12b4] sm:$0xf0] }
 0x262   :  { %5232 = vmatpush.bf16.msrb.mxu3 %v10571_v32  ;;  %v9171_v32 = vor.u32 %v11999_v18, %v9170_v30  ;;  %v10575_v1 = vor.u32 %v12337_v44, %v10572_v46  ;;  %v10070_v30 = vld [vmem:[#allocation2 + $0xe68] sm:$0xf]  ;;  %v8672_v18 = vld [vmem:[#allocation2 + $0x3dc] sm:$0xf0]  ;;  %5472 = vrot.lane.b32.xlu0 %v13306_v47, %s12950_s0  ;;  %v9971_v46 = vor.u32 %v12199_v23, %v9970_v29  ;;  %v10072_v23 = vld [vmem:[#allocation2 + $0xecc] sm:$0xf0] }
 0x263   :  { %v10071_v53 = vor.u32 %v12224_v3, %v10070_v30  ;;  %v10172_v30 = vld [vmem:[#allocation2 + $0xf94] sm:$0xf0] }
 0x264   :  { %5187 = vmatpush.bf16.msra.mxu0 %v9867_v6  ;;  %5225 = vmatpush.bf16.msra.mxu2 %v9171_v32  ;;  %v4942_v6 = vpop.f32.mrf.mxu2  ;;  %v8978_v3 = vld [vmem:[#allocation2 + $0x5d8] sm:$0xf] }
 0x265   :  { %5213 = vmatpush.bf16.msra.mxu1 %v8271_v7  ;;  %v4903_v7 = vpop.f32.mrf.mxu3  ;;  %v4931_v36 = vpop.f32.mrf.mxu1 }
 0x266   :  { %5233 = vmatpush.bf16.msrb.mxu3 %v10471_v12  ;;  %v11887_v12 = vld [vmem:[#allocation2 + $0x444] sm:$0xf]  ;;  %v4904_v45 = vadd.f32 %v4903_v7, %v848_v54  ;;  %v8878_v36 = vld [vmem:[#allocation2 + $0x510] sm:$0xf] }
 0x267   :  { %5188 = vmatmul.bf16.vlgmr.msra.gmra.mxu0 %v13060_v59  ;;  %v8775_v15 = vor.u32 %v11887_v12, %v8772_v61  ;;  %v11987_v7 = vld [vmem:[#allocation2 + $0x764] sm:$0xf] }
 0x268   :  { %5252 = vmatpush.bf16.msrb.mxu0 %v4054_v35  ;;  %5214 = vmatmul.bf16.vlgmr.msra.gmra.mxu1 %v13055_v49  ;;  %v4917_v14 = vadd.f32 %v4916_v28, %v4904_v45  ;;  %v12037_v35 = vld [vmem:[#allocation2 + $0x8f4] sm:$0xf]  ;;  %v4918_v12 = vpop.f32.mrf.mxu0  ;;  %v9172_v28 = vld [vmem:[#allocation2 + $0x7c4] sm:$0xf0]  ;;  %v11950_v45 = vld [vmem:[#allocation2 + $0x638] sm:$0xf0] }
 0x269   :  { %5271 = vmatpush.bf16.msrb.mxu1 %v9775_v10  ;;  %v10472_v10 = vld [vmem:[#allocation2 + $0x11ec] sm:$0xf0]  ;;  %5226 = vmatpush.bf16.msra.mxu2 %v9071_v57  ;;  %v9375_v38 = vor.u32 %v12037_v35, %v9372_v22  ;;  %v9870_v57 = vld [vmem:[#allocation2 + $0xcd8] sm:$0xf]  ;;  %v8979_v35 = vor.u32 %v11950_v45, %v8978_v3  ;;  %v11962_v22 = vld [vmem:[#allocation2 + $0x69c] sm:$0xf] }
 0x26a   :  { %5234 = vmatpush.bf16.msrb.mxu3 %v10371_v48  ;;  %v11862_v48 = vld [vmem:[#allocation2 + $0x37c] sm:$0xf]  ;;  %v10475_v27 = vor.u32 %v12312_v41, %v10472_v10  ;;  %v4930_v19 = vadd.f32 %v4929_v56, %v4917_v14  ;;  %v10272_v56 = vld [vmem:[#allocation2 + $0x105c] sm:$0xf0]  ;;  %v12237_v10 = vld [vmem:[#allocation2 + $0xf34] sm:$0xf] }
 0x26b   :  { %v8675_v32 = vor.u32 %v11862_v48, %v8672_v18  ;;  %v9175_v48 = vor.u32 %v11987_v7, %v9172_v28  ;;  %v11787_v18 = vld [vmem:[#allocation2 + $0x124] sm:$0xf]  ;;  %v8372_v14 = vld [vmem:[#allocation2 + $0x184] sm:$0xf0]  ;;  %v10478_v12 = vld [vmem:[#allocation2 + $0x1190] sm:$0xf] }
 0x26c   :  { %5258 = vmatpush.bf16.msra.mxu0 %v8975_v26  ;;  %v10372_v26 = vld [vmem:[#allocation2 + $0x1124] sm:$0xf0]  ;;  %5227 = vmatmul.bf16.vlgmr.msra.gmra.mxu2 %v13057_v55  ;;  %v13387_v43 = vadd.f32 %v4942_v6, %v4930_v19  ;;  %v4944_v54 = vpop.f32.mrf.mxu2  ;;  %v10578_v19 = vld [vmem:[#allocation2 + $0x1258] sm:$0xf]  ;;  %v12125_v3 = vld [vmem:[#allocation2 + $0xbb0] sm:$0xf0] }
 0x26d   :  { %5272 = vmatpush.bf16.msrb.mxu1 %v9675_v33  ;;  %5284 = vmatpush.bf16.msrb.mxu2 %v10575_v1  ;;  %v2755_v33 = vunpack.c.h.b16 %v13367_v21  ;;  %v10375_v44 = vor.u32 %v12287_v24, %v10372_v26  ;;  %v4905_v21 = vpop.f32.mrf.mxu3  ;;  %v9072_v24 = vld [vmem:[#allocation2 + $0x6fc] sm:$0xf0]  ;;  %v12212_v26 = vld [vmem:[#allocation2 + $0xe6c] sm:$0xf]  ;;  %v9778_v54 = vld [vmem:[#allocation2 + $0xc18] sm:$0xf] }
 0x26e   :  { %5235 = vmatpush.bf16.msrb.mxu3 %v10271_v60  ;;  %v11837_v60 = vld [vmem:[#allocation2 + $0x2b4] sm:$0xf]  ;;  %5514 = vrot.lane.b32.xlu1 %v13387_v43, %s12950_s0 }
 0x26f   :  { %v8575_v61 = vor.u32 %v11837_v60, %v8572_v42  ;;  %v3380_v1 = vpack.c.b16 %v2755_v33, %v2755_v33  ;;  %v8375_v33 = vor.u32 %v11787_v18, %v8372_v14  ;;  %v9075_v60 = vor.u32 %v11962_v22, %v9072_v24  ;;  %v11762_v42 = vld [vmem:[#allocation2 + $0x5c] sm:$0xf]  ;;  %v12325_v21 = vld [vmem:[#allocation2 + $0x11f0] sm:$0xf0]  ;;  %v12300_v18 = vld [vmem:[#allocation2 + $0x1128] sm:$0xf0] }
 0x270   :  { %5259 = vmatpush.bf16.msra.mxu0 %v8875_v62  ;;  %v12262_v62 = vld [vmem:[#allocation2 + $0xffc] sm:$0xf]  ;;  %v10479_v28 = vor.u32 %v12325_v21, %v10478_v12  ;;  %v8678_v14 = vld [vmem:[#allocation2 + $0x380] sm:$0xf]  ;;  %v10178_v12 = vld [vmem:[#allocation2 + $0xf38] sm:$0xf] }
 0x271   :  { %5273 = vmatpush.bf16.msrb.mxu1 %v9575_v58  ;;  %5285 = vmatpush.bf16.msrb.mxu2 %v10475_v27  ;;  %v12174_v58 = vld [vmem:[#allocation2 + $0xd38] sm:$0xf0]  ;;  %v10275_v41 = vor.u32 %v12262_v62, %v10272_v56  ;;  %v13394_v27 = vpop.f32.mrf.mxu1  ;;  %v12187_v62 = vld [vmem:[#allocation2 + $0xda4] sm:$0xf] }
 0x272   :  { %5236 = vmatpush.bf16.msrb.mxu3 %v10171_v16  ;;  %v9275_v16 = vor.u32 %v12012_v0, %v9272_v51  ;;  %v9871_v6 = vor.u32 %v12174_v58, %v9870_v57  ;;  %v10075_v0 = vor.u32 %v12212_v26, %v10072_v23  ;;  %v12150_v56 = vld [vmem:[#allocation2 + $0xc78] sm:$0xf0]  ;;  %v9972_v58 = vld [vmem:[#allocation2 + $0xe04] sm:$0xf0] }
 0x273   :  { %v9975_v7 = vor.u32 %v12187_v62, %v9972_v58  ;;  %v12250_v21 = vld [vmem:[#allocation2 + $0xf98] sm:$0xf0] }
 0x274   :  { %5260 = vmatpush.bf16.msra.mxu0 %v8775_v15  ;;  %v8475_v15 = vor.u32 %v11812_v52, %v8472_v2  ;;  %v4955_v29 = vpop.f32.mrf.mxu2  ;;  %v9779_v2 = vor.u32 %v12150_v56, %v9778_v54  ;;  %v9478_v54 = vld [vmem:[#allocation2 + $0x9c0] sm:$0xf]  ;;  %v12075_v56 = vld [vmem:[#allocation2 + $0xa20] sm:$0xf0] }
 0x275   :  { %5274 = vmatpush.bf16.msrb.mxu1 %v9475_v50  ;;  %5286 = vmatpush.bf16.msrb.mxu2 %v10375_v44  ;;  %v4057_v50 = vsel %vm3986_vm0, %v3380_v1, 0  ;;  %v8272_v44 = vld [vmem:[#allocation2 + $0xbc] sm:$0xf0]  ;;  %v8778_v1 = vld [vmem:[#allocation2 + $0x448] sm:$0xf] }
 0x276   :  { %5237 = vmatpush.bf16.msrb.mxu3 %v10071_v53  ;;  %v10175_v53 = vor.u32 %v12237_v10, %v10172_v30  ;;  %v12162_v10 = vld [vmem:[#allocation2 + $0xcdc] sm:$0xf]  ;;  %v9678_v30 = vld [vmem:[#allocation2 + $0xb50] sm:$0xf] }
 0x277   :  { %10602 = vmatmul.msk.bf16.vlgmr.msrb.gmra.mxu0 %vm3982_vm1, %v13068_v40  ;;  %v9679_v22 = vor.u32 %v12125_v3, %v9678_v30  ;;  %v12225_v30 = vld [vmem:[#allocation2 + $0xed0] sm:$0xf0]  ;;  %v8378_v3 = vld [vmem:[#allocation2 + $0x128] sm:$0xf] }
 0x278   :  { %5261 = vmatpush.bf16.msra.mxu0 %v8675_v32  ;;  %v12350_v32 = vld [vmem:[#allocation2 + $0x12b8] sm:$0xf0] }
 0x279   :  { %5275 = vmatpush.bf16.msrb.mxu1 %v9375_v38  ;;  %5287 = vmatpush.bf16.msrb.mxu2 %v10275_v41  ;;  %v11925_v38 = vld [vmem:[#allocation2 + $0x570] sm:$0xf0]  ;;  %v10579_v51 = vor.u32 %v12350_v32, %v10578_v19  ;;  %v849_v41 = vperm.slane %v13377_v9, 1  ;;  %v9578_v19 = vld [vmem:[#allocation2 + $0xa88] sm:$0xf] }
 0x27a   :  { %5238 = vmatpush.bf16.msrb.mxu3 %v9971_v46  ;;  %v823_v46 = vld [vmem:[#allocation2 + $0x1320] sm:$0xf]  ;;  %v8879_v57 = vor.u32 %v11925_v38, %v8878_v36  ;;  %v12100_v32 = vld [vmem:[#allocation2 + $0xae8] sm:$0xf0]  ;;  %v12275_v38 = vld [vmem:[#allocation2 + $0x1060] sm:$0xf0] }
 0x27b   :  { %v2756_v52 = vunpack.c.l.b16 %v823_v46  ;;  %v4956_v24 = vadd.f32 %v4955_v29, %v849_v41  ;;  %v10278_v36 = vld [vmem:[#allocation2 + $0x1000] sm:$0xf]  ;;  %v10179_v41 = vor.u32 %v12250_v21, %v10178_v12 }
 0x27c   :  { %5262 = vmatpush.bf16.msra.mxu0 %v8575_v61  ;;  %v8275_v61 = vor.u32 %v11762_v42, %v8272_v44  ;;  %v4957_v45 = vpop.f32.mrf.mxu2  ;;  %v11850_v42 = vld [vmem:[#allocation2 + $0x318] sm:$0xf0]  ;;  %v10279_v62 = vor.u32 %v12275_v38, %v10278_v36  ;;  %v12000_v36 = vld [vmem:[#allocation2 + $0x7c8] sm:$0xf0] }
 0x27d   :  { %5276 = vmatpush.bf16.msrb.mxu1 %v9275_v16  ;;  %5288 = vmatpush.bf16.msrb.mxu2 %v10175_v53  ;;  %v11900_v16 = vld [vmem:[#allocation2 + $0x4a8] sm:$0xf0]  ;;  %v11875_v53 = vld [vmem:[#allocation2 + $0x3e0] sm:$0xf0] }
 0x27e   :  { %5239 = vmatpush.bf16.msrb.mxu3 %v9871_v6  ;;  %v4996_v6 = vpop.f32.mrf.mxu1  ;;  %v11800_v45 = vld [vmem:[#allocation2 + $0x188] sm:$0xf0] }
 0x27f   :  { %v9378_v6 = vld [vmem:[#allocation2 + $0x8f8] sm:$0xf] }
 0x280   :  { %5263 = vmatpush.bf16.msra.mxu0 %v8475_v15  ;;  %v8779_v15 = vor.u32 %v11900_v16, %v8778_v1  ;;  %v4968_v46 = vpop.f32.mrf.mxu3  ;;  %v8478_v1 = vld [vmem:[#allocation2 + $0x1f0] sm:$0xf]  ;;  %v11825_v16 = vld [vmem:[#allocation2 + $0x250] sm:$0xf0] }
 0x281   :  { %5277 = vmatpush.bf16.msrb.mxu1 %v9175_v48  ;;  %5240 = vmatmul.bf16.vlgmr.msrb.gmra.mxu3 %v13060_v59  ;;  %v10378_v48 = vld [vmem:[#allocation2 + $0x10c8] sm:$0xf]  ;;  %v4969_v29 = vadd.f32 %v4968_v46, %v4956_v24  ;;  %v12200_v24 = vld [vmem:[#allocation2 + $0xe08] sm:$0xf0] }
 0x282   :  { %5304 = vmatpush.bf16.msra.mxu3 %v4057_v50  ;;  %5289 = vmatpush.bf16.msrb.mxu2 %v10075_v0  ;;  %v9872_v50 = vld [vmem:[#allocation2 + $0xd3c] sm:$0xf0]  ;;  %v10379_v23 = vor.u32 %v12300_v18, %v10378_v48  ;;  %v4981_v0 = vpop.f32.mrf.mxu0  ;;  %v9278_v18 = vld [vmem:[#allocation2 + $0x830] sm:$0xf] }
 0x283   :  { %v9875_v26 = vor.u32 %v12162_v10, %v9872_v50  ;;  %v10078_v10 = vld [vmem:[#allocation2 + $0xe70] sm:$0xf] }
 0x284   :  { %5264 = vmatpush.bf16.msra.mxu0 %v8375_v33  ;;  %v8679_v33 = vor.u32 %v11875_v53, %v8678_v14  ;;  %v10079_v48 = vor.u32 %v12225_v30, %v10078_v10  ;;  %v12025_v14 = vld [vmem:[#allocation2 + $0x890] sm:$0xf0] }
 0x285   :  { %5278 = vmatpush.bf16.msrb.mxu1 %v9075_v60  ;;  %v8578_v60 = vld [vmem:[#allocation2 + $0x2b8] sm:$0xf] }
 0x286   :  { %5310 = vmatpush.bf16.msrb.mxu3 %v8979_v35  ;;  %v3381_v35 = vpack.c.b16 %v2756_v52, %v2756_v52  ;;  %5290 = vmatpush.bf16.msrb.mxu2 %v9975_v7  ;;  %v8579_v58 = vor.u32 %v11850_v42, %v8578_v60  ;;  %v9479_v52 = vor.u32 %v12075_v56, %v9478_v54  ;;  %v12050_v7 = vld [vmem:[#allocation2 + $0x958] sm:$0xf0]  ;;  %v9878_v60 = vld [vmem:[#allocation2 + $0xce0] sm:$0xf]  ;;  %v12175_v42 = vld [vmem:[#allocation2 + $0xd40] sm:$0xf0] }
 0x287   :  { %v850_v54 = vperm.slane %v13377_v9, 2 }
 0x288   :  { %5265 = vmatpush.bf16.msra.mxu0 %v8275_v61  ;;  %5279 = vmatmul.bf16.vlgmr.msrb.gmra.mxu1 %v13057_v55  ;;  %v4060_v44 = vsel %vm3986_vm0, %v3381_v35, 0  ;;  %v4982_v61 = vadd.f32 %v4981_v0, %v4969_v29  ;;  %v4970_v50 = vpop.f32.mrf.mxu3  ;;  %v8379_v35 = vor.u32 %v11800_v45, %v8378_v3  ;;  %v9078_v29 = vld [vmem:[#allocation2 + $0x6a0] sm:$0xf] }
 0x289   :  { %5336 = vmatpush.bf16.msra.mxu1 %v10579_v51  ;;  %v9579_v51 = vor.u32 %v12100_v32, %v9578_v19  ;;  %v9279_v19 = vor.u32 %v12025_v14, %v9278_v18  ;;  %v5369_v50 = vpop.permute.xlu2 %5368 }
 0x28a   :  { %5311 = vmatpush.bf16.msrb.mxu3 %v8879_v57  ;;  %5291 = vmatpush.bf16.msrb.mxu2 %v9875_v26  ;;  %v13401_v57 = vpop.f32.mrf.mxu1  ;;  %v8278_v26 = vld [vmem:[#allocation2 + $0x60] sm:$0xf] }
 0x28b   :  { %5266 = vmatmul.bf16.vlgmr.msra.gmra.mxu0 %v13055_v49 }
 0x28c   :  { %5323 = vmatpush.bf16.msrb.mxu0 %v9779_v2  ;;  %v13405_v2 = vadd.f32 %v13394_v27, %v4982_v61  ;;  %v9379_v27 = vor.u32 %v12050_v7, %v9378_v6 }
 0x28d   :  { %5337 = vmatpush.bf16.msra.mxu1 %v10479_v28  ;;  %5292 = vmatmul.bf16.vlgmr.msrb.gmra.mxu2 %v13060_v59  ;;  %v8479_v28 = vor.u32 %v11825_v16, %v8478_v1  ;;  %v13418_v1 = vpop.permute.xlu1 %5363 }
 0x28e   :  { %5312 = vmatpush.bf16.msrb.mxu3 %v8779_v15  ;;  %5356 = vmatpush.bf16.msra.mxu2 %v4060_v44  ;;  %v4983_v15 = vpop.f32.mrf.mxu0  ;;  %v5020_v44 = vpop.f32.mrf.mxu2 }
 0x28f   :  { %5494 = vrot.lane.b32.xlu2 %v13405_v2, %s12950_s0 }
 0x290   :  { %5324 = vmatpush.bf16.msrb.mxu0 %v9679_v22  ;;  %v9978_v22 = vld [vmem:[#allocation2 + $0xda8] sm:$0xf] }
 0x291   :  { %5338 = vmatpush.bf16.msra.mxu1 %v10379_v23  ;;  %10603 = vmatmul.msk.bf16.vlgmr.msra.gmra.mxu3 %vm3982_vm1, %v13068_v40  ;;  %v11775_v23 = vld [vmem:[#allocation2 + $0xc0] sm:$0xf0]  ;;  %v9979_v32 = vor.u32 %v12200_v24, %v9978_v22 }
 0x292   :  { %5313 = vmatpush.bf16.msrb.mxu3 %v8679_v33  ;;  %v5009_v53 = vpop.f32.mrf.mxu1  ;;  %v9178_v33 = vld [vmem:[#allocation2 + $0x768] sm:$0xf]  ;;  %v8279_v38 = vor.u32 %v11775_v23, %v8278_v26 }
 0x293   :  { %v9179_v46 = vor.u32 %v12000_v36, %v9178_v33  ;;  %v5421_v53 = vpop.permute.xlu2 %5420 }
 0x294   :  { %5325 = vmatpush.bf16.msrb.mxu0 %v9579_v51  ;;  %v9879_v51 = vor.u32 %v12175_v42, %v9878_v60 }
 0x295   :  { %5339 = vmatpush.bf16.msra.mxu1 %v10279_v62  ;;  %v11975_v62 = vld [vmem:[#allocation2 + $0x700] sm:$0xf0] }
 0x296   :  { %5314 = vmatpush.bf16.msrb.mxu3 %v8579_v58  ;;  %v5046_v0 = vpop.f32.mrf.mxu0  ;;  %v9079_v56 = vor.u32 %v11975_v62, %v9078_v29  ;;  %v5008_v58 = vadd.f32 %v13401_v57, %v850_v54  ;;  %v5022_v12 = vpop.f32.mrf.mxu2  ;;  %v853_v54 = vperm.slane %v13377_v9, 5 }
 0x297   :  { %v5411_v57 = vpop.permute.xlu1 %5410 }
 0x298   :  { %5326 = vmatpush.bf16.msrb.mxu0 %v9479_v52  ;;  %v5021_v61 = vadd.f32 %v5020_v44, %v5008_v58  ;;  %v13426_v10 = vmax.f32 %v13236_v37, %v5411_v57  ;;  %v852_v37 = vperm.slane %v13377_v9, 4  ;;  %v5423_v44 = vmax.f32 %v13251_v39, %v5421_v53 }
 0x299   :  { %5340 = vmatpush.bf16.msra.mxu1 %v10179_v41 }
 0x29a   :  { %5315 = vmatpush.bf16.msrb.mxu3 %v8479_v28 }
 0x29b   :  { %v13439_v33 = vpop.permute.xlu2 %5399 }
 0x29c   :  { %5327 = vmatpush.bf16.msrb.mxu0 %v9379_v27 }
 0x29d   :  { %5341 = vmatpush.bf16.msra.mxu1 %v10079_v48  ;;  %10604 = vmatmul.msk.bf16.vlgmr.msra.gmra.mxu2 %vm3982_vm1, %v13068_v40 }
 0x29e   :  { %5316 = vmatpush.bf16.msrb.mxu3 %v8379_v35  ;;  %v5048_v21 = vpop.f32.mrf.mxu0 }
 0x2a0   :  { %5328 = vmatpush.bf16.msrb.mxu0 %v9279_v19  ;;  %v5033_v16 = vpop.f32.mrf.mxu3 }
 0x2a1   :  { %5342 = vmatpush.bf16.msra.mxu1 %v9979_v32  ;;  %v5034_v52 = vadd.f32 %v5033_v16, %v5021_v61  ;;  %v5072_v40 = vpop.f32.mrf.mxu1 }
 0x2a2   :  { %5317 = vmatpush.bf16.msrb.mxu3 %v8279_v38 }
 0x2a3   :  { %v13420_v41 = vadd.f32 %v5046_v0, %v5034_v52  ;;  %v5463_v0 = vpop.permute.xlu2 %5462 }
 0x2a4   :  { %5329 = vmatpush.bf16.msrb.mxu0 %v9179_v46  ;;  %v5465_v29 = vmax.f32 %v13343_v17, %v5463_v0  ;;  %v854_v17 = vperm.slane %v13377_v9, 6 }
 0x2a5   :  { %5318 = vmatmul.bf16.vlgmr.msrb.gmra.mxu3 %v13055_v49  ;;  %5343 = vmatpush.bf16.msra.mxu1 %v9879_v51  ;;  %v851_v49 = vperm.slane %v13377_v9, 3 }
 0x2a6   :  { %v5059_v6 = vpop.f32.mrf.mxu0  ;;  %5504 = vrot.lane.b32.xlu1 %v13420_v41, %s12950_s0 }
 0x2a8   :  { %5330 = vmatpush.bf16.msrb.mxu0 %v9079_v56  ;;  %5344 = vmatmul.bf16.vlgmr.msra.gmra.mxu1 %v13060_v59  ;;  %v5035_v7 = vpop.f32.mrf.mxu3  ;;  %v5060_v59 = vadd.f32 %v5059_v6, %v851_v49 }
 0x2a9   :  { %v5074_v28 = vpop.f32.mrf.mxu1  ;;  %v5085_v3 = vpop.f32.mrf.mxu2 }
 0x2aa   :  { %v5073_v30 = vadd.f32 %v5072_v40, %v5060_v59 }
 0x2ab   :  { %5331 = vmatmul.bf16.vlgmr.msrb.gmra.mxu0 %v13057_v55 }
 0x2ac   :  { %v5086_v45 = vadd.f32 %v5085_v3, %v5073_v30 }
 0x2ae   :  { %v5061_v55 = vpop.f32.mrf.mxu0  ;;  %5415 = vrot.lane.b32.xlu1 %v13426_v10, %s12946_s17 }
 0x2b0   :  { %v5098_v15 = vpop.f32.mrf.mxu3 }
 0x2b1   :  { %v13430_v27 = vadd.f32 %v5098_v15, %v5086_v45  ;;  %v5087_v48 = vpop.f32.mrf.mxu2 }
 0x2b3   :  { %5520 = vrot.lane.b32.xlu2 %v13430_v27, %s12950_s0 }
 0x2b8   :  { %v5100_v18 = vpop.f32.mrf.mxu3 }
 0x2b9   :  { %v5150_v35 = vpop.f32.mrf.mxu2 }
 0x2bb   :  { %5405 = vrot.lane.b32.xlu2 %v13212_v5, %s12950_s0 }
 0x2c1   :  { %v5137_v14 = vpop.f32.mrf.mxu1  ;;  %v5152_v38 = vpop.f32.mrf.mxu2 }
 0x2c3   :  { %5430 = vrot.lane.b32.xlu2 %v13228_v63, %s12950_s0 }
 0x2c4   :  { %v5111_v22 = vpop.f32.mrf.mxu3  ;;  %v5124_v24 = vpop.f32.mrf.mxu0 }
 0x2c5   :  { %v5112_v26 = vadd.f32 %v5111_v22, %v852_v37  ;;  %v855_v37 = vperm.slane %v13377_v9, 7  ;;  %v13457_v22 = vmax.f32 %v13164_v25, %v5369_v50  ;;  %v5384_v9 = vpop.permute.xlu1 %5383  ;;  %v12653_v50 = vld [vmem:[#allocation4 + $0x18] ss:$0 sm:$0xff] }
 0x2c7   :  { %v5125_v23 = vadd.f32 %v5124_v24, %v5112_v26 }
 0x2c9   :  { %v5138_v19 = vadd.f32 %v5137_v14, %v5125_v23  ;;  %v5139_v32 = vpop.f32.mrf.mxu1 }
 0x2cb   :  { %v13441_v36 = vadd.f32 %v5150_v35, %v5138_v19  ;;  %5425 = vrot.lane.b32.xlu2 %v5423_v44, %s12946_s17 }
 0x2cc   :  { %v5126_v60 = vpop.f32.mrf.mxu0  ;;  %v5113_v42 = vpop.f32.mrf.mxu3 }
 0x2cd   :  { %v5163_v51 = vpop.f32.mrf.mxu2 }
 0x2ce   :  { %v5164_v58 = vadd.f32 %v5163_v51, %v853_v54  ;;  %v5453_v51 = vpop.permute.xlu1 %5452 }
 0x2d1   :  { %v5202_v46 = vpop.f32.mrf.mxu1 }
 0x2d3   :  { %5467 = vrot.lane.b32.xlu2 %v5465_v29, %s12946_s17 }
 0x2d5   :  { %v5165_v56 = vpop.f32.mrf.mxu2 }
 0x2d9   :  { %v5204_v62 = vpop.f32.mrf.mxu1 }
 0x2e4   :  { %v5189_v12 = vpop.f32.mrf.mxu0  ;;  %v5176_v21 = vpop.f32.mrf.mxu3 }
 0x2e5   :  { %v5177_v61 = vadd.f32 %v5176_v21, %v5164_v58  ;;  %v5215_v16 = vpop.f32.mrf.mxu1  ;;  %v13465_v58 = vmax.f32 %v13315_v4, %v5453_v51  ;;  %v5515_v4 = vpop.permute.xlu1 %5514 }
 0x2e6   :  { %v5216_v59 = vadd.f32 %v5215_v16, %v854_v17 }
 0x2e7   :  { %v5190_v52 = vadd.f32 %v5189_v12, %v5177_v61 }
 0x2e9   :  { %v13448_v39 = vadd.f32 %v5202_v46, %v5190_v52  ;;  %v5495_v24 = vpop.permute.xlu2 %5494 }
 0x2ec   :  { %v5191_v40 = vpop.f32.mrf.mxu0  ;;  %v5178_v6 = vpop.f32.mrf.mxu3 }
 0x2ed   :  { %v5217_v49 = vpop.f32.mrf.mxu1 }
 0x2ef   :  { %v5228_v57 = vpop.f32.mrf.mxu2 }
 0x2f0   :  { %v5229_v30 = vadd.f32 %v5228_v57, %v5216_v59  ;;  %v5479_v59 = vpop.permute.xlu0 %5478 }
 0x2f4   :  { %v5254_v7 = vpop.f32.mrf.mxu0 }
 0x2f7   :  { %v5230_v28 = vpop.f32.mrf.mxu2 }
 0x2f8   :  { %v5481_v28 = vmax.f32 %v13359_v31, %v5479_v59  ;;  %v5490_v31 = vpop.permute.xlu0 %5489  ;;  %v12373_v59 = vld [vmem:[#allocation6 + $0xb0] sm:$0xf0] }
 0x2fc   :  { %v5256_v55 = vpop.f32.mrf.mxu0 }
 0x304   :  { %v5241_v3 = vpop.f32.mrf.mxu3 }
 0x305   :  { %v5242_v45 = vadd.f32 %v5241_v3, %v5229_v30  ;;  %v5280_v15 = vpop.f32.mrf.mxu1  ;;  %v5391_v30 = vmax.f32 %v13140_v34, %v13247_v20  ;;  %v5442_v20 = vpop.permute.xlu0 %5441 }
 0x307   :  { %v13451_v48 = vadd.f32 %v5254_v7, %v5242_v45  ;;  %v5392_v3 = vmax.f32 %v5391_v30, %v5384_v9 }
 0x308   :  { %v5267_v18 = vpop.f32.mrf.mxu0 }
 0x309   :  { %5536 = vrot.lane.b32.xlu2 %v13451_v48, %s12950_s0  ;;  %v5268_v53 = vadd.f32 %v5267_v18, %v855_v37  ;;  %v5445_v18 = vmax.f32 %v13426_v10, %v5442_v20 }
 0x30b   :  { %v5281_v23 = vadd.f32 %v5280_v15, %v5268_v53  ;;  %v5497_v15 = vmax.f32 %v13405_v2, %v5495_v24 }
 0x30c   :  { %v5243_v14 = vpop.f32.mrf.mxu3 }
 0x30d   :  { %v5282_v35 = vpop.f32.mrf.mxu1  ;;  %v5521_v42 = vpop.permute.xlu2 %5520  ;;  %v5402_v14 = vmax.f32 %v5391_v30, %v13439_v33 }
 0x30e   :  { %v5523_v45 = vmax.f32 %v13430_v27, %v5521_v42  ;;  %v13518_v42 = vmax.f32 %v13370_v11, %v5490_v31  ;;  %v12358_v31 = vld [vmem:[#allocation6 + $0x38] sm:$0xf0] }
 0x310   :  { %v5269_v26 = vpop.f32.mrf.mxu0  ;;  %v5293_v19 = vpop.f32.mrf.mxu2 }
 0x311   :  { %5373 = vrot.lane.b32.xlu2 %v13457_v22, %s12946_s17  ;;  %v5294_v32 = vadd.f32 %v5293_v19, %v5281_v23 }
 0x314   :  { %v5306_v38 = vpop.f32.mrf.mxu3 }
 0x315   :  { %v5307_v60 = vadd.f32 %v5306_v38, %v5294_v32  ;;  %v5406_v0 = vpop.permute.xlu2 %5405 }
 0x316   :  { %v13471_v57 = vmax.f32 %v13212_v5, %v5406_v0 }
 0x317   :  { %5546 = vrot.lane.b32.xlu1 %v5307_v60, %s12950_s0 }
 0x318   :  { %v5295_v44 = vpop.f32.mrf.mxu2  ;;  %v5505_v55 = vpop.permute.xlu1 %5504 }
 0x319   :  { %v5507_v5 = vmax.f32 %v13420_v41, %v5505_v55  ;;  %v13494_v41 = vmax.f32 %v13122_v8, %v13418_v1  ;;  %v5473_v8 = vpop.permute.xlu0 %5472  ;;  %v10754_v44 = vld [vmem:[#allocation6 + $0x118] sm:$0xf] }
 0x31a   :  { %v10674_v55 = vld [vmem:[#allocation6 + $0x78] sm:$0xf] }
 0x31b   :  { %v5386_v34 = vmax.f32 %v13494_v41, %v5384_v9  ;;  %v13521_v9 = vmax.f32 %v13387_v43, %v5515_v4  ;;  %v12378_v4 = vld [vmem:[#allocation6 + $0xd8] sm:$0xf0] }
 0x31c   :  { %v5308_v46 = vpop.f32.mrf.mxu3 }
 0x31d   :  { %v5431_v21 = vpop.permute.xlu2 %5430  ;;  %v12388_v46 = vld [vmem:[#allocation6 + $0x128] sm:$0xf0] }
 0x31e   :  { %v5433_v53 = vmax.f32 %v13228_v63, %v5431_v21 }
 0x31f   :  { %5447 = vrot.lane.b32.xlu1 %v13298_v13, %s12950_s0 }
 0x320   :  { %v5358_v29 = vpop.f32.mrf.mxu2  ;;  %v5416_v27 = vpop.permute.xlu1 %5415  ;;  %v5444_v26 = vmax.f32 %v5433_v53, %v5442_v20  ;;  %v10614_v20 = vld [vmem:[#allocation6] sm:$0xf] }
 0x321   :  { %v5418_v1 = vmax.f32 %v13471_v57, %v5416_v27 }
 0x325   :  { %v5345_v25 = vpop.f32.mrf.mxu1  ;;  %v13473_v7 = vpop.permute.xlu2 %5425 }
 0x326   :  { %v5428_v17 = vmax.f32 %v13471_v57, %v13473_v7  ;;  %v5434_v32 = vmax.f32 %v5433_v53, %v13473_v7  ;;  %v10914_v53 = vld [vmem:[#allocation6 + $0x258] sm:$0xf]  ;;  %v12593_v7 = vld [vmem:[#allocation6 + $0x790] sm:$0xf0] }
 0x327   :  { %5457 = vrot.lane.b32.xlu1 %v13465_v58, %s12946_s17 }
 0x328   :  { %v5319_v62 = vpop.f32.mrf.mxu3  ;;  %v5332_v54 = vpop.f32.mrf.mxu0 }
 0x329   :  { %v5320_v56 = vadd.f32 %v12653_v50, %v5319_v62  ;;  %v5360_v52 = vpop.f32.mrf.mxu2  ;;  %v10755_v50 = vor.u32 %v12388_v46, %v10754_v44 }
 0x32a   :  { %v12383_v52 = vld [vmem:[#allocation6 + $0x100] sm:$0xf0] }
 0x32b   :  { %v5333_v12 = vadd.f32 %v5332_v54, %v5320_v56  ;;  %7336 = vmatpush.bf16.msrb.mxu2 %v10755_v50  ;;  %v12423_v50 = vld [vmem:[#allocation6 + $0x240] sm:$0xf0] }
 0x32d   :  { %v5346_v61 = vadd.f32 %v5345_v25, %v5333_v12  ;;  %v5347_v16 = vpop.f32.mrf.mxu1  ;;  %v13535_v12 = vmax.f32 %v13306_v47, %v5473_v8 }
 0x32e   :  { %v10734_v16 = vld [vmem:[#allocation6 + $0xf0] sm:$0xf] }
 0x32f   :  { %v5359_v40 = vadd.f32 %v5358_v29, %v5346_v61  ;;  %5531 = vrot.lane.b32.xlu1 %v13441_v36, %s12950_s0 }
 0x330   :  { %v5321_v6 = vpop.f32.mrf.mxu3  ;;  %v5334_v49 = vpop.f32.mrf.mxu0 }
 0x331   :  { %5562 = vrot.lane.b32.xlu0 %v5359_v40, %s12950_s0  ;;  %v10714_v49 = vld [vmem:[#allocation6 + $0xc8] sm:$0xf] }
 0x332   :  { %v10715_v47 = vor.u32 %v12378_v4, %v10714_v49  ;;  %v10854_v4 = vld [vmem:[#allocation6 + $0x1e0] sm:$0xf] }
 0x337   :  { %5483 = vrot.lane.b32.xlu1 %v5481_v28, %s12946_s17 }
 0x339   :  { %5556 = vrot.lane.b32.xlu0 %v13448_v39, %s12950_s0 }
 0x33f   :  { %5577 = vrot.lane.b32.xlu1 %v5392_v3, %s12946_s17  ;;  %v10654_v3 = vld [vmem:[#allocation6 + $0x50] sm:$0xf] }
 0x341   :  { %5509 = vrot.lane.b32.xlu0 %v5507_v5, %s12946_s17  ;;  %v12368_v5 = vld [vmem:[#allocation6 + $0x88] sm:$0xf0] }
 0x342   :  { %v10675_v30 = vor.u32 %v12368_v5, %v10674_v55  ;;  %v12533_v55 = vld [vmem:[#allocation6 + $0x5b0] sm:$0xf0] }
 0x349   :  { %5525 = vrot.lane.b32.xlu0 %v5523_v45, %s12946_s17  ;;  %v12363_v45 = vld [vmem:[#allocation6 + $0x60] sm:$0xf0] }
 0x351   :  { %5499 = vrot.lane.b32.xlu0 %v5497_v15, %s12946_s17 }
 0x359   :  { %5573 = vrot.lane.b32.xlu0 %v5386_v34, %s12950_s0 }
 0x361   :  { %5597 = vrot.lane.b32.xlu0 %v5445_v18, %s12951_s27  ;;  %v12353_v18 = vld [vmem:[#allocation6 + $0x10] sm:$0xf0] }
 0x362   :  { %v10615_v27 = vor.u32 %v12353_v18, %v10614_v20  ;;  %v11314_v18 = vld [vmem:[#allocation6 + $0x578] sm:$0xf] }
 0x389   :  { %v5547_v37 = vpop.permute.xlu1 %5546 }
 0x38a   :  { %v5549_v2 = vmax.f32 %v5307_v60, %v5547_v37  ;;  %v13512_v60 = vpop.permute.xlu2 %5467 }
 0x38c   :  { %5551 = vrot.lane.b32.xlu2 %v5549_v2, %s12946_s17 }
 0x391   :  { %v5448_v10 = vpop.permute.xlu1 %5447 }
 0x392   :  { %v5450_v23 = vmax.f32 %v13298_v13, %v5448_v10  ;;  %v5537_v54 = vpop.permute.xlu2 %5536  ;;  %v12428_v10 = vld [vmem:[#allocation6 + $0x268] sm:$0xf0] }
 0x393   :  { %v13538_v21 = vmax.f32 %v13451_v48, %v5537_v54  ;;  %v10694_v48 = vld [vmem:[#allocation6 + $0xa0] sm:$0xf] }
 0x394   :  { %5581 = vrot.lane.b32.xlu2 %v5402_v14, %s12951_s27  ;;  %v5470_v63 = vmax.f32 %v5450_v23, %v13512_v60  ;;  %v10695_v28 = vor.u32 %v12373_v59, %v10694_v48  ;;  %v11334_v48 = vld [vmem:[#allocation6 + $0x5a0] sm:$0xf] }
 0x395   :  { %v11335_v5 = vor.u32 %v12533_v55, %v11334_v48  ;;  %v11076_v55 = vld [vmem:[#allocation6 + $0x3ac] sm:$0xf0] }
 0x399   :  { %v5458_v38 = vpop.permute.xlu1 %5457 }
 0x39a   :  { %v5460_v11 = vmax.f32 %v5450_v23, %v5458_v38  ;;  %v5374_v37 = vpop.permute.xlu2 %5373  ;;  %v10915_v23 = vor.u32 %v12428_v10, %v10914_v53  ;;  %v12463_v53 = vld [vmem:[#allocation6 + $0x380] sm:$0xf0] }
 0x39c   :  { %5585 = vrot.lane.b32.xlu2 %v5418_v1, %s12951_s27  ;;  %7349 = vmatpush.bf16.msra.mxu3 %v10915_v23 }
 0x3a1   :  { %v5532_v51 = vpop.permute.xlu1 %5531 }
 0x3a2   :  { %v13547_v14 = vmax.f32 %v13441_v36, %v5532_v51  ;;  %v5376_v36 = vmax.f32 %v13494_v41, %v5374_v37  ;;  %v10894_v41 = vld [vmem:[#allocation6 + $0x230] sm:$0xf] }
 0x3a3   :  { %v5563_v35 = vpop.permute.xlu0 %5562  ;;  %v11374_v51 = vld [vmem:[#allocation6 + $0x5f0] sm:$0xf] }
 0x3a4   :  { %v5565_v24 = vmax.f32 %v5359_v40, %v5563_v35  ;;  %5593 = vrot.lane.b32.xlu2 %v5444_v26, %s12946_s17  ;;  %v10735_v40 = vor.u32 %v12383_v52, %v10734_v16  ;;  %v11394_v35 = vld [vmem:[#allocation6 + $0x618] sm:$0xf]  ;;  %v11354_v16 = vld [vmem:[#allocation6 + $0x5c8] sm:$0xf] }
 0x3a6   :  { %5567 = vrot.lane.b32.xlu1 %v5565_v24, %s12946_s17  ;;  %7337 = vmatpush.bf16.msrb.mxu2 %v10735_v40  ;;  %v12538_v40 = vld [vmem:[#allocation6 + $0x5d8] sm:$0xf0] }
 0x3a9   :  { %v5484_v56 = vpop.permute.xlu1 %5483 }
 0x3aa   :  { %v5486_v61 = vmax.f32 %v13535_v12, %v5484_v56  ;;  %v5487_v6 = vmax.f32 %v13465_v58, %v5484_v56  ;;  %7338 = vmatpush.bf16.msrb.mxu2 %v10715_v47  ;;  %v10634_v58 = vld [vmem:[#allocation6 + $0x28] sm:$0xf]  ;;  %v12413_v47 = vld [vmem:[#allocation6 + $0x1f0] sm:$0xf0] }
 0x3ab   :  { %v13509_v19 = vpop.permute.xlu0 %5556  ;;  %v10635_v34 = vor.u32 %v12358_v31, %v10634_v58  ;;  %v10874_v56 = vld [vmem:[#allocation6 + $0x208] sm:$0xf]  ;;  %v10834_v31 = vld [vmem:[#allocation6 + $0x1b8] sm:$0xf] }
 0x3ac   :  { %5605 = vrot.lane.b32.xlu2 %v5470_v63, %s12951_s27  ;;  %v13551_v8 = vmax.f32 %v13448_v39, %v13509_v19 }
 0x3ae   :  { %5589 = vrot.lane.b32.xlu1 %v5434_v32, %s12950_s0  ;;  %7339 = vmatpush.bf16.msrb.mxu2 %v10695_v28  ;;  %v12548_v32 = vld [vmem:[#allocation6 + $0x628] sm:$0xf0]  ;;  %v10855_v28 = vor.u32 %v12413_v47, %v10854_v4  ;;  %v11254_v4 = vld [vmem:[#allocation6 + $0x500] sm:$0xf]  ;;  %v12513_v47 = vld [vmem:[#allocation6 + $0x510] sm:$0xf0] }
 0x3af   :  { %v11395_v63 = vor.u32 %v12548_v32, %v11394_v35  ;;  %v10814_v35 = vld [vmem:[#allocation6 + $0x190] sm:$0xf]  ;;  %v12508_v32 = vld [vmem:[#allocation6 + $0x4e8] sm:$0xf0] }
 0x3b1   :  { %v5578_v19 = vpop.permute.xlu1 %5577 }
 0x3b2   :  { %7340 = vmatpush.bf16.msrb.mxu2 %v10675_v30 }
 0x3b3   :  { %v5510_v13 = vpop.permute.xlu0 %5509 }
 0x3b4   :  { %v5518_v0 = vmax.f32 %v13521_v9, %v5510_v13  ;;  %v5512_v25 = vmax.f32 %v13518_v42, %v5510_v13 }
 0x3b6   :  { %5640 = vrot.lane.b32.xlu1 %v5518_v0, %s12951_s27  ;;  %5636 = vrot.lane.b32.xlu0 %v5512_v25, %s12946_s17 }
 0x3bb   :  { %v13527_v29 = vpop.permute.xlu0 %5525 }
 0x3bc   :  { %v5528_v43 = vmax.f32 %v13521_v9, %v13527_v29  ;;  %v5529_v62 = vmax.f32 %v5497_v15, %v13527_v29  ;;  %v10655_v15 = vor.u32 %v12363_v45, %v10654_v3  ;;  %v11074_v3 = vld [vmem:[#allocation6 + $0x398] sm:$0xf]  ;;  %v12468_v45 = vld [vmem:[#allocation6 + $0x3a8] sm:$0xf0] }
 0x3bd   :  { %v11075_v58 = vor.u32 %v12468_v45, %v11074_v3  ;;  %v12448_v3 = vld [vmem:[#allocation6 + $0x308] sm:$0xf0] }
 0x3be   :  { %5644 = vrot.lane.b32.xlu0 %v5529_v62, %s12950_s0  ;;  %5601 = vrot.lane.b32.xlu1 %v5460_v11, %s12946_s17  ;;  %v10895_v11 = vor.u32 %v12423_v50, %v10894_v41  ;;  %v12543_v62 = vld [vmem:[#allocation6 + $0x600] sm:$0xf0] }
 0x3bf   :  { %7341 = vmatpush.bf16.msrb.mxu2 %v10655_v15  ;;  %v11375_v54 = vor.u32 %v12543_v62, %v11374_v51  ;;  %7362 = vmatpush.bf16.msra.mxu0 %v11075_v58  ;;  %v12503_v50 = vld [vmem:[#allocation6 + $0x4c0] sm:$0xf0]  ;;  %v11274_v51 = vld [vmem:[#allocation6 + $0x528] sm:$0xf]  ;;  %v12493_v58 = vld [vmem:[#allocation6 + $0x470] sm:$0xf0] }
 0x3c0   :  { %7350 = vmatpush.bf16.msra.mxu3 %v10895_v11  ;;  %v12518_v11 = vld [vmem:[#allocation6 + $0x538] sm:$0xf0] }
 0x3c3   :  { %7342 = vmatpush.bf16.msrb.mxu2 %v10635_v34  ;;  %v5500_v2 = vpop.permute.xlu0 %5499  ;;  %v12408_v34 = vld [vmem:[#allocation6 + $0x1c8] sm:$0xf0] }
 0x3c4   :  { %v5502_v46 = vmax.f32 %v13518_v42, %v5500_v2  ;;  %v10835_v20 = vor.u32 %v12408_v34, %v10834_v31  ;;  %v12461_v34 = vld [vmem:[#allocation6 + $0x374] sm:$0xf] }
 0x3c6   :  { %5541 = vrot.lane.b32.xlu0 %v13538_v21, %s12946_s17  ;;  %5609 = vrot.lane.b32.xlu1 %v5486_v61, %s12950_s0  ;;  %v12418_v61 = vld [vmem:[#allocation6 + $0x218] sm:$0xf0] }
 0x3c7   :  { %7343 = vmatpush.bf16.msrb.mxu2 %v10615_v27  ;;  %v10875_v52 = vor.u32 %v12418_v61, %v10874_v56  ;;  %v12528_v27 = vld [vmem:[#allocation6 + $0x588] sm:$0xf0]  ;;  %v11014_v56 = vld [vmem:[#allocation6 + $0x320] sm:$0xf]  ;;  %v12453_v61 = vld [vmem:[#allocation6 + $0x330] sm:$0xf0] }
 0x3c8   :  { %v11315_v2 = vor.u32 %v12528_v27, %v11314_v18  ;;  %v10974_v27 = vld [vmem:[#allocation6 + $0x2d0] sm:$0xf] }
 0x3c9   :  { %7351 = vmatpush.bf16.msra.mxu3 %v10875_v52  ;;  %v10774_v52 = vld [vmem:[#allocation6 + $0x140] sm:$0xf] }
 0x3cb   :  { %v5574_v38 = vpop.permute.xlu0 %5573  ;;  %7388 = vmatpush.bf16.msra.mxu2 %v11395_v63  ;;  %v12523_v63 = vld [vmem:[#allocation6 + $0x560] sm:$0xf0] }
 0x3cc   :  { %v5621_v39 = vsel %vm5620_vm2, %v5376_v36, %v5574_v38  ;;  %v11294_v38 = vld [vmem:[#allocation6 + $0x550] sm:$0xf] }
 0x3cd   :  { %v5623_v44 = vsel %vm5622_vm3, %v5621_v39, %v5578_v19  ;;  %7352 = vmatpush.bf16.msra.mxu3 %v10855_v28  ;;  %v11295_v39 = vor.u32 %v12523_v63, %v11294_v38  ;;  %v11034_v19 = vld [vmem:[#allocation6 + $0x348] sm:$0xf]  ;;  %v12466_v28 = vld [vmem:[#allocation6 + $0x39c] sm:$0xf] }
 0x3ce   :  { %5613 = vrot.lane.b32.xlu0 %v5487_v6, %s12946_s17  ;;  %v11355_v6 = vor.u32 %v12538_v40, %v11354_v16  ;;  %v11015_v16 = vor.u32 %v12453_v61, %v11014_v56  ;;  %v12393_v40 = vld [vmem:[#allocation6 + $0x150] sm:$0xf0] }
 0x3cf   :  { %7389 = vmatpush.bf16.msra.mxu2 %v11375_v54  ;;  %v11275_v54 = vor.u32 %v12518_v11, %v11274_v51  ;;  %v10934_v51 = vld [vmem:[#allocation6 + $0x280] sm:$0xf]  ;;  %v12433_v11 = vld [vmem:[#allocation6 + $0x290] sm:$0xf0] }
 0x3d1   :  { %7353 = vmatpush.bf16.msra.mxu3 %v10835_v20  ;;  %v11056_v20 = vld [vmem:[#allocation6 + $0x384] sm:$0xf0] }
 0x3d2   :  { %v11059_v18 = vor.u32 %v12461_v34, %v11056_v20 }
 0x3d3   :  { %7390 = vmatpush.bf16.msra.mxu2 %v11355_v6  ;;  %v10775_v6 = vor.u32 %v12393_v40, %v10774_v52  ;;  %v5598_v56 = vpop.permute.xlu0 %5597  ;;  %v12598_v40 = vld [vmem:[#allocation6 + $0x7b8] sm:$0xf0] }
 0x3d7   :  { %7391 = vmatpush.bf16.msra.mxu2 %v11335_v5  ;;  %v11079_v5 = vor.u32 %v12466_v28, %v11076_v55  ;;  %v12473_v28 = vld [vmem:[#allocation6 + $0x3d0] sm:$0xf0]  ;;  %v11574_v55 = vld [vmem:[#allocation6 + $0x780] sm:$0xf] }
 0x3db   :  { %7392 = vmatpush.bf16.msra.mxu2 %v11315_v2  ;;  %v12443_v2 = vld [vmem:[#allocation6 + $0x2e0] sm:$0xf0] }
 0x3df   :  { %7393 = vmatpush.bf16.msra.mxu2 %v11295_v39  ;;  %v12438_v39 = vld [vmem:[#allocation6 + $0x2b8] sm:$0xf0] }
 0x3e3   :  { %7394 = vmatpush.bf16.msra.mxu2 %v11275_v54  ;;  %v11114_v54 = vld [vmem:[#allocation6 + $0x3e8] sm:$0xf] }
 0x3e6   :  { %v5552_v1 = vpop.permute.xlu2 %5551 }
 0x3e7   :  { %v5554_v24 = vmax.f32 %v13547_v14, %v5552_v1  ;;  %v5560_v26 = vmax.f32 %v13551_v8, %v5552_v1  ;;  %v11054_v1 = vld [vmem:[#allocation6 + $0x370] sm:$0xf] }
 0x3e8   :  { %v11055_v10 = vor.u32 %v12463_v53, %v11054_v1  ;;  %v10975_v1 = vor.u32 %v12443_v2, %v10974_v27  ;;  %v11154_v53 = vld [vmem:[#allocation6 + $0x438] sm:$0xf]  ;;  %v10736_v27 = vld [vmem:[#allocation6 + $0x104] sm:$0xf0] }
 0x3e9   :  { %5648 = vrot.lane.b32.xlu2 %v5554_v24, %s12950_s0  ;;  %5652 = vrot.lane.b32.xlu1 %v5560_v26, %s12946_s17  ;;  %v12403_v24 = vld [vmem:[#allocation6 + $0x1a0] sm:$0xf0]  ;;  %v11234_v26 = vld [vmem:[#allocation6 + $0x4d8] sm:$0xf] }
 0x3ea   :  { %v10815_v23 = vor.u32 %v12403_v24, %v10814_v35  ;;  %7363 = vmatpush.bf16.msra.mxu0 %v11055_v10  ;;  %v11235_v36 = vor.u32 %v12508_v32, %v11234_v26  ;;  %v12488_v10 = vld [vmem:[#allocation6 + $0x448] sm:$0xf0] }
 0x3eb   :  { %v11155_v24 = vor.u32 %v12488_v10, %v11154_v53  ;;  %v12456_v26 = vld [vmem:[#allocation6 + $0x34c] sm:$0xf]  ;;  %v10956_v10 = vld [vmem:[#allocation6 + $0x2bc] sm:$0xf0] }
 0x3ec   :  { %7354 = vmatpush.bf16.msra.mxu3 %v10815_v23  ;;  %7375 = vmatpush.bf16.msrb.mxu1 %v11235_v36  ;;  %v11036_v23 = vld [vmem:[#allocation6 + $0x35c] sm:$0xf0]  ;;  %v10954_v36 = vld [vmem:[#allocation6 + $0x2a8] sm:$0xf] }
 0x3ed   :  { %v11039_v38 = vor.u32 %v12456_v26, %v11036_v23  ;;  %v10716_v26 = vld [vmem:[#allocation6 + $0xdc] sm:$0xf0] }
 0x3ee   :  { %v5582_v13 = vpop.permute.xlu2 %5581 }
 0x3ef   :  { %v5625_v0 = vsel %vm5624_vm4, %v5623_v44, %v5582_v13  ;;  %v12458_v13 = vld [vmem:[#allocation6 + $0x358] sm:$0xf0] }
 0x3f0   :  { %v5672_v25 = vmul.f32 1.442695, %v5625_v0  ;;  %vm5665_vm5 = vcmp.gt.f32.partialorder %v5625_v0, 0.0  ;;  %v11035_v44 = vor.u32 %v12458_v13, %v11034_v19  ;;  %v5403_v19 = vmax.f32 %v13457_v22, %v13439_v33  ;;  %v12478_v33 = vld [vmem:[#allocation6 + $0x3f8] sm:$0xf0] }
 0x3f1   :  { %5617 = vrot.lane.b32.xlu2 %v5502_v46, %s12950_s0  ;;  %v10794_v46 = vld [vmem:[#allocation6 + $0x168] sm:$0xf]  ;;  %v10955_v13 = vor.u32 %v12438_v39, %v10954_v36  ;;  %v11115_v52 = vor.u32 %v12478_v33, %v11114_v54  ;;  %v10936_v36 = vld [vmem:[#allocation6 + $0x294] sm:$0xf0] }
 0x3f2   :  { %12656 = vpow2.f32 %v5672_v25  ;;  %v11214_v25 = vld [vmem:[#allocation6 + $0x4b0] sm:$0xf]  ;;  %7364 = vmatpush.bf16.msra.mxu0 %v11035_v44  ;;  %v11594_v22 = vld [vmem:[#allocation6 + $0x7a8] sm:$0xf] }
 0x3f3   :  { %v11215_v62 = vor.u32 %v12503_v50, %v11214_v25  ;;  %v11134_v44 = vld [vmem:[#allocation6 + $0x410] sm:$0xf]  ;;  %v11016_v25 = vld [vmem:[#allocation6 + $0x334] sm:$0xf0] }
 0x3f5   :  { %7376 = vmatpush.bf16.msrb.mxu1 %v11215_v62  ;;  %v10935_v62 = vor.u32 %v12433_v11, %v10934_v51  ;;  %v10696_v51 = vld [vmem:[#allocation6 + $0xb4] sm:$0xf0] }
 0x3f6   :  { %7365 = vmatpush.bf16.msra.mxu0 %v11015_v16  ;;  %v5586_v63 = vpop.permute.xlu2 %5585 }
 0x3f8   :  { %v12657_v42 = vpop.eup %12656 }
 0x3f9   :  { %v10605_v49 = vadd.f32 -1.0, %v12657_v42  ;;  %v11194_v42 = vld [vmem:[#allocation6 + $0x488] sm:$0xf] }
 0x3fb   :  { %v5693_v59 = vmul.f32 1.6732632, %v10605_v49  ;;  %v12498_v49 = vld [vmem:[#allocation6 + $0x498] sm:$0xf0] }
 0x3fc   :  { %v11195_v48 = vor.u32 %v12498_v49, %v11194_v42  ;;  %v12446_v42 = vld [vmem:[#allocation6 + $0x2fc] sm:$0xf] }
 0x3fd   :  { %v5700_v30 = vsel %vm5665_vm5, %v5625_v0, %v5693_v59  ;;  %v12398_v0 = vld [vmem:[#allocation6 + $0x178] sm:$0xf0]  ;;  %v11255_v59 = vor.u32 %v12513_v47, %v11254_v4  ;;  %v11595_v4 = vor.u32 %v12598_v40, %v11594_v22 }
 0x3fe   :  { %v5707_v15 = vmul.f32 1.050701, %v5700_v30  ;;  %v10795_v41 = vor.u32 %v12398_v0, %v10794_v46  ;;  %v10994_v30 = vld [vmem:[#allocation6 + $0x2f8] sm:$0xf]  ;;  %7377 = vmatpush.bf16.msrb.mxu1 %v11195_v48  ;;  %v12483_v46 = vld [vmem:[#allocation6 + $0x420] sm:$0xf0] }
 0x3ff   :  { %v10995_v45 = vor.u32 %v12448_v3, %v10994_v30  ;;  %7395 = vmatpush.bf16.msra.mxu2 %v11255_v59  ;;  %v12451_v0 = vld [vmem:[#allocation6 + $0x324] sm:$0xf]  ;;  %v11094_v59 = vld [vmem:[#allocation6 + $0x3c0] sm:$0xf]  ;;  %v10756_v30 = vld [vmem:[#allocation6 + $0x12c] sm:$0xf0] }
 0x400   :  { %v13563_v37 = vpack.c.bf16 %v5707_v15, %v5707_v15  ;;  %7355 = vmatpush.bf16.msra.mxu3 %v10795_v41  ;;  %v11174_v15 = vld [vmem:[#allocation6 + $0x460] sm:$0xf]  ;;  %v5626_v41 = vsel %vm5620_vm2, %v5403_v19, %v5586_v63  ;;  %v11019_v50 = vor.u32 %v12451_v0, %v11016_v25  ;;  %v11095_v57 = vor.u32 %v12473_v28, %v11094_v59  ;;  %v12431_v63 = vld [vmem:[#allocation6 + $0x284] sm:$0xf] }
 0x401   :  { %v11175_v31 = vor.u32 %v12493_v58, %v11174_v15  ;;  %7366 = vmatpush.bf16.msra.mxu0 %v10995_v45  ;;  %v5627_v61 = vsel %vm5622_vm3, %v5626_v41, %v5428_v17  ;;  %v12386_v17 = vld [vmem:[#allocation6 + $0x11c] sm:$0xf]  ;;  %v12441_v45 = vld [vmem:[#allocation6 + $0x2d4] sm:$0xf]  ;;  %v10976_v15 = vld [vmem:[#allocation6 + $0x2e4] sm:$0xf0]  ;;  %v5594_v58 = vpop.permute.xlu2 %5593 }
 0x402   :  { %7344 = vmatmul.bf16.vlgmr.msrb.gmra.mxu2 %v13563_v37  ;;  %v10759_v3 = vor.u32 %v12386_v17, %v10756_v30  ;;  %v10636_v59 = vld [vmem:[#allocation6 + $0x3c] sm:$0xf0]  ;;  %v12426_v30 = vld [vmem:[#allocation6 + $0x25c] sm:$0xf] }
 0x403   :  { %7453 = vmatpush.bf16.msrb.mxu2 %v11079_v5  ;;  %7378 = vmatpush.bf16.msrb.mxu1 %v11175_v31  ;;  %v11575_v5 = vor.u32 %v12593_v7, %v11574_v55  ;;  %v10979_v31 = vor.u32 %v12441_v45, %v10976_v15  ;;  %v12596_v55 = vld [vmem:[#allocation6 + $0x7ac] sm:$0xf]  ;;  %v11596_v17 = vld [vmem:[#allocation6 + $0x7bc] sm:$0xf0] }
 0x404   :  { %7356 = vmatpush.bf16.msra.mxu3 %v10775_v6  ;;  %v10996_v6 = vld [vmem:[#allocation6 + $0x30c] sm:$0xf0] }
 0x405   :  { %7367 = vmatpush.bf16.msra.mxu0 %v10975_v1  ;;  %v10999_v47 = vor.u32 %v12446_v42, %v10996_v6  ;;  %v12436_v1 = vld [vmem:[#allocation6 + $0x2ac] sm:$0xf]  ;;  %v12361_v42 = vld [vmem:[#allocation6 + $0x54] sm:$0xf]  ;;  %v10656_v6 = vld [vmem:[#allocation6 + $0x64] sm:$0xf0] }
 0x407   :  { %7454 = vmatpush.bf16.msrb.mxu2 %v11059_v18  ;;  %7379 = vmatpush.bf16.msrb.mxu1 %v11155_v24  ;;  %v12381_v18 = vld [vmem:[#allocation6 + $0xf4] sm:$0xf]  ;;  %v12376_v24 = vld [vmem:[#allocation6 + $0xcc] sm:$0xf] }
 0x408   :  { %v10739_v2 = vor.u32 %v12381_v18, %v10736_v27  ;;  %v11599_v18 = vor.u32 %v12596_v55, %v11596_v17  ;;  %v12464_v55 = vld [vmem:[#allocation6 + $0x388] sm:$0xf0]  ;;  %v12401_v17 = vld [vmem:[#allocation6 + $0x194] sm:$0xf] }
 0x409   :  { %7368 = vmatpush.bf16.msra.mxu0 %v10955_v13  ;;  %v10939_v13 = vor.u32 %v12431_v63, %v10936_v36  ;;  %v5606_v11 = vpop.permute.xlu2 %5605 }
 0x40b   :  { %7455 = vmatpush.bf16.msrb.mxu2 %v11039_v38  ;;  %v10719_v38 = vor.u32 %v12376_v24, %v10716_v26 }
 0x40d   :  { %7369 = vmatpush.bf16.msra.mxu0 %v10935_v62 }
 0x40f   :  { %7456 = vmatpush.bf16.msrb.mxu2 %v11019_v50  ;;  %v12371_v50 = vld [vmem:[#allocation6 + $0xa4] sm:$0xf] }
 0x410   :  { %v10699_v33 = vor.u32 %v12371_v50, %v10696_v51  ;;  %v11534_v50 = vld [vmem:[#allocation6 + $0x730] sm:$0xf]  ;;  %v12583_v51 = vld [vmem:[#allocation6 + $0x740] sm:$0xf0] }
 0x411   :  { %7420 = vmatpush.bf16.msrb.mxu0 %v11595_v4 }
 0x413   :  { %7457 = vmatpush.bf16.msrb.mxu2 %v10999_v47 }
 0x415   :  { %7421 = vmatpush.bf16.msrb.mxu0 %v11575_v5 }
 0x417   :  { %7458 = vmatpush.bf16.msrb.mxu2 %v10979_v31  ;;  %v10616_v31 = vld [vmem:[#allocation6 + $0x14] sm:$0xf0] }
 0x418   :  { %v13566_v35 = vpop.permute.xlu1 %5567 }
 0x419   :  { %v5570_v32 = vmax.f32 %v13551_v8, %v13566_v35  ;;  %v11135_v8 = vor.u32 %v12483_v46, %v11134_v44  ;;  %v5629_v46 = vsel %vm5620_vm2, %v5594_v58, %v5598_v56  ;;  %v13592_v9 = vmax.f32 %v13538_v21, %v13566_v35  ;;  %v12351_v58 = vld [vmem:[#allocation6 + $0x4] sm:$0xf] }
 0x41a   :  { %v10619_v27 = vor.u32 %v12351_v58, %v10616_v31  ;;  %v12459_v31 = vld [vmem:[#allocation6 + $0x360] sm:$0xf0] }
 0x41b   :  { %5656 = vrot.lane.b32.xlu0 %v5570_v32, %s12951_s27  ;;  %7380 = vmatpush.bf16.msrb.mxu1 %v11135_v8  ;;  %v10959_v32 = vor.u32 %v12436_v1, %v10956_v10  ;;  %v5684_v40 = vmul.f32 1.442695, %v13592_v9  ;;  %v11576_v10 = vld [vmem:[#allocation6 + $0x794] sm:$0xf0]  ;;  %vm5671_vm9 = vcmp.gt.f32.partialorder %v13592_v9, 0.0 }
 0x41d   :  { %7459 = vmatpush.bf16.msrb.mxu2 %v10959_v32  ;;  %v10896_v32 = vld [vmem:[#allocation6 + $0x244] sm:$0xf0] }
 0x41f   :  { %7381 = vmatpush.bf16.msrb.mxu1 %v11115_v52 }
 0x420   :  { %v5590_v16 = vpop.permute.xlu1 %5589 }
 0x421   :  { %v5628_v49 = vsel %vm5624_vm4, %v5627_v61, %v5590_v16  ;;  %7460 = vmatpush.bf16.msrb.mxu2 %v10939_v13  ;;  %v10676_v16 = vld [vmem:[#allocation6 + $0x8c] sm:$0xf0] }
 0x422   :  { %v5674_v48 = vmul.f32 1.442695, %v5628_v49  ;;  %vm5666_vm6 = vcmp.gt.f32.partialorder %v5628_v49, 0.0 }
 0x423   :  { %7382 = vmatpush.bf16.msrb.mxu1 %v11095_v57 }
 0x424   :  { %12658 = vpow2.f32 %v5674_v48  ;;  %v12356_v48 = vld [vmem:[#allocation6 + $0x2c] sm:$0xf] }
 0x425   :  { %v10639_v57 = vor.u32 %v12356_v48, %v10636_v59 }
 0x427   :  { %7427 = vmatpush.bf16.msra.mxu1 %v10759_v3  ;;  %v10916_v3 = vld [vmem:[#allocation6 + $0x26c] sm:$0xf0] }
 0x428   :  { %v5637_v34 = vpop.permute.xlu0 %5636  ;;  %v5641_v20 = vpop.permute.xlu1 %5640  ;;  %v10919_v1 = vor.u32 %v12426_v30, %v10916_v3  ;;  %v12573_v30 = vld [vmem:[#allocation6 + $0x6f0] sm:$0xf0] }
 0x429   :  { %v5659_v19 = vsel %vm5620_vm2, %v5637_v34, %v5641_v20 }
 0x42a   :  { %v12659_v53 = vpop.eup %12658  ;;  %v5660_v41 = vsel %vm5622_vm3, %v5659_v19, %v5528_v43  ;;  %v12366_v43 = vld [vmem:[#allocation6 + $0x7c] sm:$0xf]  ;;  %v12588_v19 = vld [vmem:[#allocation6 + $0x768] sm:$0xf0] }
 0x42b   :  { %v10606_v23 = vadd.f32 -1.0, %v12659_v53  ;;  %7428 = vmatpush.bf16.msra.mxu1 %v10739_v2  ;;  %v10679_v52 = vor.u32 %v12366_v43, %v10676_v16  ;;  %v12591_v53 = vld [vmem:[#allocation6 + $0x784] sm:$0xf]  ;;  %v11514_v43 = vld [vmem:[#allocation6 + $0x708] sm:$0xf] }
 0x42c   :  { %v11579_v63 = vor.u32 %v12591_v53, %v11576_v10  ;;  %v12578_v16 = vld [vmem:[#allocation6 + $0x718] sm:$0xf0]  ;;  %v11022_v10 = vld [vmem:[#allocation6 + $0x328] sm:$0xf] }
 0x42d   :  { %v5694_v39 = vmul.f32 1.6732632, %v10606_v23  ;;  %v12421_v23 = vld [vmem:[#allocation6 + $0x234] sm:$0xf] }
 0x42e   :  { %v10899_v36 = vor.u32 %v12421_v23, %v10896_v32  ;;  %v12454_v32 = vld [vmem:[#allocation6 + $0x338] sm:$0xf0] }
 0x42f   :  { %v5701_v44 = vsel %vm5666_vm6, %v5628_v49, %v5694_v39  ;;  %7429 = vmatpush.bf16.msra.mxu1 %v10719_v38  ;;  %v10659_v49 = vor.u32 %v12361_v42, %v10656_v6  ;;  %v11554_v39 = vld [vmem:[#allocation6 + $0x758] sm:$0xf]  ;;  %v12469_v42 = vld [vmem:[#allocation6 + $0x3b0] sm:$0xf0]  ;;  %v11515_v6 = vor.u32 %v12578_v16, %v11514_v43  ;;  %v11536_v16 = vld [vmem:[#allocation6 + $0x744] sm:$0xf0] }
 0x430   :  { %v5708_v0 = vmul.f32 1.050701, %v5701_v44  ;;  %v5645_v25 = vpop.permute.xlu0 %5644  ;;  %v5602_v8 = vpop.permute.xlu1 %5601  ;;  %v12416_v44 = vld [vmem:[#allocation6 + $0x20c] sm:$0xf]  ;;  %v12581_v43 = vld [vmem:[#allocation6 + $0x734] sm:$0xf] }
 0x431   :  { %v5661_v62 = vsel %vm5624_vm4, %v5660_v41, %v5645_v25  ;;  %v5630_v54 = vsel %vm5622_vm3, %v5629_v46, %v5602_v8  ;;  %v10876_v46 = vld [vmem:[#allocation6 + $0x21c] sm:$0xf0] }
 0x432   :  { %v13587_v22 = vpack.c.bf16 %v5708_v0, %v5708_v0  ;;  %v5680_v56 = vmul.f32 1.442695, %v5661_v62  ;;  %v5631_v61 = vsel %vm5624_vm4, %v5630_v54, %v5606_v11  ;;  %vm5669_vm7 = vcmp.gt.f32.partialorder %v5661_v62, 0.0  ;;  %v12411_v54 = vld [vmem:[#allocation6 + $0x1e4] sm:$0xf] }
 0x433   :  { %v5676_v29 = vmul.f32 1.442695, %v5631_v61  ;;  %7430 = vmatpush.bf16.msra.mxu1 %v10699_v33  ;;  %vm5667_vm8 = vcmp.gt.f32.partialorder %v5631_v61, 0.0  ;;  %v11555_v0 = vor.u32 %v12588_v19, %v11554_v39  ;;  %v10879_v11 = vor.u32 %v12416_v44, %v10876_v46  ;;  %v10856_v33 = vld [vmem:[#allocation6 + $0x1f4] sm:$0xf0] }
 0x434   :  { %12660 = vpow2.f32 %v5680_v56  ;;  %7357 = vmatmul.bf16.vlgmr.msra.gmra.mxu3 %v13587_v22  ;;  %v12391_v39 = vld [vmem:[#allocation6 + $0x144] sm:$0xf]  ;;  %v10776_v19 = vld [vmem:[#allocation6 + $0x154] sm:$0xf0]  ;;  %v12546_v44 = vld [vmem:[#allocation6 + $0x61c] sm:$0xf] }
 0x435   :  { %12662 = vpow2.f32 %v5676_v29  ;;  %7401 = vmatpush.bf16.msrb.mxu3 %v11555_v0  ;;  %v11396_v46 = vld [vmem:[#allocation6 + $0x62c] sm:$0xf0]  ;;  %v12586_v0 = vld [vmem:[#allocation6 + $0x75c] sm:$0xf] }
 0x436   :  { %12664 = vpow2.f32 %v5684_v40  ;;  %v11082_v40 = vld [vmem:[#allocation6 + $0x3a0] sm:$0xf] }
 0x437   :  { %7431 = vmatpush.bf16.msra.mxu1 %v10679_v52  ;;  %v10859_v52 = vor.u32 %v12411_v54, %v10856_v33  ;;  %v11434_v54 = vld [vmem:[#allocation6 + $0x668] sm:$0xf]  ;;  %v12558_v33 = vld [vmem:[#allocation6 + $0x678] sm:$0xf0] }
 0x438   :  { %v5542_v26 = vpop.permute.xlu0 %5541  ;;  %v5610_v56 = vpop.permute.xlu1 %5609 }
 0x439   :  { %v5544_v13 = vmax.f32 %v13547_v14, %v5542_v26 }
 0x43a   :  { %v12661_v4 = vpop.eup %12660 }
 0x43b   :  { %v12663_v47 = vpop.eup %12662  ;;  %v10609_v21 = vadd.f32 -1.0, %v12661_v4  ;;  %7432 = vmatpush.bf16.msra.mxu1 %v10659_v49 }
 0x43c   :  { %v10607_v35 = vadd.f32 -1.0, %v12663_v47  ;;  %v12665_v34 = vpop.eup %12664  ;;  %v12406_v47 = vld [vmem:[#allocation6 + $0x1bc] sm:$0xf] }
 0x43d   :  { %v5697_v28 = vmul.f32 1.6732632, %v10609_v21  ;;  %v10611_v38 = vadd.f32 -1.0, %v12665_v34  ;;  %v10836_v21 = vld [vmem:[#allocation6 + $0x1cc] sm:$0xf0] }
 0x43e   :  { %v5695_v7 = vmul.f32 1.6732632, %v10607_v35  ;;  %v11474_v34 = vld [vmem:[#allocation6 + $0x6b8] sm:$0xf] }
 0x43f   :  { %v5704_v5 = vsel %vm5669_vm7, %v5661_v62, %v5697_v28  ;;  %7433 = vmatpush.bf16.msra.mxu1 %v10639_v57  ;;  %v5699_v25 = vmul.f32 1.6732632, %v10611_v38  ;;  %v11535_v62 = vor.u32 %v12583_v51, %v11534_v50  ;;  %v10839_v28 = vor.u32 %v12406_v47, %v10836_v21  ;;  %v11494_v57 = vld [vmem:[#allocation6 + $0x6e0] sm:$0xf]  ;;  %v11454_v38 = vld [vmem:[#allocation6 + $0x690] sm:$0xf] }
 0x440   :  { %v5711_v45 = vmul.f32 1.050701, %v5704_v5  ;;  %v5702_v15 = vsel %vm5667_vm8, %v5631_v61, %v5695_v7  ;;  %v5476_v61 = vmax.f32 %v13535_v12, %v13512_v60  ;;  %v5614_v29 = vpop.permute.xlu0 %5613  ;;  %v11083_v60 = vor.u32 %v12469_v42, %v11082_v40  ;;  %v11062_v12 = vld [vmem:[#allocation6 + $0x378] sm:$0xf]  ;;  %v10816_v5 = vld [vmem:[#allocation6 + $0x1a4] sm:$0xf0] }
 0x441   :  { %v5709_v20 = vmul.f32 1.050701, %v5702_v15  ;;  %v5706_v14 = vsel %vm5671_vm9, %v13592_v9, %v5699_v25  ;;  %7402 = vmatpush.bf16.msrb.mxu3 %v11535_v62  ;;  %v11495_v3 = vor.u32 %v12573_v30, %v11494_v57  ;;  %v11042_v15 = vld [vmem:[#allocation6 + $0x350] sm:$0xf]  ;;  %v10819_v58 = vor.u32 %v12401_v17, %v10816_v5  ;;  %v11002_v51 = vld [vmem:[#allocation6 + $0x300] sm:$0xf] }
 0x442   :  { %v13596_v2 = vpack.c.bf16 %v5711_v45, %v5711_v45  ;;  %v5713_v49 = vmul.f32 1.050701, %v5706_v14  ;;  %v5632_v4 = vsel %vm5620_vm2, %v5476_v61, %v5610_v56  ;;  %v11063_v45 = vor.u32 %v12464_v55, %v11062_v12  ;;  %v11556_v25 = vld [vmem:[#allocation6 + $0x76c] sm:$0xf0]  ;;  %v12541_v42 = vld [vmem:[#allocation6 + $0x5f4] sm:$0xf] }
 0x443   :  { %v13598_v24 = vpack.c.bf16 %v5709_v20, %v5709_v20  ;;  %7434 = vmatpush.bf16.msra.mxu1 %v10619_v27  ;;  %v5649_v41 = vpop.permute.xlu2 %5648  ;;  %v5633_v9 = vsel %vm5622_vm3, %v5632_v4, %v5614_v29  ;;  %v12568_v20 = vld [vmem:[#allocation6 + $0x6c8] sm:$0xf0]  ;;  %v10796_v27 = vld [vmem:[#allocation6 + $0x17c] sm:$0xf0]  ;;  %v11043_v53 = vor.u32 %v12459_v31, %v11042_v15  ;;  %v11023_v50 = vor.u32 %v12454_v32, %v11022_v10  ;;  %v11236_v12 = vld [vmem:[#allocation6 + $0x4ec] sm:$0xf0] }
 0x444   :  { %7396 = vmatmul.bf16.vlgmr.msra.gmra.mxu2 %v13596_v2  ;;  %v13604_v8 = vsel %vm5620_vm2, %v5544_v13, %v5649_v41  ;;  %v13613_v7 = vpack.c.bf16 %v5713_v49, %v5713_v49  ;;  %v10779_v62 = vor.u32 %v12391_v39, %v10776_v19  ;;  %v11559_v56 = vor.u32 %v12586_v0, %v11556_v25  ;;  %v10982_v49 = vld [vmem:[#allocation6 + $0x2d8] sm:$0xf]  ;;  %v12444_v47 = vld [vmem:[#allocation6 + $0x2e8] sm:$0xf0]  ;;  %v11414_v21 = vld [vmem:[#allocation6 + $0x640] sm:$0xf] }
 0x445   :  { %7370 = vmatmul.bf16.vlgmr.msra.gmra.mxu0 %v13598_v24  ;;  %7511 = vmatpush.bf16.msra.mxu2 %v11599_v18  ;;  %v12396_v18 = vld [vmem:[#allocation6 + $0x16c] sm:$0xf]  ;;  %v11435_v61 = vor.u32 %v12558_v33, %v11434_v54  ;;  %v10983_v17 = vor.u32 %v12444_v47, %v10982_v49  ;;  %v11356_v30 = vld [vmem:[#allocation6 + $0x5dc] sm:$0xf0]  ;;  %v11216_v31 = vld [vmem:[#allocation6 + $0x4c4] sm:$0xf0] }
 0x446   :  { %7440 = vmatpush.bf16.msra.mxu0 %v10919_v1  ;;  %7403 = vmatpush.bf16.msrb.mxu3 %v11515_v6  ;;  %v11475_v1 = vor.u32 %v12568_v20, %v11474_v34  ;;  %v10799_v23 = vor.u32 %v12396_v18, %v10796_v27  ;;  %v11376_v6 = vld [vmem:[#allocation6 + $0x604] sm:$0xf0]  ;;  %v12536_v5 = vld [vmem:[#allocation6 + $0x5cc] sm:$0xf]  ;;  %v12571_v34 = vld [vmem:[#allocation6 + $0x6e4] sm:$0xf] }
 0x447   :  { %v11379_v57 = vor.u32 %v12541_v42, %v11376_v6  ;;  %v11496_v20 = vld [vmem:[#allocation6 + $0x6f4] sm:$0xf0]  ;;  %v11359_v27 = vor.u32 %v12536_v5, %v11356_v30  ;;  %v11602_v32 = vld [vmem:[#allocation6 + $0x7b0] sm:$0xf]  ;;  %v11196_v39 = vld [vmem:[#allocation6 + $0x49c] sm:$0xf0] }
 0x448   :  { %v11336_v10 = vld [vmem:[#allocation6 + $0x5b4] sm:$0xf0]  ;;  %v12566_v19 = vld [vmem:[#allocation6 + $0x6bc] sm:$0xf]  ;;  %v12491_v33 = vld [vmem:[#allocation6 + $0x464] sm:$0xf] }
 0x449   :  { %7512 = vmatpush.bf16.msra.mxu2 %v11579_v63  ;;  %v12563_v63 = vld [vmem:[#allocation6 + $0x6a0] sm:$0xf0]  ;;  %v12526_v25 = vld [vmem:[#allocation6 + $0x57c] sm:$0xf]  ;;  %v11296_v42 = vld [vmem:[#allocation6 + $0x564] sm:$0xf0] }
 0x44a   :  { %7441 = vmatpush.bf16.msra.mxu0 %v10899_v36  ;;  %7404 = vmatpush.bf16.msrb.mxu3 %v11495_v3  ;;  %v11455_v13 = vor.u32 %v12563_v63, %v11454_v38  ;;  %v10962_v3 = vld [vmem:[#allocation6 + $0x2b0] sm:$0xf]  ;;  %v12599_v38 = vld [vmem:[#allocation6 + $0x7c0] sm:$0xf0]  ;;  %v11499_v63 = vor.u32 %v12571_v34, %v11496_v20  ;;  %v12422_v49 = vld [vmem:[#allocation6 + $0x23c] sm:$0xf] }
 0x44b   :  { %v5618_v35 = vpop.permute.xlu2 %5617  ;;  %v12481_v30 = vld [vmem:[#allocation6 + $0x414] sm:$0xf]  ;;  %v11242_v20 = vld [vmem:[#allocation6 + $0x4e0] sm:$0xf] }
 0x44c   :  { %v5634_v48 = vsel %vm5624_vm4, %v5633_v9, %v5618_v35  ;;  %v12553_v9 = vld [vmem:[#allocation6 + $0x650] sm:$0xf0]  ;;  %v11539_v35 = vor.u32 %v12581_v43, %v11536_v16 }
 0x44d   :  { %v5678_v59 = vmul.f32 1.442695, %v5634_v48  ;;  %vm5668_vm10 = vcmp.gt.f32.partialorder %v5634_v48, 0.0 }
 0x44e   :  { %7442 = vmatpush.bf16.msra.mxu0 %v10879_v11  ;;  %7405 = vmatpush.bf16.msrb.mxu3 %v11475_v1  ;;  %v12449_v11 = vld [vmem:[#allocation6 + $0x310] sm:$0xf0] }
 0x44f   :  { %12666 = vpow2.f32 %v5678_v59  ;;  %v11003_v40 = vor.u32 %v12449_v11, %v11002_v51  ;;  %v12576_v59 = vld [vmem:[#allocation6 + $0x70c] sm:$0xf]  ;;  %v11582_v51 = vld [vmem:[#allocation6 + $0x788] sm:$0xf]  ;;  %v12594_v11 = vld [vmem:[#allocation6 + $0x798] sm:$0xf0] }
 0x452   :  { %7443 = vmatpush.bf16.msra.mxu0 %v10859_v52  ;;  %7406 = vmatpush.bf16.msrb.mxu3 %v11455_v13  ;;  %v11399_v52 = vor.u32 %v12546_v44, %v11396_v46  ;;  %v11476_v13 = vld [vmem:[#allocation6 + $0x6cc] sm:$0xf0] }
 0x453   :  { %v11479_v54 = vor.u32 %v12566_v19, %v11476_v13 }
 0x454   :  { %7461 = vmatmul.bf16.vlgmr.msrb.gmra.mxu2 %v13598_v24 }
 0x455   :  { %7544 = vmatpush.bf16.msrb.mxu2 %v11083_v60  ;;  %11612 = vmatmul.msk.bf16.vlgmr.msrb.gmra.mxu0 %vm5620_vm2, %v13613_v7  ;;  %v12667_v26 = vpop.eup %12666  ;;  %v12506_v60 = vld [vmem:[#allocation6 + $0x4dc] sm:$0xf] }
 0x456   :  { %7444 = vmatpush.bf16.msra.mxu0 %v10839_v28  ;;  %v10608_v36 = vadd.f32 -1.0, %v12667_v26  ;;  %7407 = vmatpush.bf16.msrb.mxu3 %v11435_v61  ;;  %v11516_v28 = vld [vmem:[#allocation6 + $0x71c] sm:$0xf0]  ;;  %v11239_v55 = vor.u32 %v12506_v60, %v11236_v12  ;;  %v10942_v26 = vld [vmem:[#allocation6 + $0x288] sm:$0xf] }
 0x457   :  { %v11519_v15 = vor.u32 %v12576_v59, %v11516_v28  ;;  %v12561_v61 = vld [vmem:[#allocation6 + $0x694] sm:$0xf]  ;;  %v11436_v60 = vld [vmem:[#allocation6 + $0x67c] sm:$0xf0]  ;;  %v12516_v28 = vld [vmem:[#allocation6 + $0x52c] sm:$0xf] }
 0x458   :  { %v5696_v41 = vmul.f32 1.6732632, %v10608_v36  ;;  %v12496_v36 = vld [vmem:[#allocation6 + $0x48c] sm:$0xf] }
 0x459   :  { %7545 = vmatpush.bf16.msrb.mxu2 %v11063_v45  ;;  %v12439_v45 = vld [vmem:[#allocation6 + $0x2c0] sm:$0xf0]  ;;  %v11199_v44 = vor.u32 %v12496_v36, %v11196_v39  ;;  %v10864_v36 = vld [vmem:[#allocation6 + $0x1fc] sm:$0xf0] }
 0x45a   :  { %7445 = vmatpush.bf16.msra.mxu0 %v10819_v58  ;;  %v5703_v14 = vsel %vm5668_vm10, %v5634_v48, %v5696_v41  ;;  %v11415_v48 = vor.u32 %v12553_v9, %v11414_v21  ;;  %v12501_v58 = vld [vmem:[#allocation6 + $0x4b4] sm:$0xf]  ;;  %v10963_v1 = vor.u32 %v12439_v45, %v10962_v3  ;;  %v11603_v41 = vor.u32 %v12599_v38, %v11602_v32  ;;  %v12486_v21 = vld [vmem:[#allocation6 + $0x43c] sm:$0xf]  ;;  %v11156_v9 = vld [vmem:[#allocation6 + $0x44c] sm:$0xf0] }
 0x45b   :  { %v5710_v29 = vmul.f32 1.050701, %v5703_v14  ;;  %v11219_v18 = vor.u32 %v12501_v58, %v11216_v31  ;;  %v11176_v14 = vld [vmem:[#allocation6 + $0x474] sm:$0xf0]  ;;  %v11159_v12 = vor.u32 %v12486_v21, %v11156_v9  ;;  %v11136_v3 = vld [vmem:[#allocation6 + $0x424] sm:$0xf0] }
 0x45c   :  { %7408 = vmatpush.bf16.msrb.mxu3 %v11415_v48  ;;  %v11179_v43 = vor.u32 %v12491_v33, %v11176_v14  ;;  %v12556_v48 = vld [vmem:[#allocation6 + $0x66c] sm:$0xf]  ;;  %v10884_v45 = vld [vmem:[#allocation6 + $0x224] sm:$0xf0]  ;;  %v11416_v58 = vld [vmem:[#allocation6 + $0x654] sm:$0xf0]  ;;  %v11139_v31 = vor.u32 %v12481_v30, %v11136_v3 }
 0x45d   :  { %7546 = vmatpush.bf16.msrb.mxu2 %v11043_v53  ;;  %v13618_v4 = vpack.c.bf16 %v5710_v29, %v5710_v29  ;;  %v12531_v53 = vld [vmem:[#allocation6 + $0x5a4] sm:$0xf]  ;;  %v11456_v29 = vld [vmem:[#allocation6 + $0x6a4] sm:$0xf0]  ;;  %v11439_v5 = vor.u32 %v12556_v48, %v11436_v60  ;;  %v12476_v32 = vld [vmem:[#allocation6 + $0x3ec] sm:$0xf] }
 0x45e   :  { %7446 = vmatpush.bf16.msra.mxu0 %v10799_v23  ;;  %v12434_v23 = vld [vmem:[#allocation6 + $0x298] sm:$0xf0]  ;;  %v11339_v46 = vor.u32 %v12531_v53, %v11336_v10  ;;  %v11459_v47 = vor.u32 %v12561_v61, %v11456_v29  ;;  %v10922_v53 = vld [vmem:[#allocation6 + $0x260] sm:$0xf]  ;;  %v11202_v61 = vld [vmem:[#allocation6 + $0x490] sm:$0xf] }
 0x45f   :  { %7383 = vmatmul.bf16.vlgmr.msrb.gmra.mxu1 %v13618_v4  ;;  %v10943_v0 = vor.u32 %v12434_v23, %v10942_v26  ;;  %v12429_v26 = vld [vmem:[#allocation6 + $0x270] sm:$0xf0]  ;;  %v11116_v38 = vld [vmem:[#allocation6 + $0x3fc] sm:$0xf0]  ;;  %v12499_v29 = vld [vmem:[#allocation6 + $0x4a0] sm:$0xf0] }
 0x460   :  { %7479 = vmatpush.bf16.msrb.mxu1 %v11399_v52  ;;  %7466 = vmatpush.bf16.msra.mxu3 %v11239_v55  ;;  %v11583_v52 = vor.u32 %v12594_v11, %v11582_v51  ;;  %v11276_v55 = vld [vmem:[#allocation6 + $0x53c] sm:$0xf0]  ;;  %v11119_v19 = vor.u32 %v12476_v32, %v11116_v38  ;;  %v12471_v51 = vld [vmem:[#allocation6 + $0x3c4] sm:$0xf]  ;;  %v11096_v11 = vld [vmem:[#allocation6 + $0x3d4] sm:$0xf0] }
 0x461   :  { %7547 = vmatpush.bf16.msrb.mxu2 %v11023_v50  ;;  %v11316_v50 = vld [vmem:[#allocation6 + $0x58c] sm:$0xf0]  ;;  %v11279_v34 = vor.u32 %v12516_v28, %v11276_v55  ;;  %v11099_v14 = vor.u32 %v12471_v51, %v11096_v11  ;;  %v12494_v21 = vld [vmem:[#allocation6 + $0x478] sm:$0xf0]  ;;  %v12397_v60 = vld [vmem:[#allocation6 + $0x174] sm:$0xf]  ;;  %v5653_v28 = vpop.permute.xlu1 %5652 }
 0x462   :  { %7447 = vmatpush.bf16.msra.mxu0 %v10779_v62  ;;  %v12427_v62 = vld [vmem:[#allocation6 + $0x264] sm:$0xf]  ;;  %v11319_v16 = vor.u32 %v12526_v25, %v11316_v50  ;;  %v12504_v25 = vld [vmem:[#allocation6 + $0x4c8] sm:$0xf0]  ;;  %v12414_v48 = vld [vmem:[#allocation6 + $0x1f8] sm:$0xf0] }
 0x463   :  { %v12424_v50 = vld [vmem:[#allocation6 + $0x248] sm:$0xf0]  ;;  %v10842_v3 = vld [vmem:[#allocation6 + $0x1c0] sm:$0xf]  ;;  %v10822_v38 = vld [vmem:[#allocation6 + $0x198] sm:$0xf] }
 0x464   :  { %11613 = vmatmul.msk.bf16.vlgmr.msra.gmra.mxu2 %vm5620_vm2, %v13613_v7  ;;  %7480 = vmatpush.bf16.msrb.mxu1 %v11379_v57  ;;  %v12577_v51 = vld [vmem:[#allocation6 + $0x714] sm:$0xf]  ;;  %v11524_v11 = vld [vmem:[#allocation6 + $0x724] sm:$0xf0] }
 0x465   :  { %7548 = vmatpush.bf16.msrb.mxu2 %v11003_v40  ;;  %7448 = vmatmul.bf16.vlgmr.msra.gmra.mxu0 %v13587_v22  ;;  %v12521_v40 = vld [vmem:[#allocation6 + $0x554] sm:$0xf] }
 0x466   :  { %7492 = vmatpush.bf16.msrb.mxu0 %v11559_v56  ;;  %7467 = vmatpush.bf16.msra.mxu3 %v11219_v18  ;;  %v10924_v56 = vld [vmem:[#allocation6 + $0x274] sm:$0xf0]  ;;  %v11299_v59 = vor.u32 %v12521_v40, %v11296_v42  ;;  %v12509_v18 = vld [vmem:[#allocation6 + $0x4f0] sm:$0xf0]  ;;  %v12402_v40 = vld [vmem:[#allocation6 + $0x19c] sm:$0xf] }
 0x467   :  { %v10927_v6 = vor.u32 %v12427_v62, %v10924_v56  ;;  %v11243_v39 = vor.u32 %v12509_v18, %v11242_v20  ;;  %v12407_v62 = vld [vmem:[#allocation6 + $0x1c4] sm:$0xf]  ;;  %v10824_v42 = vld [vmem:[#allocation6 + $0x1ac] sm:$0xf0]  ;;  %v11564_v18 = vld [vmem:[#allocation6 + $0x774] sm:$0xf0] }
 0x468   :  { %7481 = vmatpush.bf16.msrb.mxu1 %v11359_v27  ;;  %v12511_v27 = vld [vmem:[#allocation6 + $0x504] sm:$0xf]  ;;  %v10827_v9 = vor.u32 %v12402_v40, %v10824_v42  ;;  %v12589_v40 = vld [vmem:[#allocation6 + $0x770] sm:$0xf0]  ;;  %v12572_v42 = vld [vmem:[#allocation6 + $0x6ec] sm:$0xf] }
 0x469   :  { %7549 = vmatpush.bf16.msrb.mxu2 %v10983_v17  ;;  %v12417_v17 = vld [vmem:[#allocation6 + $0x214] sm:$0xf]  ;;  %v12587_v20 = vld [vmem:[#allocation6 + $0x764] sm:$0xf] }
 0x46a   :  { %7493 = vmatpush.bf16.msrb.mxu0 %v11539_v35  ;;  %7468 = vmatpush.bf16.msra.mxu3 %v11199_v44  ;;  %v10904_v35 = vld [vmem:[#allocation6 + $0x24c] sm:$0xf0]  ;;  %v10887_v10 = vor.u32 %v12417_v17, %v10884_v45  ;;  %v10923_v44 = vor.u32 %v12429_v26, %v10922_v53  ;;  %v11162_v17 = vld [vmem:[#allocation6 + $0x440] sm:$0xf]  ;;  %v12409_v45 = vld [vmem:[#allocation6 + $0x1d0] sm:$0xf0] }
 0x46b   :  { %v10907_v57 = vor.u32 %v12422_v49, %v10904_v35  ;;  %v10862_v35 = vld [vmem:[#allocation6 + $0x1e8] sm:$0xf]  ;;  %v10843_v53 = vor.u32 %v12409_v45, %v10842_v3  ;;  %v12484_v26 = vld [vmem:[#allocation6 + $0x428] sm:$0xf0]  ;;  %v11484_v3 = vld [vmem:[#allocation6 + $0x6d4] sm:$0xf0] }
 0x46c   :  { %7482 = vmatpush.bf16.msrb.mxu1 %v11339_v46  ;;  %v10902_v46 = vld [vmem:[#allocation6 + $0x238] sm:$0xf] }
 0x46d   :  { %7550 = vmatpush.bf16.msrb.mxu2 %v10963_v1  ;;  %v11256_v1 = vld [vmem:[#allocation6 + $0x514] sm:$0xf0]  ;;  %v10903_v56 = vor.u32 %v12424_v50, %v10902_v46  ;;  %v11122_v46 = vld [vmem:[#allocation6 + $0x3f0] sm:$0xf] }
 0x46e   :  { %7494 = vmatpush.bf16.msrb.mxu0 %v11519_v15  ;;  %7469 = vmatpush.bf16.msra.mxu3 %v11179_v43  ;;  %v12551_v15 = vld [vmem:[#allocation6 + $0x644] sm:$0xf]  ;;  %v11259_v13 = vor.u32 %v12511_v27, %v11256_v1 }
 0x46f   :  { %7435 = vmatmul.bf16.vlgmr.msra.gmra.mxu1 %v13563_v37  ;;  %v11419_v23 = vor.u32 %v12551_v15, %v11416_v58  ;;  %v12392_v15 = vld [vmem:[#allocation6 + $0x14c] sm:$0xf]  ;;  %v10784_v58 = vld [vmem:[#allocation6 + $0x15c] sm:$0xf0] }
 0x470   :  { %7483 = vmatpush.bf16.msrb.mxu1 %v11319_v16  ;;  %v10882_v16 = vld [vmem:[#allocation6 + $0x210] sm:$0xf]  ;;  %v10787_v32 = vor.u32 %v12392_v15, %v10784_v58 }
 0x471   :  { %7551 = vmatpush.bf16.msrb.mxu2 %v10943_v0  ;;  %v11222_v0 = vld [vmem:[#allocation6 + $0x4b8] sm:$0xf] }
 0x472   :  { %7495 = vmatpush.bf16.msrb.mxu0 %v11499_v63  ;;  %7470 = vmatpush.bf16.msra.mxu3 %v11159_v12  ;;  %v12412_v63 = vld [vmem:[#allocation6 + $0x1ec] sm:$0xf]  ;;  %v11223_v33 = vor.u32 %v12504_v25, %v11222_v0  ;;  %v10804_v12 = vld [vmem:[#allocation6 + $0x184] sm:$0xf0]  ;;  %v12479_v0 = vld [vmem:[#allocation6 + $0x400] sm:$0xf0] }
 0x473   :  { %v10807_v30 = vor.u32 %v12397_v60, %v10804_v12  ;;  %v10802_v25 = vld [vmem:[#allocation6 + $0x170] sm:$0xf]  ;;  %v11542_v60 = vld [vmem:[#allocation6 + $0x738] sm:$0xf] }
 0x474   :  { %7552 = vmatmul.bf16.vlgmr.msrb.gmra.mxu2 %v13598_v24  ;;  %7484 = vmatpush.bf16.msrb.mxu1 %v11299_v59 }
 0x475   :  { %7602 = vmatpush.bf16.msra.mxu2 %v11603_v41  ;;  %v10867_v41 = vor.u32 %v12412_v63, %v10864_v36  ;;  %v12404_v63 = vld [vmem:[#allocation6 + $0x1a8] sm:$0xf0]  ;;  %v11567_v36 = vor.u32 %v12587_v20, %v11564_v18  ;;  %v11522_v18 = vld [vmem:[#allocation6 + $0x710] sm:$0xf] }
 0x476   :  { %7496 = vmatpush.bf16.msrb.mxu0 %v11479_v54  ;;  %7471 = vmatpush.bf16.msra.mxu3 %v11139_v31  ;;  %v10844_v54 = vld [vmem:[#allocation6 + $0x1d4] sm:$0xf0]  ;;  %v5663_v31 = vsel %vm5622_vm3, %v13604_v8, %v5653_v28  ;;  %v12582_v8 = vld [vmem:[#allocation6 + $0x73c] sm:$0xf]  ;;  %v12584_v28 = vld [vmem:[#allocation6 + $0x748] sm:$0xf0] }
 0x477   :  { %v10847_v43 = vor.u32 %v12407_v62, %v10844_v54  ;;  %v11123_v62 = vor.u32 %v12479_v0, %v11122_v46  ;;  %v11543_v58 = vor.u32 %v12584_v28, %v11542_v60  ;;  %v12384_v20 = vld [vmem:[#allocation6 + $0x108] sm:$0xf0]  ;;  %v10724_v46 = vld [vmem:[#allocation6 + $0xe4] sm:$0xf0]  ;;  %v12557_v0 = vld [vmem:[#allocation6 + $0x674] sm:$0xf] }
 0x478   :  { %7485 = vmatpush.bf16.msrb.mxu1 %v11279_v34  ;;  %v10684_v60 = vld [vmem:[#allocation6 + $0x94] sm:$0xf0] }
 0x479   :  { %7603 = vmatpush.bf16.msra.mxu2 %v11583_v52  ;;  %v12419_v52 = vld [vmem:[#allocation6 + $0x220] sm:$0xf0] }
 0x47a   :  { %7497 = vmatpush.bf16.msrb.mxu0 %v11459_v47  ;;  %7472 = vmatpush.bf16.msra.mxu3 %v11119_v19  ;;  %v10883_v49 = vor.u32 %v12419_v52, %v10882_v16  ;;  %v11182_v47 = vld [vmem:[#allocation6 + $0x468] sm:$0xf]  ;;  %v11527_v16 = vor.u32 %v12577_v51, %v11524_v11  ;;  %v11562_v52 = vld [vmem:[#allocation6 + $0x760] sm:$0xf] }
 0x47b   :  { %v11183_v59 = vor.u32 %v12494_v21, %v11182_v47  ;;  %v10702_v11 = vld [vmem:[#allocation6 + $0xa8] sm:$0xf] }
 0x47c   :  { %7486 = vmatpush.bf16.msrb.mxu1 %v11259_v13 }
 0x47d   :  { %7622 = vmatpush.bf16.msrb.mxu2 %v10927_v6  ;;  %v11203_v6 = vor.u32 %v12499_v29, %v11202_v61  ;;  %v10782_v61 = vld [vmem:[#allocation6 + $0x148] sm:$0xf]  ;;  %v12394_v29 = vld [vmem:[#allocation6 + $0x158] sm:$0xf0] }
 0x47e   :  { %7498 = vmatpush.bf16.msrb.mxu0 %v11439_v5  ;;  %7473 = vmatpush.bf16.msra.mxu3 %v11099_v14  ;;  %v12489_v5 = vld [vmem:[#allocation6 + $0x450] sm:$0xf0]  ;;  %v12474_v14 = vld [vmem:[#allocation6 + $0x3d8] sm:$0xf0]  ;;  %v10783_v21 = vor.u32 %v12394_v29, %v10782_v61  ;;  %v10704_v61 = vld [vmem:[#allocation6 + $0xbc] sm:$0xf0] }
 0x47f   :  { %7487 = vmatmul.bf16.vlgmr.msrb.gmra.mxu1 %v13596_v2  ;;  %v11163_v27 = vor.u32 %v12489_v5, %v11162_v17  ;;  %v10764_v17 = vld [vmem:[#allocation6 + $0x134] sm:$0xf0]  ;;  %v12552_v29 = vld [vmem:[#allocation6 + $0x64c] sm:$0xf] }
 0x480   :  { %7531 = vmatpush.bf16.msra.mxu1 %v10923_v44  ;;  %v10823_v44 = vor.u32 %v12404_v63, %v10822_v38 }
 0x481   :  { %7623 = vmatpush.bf16.msrb.mxu2 %v10907_v57  ;;  %v10863_v57 = vor.u32 %v12414_v48, %v10862_v35  ;;  %v11563_v35 = vor.u32 %v12589_v40, %v11562_v52  ;;  %v12389_v48 = vld [vmem:[#allocation6 + $0x130] sm:$0xf0]  ;;  %v11250_v52 = vld [vmem:[#allocation6 + $0x4e8] sm:$0xf]  ;;  %v12510_v40 = vld [vmem:[#allocation6 + $0x4f8] sm:$0xf0] }
 0x482   :  { %7499 = vmatpush.bf16.msrb.mxu0 %v11419_v23 }
 0x484   :  { %11614 = vmatmul.msk.bf16.vlgmr.msra.gmra.mxu2 %vm5620_vm2, %v13613_v7  ;;  %7532 = vmatpush.bf16.msra.mxu1 %v10903_v56 }
 0x485   :  { %7624 = vmatpush.bf16.msrb.mxu2 %v10887_v10  ;;  %v13629_v55 = vpop.f32.mrf.mxu2  ;;  %v11142_v10 = vld [vmem:[#allocation6 + $0x418] sm:$0xf] }
 0x486   :  { %7557 = vmatpush.bf16.msra.mxu0 %v11243_v39  ;;  %v11544_v39 = vld [vmem:[#allocation6 + $0x74c] sm:$0xf0]  ;;  %v11143_v19 = vor.u32 %v12484_v26, %v11142_v10  ;;  %v12562_v26 = vld [vmem:[#allocation6 + $0x69c] sm:$0xf] }
 0x487   :  { %v11547_v50 = vor.u32 %v12582_v8, %v11544_v39  ;;  %v10744_v10 = vld [vmem:[#allocation6 + $0x10c] sm:$0xf0]  ;;  %v12379_v8 = vld [vmem:[#allocation6 + $0xe0] sm:$0xf0]  ;;  %v11502_v39 = vld [vmem:[#allocation6 + $0x6e8] sm:$0xf] }
 0x488   :  { %7533 = vmatpush.bf16.msra.mxu1 %v10883_v49 }
 0x489   :  { %7625 = vmatpush.bf16.msrb.mxu2 %v10867_v41  ;;  %v12399_v41 = vld [vmem:[#allocation6 + $0x180] sm:$0xf0] }
 0x48a   :  { %7558 = vmatpush.bf16.msra.mxu0 %v11223_v33  ;;  %v10803_v54 = vor.u32 %v12399_v41, %v10802_v25  ;;  %v11102_v33 = vld [vmem:[#allocation6 + $0x3c8] sm:$0xf] }
 0x48b   :  { %v11103_v49 = vor.u32 %v12474_v14, %v11102_v33  ;;  %v11444_v25 = vld [vmem:[#allocation6 + $0x684] sm:$0xf0]  ;;  %v12569_v14 = vld [vmem:[#allocation6 + $0x6d0] sm:$0xf0] }
 0x48c   :  { %7534 = vmatpush.bf16.msra.mxu1 %v10863_v57  ;;  %v12387_v57 = vld [vmem:[#allocation6 + $0x124] sm:$0xf]  ;;  %v11447_v33 = vor.u32 %v12557_v0, %v11444_v25  ;;  %v11190_v25 = vld [vmem:[#allocation6 + $0x470] sm:$0xf] }
 0x48d   :  { %7626 = vmatpush.bf16.msrb.mxu2 %v10847_v43  ;;  %v5657_v34 = vpop.permute.xlu0 %5656  ;;  %v7347_v13 = vpop.f32.mrf.mxu2 }
 0x48e   :  { %7559 = vmatpush.bf16.msra.mxu0 %v11203_v6  ;;  %v5664_v1 = vsel %vm5624_vm4, %v5663_v31, %v5657_v34  ;;  %v11504_v6 = vld [vmem:[#allocation6 + $0x6fc] sm:$0xf0]  ;;  %v10767_v31 = vor.u32 %v12387_v57, %v10764_v17  ;;  %v10742_v34 = vld [vmem:[#allocation6 + $0xf8] sm:$0xf]  ;;  %v12574_v13 = vld [vmem:[#allocation6 + $0x6f8] sm:$0xf0] }
 0x48f   :  { %v5682_v23 = vmul.f32 1.442695, %v5664_v1  ;;  %vm5670_vm11 = vcmp.gt.f32.partialorder %v5664_v1, 0.0  ;;  %v11230_v57 = vld [vmem:[#allocation6 + $0x4c0] sm:$0xf] }
 0x490   :  { %7535 = vmatpush.bf16.msra.mxu1 %v10843_v53  ;;  %v12382_v53 = vld [vmem:[#allocation6 + $0xfc] sm:$0xf]  ;;  %v12505_v17 = vld [vmem:[#allocation6 + $0x4d0] sm:$0xf0] }
 0x491   :  { %7627 = vmatpush.bf16.msrb.mxu2 %v10827_v9  ;;  %12668 = vpow2.f32 %v5682_v23  ;;  %v10762_v9 = vld [vmem:[#allocation6 + $0x120] sm:$0xf]  ;;  %v11464_v23 = vld [vmem:[#allocation6 + $0x6ac] sm:$0xf0]  ;;  %v10747_v63 = vor.u32 %v12382_v53, %v10744_v10  ;;  %v11210_v53 = vld [vmem:[#allocation6 + $0x498] sm:$0xf] }
 0x492   :  { %7560 = vmatpush.bf16.msra.mxu0 %v11183_v59  ;;  %v11507_v59 = vor.u32 %v12572_v42, %v11504_v6  ;;  %v10763_v45 = vor.u32 %v12389_v48, %v10762_v9  ;;  %v12367_v48 = vld [vmem:[#allocation6 + $0x84] sm:$0xf]  ;;  %v12500_v10 = vld [vmem:[#allocation6 + $0x4a8] sm:$0xf0] }
 0x494   :  { %7536 = vmatpush.bf16.msra.mxu1 %v10823_v44  ;;  %v12377_v44 = vld [vmem:[#allocation6 + $0xd4] sm:$0xf] }
 0x495   :  { %7628 = vmatpush.bf16.msrb.mxu2 %v10807_v30  ;;  %v12567_v30 = vld [vmem:[#allocation6 + $0x6c4] sm:$0xf]  ;;  %v10727_v51 = vor.u32 %v12377_v44, %v10724_v46  ;;  %v11244_v44 = vld [vmem:[#allocation6 + $0x4f4] sm:$0xf0] }
 0x496   :  { %7561 = vmatpush.bf16.msra.mxu0 %v11163_v27  ;;  %v11487_v27 = vor.u32 %v12567_v30, %v11484_v3  ;;  %v10687_v30 = vor.u32 %v12367_v48, %v10684_v60  ;;  %v10662_v3 = vld [vmem:[#allocation6 + $0x58] sm:$0xf] }
 0x497   :  { %v12669_v56 = vpop.eup %12668  ;;  %v11382_v60 = vld [vmem:[#allocation6 + $0x5f8] sm:$0xf] }
 0x498   :  { %v10610_v43 = vadd.f32 -1.0, %v12669_v56  ;;  %7537 = vmatpush.bf16.msra.mxu1 %v10803_v54  ;;  %v11482_v54 = vld [vmem:[#allocation6 + $0x6c0] sm:$0xf]  ;;  %v12372_v56 = vld [vmem:[#allocation6 + $0xac] sm:$0xf] }
 0x499   :  { %7629 = vmatpush.bf16.msrb.mxu2 %v10787_v32  ;;  %v10743_v32 = vor.u32 %v12384_v20, %v10742_v34  ;;  %v11483_v42 = vor.u32 %v12569_v14, %v11482_v54  ;;  %v10707_v6 = vor.u32 %v12372_v56, %v10704_v61  ;;  %v12362_v34 = vld [vmem:[#allocation6 + $0x5c] sm:$0xf]  ;;  %v10664_v20 = vld [vmem:[#allocation6 + $0x6c] sm:$0xf0]  ;;  %v10624_v14 = vld [vmem:[#allocation6 + $0x1c] sm:$0xf0] }
 0x49a   :  { %7562 = vmatpush.bf16.msra.mxu0 %v11143_v19  ;;  %v5698_v47 = vmul.f32 1.6732632, %v10610_v43  ;;  %v11467_v19 = vor.u32 %v12562_v26, %v11464_v23  ;;  %v11424_v43 = vld [vmem:[#allocation6 + $0x65c] sm:$0xf0]  ;;  %v10667_v23 = vor.u32 %v12362_v34, %v10664_v20  ;;  %v12354_v54 = vld [vmem:[#allocation6 + $0x18] sm:$0xf0] }
 0x49b   :  { %v11427_v9 = vor.u32 %v12552_v29, %v11424_v43  ;;  %v11402_v29 = vld [vmem:[#allocation6 + $0x620] sm:$0xf]  ;;  %v12549_v43 = vld [vmem:[#allocation6 + $0x630] sm:$0xf0] }
 0x49c   :  { %7630 = vmatmul.bf16.vlgmr.msrb.gmra.mxu2 %v13587_v22  ;;  %v5705_v12 = vsel %vm5670_vm11, %v5664_v1, %v5698_v47  ;;  %7538 = vmatpush.bf16.msra.mxu1 %v10783_v21  ;;  %v12579_v1 = vld [vmem:[#allocation6 + $0x720] sm:$0xf0]  ;;  %v12369_v47 = vld [vmem:[#allocation6 + $0x90] sm:$0xf0]  ;;  %v11462_v21 = vld [vmem:[#allocation6 + $0x698] sm:$0xf] }
 0x49d   :  { %7674 = vmatpush.bf16.msra.mxu2 %v11567_v36  ;;  %v5712_v5 = vmul.f32 1.050701, %v5705_v12  ;;  %v11523_v38 = vor.u32 %v12579_v1, %v11522_v18  ;;  %v10722_v36 = vld [vmem:[#allocation6 + $0xd0] sm:$0xf]  ;;  %v11251_v12 = vor.u32 %v12510_v40, %v11250_v52  ;;  %v11231_v18 = vor.u32 %v12505_v17, %v11230_v57  ;;  %v12547_v40 = vld [vmem:[#allocation6 + $0x624] sm:$0xf] }
 0x49e   :  { %7563 = vmatpush.bf16.msra.mxu0 %v11123_v62  ;;  %v10723_v41 = vor.u32 %v12379_v8, %v10722_v36  ;;  %v12374_v62 = vld [vmem:[#allocation6 + $0xb8] sm:$0xf0]  ;;  %v12357_v8 = vld [vmem:[#allocation6 + $0x34] sm:$0xf]  ;;  %v11224_v52 = vld [vmem:[#allocation6 + $0x4cc] sm:$0xf0] }
 0x49f   :  { %v13635_v15 = vpack.c.bf16 %v5712_v5, %v5712_v5  ;;  %7539 = vmatmul.bf16.vlgmr.msra.gmra.mxu1 %v13587_v22  ;;  %v12554_v36 = vld [vmem:[#allocation6 + $0x658] sm:$0xf0]  ;;  %v11204_v17 = vld [vmem:[#allocation6 + $0x4a4] sm:$0xf0] }
 0x4a0   :  { %7583 = vmatpush.bf16.msrb.mxu1 %v11563_v35  ;;  %v12564_v35 = vld [vmem:[#allocation6 + $0x6a8] sm:$0xf0] }
 0x4a1   :  { %7675 = vmatpush.bf16.msra.mxu2 %v11547_v50  ;;  %7409 = vmatmul.bf16.vlgmr.msrb.gmra.mxu3 %v13635_v15  ;;  %v11503_v50 = vor.u32 %v12574_v13, %v11502_v39  ;;  %v11463_v5 = vor.u32 %v12564_v35, %v11462_v21  ;;  %v10644_v39 = vld [vmem:[#allocation6 + $0x44] sm:$0xf0]  ;;  %v12507_v13 = vld [vmem:[#allocation6 + $0x4e4] sm:$0xf] }
 0x4a2   :  { %7564 = vmatpush.bf16.msra.mxu0 %v11103_v49  ;;  %7518 = vmatpush.bf16.msrb.mxu3 %v10763_v45  ;;  %v10682_v49 = vld [vmem:[#allocation6 + $0x80] sm:$0xf]  ;;  %v12364_v45 = vld [vmem:[#allocation6 + $0x68] sm:$0xf0]  ;;  %v11247_v61 = vor.u32 %v12507_v13, %v11244_v44  ;;  %v11342_v13 = vld [vmem:[#allocation6 + $0x5a8] sm:$0xf] }
 0x4a3   :  { %7500 = vmatmul.bf16.vlgmr.msrb.gmra.mxu0 %v13635_v15  ;;  %v10683_v28 = vor.u32 %v12369_v47, %v10682_v49  ;;  %v10663_v1 = vor.u32 %v12364_v45, %v10662_v3  ;;  %v11170_v49 = vld [vmem:[#allocation6 + $0x448] sm:$0xf]  ;;  %v12490_v47 = vld [vmem:[#allocation6 + $0x458] sm:$0xf0]  ;;  %v11150_v3 = vld [vmem:[#allocation6 + $0x420] sm:$0xf] }
 0x4a4   :  { %7584 = vmatpush.bf16.msrb.mxu1 %v11543_v58  ;;  %v11442_v58 = vld [vmem:[#allocation6 + $0x670] sm:$0xf]  ;;  %v11171_v57 = vor.u32 %v12490_v47, %v11170_v49  ;;  %v12485_v45 = vld [vmem:[#allocation6 + $0x430] sm:$0xf0]  ;;  %v12534_v44 = vld [vmem:[#allocation6 + $0x5b8] sm:$0xf0] }
 0x4a5   :  { %7676 = vmatpush.bf16.msra.mxu2 %v11527_v16  ;;  %v10703_v16 = vor.u32 %v12374_v62, %v10702_v11  ;;  %v10647_v62 = vor.u32 %v12357_v8, %v10644_v39  ;;  %v11302_v47 = vld [vmem:[#allocation6 + $0x558] sm:$0xf] }
 0x4a6   :  { %7609 = vmatpush.bf16.msrb.mxu0 %v10767_v31  ;;  %7519 = vmatpush.bf16.msrb.mxu3 %v10743_v32  ;;  %v12559_v31 = vld [vmem:[#allocation6 + $0x680] sm:$0xf0]  ;;  %v10642_v32 = vld [vmem:[#allocation6 + $0x30] sm:$0xf] }
 0x4a7   :  { %v11443_v26 = vor.u32 %v12559_v31, %v11442_v58 }
 0x4a8   :  { %7585 = vmatpush.bf16.msrb.mxu1 %v11523_v38  ;;  %v12359_v38 = vld [vmem:[#allocation6 + $0x40] sm:$0xf0] }
 0x4a9   :  { %7677 = vmatpush.bf16.msra.mxu2 %v11507_v59  ;;  %v13640_v59 = vld [vmem:[#allocation7] sm:$0x1f]  ;;  %v10643_v0 = vor.u32 %v12359_v38, %v10642_v32  ;;  %v11130_v38 = vld [vmem:[#allocation6 + $0x3f8] sm:$0xf] }
 0x4aa   :  { %7610 = vmatpush.bf16.msrb.mxu0 %v10747_v63  ;;  %7520 = vmatpush.bf16.msrb.mxu3 %v10723_v41  ;;  %v11422_v63 = vld [vmem:[#allocation6 + $0x648] sm:$0xf]  ;;  %v12495_v41 = vld [vmem:[#allocation6 + $0x480] sm:$0xf0] }
 0x4ab   :  { %v11423_v11 = vor.u32 %v12554_v36, %v11422_v63  ;;  %v12480_v63 = vld [vmem:[#allocation6 + $0x408] sm:$0xf0] }
 0x4ac   :  { %7586 = vmatpush.bf16.msrb.mxu1 %v11503_v50  ;;  %v10622_v50 = vld [vmem:[#allocation6 + $0x8] sm:$0xf] }
 0x4ad   :  { %7678 = vmatpush.bf16.msra.mxu2 %v11487_v27  ;;  %v6023_v27 = vperm.slane %v13640_v59, 0 }
 0x4ae   :  { %7611 = vmatpush.bf16.msrb.mxu0 %v10727_v51  ;;  %7521 = vmatpush.bf16.msrb.mxu3 %v10703_v16  ;;  %v12502_v16 = vld [vmem:[#allocation6 + $0x4bc] sm:$0xf] }
 0x4af   :  { %v7346_v46 = vadd.f32 %v13629_v55, %v6023_v27  ;;  %v11191_v55 = vor.u32 %v12495_v41, %v11190_v25  ;;  %v11227_v35 = vor.u32 %v12502_v16, %v11224_v52  ;;  %v12539_v27 = vld [vmem:[#allocation6 + $0x5e0] sm:$0xf0]  ;;  %v11164_v25 = vld [vmem:[#allocation6 + $0x454] sm:$0xf0]  ;;  %v12532_v41 = vld [vmem:[#allocation6 + $0x5ac] sm:$0xf] }
 0x4b0   :  { %7587 = vmatpush.bf16.msrb.mxu1 %v11483_v42  ;;  %v11404_v42 = vld [vmem:[#allocation6 + $0x634] sm:$0xf0]  ;;  %v11144_v16 = vld [vmem:[#allocation6 + $0x42c] sm:$0xf0] }
 0x4b1   :  { %7679 = vmatpush.bf16.msra.mxu2 %v11467_v19  ;;  %7474 = vmatmul.bf16.vlgmr.msra.gmra.mxu3 %v13618_v4  ;;  %v11211_v19 = vor.u32 %v12500_v10, %v11210_v53  ;;  %v11407_v48 = vor.u32 %v12547_v40, %v11404_v42  ;;  %v11151_v53 = vor.u32 %v12485_v45, %v11150_v3  ;;  %v11184_v10 = vld [vmem:[#allocation6 + $0x47c] sm:$0xf0]  ;;  %v11324_v52 = vld [vmem:[#allocation6 + $0x594] sm:$0xf0]  ;;  %v12472_v3 = vld [vmem:[#allocation6 + $0x3cc] sm:$0xf] }
 0x4b2   :  { %7612 = vmatpush.bf16.msrb.mxu0 %v10707_v6  ;;  %7522 = vmatpush.bf16.msrb.mxu3 %v10683_v28  ;;  %v10623_v6 = vor.u32 %v12354_v54, %v10622_v50  ;;  %v12497_v28 = vld [vmem:[#allocation6 + $0x494] sm:$0xf]  ;;  %v11344_v50 = vld [vmem:[#allocation6 + $0x5bc] sm:$0xf0]  ;;  %v11343_v54 = vor.u32 %v12534_v44, %v11342_v13  ;;  %v11090_v13 = vld [vmem:[#allocation6 + $0x3a8] sm:$0xf] }
 0x4b3   :  { %7565 = vmatmul.bf16.vlgmr.msra.gmra.mxu0 %v13618_v4  ;;  %v11207_v34 = vor.u32 %v12497_v28, %v11204_v17  ;;  %v11104_v45 = vld [vmem:[#allocation6 + $0x3dc] sm:$0xf0]  ;;  %v12470_v44 = vld [vmem:[#allocation6 + $0x3b8] sm:$0xf0] }
 0x4b4   :  { %7588 = vmatpush.bf16.msrb.mxu1 %v11463_v5  ;;  %v12542_v5 = vld [vmem:[#allocation6 + $0x5fc] sm:$0xf] }
 0x4b5   :  { %7680 = vmatpush.bf16.msra.mxu2 %v11447_v33  ;;  %v12352_v33 = vld [vmem:[#allocation6 + $0xc] sm:$0xf] }
 0x4b6   :  { %7613 = vmatpush.bf16.msrb.mxu0 %v10687_v30  ;;  %7523 = vmatpush.bf16.msrb.mxu3 %v10663_v1  ;;  %v10627_v21 = vor.u32 %v12352_v33, %v10624_v14  ;;  %v11384_v30 = vld [vmem:[#allocation6 + $0x60c] sm:$0xf0]  ;;  %v12492_v1 = vld [vmem:[#allocation6 + $0x46c] sm:$0xf]  ;;  %v11347_v14 = vor.u32 %v12532_v41, %v11344_v50 }
 0x4b7   :  { %v7358_v51 = vpop.f32.mrf.mxu3  ;;  %v11387_v20 = vor.u32 %v12542_v5, %v11384_v30  ;;  %v11187_v39 = vor.u32 %v12492_v1, %v11184_v10  ;;  %v11282_v5 = vld [vmem:[#allocation6 + $0x530] sm:$0xf]  ;;  %v12519_v30 = vld [vmem:[#allocation6 + $0x540] sm:$0xf0]  ;;  %v11262_v1 = vld [vmem:[#allocation6 + $0x508] sm:$0xf] }
 0x4b8   :  { %7589 = vmatpush.bf16.msrb.mxu1 %v11443_v26  ;;  %v7359_v56 = vadd.f32 %v7358_v51, %v7346_v46  ;;  %v12537_v26 = vld [vmem:[#allocation6 + $0x5d4] sm:$0xf]  ;;  %v12487_v46 = vld [vmem:[#allocation6 + $0x444] sm:$0xf]  ;;  %v11110_v51 = vld [vmem:[#allocation6 + $0x3d0] sm:$0xf] }
 0x4b9   :  { %7681 = vmatpush.bf16.msra.mxu2 %v11427_v9  ;;  %v11403_v9 = vor.u32 %v12549_v43, %v11402_v29  ;;  %v11167_v33 = vor.u32 %v12487_v46, %v11164_v25  ;;  %v12482_v29 = vld [vmem:[#allocation6 + $0x41c] sm:$0xf] }
 0x4ba   :  { %7614 = vmatpush.bf16.msrb.mxu0 %v10667_v23  ;;  %7524 = vmatpush.bf16.msrb.mxu3 %v10643_v0  ;;  %v11364_v23 = vld [vmem:[#allocation6 + $0x5e4] sm:$0xf0]  ;;  %v11131_v0 = vor.u32 %v12480_v63, %v11130_v38  ;;  %v12467_v63 = vld [vmem:[#allocation6 + $0x3a4] sm:$0xf] }
 0x4bc   :  { %7682 = vmatmul.bf16.vlgmr.msra.gmra.mxu2 %v13635_v15  ;;  %7590 = vmatpush.bf16.msrb.mxu1 %v11423_v11  ;;  %v12475_v11 = vld [vmem:[#allocation6 + $0x3e0] sm:$0xf0] }
 0x4bd   :  { %7739 = vmatpush.bf16.msrb.mxu2 %v11251_v12  ;;  %v12544_v12 = vld [vmem:[#allocation6 + $0x608] sm:$0xf0]  ;;  %v11111_v43 = vor.u32 %v12475_v11, %v11110_v51  ;;  %v11091_v51 = vor.u32 %v12470_v44, %v11090_v13  ;;  %v12462_v11 = vld [vmem:[#allocation6 + $0x37c] sm:$0xf]  ;;  %v10990_v13 = vld [vmem:[#allocation6 + $0x2e0] sm:$0xf] }
 0x4be   :  { %7615 = vmatpush.bf16.msrb.mxu0 %v10647_v62  ;;  %7525 = vmatpush.bf16.msrb.mxu3 %v10623_v6  ;;  %v11383_v31 = vor.u32 %v12544_v12, %v11382_v60  ;;  %v11147_v6 = vor.u32 %v12482_v29, %v11144_v16  ;;  %v11304_v60 = vld [vmem:[#allocation6 + $0x56c] sm:$0xf0]  ;;  %v12465_v29 = vld [vmem:[#allocation6 + $0x390] sm:$0xf0] }
 0x4bf   :  { %7591 = vmatmul.bf16.vlgmr.msrb.gmra.mxu1 %v13635_v15  ;;  %v7360_v58 = vpop.f32.mrf.mxu3  ;;  %v12445_v44 = vld [vmem:[#allocation6 + $0x2f0] sm:$0xf0] }
 0x4c0   :  { %7648 = vmatpush.bf16.msra.mxu1 %v11247_v61  ;;  %v12529_v61 = vld [vmem:[#allocation6 + $0x590] sm:$0xf0] }
 0x4c1   :  { %7740 = vmatpush.bf16.msrb.mxu2 %v11231_v18  ;;  %v11362_v18 = vld [vmem:[#allocation6 + $0x5d0] sm:$0xf]  ;;  %7526 = vmatmul.bf16.vlgmr.msrb.gmra.mxu3 %v13563_v37  ;;  %v12517_v58 = vld [vmem:[#allocation6 + $0x534] sm:$0xf] }
 0x4c2   :  { %7616 = vmatpush.bf16.msrb.mxu0 %v10627_v21  ;;  %7570 = vmatpush.bf16.msra.mxu3 %v11403_v9  ;;  %v7371_v32 = vpop.f32.mrf.mxu0  ;;  %v11363_v8 = vor.u32 %v12539_v27, %v11362_v18  ;;  %v12524_v21 = vld [vmem:[#allocation6 + $0x568] sm:$0xf0]  ;;  %v12477_v9 = vld [vmem:[#allocation6 + $0x3f4] sm:$0xf]  ;;  %v12390_v18 = vld [vmem:[#allocation6 + $0x138] sm:$0xf0]  ;;  %v11283_v27 = vor.u32 %v12519_v30, %v11282_v5 }
 0x4c3   :  { %v13650_v36 = vadd.f32 %v7371_v32, %v7359_v56  ;;  %v11322_v56 = vld [vmem:[#allocation6 + $0x580] sm:$0xf]  ;;  %v11303_v28 = vor.u32 %v12524_v21, %v11302_v47  ;;  %v12460_v47 = vld [vmem:[#allocation6 + $0x368] sm:$0xf0]  ;;  %v11030_v5 = vld [vmem:[#allocation6 + $0x330] sm:$0xf] }
 0x4c4   :  { %7649 = vmatpush.bf16.msra.mxu1 %v11227_v35  ;;  %v11323_v42 = vor.u32 %v12529_v61, %v11322_v56  ;;  %v11124_v35 = vld [vmem:[#allocation6 + $0x404] sm:$0xf0]  ;;  %v11264_v32 = vld [vmem:[#allocation6 + $0x51c] sm:$0xf0]  ;;  %v12380_v56 = vld [vmem:[#allocation6 + $0xe8] sm:$0xf0] }
 0x4c5   :  { %7741 = vmatpush.bf16.msrb.mxu2 %v11211_v19  ;;  %7617 = vmatmul.bf16.vlgmr.msrb.gmra.mxu0 %v13563_v37  ;;  %v11367_v19 = vor.u32 %v12537_v26, %v11364_v23  ;;  %v12514_v26 = vld [vmem:[#allocation6 + $0x518] sm:$0xf0]  ;;  %v12512_v23 = vld [vmem:[#allocation6 + $0x50c] sm:$0xf]  ;;  %v11070_v61 = vld [vmem:[#allocation6 + $0x380] sm:$0xf] }
 0x4c6   :  { %7661 = vmatpush.bf16.msra.mxu0 %v11407_v48  ;;  %7571 = vmatpush.bf16.msra.mxu3 %v11383_v31  ;;  %v12522_v48 = vld [vmem:[#allocation6 + $0x55c] sm:$0xf]  ;;  %v11284_v31 = vld [vmem:[#allocation6 + $0x544] sm:$0xf0]  ;;  %v11267_v25 = vor.u32 %v12512_v23, %v11264_v32  ;;  %v12455_v30 = vld [vmem:[#allocation6 + $0x340] sm:$0xf0] }
 0x4c7   :  { %v13652_v62 = vpop.f32.mrf.mxu2  ;;  %v11307_v17 = vor.u32 %v12522_v48, %v11304_v60  ;;  %v11287_v10 = vor.u32 %v12517_v58, %v11284_v31  ;;  %v12452_v60 = vld [vmem:[#allocation6 + $0x32c] sm:$0xf] }
 0x4c8   :  { %7650 = vmatpush.bf16.msra.mxu1 %v11207_v34 }
 0x4c9   :  { %7742 = vmatpush.bf16.msrb.mxu2 %v11191_v55  ;;  %v12527_v55 = vld [vmem:[#allocation6 + $0x584] sm:$0xf] }
 0x4ca   :  { %7662 = vmatpush.bf16.msra.mxu0 %v11387_v20  ;;  %7572 = vmatpush.bf16.msra.mxu3 %v11363_v8  ;;  %v7373_v40 = vpop.f32.mrf.mxu0  ;;  %v11327_v49 = vor.u32 %v12527_v55, %v11324_v52  ;;  %v10770_v20 = vld [vmem:[#allocation6 + $0x128] sm:$0xf]  ;;  %v11084_v8 = vld [vmem:[#allocation6 + $0x3b4] sm:$0xf0]  ;;  %v11071_v55 = vor.u32 %v12465_v29, %v11070_v61  ;;  %v12457_v52 = vld [vmem:[#allocation6 + $0x354] sm:$0xf] }
 0x4cb   :  { %v10771_v38 = vor.u32 %v12390_v18, %v10770_v20  ;;  %v11087_v41 = vor.u32 %v12467_v63, %v11084_v8  ;;  %v11044_v40 = vld [vmem:[#allocation6 + $0x364] sm:$0xf0]  ;;  %v11031_v20 = vor.u32 %v12455_v30, %v11030_v5  ;;  %v12447_v18 = vld [vmem:[#allocation6 + $0x304] sm:$0xf]  ;;  %v12442_v63 = vld [vmem:[#allocation6 + $0x2dc] sm:$0xf] }
 0x4cc   :  { %7651 = vmatpush.bf16.msra.mxu1 %v11187_v39  ;;  %v10750_v39 = vld [vmem:[#allocation6 + $0x100] sm:$0xf]  ;;  %v10984_v8 = vld [vmem:[#allocation6 + $0x2ec] sm:$0xf0]  ;;  %v12440_v61 = vld [vmem:[#allocation6 + $0x2c8] sm:$0xf0] }
 0x4cd   :  { %7743 = vmatpush.bf16.msrb.mxu2 %v11171_v57  ;;  %v11127_v57 = vor.u32 %v12477_v9, %v11124_v35 }
 0x4ce   :  { %7663 = vmatpush.bf16.msra.mxu0 %v11367_v19  ;;  %7573 = vmatpush.bf16.msra.mxu3 %v11343_v54  ;;  %v12385_v19 = vld [vmem:[#allocation6 + $0x110] sm:$0xf0]  ;;  %v11064_v54 = vld [vmem:[#allocation6 + $0x38c] sm:$0xf0] }
 0x4cf   :  { %v7399_v12 = vpop.f32.mrf.mxu2  ;;  %v10751_v50 = vor.u32 %v12385_v19, %v10750_v39  ;;  %v10650_v39 = vld [vmem:[#allocation6 + $0x38] sm:$0xf]  ;;  %v12360_v19 = vld [vmem:[#allocation6 + $0x48] sm:$0xf0] }
 0x4d0   :  { %7652 = vmatpush.bf16.msra.mxu1 %v11167_v33  ;;  %v10730_v33 = vld [vmem:[#allocation6 + $0xd8] sm:$0xf]  ;;  %v11024_v12 = vld [vmem:[#allocation6 + $0x33c] sm:$0xf0] }
 0x4d1   :  { %7744 = vmatpush.bf16.msrb.mxu2 %v11151_v53  ;;  %v11107_v53 = vor.u32 %v12472_v3, %v11104_v45  ;;  %v10731_v16 = vor.u32 %v12380_v56, %v10730_v33  ;;  %v11027_v45 = vor.u32 %v12452_v60, %v11024_v12  ;;  %v10630_v33 = vld [vmem:[#allocation6 + $0x10] sm:$0xf]  ;;  %v10970_v56 = vld [vmem:[#allocation6 + $0x2b8] sm:$0xf]  ;;  %v11390_v60 = vld [vmem:[#allocation6 + $0x600] sm:$0xf] }
 0x4d2   :  { %7664 = vmatpush.bf16.msra.mxu0 %v11347_v14  ;;  %7574 = vmatpush.bf16.msra.mxu3 %v11323_v42  ;;  %v13655_v34 = vpop.f32.mrf.mxu0  ;;  %v10710_v42 = vld [vmem:[#allocation6 + $0xb0] sm:$0xf]  ;;  %v12545_v12 = vld [vmem:[#allocation6 + $0x610] sm:$0xf0] }
 0x4d4   :  { %7653 = vmatpush.bf16.msra.mxu1 %v11147_v6  ;;  %v12375_v6 = vld [vmem:[#allocation6 + $0xc0] sm:$0xf0] }
 0x4d5   :  { %7745 = vmatpush.bf16.msrb.mxu2 %v11131_v0  ;;  %v11263_v0 = vor.u32 %v12514_v26, %v11262_v1  ;;  %v10711_v35 = vor.u32 %v12375_v6, %v10710_v42  ;;  %v10670_v1 = vld [vmem:[#allocation6 + $0x60] sm:$0xf]  ;;  %v10971_v6 = vor.u32 %v12440_v61, %v10970_v56 }
 0x4d6   :  { %7665 = vmatpush.bf16.msra.mxu0 %v11327_v49  ;;  %7575 = vmatpush.bf16.msra.mxu3 %v11303_v28  ;;  %v11050_v49 = vld [vmem:[#allocation6 + $0x358] sm:$0xf]  ;;  %v10690_v28 = vld [vmem:[#allocation6 + $0x88] sm:$0xf]  ;;  %v11310_v61 = vld [vmem:[#allocation6 + $0x560] sm:$0xf] }
 0x4d7   :  { %v13657_v46 = vpop.f32.mrf.mxu2  ;;  %v11051_v48 = vor.u32 %v12460_v47, %v11050_v49  ;;  %v10944_v49 = vld [vmem:[#allocation6 + $0x29c] sm:$0xf0]  ;;  %v10950_v47 = vld [vmem:[#allocation6 + $0x290] sm:$0xf] }
 0x4d8   :  { %7654 = vmatpush.bf16.msra.mxu1 %v11127_v57 }
 0x4d9   :  { %7746 = vmatpush.bf16.msrb.mxu2 %v11111_v43  ;;  %v11067_v43 = vor.u32 %v12462_v11, %v11064_v54  ;;  %v12437_v11 = vld [vmem:[#allocation6 + $0x2b4] sm:$0xf]  ;;  %v10964_v54 = vld [vmem:[#allocation6 + $0x2c4] sm:$0xf0] }
 0x4da   :  { %7666 = vmatpush.bf16.msra.mxu0 %v11307_v17  ;;  %7576 = vmatpush.bf16.msra.mxu3 %v11283_v27  ;;  %v7425_v14 = vpop.f32.mrf.mxu0  ;;  %v12370_v17 = vld [vmem:[#allocation6 + $0x98] sm:$0xf0]  ;;  %v11004_v27 = vld [vmem:[#allocation6 + $0x314] sm:$0xf0] }
 0x4db   :  { %v10691_v31 = vor.u32 %v12370_v17, %v10690_v28  ;;  %v11007_v23 = vor.u32 %v12447_v18, %v11004_v27  ;;  %v12355_v14 = vld [vmem:[#allocation6 + $0x20] sm:$0xf0]  ;;  %v11610_v28 = vld [vmem:[#allocation6 + $0x7b8] sm:$0xf]  ;;  %v11584_v18 = vld [vmem:[#allocation6 + $0x79c] sm:$0xf0] }
 0x4dc   :  { %7747 = vmatmul.bf16.vlgmr.msrb.gmra.mxu2 %v13618_v4  ;;  %7655 = vmatpush.bf16.msra.mxu1 %v11107_v53  ;;  %v7384_v9 = vpop.f32.mrf.mxu1  ;;  %v12365_v53 = vld [vmem:[#allocation6 + $0x70] sm:$0xf0]  ;;  %v10631_v42 = vor.u32 %v12355_v14, %v10630_v33  ;;  %v11370_v27 = vld [vmem:[#allocation6 + $0x5d8] sm:$0xf] }
 0x4dd   :  { %v7385_v57 = vadd.f32 %v7384_v9, %v13650_v36  ;;  %v12450_v36 = vld [vmem:[#allocation6 + $0x318] sm:$0xf0] }
 0x4de   :  { %7667 = vmatpush.bf16.msra.mxu0 %v11287_v10  ;;  %7577 = vmatpush.bf16.msra.mxu3 %v11263_v0  ;;  %v11010_v10 = vld [vmem:[#allocation6 + $0x308] sm:$0xf] }
 0x4df   :  { %7656 = vmatmul.bf16.vlgmr.msra.gmra.mxu1 %v13618_v4  ;;  %v7464_v21 = vpop.f32.mrf.mxu2  ;;  %v11047_v4 = vor.u32 %v12457_v52, %v11044_v40  ;;  %v13666_v58 = vadd.f32 %v13652_v62, %v7385_v57  ;;  %v11011_v62 = vor.u32 %v12450_v36, %v11010_v10  ;;  %v12432_v52 = vld [vmem:[#allocation6 + $0x28c] sm:$0xf] }
 0x4e0   :  { %7700 = vmatpush.bf16.msrb.mxu1 %v10771_v38  ;;  %v10671_v38 = vor.u32 %v12365_v53, %v10670_v1  ;;  %v12435_v21 = vld [vmem:[#allocation6 + $0x2a0] sm:$0xf0]  ;;  %v12600_v57 = vld [vmem:[#allocation6 + $0x7c8] sm:$0xf0]  ;;  %v10947_v5 = vor.u32 %v12432_v52, %v10944_v49  ;;  %v11290_v52 = vld [vmem:[#allocation6 + $0x538] sm:$0xf] }
 0x4e1   :  { %7578 = vmatmul.bf16.vlgmr.msra.gmra.mxu3 %v13596_v2  ;;  %v10951_v30 = vor.u32 %v12435_v21, %v10950_v47  ;;  %v11611_v1 = vor.u32 %v12600_v57, %v11610_v28  ;;  %v12540_v36 = vld [vmem:[#allocation6 + $0x5e8] sm:$0xf0]  ;;  %v12410_v49 = vld [vmem:[#allocation6 + $0x1d8] sm:$0xf0] }
 0x4e2   :  { %7668 = vmatpush.bf16.msra.mxu0 %v11267_v25  ;;  %7635 = vmatpush.bf16.msrb.mxu3 %v11087_v41  ;;  %v13663_v3 = vpop.f32.mrf.mxu0  ;;  %v10987_v25 = vor.u32 %v12442_v63, %v10984_v8  ;;  %v6024_v41 = vperm.slane %v13640_v59, 1  ;;  %v11371_v8 = vor.u32 %v12540_v36, %v11370_v27  ;;  %v12585_v36 = vld [vmem:[#allocation6 + $0x750] sm:$0xf0] }
 0x4e4   :  { %7701 = vmatpush.bf16.msrb.mxu1 %v10751_v50  ;;  %v7386_v32 = vpop.f32.mrf.mxu1  ;;  %v10651_v50 = vor.u32 %v12360_v19, %v10650_v39  ;;  %v11350_v19 = vld [vmem:[#allocation6 + $0x5b0] sm:$0xf] }
 0x4e5   :  { %7669 = vmatmul.bf16.vlgmr.msra.gmra.mxu0 %v13596_v2  ;;  %v11590_v32 = vld [vmem:[#allocation6 + $0x790] sm:$0xf] }
 0x4e6   :  { %7726 = vmatpush.bf16.msrb.mxu0 %v11091_v51  ;;  %7636 = vmatpush.bf16.msrb.mxu3 %v11067_v43  ;;  %v10991_v51 = vor.u32 %v12445_v44, %v10990_v13  ;;  %v11410_v43 = vld [vmem:[#allocation6 + $0x628] sm:$0xf]  ;;  %v10910_v13 = vld [vmem:[#allocation6 + $0x240] sm:$0xf]  ;;  %v12425_v44 = vld [vmem:[#allocation6 + $0x250] sm:$0xf0] }
 0x4e7   :  { %v13668_v26 = vpop.f32.mrf.mxu2 }
 0x4e8   :  { %7702 = vmatpush.bf16.msrb.mxu1 %v10731_v16  ;;  %v12550_v16 = vld [vmem:[#allocation6 + $0x638] sm:$0xf0] }
 0x4e9   :  { %v11411_v9 = vor.u32 %v12550_v16, %v11410_v43  ;;  %v12415_v43 = vld [vmem:[#allocation6 + $0x200] sm:$0xf0] }
 0x4ea   :  { %7727 = vmatpush.bf16.msrb.mxu0 %v11071_v55  ;;  %7637 = vmatpush.bf16.msrb.mxu3 %v11047_v4  ;;  %v7451_v0 = vpop.f32.mrf.mxu0  ;;  %v10967_v55 = vor.u32 %v12437_v11, %v10964_v54  ;;  %v10890_v11 = vld [vmem:[#allocation6 + $0x218] sm:$0xf]  ;;  %v12420_v54 = vld [vmem:[#allocation6 + $0x228] sm:$0xf0] }
 0x4eb   :  { %v10891_v56 = vor.u32 %v12420_v54, %v10890_v11  ;;  %v12565_v11 = vld [vmem:[#allocation6 + $0x6b0] sm:$0xf0] }
 0x4ec   :  { %7703 = vmatpush.bf16.msrb.mxu1 %v10711_v35  ;;  %v7436_v40 = vpop.f32.mrf.mxu1  ;;  %v12597_v35 = vld [vmem:[#allocation6 + $0x7b4] sm:$0xf] }
 0x4ed   :  { %v7437_v4 = vadd.f32 %v7436_v40, %v6024_v41  ;;  %v11330_v41 = vld [vmem:[#allocation6 + $0x588] sm:$0xf] }
 0x4ee   :  { %7728 = vmatpush.bf16.msrb.mxu0 %v11051_v48  ;;  %7638 = vmatpush.bf16.msrb.mxu3 %v11027_v45  ;;  %v11604_v48 = vld [vmem:[#allocation6 + $0x7c4] sm:$0xf0] }
 0x4ef   :  { %v7516_v29 = vpop.f32.mrf.mxu2  ;;  %v7450_v17 = vadd.f32 %v13663_v3, %v7437_v4  ;;  %v11607_v45 = vor.u32 %v12597_v35, %v11604_v48  ;;  %v12430_v3 = vld [vmem:[#allocation6 + $0x278] sm:$0xf0]  ;;  %v12515_v35 = vld [vmem:[#allocation6 + $0x520] sm:$0xf0]  ;;  %v10830_v48 = vld [vmem:[#allocation6 + $0x1a0] sm:$0xf] }
 0x4f0   :  { %7704 = vmatpush.bf16.msrb.mxu1 %v10691_v31  ;;  %v11391_v31 = vor.u32 %v12545_v12, %v11390_v60  ;;  %v12525_v29 = vld [vmem:[#allocation6 + $0x570] sm:$0xf0] }
 0x4f1   :  { %v13673_v53 = vadd.f32 %v13657_v46, %v7450_v17  ;;  %v12535_v46 = vld [vmem:[#allocation6 + $0x5c0] sm:$0xf0]  ;;  %v11311_v16 = vor.u32 %v12525_v29, %v11310_v61  ;;  %v12405_v60 = vld [vmem:[#allocation6 + $0x1b0] sm:$0xf0]  ;;  %v10810_v17 = vld [vmem:[#allocation6 + $0x178] sm:$0xf] }
 0x4f2   :  { %7729 = vmatpush.bf16.msrb.mxu0 %v11031_v20  ;;  %7639 = vmatpush.bf16.msrb.mxu3 %v11007_v23  ;;  %v12592_v20 = vld [vmem:[#allocation6 + $0x78c] sm:$0xf]  ;;  %v10930_v23 = vld [vmem:[#allocation6 + $0x268] sm:$0xf]  ;;  %v10831_v28 = vor.u32 %v12405_v60, %v10830_v48 }
 0x4f3   :  { %v11587_v63 = vor.u32 %v12592_v20, %v11584_v18  ;;  %v10931_v39 = vor.u32 %v12430_v3, %v10930_v23  ;;  %v11570_v20 = vld [vmem:[#allocation6 + $0x768] sm:$0xf]  ;;  %v12590_v18 = vld [vmem:[#allocation6 + $0x778] sm:$0xf0]  ;;  %v12560_v61 = vld [vmem:[#allocation6 + $0x688] sm:$0xf0] }
 0x4f4   :  { %7705 = vmatpush.bf16.msrb.mxu1 %v10671_v38  ;;  %v12595_v38 = vld [vmem:[#allocation6 + $0x7a0] sm:$0xf0] }
 0x4f5   :  { %v11591_v0 = vor.u32 %v12595_v38, %v11590_v32  ;;  %v11530_v32 = vld [vmem:[#allocation6 + $0x718] sm:$0xf]  ;;  %v12580_v38 = vld [vmem:[#allocation6 + $0x728] sm:$0xf0] }
 0x4f6   :  { %7730 = vmatpush.bf16.msrb.mxu0 %v11011_v62  ;;  %7640 = vmatpush.bf16.msrb.mxu3 %v10987_v25  ;;  %v7438_v62 = vpop.f32.mrf.mxu1  ;;  %v10911_v25 = vor.u32 %v12425_v44, %v10910_v13  ;;  %v11490_v44 = vld [vmem:[#allocation6 + $0x6c8] sm:$0xf] }
 0x4f7   :  { %v13675_v10 = vpop.f32.mrf.mxu2 }
 0x4f8   :  { %7706 = vmatpush.bf16.msrb.mxu1 %v10651_v50 }
 0x4fa   :  { %7731 = vmatpush.bf16.msrb.mxu0 %v10991_v51  ;;  %7641 = vmatpush.bf16.msrb.mxu3 %v10967_v55  ;;  %v12530_v51 = vld [vmem:[#allocation6 + $0x598] sm:$0xf0] }
 0x4fb   :  { %v11331_v14 = vor.u32 %v12530_v51, %v11330_v41  ;;  %v11470_v51 = vld [vmem:[#allocation6 + $0x6a0] sm:$0xf] }
 0x4fc   :  { %7707 = vmatpush.bf16.msrb.mxu1 %v10631_v42  ;;  %v12520_v42 = vld [vmem:[#allocation6 + $0x548] sm:$0xf0]  ;;  %v11471_v54 = vor.u32 %v12565_v11, %v11470_v51  ;;  %v6027_v51 = vperm.slane %v13640_v59, 4 }
 0x4fd   :  { %v11291_v21 = vor.u32 %v12520_v42, %v11290_v52 }
 0x4fe   :  { %7732 = vmatpush.bf16.msrb.mxu0 %v10971_v6  ;;  %7642 = vmatpush.bf16.msrb.mxu3 %v10947_v5  ;;  %v13680_v33 = vpop.f32.mrf.mxu1  ;;  %v10850_v6 = vld [vmem:[#allocation6 + $0x1c8] sm:$0xf]  ;;  %v12400_v5 = vld [vmem:[#allocation6 + $0x188] sm:$0xf0] }
 0x4ff   :  { %7708 = vmatmul.bf16.vlgmr.msrb.gmra.mxu1 %v13563_v37  ;;  %v11351_v37 = vor.u32 %v12535_v46, %v11350_v19  ;;  %v7555_v50 = vpop.f32.mrf.mxu2  ;;  %v10851_v4 = vor.u32 %v12410_v49, %v10850_v6  ;;  %v12575_v19 = vld [vmem:[#allocation6 + $0x700] sm:$0xf0] }
 0x500   :  { %7752 = vmatpush.bf16.msra.mxu1 %v11411_v9  ;;  %v11270_v9 = vld [vmem:[#allocation6 + $0x510] sm:$0xf] }
 0x501   :  { %7643 = vmatmul.bf16.vlgmr.msrb.gmra.mxu3 %v13598_v24  ;;  %v11271_v12 = vor.u32 %v12515_v35, %v11270_v9  ;;  %v6026_v9 = vperm.slane %v13640_v59, 3 }
 0x502   :  { %7733 = vmatpush.bf16.msrb.mxu0 %v10951_v30  ;;  %7693 = vmatpush.bf16.msra.mxu3 %v11607_v45  ;;  %v10811_v30 = vor.u32 %v12400_v5, %v10810_v17  ;;  %v10790_v45 = vld [vmem:[#allocation6 + $0x150] sm:$0xf] }
 0x504   :  { %7753 = vmatpush.bf16.msra.mxu1 %v11391_v31  ;;  %v12395_v31 = vld [vmem:[#allocation6 + $0x160] sm:$0xf0] }
 0x505   :  { %7734 = vmatmul.bf16.vlgmr.msrb.gmra.mxu0 %v13598_v24  ;;  %v10870_v24 = vld [vmem:[#allocation6 + $0x1f0] sm:$0xf]  ;;  %v10791_v27 = vor.u32 %v12395_v31, %v10790_v45 }
 0x506   :  { %7784 = vmatpush.bf16.msra.mxu0 %v11611_v1  ;;  %7694 = vmatpush.bf16.msra.mxu3 %v11587_v63  ;;  %v10871_v55 = vor.u32 %v12415_v43, %v10870_v24  ;;  %v7490_v47 = vpop.f32.mrf.mxu1  ;;  %v11571_v1 = vor.u32 %v12590_v18, %v11570_v20  ;;  %v11430_v24 = vld [vmem:[#allocation6 + $0x650] sm:$0xf]  ;;  %v12555_v43 = vld [vmem:[#allocation6 + $0x660] sm:$0xf0] }
 0x507   :  { %v13682_v40 = vpop.f32.mrf.mxu2 }
 0x508   :  { %7754 = vmatpush.bf16.msra.mxu1 %v11371_v8  ;;  %v11531_v8 = vor.u32 %v12580_v38, %v11530_v32 }
 0x50a   :  { %7713 = vmatpush.bf16.msrb.mxu3 %v10931_v39  ;;  %7785 = vmatpush.bf16.msra.mxu0 %v11591_v0  ;;  %v11510_v39 = vld [vmem:[#allocation6 + $0x6f0] sm:$0xf]  ;;  %v12570_v0 = vld [vmem:[#allocation6 + $0x6d8] sm:$0xf0] }
 0x50b   :  { %v11511_v46 = vor.u32 %v12575_v19, %v11510_v39 }
 0x50c   :  { %7755 = vmatpush.bf16.msra.mxu1 %v11351_v37 }
 0x50e   :  { %7714 = vmatpush.bf16.msrb.mxu3 %v10911_v25 }
 0x50f   :  { %v7607_v57 = vpop.f32.mrf.mxu2 }
 0x510   :  { %7756 = vmatpush.bf16.msra.mxu1 %v11331_v14 }
 0x511   :  { %11615 = vmatmul.msk.bf16.vlgmr.msra.gmra.mxu3 %vm5620_vm2, %v13613_v7 }
 0x512   :  { %7715 = vmatpush.bf16.msrb.mxu3 %v10891_v56  ;;  %v11450_v56 = vld [vmem:[#allocation6 + $0x678] sm:$0xf] }
 0x514   :  { %7757 = vmatpush.bf16.msra.mxu1 %v11311_v16  ;;  %v11431_v16 = vor.u32 %v12555_v43, %v11430_v24 }
 0x515   :  { %11616 = vmatmul.msk.bf16.vlgmr.msra.gmra.mxu0 %vm5620_vm2, %v13613_v7  ;;  %v11550_v7 = vld [vmem:[#allocation6 + $0x740] sm:$0xf] }
 0x516   :  { %7716 = vmatpush.bf16.msrb.mxu3 %v10871_v55  ;;  %v11551_v3 = vor.u32 %v12585_v36, %v11550_v7 }
 0x518   :  { %7758 = vmatpush.bf16.msra.mxu1 %v11291_v21 }
 0x51a   :  { %7717 = vmatpush.bf16.msrb.mxu3 %v10851_v4 }
 0x51c   :  { %7759 = vmatpush.bf16.msra.mxu1 %v11271_v12  ;;  %v7540_v62 = vpop.f32.mrf.mxu1 }
 0x51e   :  { %7718 = vmatpush.bf16.msrb.mxu3 %v10831_v28 }
 0x51f   :  { %7760 = vmatmul.bf16.vlgmr.msra.gmra.mxu1 %v13596_v2  ;;  %v7631_v23 = vpop.f32.mrf.mxu2 }
 0x520   :  { %v7501_v63 = vpop.f32.mrf.mxu0 }
 0x522   :  { %7719 = vmatpush.bf16.msrb.mxu3 %v10811_v30 }
 0x524   :  { %v7410_v13 = vpop.f32.mrf.mxu3  ;;  %v7542_v25 = vpop.f32.mrf.mxu1 }
 0x525   :  { %v7411_v37 = vadd.f32 %v7410_v13, %v13666_v58  ;;  %v11451_v58 = vor.u32 %v12560_v61, %v11450_v56 }
 0x526   :  { %7720 = vmatpush.bf16.msrb.mxu3 %v10791_v27 }
 0x527   :  { %v7633_v2 = vpop.f32.mrf.mxu2  ;;  %v13692_v50 = vadd.f32 %v13655_v34, %v7411_v37 }
 0x528   :  { %v7503_v41 = vpop.f32.mrf.mxu0 }
 0x529   :  { %7721 = vmatmul.bf16.vlgmr.msrb.gmra.mxu3 %v13587_v22  ;;  %v11491_v22 = vor.u32 %v12570_v0, %v11490_v44  ;;  %7792 = vrot.lane.b32.xlu1 %v13692_v50, %s12946_s17 }
 0x52a   :  { %7765 = vmatpush.bf16.msra.mxu3 %v11571_v1 }
 0x52c   :  { %v7412_v14 = vpop.f32.mrf.mxu3 }
 0x52e   :  { %7766 = vmatpush.bf16.msra.mxu3 %v11551_v3 }
 0x530   :  { %v7566_v29 = vpop.f32.mrf.mxu0 }
 0x532   :  { %7767 = vmatpush.bf16.msra.mxu3 %v11531_v8 }
 0x534   :  { %v7475_v34 = vpop.f32.mrf.mxu3 }
 0x535   :  { %v7476_v55 = vadd.f32 %v7475_v34, %v13673_v53 }
 0x536   :  { %7768 = vmatpush.bf16.msra.mxu3 %v11511_v46 }
 0x537   :  { %v7489_v52 = vadd.f32 %v13680_v33, %v7476_v55  ;;  %v11644_v55 = vld [vmem:[#allocation9 + $0x30] sm:$0xf] }
 0x538   :  { %v7568_v6 = vpop.f32.mrf.mxu0 }
 0x539   :  { %v7502_v49 = vadd.f32 %v7501_v63, %v7489_v52  ;;  %v12608_v52 = vld [vmem:[#allocation9 + $0x34] sm:$0xf0] }
 0x53a   :  { %7769 = vmatpush.bf16.msra.mxu3 %v11491_v22  ;;  %v11645_v6 = vor.u32 %v12608_v52, %v11644_v55 }
 0x53b   :  { %v13700_v21 = vadd.f32 %v13668_v26, %v7502_v49  ;;  %v11646_v49 = vld [vmem:[#allocation9 + $0x38] sm:$0xf0] }
 0x53c   :  { %v7592_v47 = vpop.f32.mrf.mxu1  ;;  %v7477_v4 = vpop.f32.mrf.mxu3  ;;  %7884 = vmatpush.bf16.msra.mxu2 %v11645_v6 }
 0x53d   :  { %7798 = vrot.lane.b32.xlu2 %v13700_v21, %s12946_s17 }
 0x53e   :  { %7770 = vmatpush.bf16.msra.mxu3 %v11471_v54 }
 0x53f   :  { %v7683_v42 = vpop.f32.mrf.mxu2 }
 0x542   :  { %7771 = vmatpush.bf16.msra.mxu3 %v11451_v58  ;;  %v7618_v53 = vpop.f32.mrf.mxu0 }
 0x543   :  { %v7619_v48 = vadd.f32 %v7618_v53, %v6026_v9  ;;  %v12606_v9 = vld [vmem:[#allocation9 + $0x24] sm:$0xf0] }
 0x544   :  { %v7594_v60 = vpop.f32.mrf.mxu1  ;;  %v7527_v12 = vpop.f32.mrf.mxu3 }
 0x545   :  { %v7632_v33 = vadd.f32 %v7631_v23, %v7619_v48  ;;  %v11638_v48 = vld [vmem:[#allocation9 + $0x28] sm:$0xf0] }
 0x546   :  { %7772 = vmatpush.bf16.msra.mxu3 %v11431_v16 }
 0x547   :  { %v7685_v35 = vpop.f32.mrf.mxu2 }
 0x548   :  { %v12605_v35 = vld [vmem:[#allocation9 + $0x24] sm:$0xf] }
 0x549   :  { %7773 = vmatmul.bf16.vlgmr.msra.gmra.mxu3 %v13635_v15  ;;  %v6025_v15 = vperm.slane %v13640_v59, 2  ;;  %v11636_v59 = vld [vmem:[#allocation9 + $0x20] sm:$0xf] }
 0x54a   :  { %v7620_v28 = vpop.f32.mrf.mxu0  ;;  %v11637_v53 = vor.u32 %v12606_v9, %v11636_v59 }
 0x54b   :  { %v7528_v17 = vadd.f32 %v7527_v12, %v6025_v15  ;;  %v11628_v12 = vld [vmem:[#allocation9 + $0x10] sm:$0xf]  ;;  %v12604_v28 = vld [vmem:[#allocation9 + $0x14] sm:$0xf0] }
 0x54c   :  { %v7529_v57 = vpop.f32.mrf.mxu3  ;;  %7885 = vmatpush.bf16.msra.mxu2 %v11637_v53  ;;  %v11629_v15 = vor.u32 %v12604_v28, %v11628_v12 }
 0x54d   :  { %v7541_v26 = vadd.f32 %v7540_v62, %v7528_v17  ;;  %v12603_v57 = vld [vmem:[#allocation9 + $0x14] sm:$0xf]  ;;  %v11630_v17 = vld [vmem:[#allocation9 + $0x18] sm:$0xf0] }
 0x54f   :  { %v7554_v20 = vadd.f32 %v13675_v10, %v7541_v26 }
 0x550   :  { %7886 = vmatpush.bf16.msra.mxu2 %v11629_v15 }
 0x551   :  { %v7567_v27 = vadd.f32 %v7566_v29, %v7554_v20 }
 0x55c   :  { %v7657_v30 = vpop.f32.mrf.mxu1 }
 0x55f   :  { %v7748_v5 = vpop.f32.mrf.mxu2 }
 0x562   :  { %v7670_v45 = vpop.f32.mrf.mxu0 }
 0x564   :  { %v7659_v18 = vpop.f32.mrf.mxu1  ;;  %v7579_v1 = vpop.f32.mrf.mxu3 }
 0x565   :  { %v7580_v7 = vadd.f32 %v7579_v1, %v7567_v27  ;;  %v11622_v18 = vld [vmem:[#allocation9 + $0x8] sm:$0xf0] }
 0x567   :  { %v7750_v31 = vpop.f32.mrf.mxu2  ;;  %v7593_v36 = vadd.f32 %v7592_v47, %v7580_v7  ;;  %v12624_v7 = vld [vmem:[#allocation12 + $0x78] sm:$0xff] }
 0x568   :  { %v12601_v31 = vld [vmem:[#allocation9 + $0x4] sm:$0xf] }
 0x569   :  { %v13708_v3 = vadd.f32 %v13682_v40, %v7593_v36  ;;  %v11625_v1 = vor.u32 %v12601_v31, %v11622_v18  ;;  %v12616_v36 = vld [vmem:[#allocation12 + $0x38] sm:$0xff]  ;;  %v12625_v18 = vld [vmem:[#allocation15] sm:$0xff] }
 0x56a   :  { %v7672_v23 = vpop.f32.mrf.mxu0  ;;  %8054 = vmatpush.bf16.msrb.mxu1 %v12616_v36  ;;  %v12627_v31 = vld [vmem:[#allocation15 + $0x10] sm:$0xff] }
 0x56b   :  { %7804 = vrot.lane.b32.xlu0 %v13708_v3, %s12946_s17 }
 0x56c   :  { %v7581_v32 = vpop.f32.mrf.mxu3 }
 0x57c   :  { %v7709_v38 = vpop.f32.mrf.mxu1 }
 0x57d   :  { %v7710_v11 = vadd.f32 %v7709_v38, %v6027_v51  ;;  %v12623_v38 = vld [vmem:[#allocation12 + $0x70] sm:$0xff] }
 0x57e   :  { %v12619_v51 = vld [vmem:[#allocation12 + $0x50] sm:$0xff] }
 0x582   :  { %v7735_v62 = vpop.f32.mrf.mxu0 }
 0x584   :  { %v7711_v63 = vpop.f32.mrf.mxu1  ;;  %v7644_v8 = vpop.f32.mrf.mxu3 }
 0x585   :  { %v7645_v39 = vadd.f32 %v7644_v8, %v7632_v33  ;;  %v11641_v33 = vor.u32 %v12605_v35, %v11638_v48 }
 0x587   :  { %v7658_v10 = vadd.f32 %v7657_v30, %v7645_v39  ;;  %v11620_v30 = vld [vmem:[#allocation9] sm:$0xf] }
 0x589   :  { %v7671_v13 = vadd.f32 %v7670_v45, %v7658_v10  ;;  %v12602_v45 = vld [vmem:[#allocation9 + $0x4] sm:$0xf0] }
 0x58a   :  { %v7737_v19 = vpop.f32.mrf.mxu0  ;;  %v11621_v20 = vor.u32 %v12602_v45, %v11620_v30  ;;  %v12629_v30 = vld [vmem:[#allocation15 + $0x20] sm:$0xff]  ;;  %v12628_v45 = vld [vmem:[#allocation15 + $0x18] sm:$0xff] }
 0x58b   :  { %v7684_v44 = vadd.f32 %v7683_v42, %v7671_v13  ;;  %v12607_v42 = vld [vmem:[#allocation9 + $0x34] sm:$0xf] }
 0x58c   :  { %v7646_v2 = vpop.f32.mrf.mxu3  ;;  %v11649_v47 = vor.u32 %v12607_v42, %v11646_v49  ;;  %7887 = vmatpush.bf16.msra.mxu2 %v11621_v20  ;;  %v12626_v20 = vld [vmem:[#allocation15 + $0x8] sm:$0xff] }
 0x58e   :  { %7897 = vmatpush.bf16.msrb.mxu0 %v11649_v47 }
 0x590   :  { %8067 = vmatpush.bf16.msrb.mxu2 %v12624_v7 }
 0x592   :  { %v7787_v46 = vpop.f32.mrf.mxu0  ;;  %7898 = vmatpush.bf16.msrb.mxu0 %v11641_v33 }
 0x594   :  { %v7696_v0 = vpop.f32.mrf.mxu3  ;;  %8068 = vmatpush.bf16.msrb.mxu2 %v12623_v38 }
 0x595   :  { %v13712_v37 = vadd.f32 %v7696_v0, %v7684_v44 }
 0x597   :  { %7810 = vrot.lane.b32.xlu1 %v13712_v37, %s12946_s17  ;;  %v7799_v27 = vpop.permute.xlu2 %7798 }
 0x59a   :  { %v7789_v40 = vpop.f32.mrf.mxu0 }
 0x59b   :  { %v7793_v4 = vpop.permute.xlu1 %7792  ;;  %v12615_v40 = vld [vmem:[#allocation12 + $0x30] sm:$0xff] }
 0x59c   :  { %v7761_v25 = vpop.f32.mrf.mxu1  ;;  %v7698_v41 = vpop.f32.mrf.mxu3  ;;  %v7795_v60 = vmax.f32 %v13692_v50, %v7793_v4  ;;  %8055 = vmatpush.bf16.msrb.mxu1 %v12615_v40 }
 0x59d   :  { %v12620_v41 = vld [vmem:[#allocation12 + $0x58] sm:$0xff] }
 0x59e   :  { %v7796_v26 = vmax.f32 %v7795_v60, %v13700_v21 }
 0x5a0   :  { %v7801_v50 = vmax.f32 %v7796_v26, %v7799_v27  ;;  %v12630_v26 = vld [vmem:[#allocation15 + $0x28] sm:$0xff]  ;;  %v12654_v27 = vld [vmem:[#allocation13] ss:$0 sm:$0xff] }
 0x5a2   :  { %v7802_v32 = vmax.f32 %v7801_v50, %v13708_v3 }
 0x5a4   :  { %v7763_v22 = vpop.f32.mrf.mxu1 }
 0x5a5   :  { %v12613_v22 = vld [vmem:[#allocation12 + $0x20] sm:$0xff] }
 0x5ac   :  { %v7722_v54 = vpop.f32.mrf.mxu3 }
 0x5ad   :  { %v7723_v14 = vadd.f32 %v7722_v54, %v7710_v11  ;;  %v12612_v11 = vld [vmem:[#allocation12 + $0x18] sm:$0xff]  ;;  %v12618_v54 = vld [vmem:[#allocation12 + $0x48] sm:$0xff] }
 0x5af   :  { %v7736_v56 = vadd.f32 %v7735_v62, %v7723_v14  ;;  %v12622_v62 = vld [vmem:[#allocation12 + $0x68] sm:$0xff]  ;;  %v12611_v14 = vld [vmem:[#allocation12 + $0x10] sm:$0xff] }
 0x5b0   :  { %8069 = vmatpush.bf16.msrb.mxu2 %v12622_v62 }
 0x5b1   :  { %v7749_v61 = vadd.f32 %v7748_v5, %v7736_v56  ;;  %v11633_v5 = vor.u32 %v12603_v57, %v11630_v17  ;;  %v12617_v56 = vld [vmem:[#allocation12 + $0x40] sm:$0xff] }
 0x5b3   :  { %v7762_v29 = vadd.f32 %v7761_v25, %v7749_v61  ;;  %7899 = vmatpush.bf16.msrb.mxu0 %v11633_v5  ;;  %v12614_v25 = vld [vmem:[#allocation12 + $0x28] sm:$0xff] }
 0x5b4   :  { %v7724_v58 = vpop.f32.mrf.mxu3  ;;  %8056 = vmatpush.bf16.msrb.mxu1 %v12614_v25  ;;  %v12610_v61 = vld [vmem:[#allocation12 + $0x8] sm:$0xff] }
 0x5b5   :  { %v7831_v58 = vld [vmem:[#allocation10] sm:$0x3] }
 0x5b6   :  { %v7833_v42 = vperm.slane %v7831_v58, 0 }
 0x5b7   :  { %7900 = vmatpush.bf16.msrb.mxu0 %v11625_v1 }
 0x5b8   :  { %8057 = vmatpush.bf16.msrb.mxu1 %v12613_v22 }
 0x5bc   :  { %8058 = vmatpush.bf16.msrb.mxu1 %v12612_v11 }
 0x5c0   :  { %8059 = vmatpush.bf16.msrb.mxu1 %v12611_v14 }
 0x5c4   :  { %8060 = vmatpush.bf16.msrb.mxu1 %v12610_v61 }
 0x5cc   :  { %v7774_v24 = vpop.f32.mrf.mxu3 }
 0x5cd   :  { %v7775_v43 = vadd.f32 %v7774_v24, %v7762_v29  ;;  %v12609_v29 = vld [vmem:[#allocation12] sm:$0xff] }
 0x5ce   :  { %8061 = vmatpush.bf16.msrb.mxu1 %v12609_v29  ;;  %v12632_v24 = vld [vmem:[#allocation15 + $0x38] sm:$0xff] }
 0x5cf   :  { %v7788_v16 = vadd.f32 %v7787_v46, %v7775_v43  ;;  %v7834_v43 = vperm.slane %v7831_v58, 1  ;;  %8156 = vmatpush.bf16.msrb.mxu3 %v12632_v24 }
 0x5d4   :  { %v7776_v34 = vpop.f32.mrf.mxu3 }
 0x5dd   :  { %v7805_v23 = vpop.permute.xlu0 %7804 }
 0x5de   :  { %v7807_v21 = vmax.f32 %v7802_v32, %v7805_v23 }
 0x5e0   :  { %v7808_v63 = vmax.f32 %v7807_v21, %v13712_v37  ;;  %v12621_v37 = vld [vmem:[#allocation12 + $0x60] sm:$0xff] }
 0x5e1   :  { %8070 = vmatpush.bf16.msrb.mxu2 %v12621_v37 }
 0x5e5   :  { %8071 = vmatpush.bf16.msrb.mxu2 %v12620_v41 }
 0x5e9   :  { %8072 = vmatpush.bf16.msrb.mxu2 %v12619_v51 }
 0x5ed   :  { %8073 = vmatpush.bf16.msrb.mxu2 %v12618_v54 }
 0x5f1   :  { %8074 = vmatpush.bf16.msrb.mxu2 %v12617_v56 }
 0x609   :  { %v7811_v8 = vpop.permute.xlu1 %7810 }
 0x60a   :  { %v7813_v39 = vmax.f32 %v7808_v63, %v7811_v8 }
 0x60c   :  { %v7814_v19 = vmax.f32 %v7813_v39, %v7788_v16  ;;  %v12631_v16 = vld [vmem:[#allocation15 + $0x30] sm:$0xff] }
 0x60d   :  { %8157 = vmatpush.bf16.msrb.mxu3 %v12631_v16 }
 0x60e   :  { %v7816_v10 = vmul.f32 1.442695, %v7814_v19  ;;  %vm7815_vm12 = vcmp.gt.f32.partialorder %v7814_v19, 0.0 }
 0x610   :  { %12670 = vpow2.f32 %v7816_v10  ;;  %v12655_v10 = vld [vmem:[#allocation16] ss:$0 sm:$0xff] }
 0x611   :  { %8158 = vmatpush.bf16.msrb.mxu3 %v12630_v26 }
 0x615   :  { %8159 = vmatpush.bf16.msrb.mxu3 %v12629_v30 }
 0x616   :  { %v12671_v2 = vpop.eup %12670 }
 0x617   :  { %v11617_v46 = vadd.f32 -1.0, %v12671_v2 }
 0x619   :  { %v7819_v13 = vmul.f32 1.6732632, %v11617_v46  ;;  %8160 = vmatpush.bf16.msrb.mxu3 %v12628_v45 }
 0x61b   :  { %v7820_v44 = vsel %vm7815_vm12, %v7814_v19, %v7819_v13 }
 0x61c   :  { %v7821_v3 = vmul.f32 1.050701, %v7820_v44 }
 0x61d   :  { %8161 = vmatpush.bf16.msrb.mxu3 %v12627_v31 }
 0x61e   :  { %v7822_v0 = vpack.c.bf16 %v7821_v3, %v7821_v3 }
 0x620   :  { %11650 = vmatmul.msk.bf16.vlgmr.msra.gmra.mxu2 %vm5622_vm3, %v7822_v0  ;;  %11651 = vmatmul.msk.bf16.vlgmr.msrb.gmra.mxu0 %vm5622_vm3, %v7822_v0 }
 0x621   :  { %8162 = vmatpush.bf16.msrb.mxu3 %v12626_v20 }
 0x625   :  { %8163 = vmatpush.bf16.msrb.mxu3 %v12625_v18 }
 0x69d   :  { %v7902_v34 = vpop.f32.mrf.mxu0 }
 0x69e   :  { %v7903_v55 = vadd.f32 %v7902_v34, %v7834_v43 }
 0x6a0   :  { %v7910_v52 = vmul.f32 1.442695, %v7903_v55  ;;  %vm7907_vm13 = vcmp.gt.f32.partialorder %v7903_v55, 0.0 }
 0x6a2   :  { %12672 = vpow2.f32 %v7910_v52 }
 0x6a3   :  { %v7889_v6 = vpop.f32.mrf.mxu2 }
 0x6a4   :  { %v7890_v49 = vadd.f32 %v7889_v6, %v7833_v42 }
 0x6a5   :  { %v7904_v47 = vpop.f32.mrf.mxu0 }
 0x6a6   :  { %v7908_v4 = vmul.f32 1.442695, %v7890_v49  ;;  %vm7906_vm14 = vcmp.gt.f32.partialorder %v7890_v49, 0.0 }
 0x6a8   :  { %v12673_v59 = vpop.eup %12672  ;;  %12674 = vpow2.f32 %v7908_v4 }
 0x6a9   :  { %v11653_v9 = vadd.f32 -1.0, %v12673_v59 }
 0x6ab   :  { %v7915_v35 = vmul.f32 1.6732632, %v11653_v9  ;;  %v7891_v53 = vpop.f32.mrf.mxu2 }
 0x6ad   :  { %v7917_v48 = vsel %vm7907_vm13, %v7903_v55, %v7915_v35 }
 0x6ae   :  { %v12675_v33 = vpop.eup %12674  ;;  %v7919_v60 = vmul.f32 1.050701, %v7917_v48 }
 0x6af   :  { %v11652_v12 = vadd.f32 -1.0, %v12675_v33 }
 0x6b0   :  { %v7921_v28 = vpack.c.bf16 %v7919_v60, %v7919_v60 }
 0x6b1   :  { %v7914_v57 = vmul.f32 1.6732632, %v11652_v12 }
 0x6b2   :  { %8075 = vmatmul.bf16.vlgmr.msrb.gmra.mxu2 %v7921_v28 }
 0x6b3   :  { %v7916_v15 = vsel %vm7906_vm14, %v7890_v49, %v7914_v57 }
 0x6b4   :  { %v7918_v17 = vmul.f32 1.050701, %v7916_v15 }
 0x6b6   :  { %v7920_v5 = vpack.c.bf16 %v7918_v17, %v7918_v17 }
 0x6b8   :  { %8062 = vmatmul.bf16.vlgmr.msrb.gmra.mxu1 %v7920_v5 }
 0x735   :  { %v8063_v1 = vpop.f32.mrf.mxu1  ;;  %v8076_v50 = vpop.f32.mrf.mxu2 }
 0x736   :  { %v8064_v7 = vadd.f32 %v12654_v27, %v8063_v1 }
 0x738   :  { %v8077_v36 = vadd.f32 %v8076_v50, %v8064_v7 }
 0x73a   :  { %v8081_v23 = vmul.f32 1.442695, %v8077_v36  ;;  %vm8080_vm15 = vcmp.gt.f32.partialorder %v8077_v36, 0.0 }
 0x73c   :  { %12676 = vpow2.f32 %v8081_v23 }
 0x73d   :  { %v8065_v32 = vpop.f32.mrf.mxu1  ;;  %v8078_v38 = vpop.f32.mrf.mxu2 }
 0x742   :  { %v12677_v21 = vpop.eup %12676 }
 0x743   :  { %v11718_v62 = vadd.f32 -1.0, %v12677_v21 }
 0x745   :  { %v8084_v63 = vmul.f32 1.6732632, %v11718_v62 }
 0x747   :  { %v8085_v8 = vsel %vm8080_vm15, %v8077_v36, %v8084_v63 }
 0x748   :  { %v8086_v39 = vmul.f32 1.050701, %v8085_v8 }
 0x74a   :  { %v8087_v19 = vpack.c.bf16 %v8086_v39, %v8086_v39 }
 0x74c   :  { %8164 = vmatmul.bf16.vlgmr.msrb.gmra.mxu3 %v8087_v19 }
 0x7cf   :  { %v8165_v2 = vpop.f32.mrf.mxu3 }
 0x7d0   :  { %v8166_v46 = vadd.f32 %v12655_v10, %v8165_v2 }
 0x7d2   :  { %8169 = vst [vmem:[%s13737_s11] sm:$0xff] %v8166_v46 }
 0x7d7   :  { %v8167_v13 = vpop.f32.mrf.mxu3 }
 0x7d8   :  { %8174 = vsyncpa [#allocation3], 1 }
 0x7d9   :  { %8175 = vsyncpa [#allocation5], 1 }
 0x7da   :  { %8176 = vsyncpa [#allocation8], 1 }
 0x7db   :  { %8177 = vsyncpa [#allocation11], 1 }
 0x7dc   :  { %8178 = vsyncpa [#allocation14], 1 }
 0x7dd   :  { %8179 = vsyncpa [#allocation17], 1 }

</bundles_post_ra>
